<compile_context>
chip_gen: v5e
topology: v5e:2x2
jax: 0.10.0
libtpu: 0.0.40
codegen_flags: <defaults>
</compile_context>

<pallas_src>
import math
import functools

import jax
import jax.numpy as jnp
from jax.experimental import pallas as pl
from jax.experimental.pallas import tpu as pltpu


# ----------------------------------------------------------------------------
# Pallas kernel: one TransformerDecoderBlock for a (TB, S, E) batch tile
# ----------------------------------------------------------------------------
def decoder_block_kernel(x_ref, wqkv_ref, bqkv_ref, wo_ref, w1_ref, b1_ref,
                         w2_ref, vec_ref, o_ref, *, num_heads):
    TB, S, E = x_ref.shape
    H = num_heads
    D = E // H
    M = TB * S
    scale = jnp.float32(1.0 / math.sqrt(D))

    x = x_ref[...].astype(jnp.float32)                 # (TB, S, E)
    x2 = x.reshape(M, E)                               # layout-free leading merge

    # ---- fused QKV projection: one lane-dense MXU matmul (bf16 in, f32 acc) --
    qkv = jnp.dot(x2.astype(jnp.bfloat16), wqkv_ref[...],
                  preferred_element_type=jnp.float32) + bqkv_ref[...]   # (M, 3E)

    q = qkv[:, :E].reshape(TB, S, E)                   # lane-aligned slices
    k = qkv[:, E:2 * E].reshape(TB, S, E)
    v = qkv[:, 2 * E:].reshape(TB, S, E)

    # ---- causal mask (built once, head/batch invariant) ----------------------
    row = jax.lax.broadcasted_iota(jnp.int32, (S, S), 0)   # query index
    col = jax.lax.broadcasted_iota(jnp.int32, (S, S), 1)   # key index
    neg = jnp.where(col > row, jnp.float32(-1e30), jnp.float32(0.0))

    # ---- attention: per-head batched-over-TB matmuls -------------------------
    head_out = []
    for h in range(H):                                 # static unroll (H small)
        lo, hi = h * D, (h + 1) * D
        qh = q[:, :, lo:hi].astype(jnp.bfloat16)       # (TB, S, D)
        kh = k[:, :, lo:hi].astype(jnp.bfloat16)
        vh = v[:, :, lo:hi].astype(jnp.bfloat16)
        s = jnp.einsum('bqd,bkd->bqk', qh, kh,
                       preferred_element_type=jnp.float32) * scale
        s = s + neg                                    # broadcast over TB
        m = jnp.max(s, axis=-1, keepdims=True)
        p = jnp.exp(s - m)
        l = jnp.sum(p, axis=-1, keepdims=True)
        p = p * pl.reciprocal(l, approx=True)          # EUP, not VALU divide
        head_out.append(jnp.einsum('bqk,bkd->bqd', p.astype(jnp.bfloat16), vh,
                                   preferred_element_type=jnp.float32))
    ctx = jnp.concatenate(head_out, axis=-1).reshape(M, E)   # lane-aligned concat

    # ---- output projection: single full-K matmul (MXU does the head sum) -----
    attn = jnp.dot(ctx.astype(jnp.bfloat16), wo_ref[...],
                   preferred_element_type=jnp.float32) + vec_ref[0:1, :]

    # ---- residual + LayerNorm 1 (single-pass variance) ------------------------
    y = x2 + attn
    mu = jnp.mean(y, axis=-1, keepdims=True)
    var = jnp.mean(y * y, axis=-1, keepdims=True) - mu * mu
    y = (y - mu) * jax.lax.rsqrt(var + 1e-5) * vec_ref[1:2, :] + vec_ref[2:3, :]

    # ---- feed-forward (Linear -> ReLU -> Linear), dropout = identity ---------
    h1 = jnp.dot(y.astype(jnp.bfloat16), w1_ref[...],
                 preferred_element_type=jnp.float32) + b1_ref[...]
    h1 = jnp.maximum(h1, 0.0)
    ff = jnp.dot(h1.astype(jnp.bfloat16), w2_ref[...],
                 preferred_element_type=jnp.float32) + vec_ref[3:4, :]

    # ---- residual + LayerNorm 2 ------------------------------------------------
    z = y + ff
    mu2 = jnp.mean(z, axis=-1, keepdims=True)
    var2 = jnp.mean(z * z, axis=-1, keepdims=True) - mu2 * mu2
    z = (z - mu2) * jax.lax.rsqrt(var2 + 1e-5) * vec_ref[4:5, :] + vec_ref[5:6, :]

    o_ref[...] = z.reshape(TB, S, E).astype(o_ref.dtype)


# ----------------------------------------------------------------------------
# pallas_call wrapper
# ----------------------------------------------------------------------------
def transformer_decoder_block(x, kp, *, num_heads, batch_tile=8):
    B, S, E = x.shape
    TB = min(batch_tile, B)
    assert B % TB == 0, "batch must be divisible by the batch tile"
    F = kp['w1'].shape[1]
    nb = B // TB

    const = lambda shape: pl.BlockSpec(shape, lambda b: (0, 0))

    kernel = functools.partial(decoder_block_kernel, num_heads=num_heads)
    return pl.pallas_call(
        kernel,
        out_shape=jax.ShapeDtypeStruct((B, S, E), x.dtype),
        grid=(nb,),
        in_specs=[
            pl.BlockSpec((TB, S, E), lambda b: (b, 0, 0)),   # x (batch-tiled)
            const((E, 3 * E)),                               # wqkv  (bf16)
            const((1, 3 * E)),                               # bqkv  (f32)
            const((E, E)),                                   # wo    (bf16)
            const((E, F)),                                   # w1    (bf16)
            const((1, F)),                                   # b1    (f32)
            const((F, E)),                                   # w2    (bf16)
            const((6, E)),                                   # packed vec slab (f32)
        ],
        out_specs=pl.BlockSpec((TB, S, E), lambda b: (b, 0, 0)),
        compiler_params=pltpu.CompilerParams(
            dimension_semantics=("parallel",),   # batch tiles are independent
            vmem_limit_bytes=48 * 1024 * 1024,   # < v7x 64 MiB physical VMEM
        ),
    )(x, kp['wqkv'], kp['bqkv'], kp['wo'], kp['w1'], kp['b1'], kp['w2'], kp['vec'])


# ----------------------------------------------------------------------------
# Parameters in PyTorch layout + repack into kernel layout
# ----------------------------------------------------------------------------
def make_torch_params(key, *, embed_dim, feedforward_dim):
    E, F = embed_dim, feedforward_dim
    ks = jax.random.split(key, 12)

    def nrm(k, shape, scale=0.05):
        return (scale * jax.random.normal(k, shape)).astype(jnp.float32)

    return dict(
        in_proj_weight=nrm(ks[0], (3 * E, E)),      # nn.MultiheadAttention layout
        in_proj_bias=nrm(ks[1], (3 * E,)),
        out_proj_weight=nrm(ks[2], (E, E)),
        out_proj_bias=nrm(ks[3], (E,)),
        ln1_w=1.0 + nrm(ks[4], (E,), 0.1), ln1_b=nrm(ks[5], (E,), 0.1),
        lin1_w=nrm(ks[6], (F, E)), lin1_b=nrm(ks[7], (F,)),
        lin2_w=nrm(ks[8], (E, F)), lin2_b=nrm(ks[9], (E,)),
        ln2_w=1.0 + nrm(ks[10], (E,), 0.1), ln2_b=nrm(ks[11], (E,), 0.1),
    )


def prepare_kernel_params(p):
    """Repack PyTorch-layout weights into the fused kernel layout (pure JAX).

    Matmul weights -> bf16 (MXU operands, f32 accumulation in-kernel);
    biases / LayerNorm vectors stay f32 and are packed into one (6, E) slab.
    """
    E = p['out_proj_weight'].shape[0]
    F = p['lin1_w'].shape[0]
    Win, bin_ = p['in_proj_weight'], p['in_proj_bias']
    Wq, Wk, Wv = Win[:E], Win[E:2 * E], Win[2 * E:]

    wqkv = jnp.concatenate([Wq.T, Wk.T, Wv.T], axis=1)          # (E, 3E)
    vec = jnp.stack([p['out_proj_bias'],                        # row 0: bo
                     p['ln1_w'], p['ln1_b'],                    # rows 1,2
                     p['lin2_b'],                               # row 3: b2
                     p['ln2_w'], p['ln2_b']], axis=0)           # rows 4,5

    return dict(
        wqkv=wqkv.astype(jnp.bfloat16),
        bqkv=bin_.reshape(1, 3 * E).astype(jnp.float32),
        wo=p['out_proj_weight'].T.astype(jnp.bfloat16),
        w1=p['lin1_w'].T.astype(jnp.bfloat16),
        b1=p['lin1_b'].reshape(1, F).astype(jnp.float32),
        w2=p['lin2_w'].T.astype(jnp.bfloat16),
        vec=vec.astype(jnp.float32),
    )


# ----------------------------------------------------------------------------
# Pure-JAX f32 reference (mirrors the PyTorch module exactly)
# ----------------------------------------------------------------------------
def _layer_norm(x, g, b, eps=1e-5):
    mu = jnp.mean(x, axis=-1, keepdims=True)
    var = jnp.mean((x - mu) ** 2, axis=-1, keepdims=True)
    return (x - mu) * jax.lax.rsqrt(var + eps) * g + b


def reference_forward(x, p, *, num_heads):
    B, S, E = x.shape
    H, D = num_heads, E // num_heads
    qkv = x @ p['in_proj_weight'].T + p['in_proj_bias']
    q, k, v = qkv[..., :E], qkv[..., E:2 * E], qkv[..., 2 * E:]

    def split(t):
        return jnp.transpose(t.reshape(B, S, H, D), (0, 2, 1, 3))

    q, k, v = split(q), split(k), split(v)
    s = jnp.einsum('bhqd,bhkd->bhqk', q, k) / math.sqrt(D)
    mask = jnp.where(jnp.triu(jnp.ones((S, S), bool), k=1), -jnp.inf, 0.0)
    s = s + mask
    a = jax.nn.softmax(s, axis=-1)
    o = jnp.einsum('bhqk,bhkd->bhqd', a, v)
    o = jnp.transpose(o, (0, 2, 1, 3)).reshape(B, S, E)
    attn = o @ p['out_proj_weight'].T + p['out_proj_bias']

    y = _layer_norm(x + attn, p['ln1_w'], p['ln1_b'])
    h1 = jnp.maximum(y @ p['lin1_w'].T + p['lin1_b'], 0.0)
    ff = h1 @ p['lin2_w'].T + p['lin2_b']
    return _layer_norm(y + ff, p['ln2_w'], p['ln2_b'])


# ----------------------------------------------------------------------------
# Demo
# ----------------------------------------------------------------------------
if __name__ == "__main__":
    B, S = 16, 16            # 16 batch elems, folded 8-per-grid-step -> grid=(2,)
    EMBED_DIM = 256          # lane-dense (multiple of 128)
    NHEAD = 2                # head_dim = 128 -> lane-aligned per-head slices
    FF_DIM = 512
    BATCH_TILE = 8           # M = 8*16 = 128 rows per MXU matmul

    key = jax.random.PRNGKey(0)
    kp_key, kx_key = jax.random.split(key)
    torch_params = make_torch_params(kp_key, embed_dim=EMBED_DIM,
                                     feedforward_dim=FF_DIM)
    kernel_params = prepare_kernel_params(torch_params)
    x = jax.random.normal(kx_key, (B, S, EMBED_DIM), jnp.float32)

    out = transformer_decoder_block(x, kernel_params, num_heads=NHEAD,
                                    batch_tile=BATCH_TILE)
    out = jax.block_until_ready(out)

    ref = reference_forward(x, torch_params, num_heads=NHEAD)

    assert out.shape == (B, S, EMBED_DIM), out.shape
    # Tolerance covers bf16 MXU operands + approx reciprocal vs the pure-f32
    # reference; a structurally wrong kernel would be O(1) off.
    assert bool(jnp.allclose(out, ref, atol=5e-2, rtol=5e-2)), \
        float(jnp.max(jnp.abs(out - ref)))
    print("KERNEL_OK")
</pallas_src>

<mosaic_0001>
module attributes {stable_mosaic.version = 11 : i64} {
  func.func @decoder_block_kernel(%arg0: i32, %arg1: memref<8x16x256xf32, #tpu.memory_space<vmem>>, %arg2: memref<256x768xbf16, #tpu.memory_space<vmem>>, %arg3: memref<1x768xf32, #tpu.memory_space<vmem>>, %arg4: memref<256x256xbf16, #tpu.memory_space<vmem>>, %arg5: memref<256x512xbf16, #tpu.memory_space<vmem>>, %arg6: memref<1x512xf32, #tpu.memory_space<vmem>>, %arg7: memref<512x256xbf16, #tpu.memory_space<vmem>>, %arg8: memref<6x256xf32, #tpu.memory_space<vmem>>, %arg9: memref<8x16x256xf32, #tpu.memory_space<vmem>>) attributes {dimension_semantics = [#tpu.dimension_semantics<parallel>], iteration_bounds = array<i64: 2>, scalar_prefetch = 0 : i64, scratch_operands = 0 : i64, tpu.core_type = #tpu.core_type<tc>, window_params = [{transform_indices = @transform_0, window_bounds = array<i64: 8, 16, 256>}, {pipeline_mode = #tpu.pipeline_mode<synchronous>, transform_indices = @transform_1, window_bounds = array<i64: 256, 768>}, {pipeline_mode = #tpu.pipeline_mode<synchronous>, transform_indices = @transform_2, window_bounds = array<i64: 1, 768>}, {pipeline_mode = #tpu.pipeline_mode<synchronous>, transform_indices = @transform_3, window_bounds = array<i64: 256, 256>}, {pipeline_mode = #tpu.pipeline_mode<synchronous>, transform_indices = @transform_4, window_bounds = array<i64: 256, 512>}, {pipeline_mode = #tpu.pipeline_mode<synchronous>, transform_indices = @transform_5, window_bounds = array<i64: 1, 512>}, {pipeline_mode = #tpu.pipeline_mode<synchronous>, transform_indices = @transform_6, window_bounds = array<i64: 512, 256>}, {pipeline_mode = #tpu.pipeline_mode<synchronous>, transform_indices = @transform_7, window_bounds = array<i64: 6, 256>}, {transform_indices = @transform_8, window_bounds = array<i64: 8, 16, 256>}]} {
    %c0 = arith.constant 0 : index
    %c0_0 = arith.constant 0 : index
    %c0_1 = arith.constant 0 : index
    %0 = vector.load %arg1[%c0, %c0_0, %c0_1] : memref<8x16x256xf32, #tpu.memory_space<vmem>>, vector<8x16x256xf32>
    %1 = vector.shape_cast %0 : vector<8x16x256xf32> to vector<128x256xf32>
    %2 = arith.truncf %1 : vector<128x256xf32> to vector<128x256xbf16>
    %c0_2 = arith.constant 0 : index
    %c0_3 = arith.constant 0 : index
    %3 = vector.load %arg2[%c0_2, %c0_3] : memref<256x768xbf16, #tpu.memory_space<vmem>>, vector<256x768xbf16>
    %cst = arith.constant dense<0.000000e+00> : vector<128x768xf32>
    %4 = tpu.matmul %2, %3, %cst {dimension_numbers = #tpu.dot_dimension_numbers<[1], [0], [0], [1], [0, 0, 1, 1], [], []>} : vector<128x256xbf16>, vector<256x768xbf16>, vector<128x768xf32> -> vector<128x768xf32>
    %c0_4 = arith.constant 0 : index
    %c0_5 = arith.constant 0 : index
    %5 = vector.load %arg3[%c0_4, %c0_5] : memref<1x768xf32, #tpu.memory_space<vmem>>, vector<1x768xf32>
    %6 = vector.broadcast %5 : vector<1x768xf32> to vector<128x768xf32>
    %7 = arith.addf %4, %6 : vector<128x768xf32>
    %8 = vector.extract_strided_slice %7 {offsets = [0, 0], sizes = [128, 256], strides = [1, 1]} : vector<128x768xf32> to vector<128x256xf32>
    %9 = vector.shape_cast %8 : vector<128x256xf32> to vector<8x16x256xf32>
    %10 = vector.extract_strided_slice %7 {offsets = [0, 256], sizes = [128, 256], strides = [1, 1]} : vector<128x768xf32> to vector<128x256xf32>
    %11 = vector.shape_cast %10 : vector<128x256xf32> to vector<8x16x256xf32>
    %12 = vector.extract_strided_slice %7 {offsets = [0, 512], sizes = [128, 256], strides = [1, 1]} : vector<128x768xf32> to vector<128x256xf32>
    %13 = vector.shape_cast %12 : vector<128x256xf32> to vector<8x16x256xf32>
    %14 = tpu.iota {dimensions = array<i32: 0>} : vector<16x16xi32>
    %15 = tpu.iota {dimensions = array<i32: 1>} : vector<16x16xi32>
    %16 = arith.cmpi sgt, %15, %14 : vector<16x16xi32>
    %cst_6 = arith.constant -1.000000e+30 : f32
    %cst_7 = arith.constant 0.000000e+00 : f32
    %17 = vector.broadcast %cst_6 : f32 to vector<16x16xf32>
    %18 = vector.broadcast %cst_7 : f32 to vector<16x16xf32>
    %19 = arith.select %16, %17, %18 : vector<16x16xi1>, vector<16x16xf32>
    %20 = vector.extract_strided_slice %9 {offsets = [0, 0, 0], sizes = [8, 16, 128], strides = [1, 1, 1]} : vector<8x16x256xf32> to vector<8x16x128xf32>
    %21 = arith.truncf %20 : vector<8x16x128xf32> to vector<8x16x128xbf16>
    %22 = vector.extract_strided_slice %11 {offsets = [0, 0, 0], sizes = [8, 16, 128], strides = [1, 1, 1]} : vector<8x16x256xf32> to vector<8x16x128xf32>
    %23 = arith.truncf %22 : vector<8x16x128xf32> to vector<8x16x128xbf16>
    %24 = vector.extract_strided_slice %13 {offsets = [0, 0, 0], sizes = [8, 16, 128], strides = [1, 1, 1]} : vector<8x16x256xf32> to vector<8x16x128xf32>
    %25 = arith.truncf %24 : vector<8x16x128xf32> to vector<8x16x128xbf16>
    "tpu.trace_start"() <{level = 10 : i32, message = "bqd,bkd->bqk"}> : () -> ()
    %cst_8 = arith.constant dense<0.000000e+00> : vector<8x16x16xf32>
    %26 = tpu.matmul %21, %23, %cst_8 {dimension_numbers = #tpu.dot_dimension_numbers<[2], [2], [1], [1], [0, 0, 0, 1, 1, 1], [0], [0]>} : vector<8x16x128xbf16>, vector<8x16x128xbf16>, vector<8x16x16xf32> -> vector<8x16x16xf32>
    "tpu.trace_stop"() : () -> ()
    %cst_9 = arith.constant 0.0883883461 : f32
    %27 = vector.broadcast %cst_9 : f32 to vector<8x16x16xf32>
    %28 = arith.mulf %26, %27 : vector<8x16x16xf32>
    %29 = vector.shape_cast %19 : vector<16x16xf32> to vector<1x16x16xf32>
    %30 = vector.broadcast %29 : vector<1x16x16xf32> to vector<8x16x16xf32>
    %31 = arith.addf %28, %30 : vector<8x16x16xf32>
    %cst_10 = arith.constant dense<0xFF800000> : vector<8x16xf32>
    %32 = vector.multi_reduction <maximumf>, %31, %cst_10 [2] : vector<8x16x16xf32> to vector<8x16xf32>
    %33 = vector.shape_cast %32 : vector<8x16xf32> to vector<8x16x1xf32>
    %34 = vector.broadcast %33 : vector<8x16x1xf32> to vector<8x16x16xf32>
    %35 = arith.subf %31, %34 : vector<8x16x16xf32>
    %36 = math.exp %35 : vector<8x16x16xf32>
    %cst_11 = arith.constant dense<0.000000e+00> : vector<8x16xf32>
    %37 = vector.multi_reduction <add>, %36, %cst_11 [2] : vector<8x16x16xf32> to vector<8x16xf32>
    %38 = vector.shape_cast %37 : vector<8x16xf32> to vector<8x16x1xf32>
    %39 = tpu.reciprocal %38 {approx = true} : vector<8x16x1xf32> -> vector<8x16x1xf32>
    %40 = vector.broadcast %39 : vector<8x16x1xf32> to vector<8x16x16xf32>
    %41 = arith.mulf %36, %40 : vector<8x16x16xf32>
    %42 = arith.truncf %41 : vector<8x16x16xf32> to vector<8x16x16xbf16>
    "tpu.trace_start"() <{level = 10 : i32, message = "bqk,bkd->bqd"}> : () -> ()
    %cst_12 = arith.constant dense<0.000000e+00> : vector<8x16x128xf32>
    %43 = tpu.matmul %42, %25, %cst_12 {dimension_numbers = #tpu.dot_dimension_numbers<[2], [1], [1], [2], [0, 0, 0, 1, 1, 2], [0], [0]>} : vector<8x16x16xbf16>, vector<8x16x128xbf16>, vector<8x16x128xf32> -> vector<8x16x128xf32>
    "tpu.trace_stop"() : () -> ()
    %44 = vector.extract_strided_slice %9 {offsets = [0, 0, 128], sizes = [8, 16, 128], strides = [1, 1, 1]} : vector<8x16x256xf32> to vector<8x16x128xf32>
    %45 = arith.truncf %44 : vector<8x16x128xf32> to vector<8x16x128xbf16>
    %46 = vector.extract_strided_slice %11 {offsets = [0, 0, 128], sizes = [8, 16, 128], strides = [1, 1, 1]} : vector<8x16x256xf32> to vector<8x16x128xf32>
    %47 = arith.truncf %46 : vector<8x16x128xf32> to vector<8x16x128xbf16>
    %48 = vector.extract_strided_slice %13 {offsets = [0, 0, 128], sizes = [8, 16, 128], strides = [1, 1, 1]} : vector<8x16x256xf32> to vector<8x16x128xf32>
    %49 = arith.truncf %48 : vector<8x16x128xf32> to vector<8x16x128xbf16>
    "tpu.trace_start"() <{level = 10 : i32, message = "bqd,bkd->bqk"}> : () -> ()
    %cst_13 = arith.constant dense<0.000000e+00> : vector<8x16x16xf32>
    %50 = tpu.matmul %45, %47, %cst_13 {dimension_numbers = #tpu.dot_dimension_numbers<[2], [2], [1], [1], [0, 0, 0, 1, 1, 1], [0], [0]>} : vector<8x16x128xbf16>, vector<8x16x128xbf16>, vector<8x16x16xf32> -> vector<8x16x16xf32>
    "tpu.trace_stop"() : () -> ()
    %cst_14 = arith.constant 0.0883883461 : f32
    %51 = vector.broadcast %cst_14 : f32 to vector<8x16x16xf32>
    %52 = arith.mulf %50, %51 : vector<8x16x16xf32>
    %53 = vector.shape_cast %19 : vector<16x16xf32> to vector<1x16x16xf32>
    %54 = vector.broadcast %53 : vector<1x16x16xf32> to vector<8x16x16xf32>
    %55 = arith.addf %52, %54 : vector<8x16x16xf32>
    %cst_15 = arith.constant dense<0xFF800000> : vector<8x16xf32>
    %56 = vector.multi_reduction <maximumf>, %55, %cst_15 [2] : vector<8x16x16xf32> to vector<8x16xf32>
    %57 = vector.shape_cast %56 : vector<8x16xf32> to vector<8x16x1xf32>
    %58 = vector.broadcast %57 : vector<8x16x1xf32> to vector<8x16x16xf32>
    %59 = arith.subf %55, %58 : vector<8x16x16xf32>
    %60 = math.exp %59 : vector<8x16x16xf32>
    %cst_16 = arith.constant dense<0.000000e+00> : vector<8x16xf32>
    %61 = vector.multi_reduction <add>, %60, %cst_16 [2] : vector<8x16x16xf32> to vector<8x16xf32>
    %62 = vector.shape_cast %61 : vector<8x16xf32> to vector<8x16x1xf32>
    %63 = tpu.reciprocal %62 {approx = true} : vector<8x16x1xf32> -> vector<8x16x1xf32>
    %64 = vector.broadcast %63 : vector<8x16x1xf32> to vector<8x16x16xf32>
    %65 = arith.mulf %60, %64 : vector<8x16x16xf32>
    %66 = arith.truncf %65 : vector<8x16x16xf32> to vector<8x16x16xbf16>
    "tpu.trace_start"() <{level = 10 : i32, message = "bqk,bkd->bqd"}> : () -> ()
    %cst_17 = arith.constant dense<0.000000e+00> : vector<8x16x128xf32>
    %67 = tpu.matmul %66, %49, %cst_17 {dimension_numbers = #tpu.dot_dimension_numbers<[2], [1], [1], [2], [0, 0, 0, 1, 1, 2], [0], [0]>} : vector<8x16x16xbf16>, vector<8x16x128xbf16>, vector<8x16x128xf32> -> vector<8x16x128xf32>
    "tpu.trace_stop"() : () -> ()
    %68 = tpu.concatenate %43, %67 in 2 : vector<8x16x128xf32>, vector<8x16x128xf32> -> vector<8x16x256xf32>
    %69 = vector.shape_cast %68 : vector<8x16x256xf32> to vector<128x256xf32>
    %70 = arith.truncf %69 : vector<128x256xf32> to vector<128x256xbf16>
    %c0_18 = arith.constant 0 : index
    %c0_19 = arith.constant 0 : index
    %71 = vector.load %arg4[%c0_18, %c0_19] : memref<256x256xbf16, #tpu.memory_space<vmem>>, vector<256x256xbf16>
    %cst_20 = arith.constant dense<0.000000e+00> : vector<128x256xf32>
    %72 = tpu.matmul %70, %71, %cst_20 {dimension_numbers = #tpu.dot_dimension_numbers<[1], [0], [0], [1], [0, 0, 1, 1], [], []>} : vector<128x256xbf16>, vector<256x256xbf16>, vector<128x256xf32> -> vector<128x256xf32>
    %c0_21 = arith.constant 0 : index
    %c0_22 = arith.constant 0 : index
    %73 = vector.load %arg8[%c0_21, %c0_22] : memref<6x256xf32, #tpu.memory_space<vmem>>, vector<1x256xf32>
    %74 = vector.broadcast %73 : vector<1x256xf32> to vector<128x256xf32>
    %75 = arith.addf %72, %74 : vector<128x256xf32>
    %76 = arith.addf %1, %75 : vector<128x256xf32>
    %cst_23 = arith.constant dense<0.000000e+00> : vector<128xf32>
    %77 = vector.multi_reduction <add>, %76, %cst_23 [1] : vector<128x256xf32> to vector<128xf32>
    %78 = vector.shape_cast %77 : vector<128xf32> to vector<128x1xf32>
    %cst_24 = arith.constant 2.560000e+02 : f32
    %79 = vector.broadcast %cst_24 : f32 to vector<128x1xf32>
    %80 = arith.divf %78, %79 : vector<128x1xf32>
    %81 = arith.mulf %76, %76 : vector<128x256xf32>
    %cst_25 = arith.constant dense<0.000000e+00> : vector<128xf32>
    %82 = vector.multi_reduction <add>, %81, %cst_25 [1] : vector<128x256xf32> to vector<128xf32>
    %83 = vector.shape_cast %82 : vector<128xf32> to vector<128x1xf32>
    %cst_26 = arith.constant 2.560000e+02 : f32
    %84 = vector.broadcast %cst_26 : f32 to vector<128x1xf32>
    %85 = arith.divf %83, %84 : vector<128x1xf32>
    %86 = arith.mulf %80, %80 : vector<128x1xf32>
    %87 = arith.subf %85, %86 : vector<128x1xf32>
    %88 = vector.broadcast %80 : vector<128x1xf32> to vector<128x256xf32>
    %89 = arith.subf %76, %88 : vector<128x256xf32>
    %cst_27 = arith.constant 9.99999974E-6 : f32
    %90 = vector.broadcast %cst_27 : f32 to vector<128x1xf32>
    %91 = arith.addf %87, %90 : vector<128x1xf32>
    %92 = math.rsqrt %91 : vector<128x1xf32>
    %93 = vector.broadcast %92 : vector<128x1xf32> to vector<128x256xf32>
    %94 = arith.mulf %89, %93 : vector<128x256xf32>
    %c1 = arith.constant 1 : index
    %c0_28 = arith.constant 0 : index
    %95 = vector.load %arg8[%c1, %c0_28] : memref<6x256xf32, #tpu.memory_space<vmem>>, vector<1x256xf32>
    %96 = vector.broadcast %95 : vector<1x256xf32> to vector<128x256xf32>
    %97 = arith.mulf %94, %96 : vector<128x256xf32>
    %c2 = arith.constant 2 : index
    %c0_29 = arith.constant 0 : index
    %98 = vector.load %arg8[%c2, %c0_29] : memref<6x256xf32, #tpu.memory_space<vmem>>, vector<1x256xf32>
    %99 = vector.broadcast %98 : vector<1x256xf32> to vector<128x256xf32>
    %100 = arith.addf %97, %99 : vector<128x256xf32>
    %101 = arith.truncf %100 : vector<128x256xf32> to vector<128x256xbf16>
    %c0_30 = arith.constant 0 : index
    %c0_31 = arith.constant 0 : index
    %102 = vector.load %arg5[%c0_30, %c0_31] : memref<256x512xbf16, #tpu.memory_space<vmem>>, vector<256x512xbf16>
    %cst_32 = arith.constant dense<0.000000e+00> : vector<128x512xf32>
    %103 = tpu.matmul %101, %102, %cst_32 {dimension_numbers = #tpu.dot_dimension_numbers<[1], [0], [0], [1], [0, 0, 1, 1], [], []>} : vector<128x256xbf16>, vector<256x512xbf16>, vector<128x512xf32> -> vector<128x512xf32>
    %c0_33 = arith.constant 0 : index
    %c0_34 = arith.constant 0 : index
    %104 = vector.load %arg6[%c0_33, %c0_34] : memref<1x512xf32, #tpu.memory_space<vmem>>, vector<1x512xf32>
    %105 = vector.broadcast %104 : vector<1x512xf32> to vector<128x512xf32>
    %106 = arith.addf %103, %105 : vector<128x512xf32>
    %cst_35 = arith.constant 0.000000e+00 : f32
    %107 = vector.broadcast %cst_35 : f32 to vector<128x512xf32>
    %108 = arith.maximumf %106, %107 : vector<128x512xf32>
    %109 = arith.truncf %108 : vector<128x512xf32> to vector<128x512xbf16>
    %c0_36 = arith.constant 0 : index
    %c0_37 = arith.constant 0 : index
    %110 = vector.load %arg7[%c0_36, %c0_37] : memref<512x256xbf16, #tpu.memory_space<vmem>>, vector<512x256xbf16>
    %cst_38 = arith.constant dense<0.000000e+00> : vector<128x256xf32>
    %111 = tpu.matmul %109, %110, %cst_38 {dimension_numbers = #tpu.dot_dimension_numbers<[1], [0], [0], [1], [0, 0, 1, 1], [], []>} : vector<128x512xbf16>, vector<512x256xbf16>, vector<128x256xf32> -> vector<128x256xf32>
    %c3 = arith.constant 3 : index
    %c0_39 = arith.constant 0 : index
    %112 = vector.load %arg8[%c3, %c0_39] : memref<6x256xf32, #tpu.memory_space<vmem>>, vector<1x256xf32>
    %113 = vector.broadcast %112 : vector<1x256xf32> to vector<128x256xf32>
    %114 = arith.addf %111, %113 : vector<128x256xf32>
    %115 = arith.addf %100, %114 : vector<128x256xf32>
    %cst_40 = arith.constant dense<0.000000e+00> : vector<128xf32>
    %116 = vector.multi_reduction <add>, %115, %cst_40 [1] : vector<128x256xf32> to vector<128xf32>
    %117 = vector.shape_cast %116 : vector<128xf32> to vector<128x1xf32>
    %cst_41 = arith.constant 2.560000e+02 : f32
    %118 = vector.broadcast %cst_41 : f32 to vector<128x1xf32>
    %119 = arith.divf %117, %118 : vector<128x1xf32>
    %120 = arith.mulf %115, %115 : vector<128x256xf32>
    %cst_42 = arith.constant dense<0.000000e+00> : vector<128xf32>
    %121 = vector.multi_reduction <add>, %120, %cst_42 [1] : vector<128x256xf32> to vector<128xf32>
    %122 = vector.shape_cast %121 : vector<128xf32> to vector<128x1xf32>
    %cst_43 = arith.constant 2.560000e+02 : f32
    %123 = vector.broadcast %cst_43 : f32 to vector<128x1xf32>
    %124 = arith.divf %122, %123 : vector<128x1xf32>
    %125 = arith.mulf %119, %119 : vector<128x1xf32>
    %126 = arith.subf %124, %125 : vector<128x1xf32>
    %127 = vector.broadcast %119 : vector<128x1xf32> to vector<128x256xf32>
    %128 = arith.subf %115, %127 : vector<128x256xf32>
    %cst_44 = arith.constant 9.99999974E-6 : f32
    %129 = vector.broadcast %cst_44 : f32 to vector<128x1xf32>
    %130 = arith.addf %126, %129 : vector<128x1xf32>
    %131 = math.rsqrt %130 : vector<128x1xf32>
    %132 = vector.broadcast %131 : vector<128x1xf32> to vector<128x256xf32>
    %133 = arith.mulf %128, %132 : vector<128x256xf32>
    %c4 = arith.constant 4 : index
    %c0_45 = arith.constant 0 : index
    %134 = vector.load %arg8[%c4, %c0_45] : memref<6x256xf32, #tpu.memory_space<vmem>>, vector<1x256xf32>
    %135 = vector.broadcast %134 : vector<1x256xf32> to vector<128x256xf32>
    %136 = arith.mulf %133, %135 : vector<128x256xf32>
    %c5 = arith.constant 5 : index
    %c0_46 = arith.constant 0 : index
    %137 = vector.load %arg8[%c5, %c0_46] : memref<6x256xf32, #tpu.memory_space<vmem>>, vector<1x256xf32>
    %138 = vector.broadcast %137 : vector<1x256xf32> to vector<128x256xf32>
    %139 = arith.addf %136, %138 : vector<128x256xf32>
    %140 = vector.shape_cast %139 : vector<128x256xf32> to vector<8x16x256xf32>
    %c0_47 = arith.constant 0 : index
    %c0_48 = arith.constant 0 : index
    %c0_49 = arith.constant 0 : index
    %141 = vector.load %arg9[%c0_47, %c0_48, %c0_49] : memref<8x16x256xf32, #tpu.memory_space<vmem>>, vector<8x16x256xf32>
    tpu.vector_store %arg9[%c0_47, %c0_48, %c0_49], %140 {strides = array<i32>} : memref<8x16x256xf32, #tpu.memory_space<vmem>>, vector<8x16x256xf32>,
    return
  }
  func.func @transform_0(%arg0: i32) -> (i32, i32, i32) {
    %c0_i32 = arith.constant 0 : i32
    %c0_i32_0 = arith.constant 0 : i32
    %c0_i32_1 = arith.constant 0 : i32
    return %arg0, %c0_i32, %c0_i32_0 : i32, i32, i32
  }
  func.func @transform_1(%arg0: i32) -> (i32, i32) {
    %c0_i32 = arith.constant 0 : i32
    %c0_i32_0 = arith.constant 0 : i32
    %c0_i32_1 = arith.constant 0 : i32
    return %c0_i32, %c0_i32_0 : i32, i32
  }
  func.func @transform_2(%arg0: i32) -> (i32, i32) {
    %c0_i32 = arith.constant 0 : i32
    %c0_i32_0 = arith.constant 0 : i32
    %c0_i32_1 = arith.constant 0 : i32
    return %c0_i32, %c0_i32_0 : i32, i32
  }
  func.func @transform_3(%arg0: i32) -> (i32, i32) {
    %c0_i32 = arith.constant 0 : i32
    %c0_i32_0 = arith.constant 0 : i32
    %c0_i32_1 = arith.constant 0 : i32
    return %c0_i32, %c0_i32_0 : i32, i32
  }
  func.func @transform_4(%arg0: i32) -> (i32, i32) {
    %c0_i32 = arith.constant 0 : i32
    %c0_i32_0 = arith.constant 0 : i32
    %c0_i32_1 = arith.constant 0 : i32
    return %c0_i32, %c0_i32_0 : i32, i32
  }
  func.func @transform_5(%arg0: i32) -> (i32, i32) {
    %c0_i32 = arith.constant 0 : i32
    %c0_i32_0 = arith.constant 0 : i32
    %c0_i32_1 = arith.constant 0 : i32
    return %c0_i32, %c0_i32_0 : i32, i32
  }
  func.func @transform_6(%arg0: i32) -> (i32, i32) {
    %c0_i32 = arith.constant 0 : i32
    %c0_i32_0 = arith.constant 0 : i32
    %c0_i32_1 = arith.constant 0 : i32
    return %c0_i32, %c0_i32_0 : i32, i32
  }
  func.func @transform_7(%arg0: i32) -> (i32, i32) {
    %c0_i32 = arith.constant 0 : i32
    %c0_i32_0 = arith.constant 0 : i32
    %c0_i32_1 = arith.constant 0 : i32
    return %c0_i32, %c0_i32_0 : i32, i32
  }
  func.func @transform_8(%arg0: i32) -> (i32, i32, i32) {
    %c0_i32 = arith.constant 0 : i32
    %c0_i32_0 = arith.constant 0 : i32
    %c0_i32_1 = arith.constant 0 : i32
    return %arg0, %c0_i32, %c0_i32_0 : i32, i32, i32
  }
}

</mosaic_0001>

<bundles_post_ra>
// kernel: tpu_custom_call.1
= control target key start
LH: loop header
LB: loop body
LE: loop exit
PB: predicated region body
PF: predicated region fallthrough
CT: control target
= control target key end

     0   :  { %s11261_s0 = inlined_call_operand.hbm [shape: f32[16,16,256], index: 0, kind: input, shape index: {}]   ;;  %s11262_s1 = inlined_call_operand.hbm [shape: bf16[256,768], index: 1, kind: input, shape index: {}]   ;;  %s11263_s2 = inlined_call_operand.hbm [shape: f32[1,768], index: 2, kind: input, shape index: {}]   ;;  %s11264_s3 = inlined_call_operand.hbm [shape: bf16[256,256], index: 3, kind: input, shape index: {}]   ;;  %s11265_s4 = inlined_call_operand.hbm [shape: bf16[256,512], index: 4, kind: input, shape index: {}]   ;;  %s11266_s5 = inlined_call_operand.vmem [shape: f32[1,512], index: 5, kind: input, shape index: {}]   ;;  %s11267_s6 = inlined_call_operand.hbm [shape: bf16[512,256], index: 6, kind: input, shape index: {}]   ;;  %s11268_s7 = inlined_call_operand.hbm [shape: f32[6,256], index: 7, kind: input, shape index: {}]   ;;  %s11269_s8 = inlined_call_operand.hbm [shape: f32[16,16,256], index: 8, kind: output, shape index: {}]  }
   0x1   :  { %11322 = sst [smem:[#allocation52_spill]] %s11262_s1 }
   0x2   :  { %11323 = sst [smem:[#allocation53_spill]] %s11263_s2 }
   0x3   :  { %11324 = sst [smem:[#allocation54_spill]] %s11264_s3 }
   0x4   :  { %13 = vsyncpa [#allocation3], 0 }
   0x5   :  { %15 = vsyncpa [#allocation3 + $0x1], 0 }
   0x6   :  { %16 = vsyncpa [#allocation6], 0 }
   0x7   :  { %17 = vsyncpa [#allocation9], 0 }
   0x8   :  { %18 = vsyncpa [#allocation12], 0 }
   0x9   :  { %19 = vsyncpa [#allocation4], 0 }
   0xa   :  { %21 = vsyncpa [#allocation4 + $0x1], 0  ;;  %s8453_s27 = smov 0   ;;  %s8455_s28 = smov 0  }
   0xb   :  { %s8457_s29 = smov 0   ;;  %s8459_s30 = smov 0  }
   0xc LB: > { %s11325_s1 = sld [smem:[#allocation52_spill]]  ;;  %s8477_s12 = sadd.s32 4294967295, %s8390_s30   ;;  %s8390_s30 = sphi %s8459_s30, %s11489_s30   ;;  %s8386_s29 = sphi %s8457_s29, %s11488_s29   ;;  %s8382_s28 = sphi %s8455_s28, %s11487_s28   ;;  %s8378_s27 = sphi %s8453_s27, %s11486_s27  }
   0xd   : > { %p6431_p0 = scmp.ge.s32.totalorder %s8390_s30, 1  ;;  %p48_p1 = scmp.eq.s32.totalorder %s8477_s12, 0 }
   0xe   : > { %p231_p2 = scmp.lt.s32.totalorder %s8390_s30, 3  ;;  %s8392_s14 = smov [#allocation5]  }
   0xf   : > { %s244_s15 = sshll.u32 %s8392_s14, 4  ;;  %s11327_s3 = sld [smem:[#allocation54_spill]]  ;;  %s245_s15 = int_to_ptr.vmem [resolvable:$true] %s244_s15 }
  0x10   : > { %p8482_p3 = pnand %p6431_p0, %p231_p2  ;;  %s8393_s20 = smov [#allocation8]  }
  0x11   : > { %s270_s21 = sshll.u32 %s8393_s20, 4  ;;  %s8394_s22 = smov 384   ;;  %s271_s21 = int_to_ptr.vmem [resolvable:$true] %s270_s21 }
  0x12   : > { %s242_s11 = sshll.u32 %s11325_s1, 4  ;;  %p7786_p4 = pneg %p8482_p3  ;;  %s243_s11 = int_to_ptr.hbm [resolvable:$true] %s242_s11 }
  0x13   : > { %s8395_s23 = smov 24   ;;  %s8396_s24 = smov 128  }
  0x14   : > { %p8494_p6 = pnand %p7786_p4, %p48_p1  ;;  %s8397_s25 = smov 8  }
  0x15   : > { %s268_s18 = sshll.u32 %s11327_s3, 4  ;;  %s299_s10 = sshll.u32 %s11267_s6, 4  ;;  %s269_s18 = int_to_ptr.hbm [resolvable:$true] %s268_s18  ;;  %s300_s10 = int_to_ptr.hbm [resolvable:$true] %s299_s10 }
  0x16   : > { %7789 = dma.hbm_to_vmem [thread:$0]  (!%p8494_p6), %s243_s11, 12288, %s245_s15, [#allocation6], %s8394_s22, %s8394_s22, %s8395_s23  }
  0x17   : > { %7795 = dma.hbm_to_vmem [thread:$0]  (!%p8494_p6), %s269_s18, 4096, %s271_s21, [#allocation9], %s8396_s24, %s8396_s24, %s8397_s25  }
  0x18   : > { %s8398_s14 = smov [#allocation11]   ;;  %s11329_s2 = sld [smem:[#allocation53_spill]] }
  0x19   : > { %s301_s16 = sshll.u32 %s8398_s14, 4  ;;  %s8399_s11 = smov [#allocation7]   ;;  %s302_s16 = int_to_ptr.vmem [resolvable:$true] %s301_s16 }
  0x1a   : > { %7801 = dma.hbm_to_vmem [thread:$0]  (!%p8494_p6), %s300_s10, 8192, %s302_s16, [#allocation12], %s8396_s24, %s8396_s24, %s8397_s25  }
  0x1b   : > { %s259_s15 = sshll.u32 %s8399_s11, 4  ;;  %s282_s21 = sshll.u32 %s11265_s4, 4  ;;  %s260_s15 = int_to_ptr.vmem [resolvable:$true] %s259_s15  ;;  %s283_s21 = int_to_ptr.hbm [resolvable:$true] %s282_s21 }
  0x1c   : > { %s8400_s23 = smov [#allocation10]   ;;  %s314_s9 = sshll.u32 %s11268_s7, 4  ;;  %s315_s9 = int_to_ptr.hbm [resolvable:$true] %s314_s9 }
  0x1d   : > { %s284_s26 = sshll.u32 %s8400_s23, 4  ;;  %s11270_s10 = smov 256   ;;  %s285_s26 = int_to_ptr.vmem [resolvable:$true] %s284_s26 }
  0x1e   : > { %s257_s1 = sshll.u32 %s11329_s2, 4  ;;  %s11271_s14 = smov 16   ;;  %s258_s1 = int_to_ptr.hbm [resolvable:$true] %s257_s1 }
  0x1f   : > { %7792 = dma.hbm_to_vmem [thread:$0]  (!%p8494_p6), %s258_s1, 96, %s260_s15, [#allocation6]  }
  0x20   : > { %7798 = dma.hbm_to_vmem [thread:$0]  (!%p8494_p6), %s283_s21, 8192, %s285_s26, [#allocation9], %s11270_s10, %s11270_s10, %s11271_s14  }
  0x21   : > { %s8403_s1 = smov [#allocation13]   ;;  %s6430_s17 = sadd.s32 4294967294, %s8390_s30  }
  0x22   : > { %s316_s16 = sshll.u32 %s8403_s1, 4  ;;  %s8527_s20 = sadd.s32 1, %s8390_s30   ;;  %s317_s16 = int_to_ptr.vmem [resolvable:$true] %s316_s16 }
  0x23   : > { %7804 = dma.hbm_to_vmem [thread:$0]  (!%p8494_p6), %s315_s9, 256, %s317_s16, [#allocation12]  }
  0x24   : > { %s31_s11 = ssub.s32 %s8390_s30, %s8527_s20  ;;  %s34_s15 = sadd.s32 1, %s8386_s29 }
  0x25   : > { %p32_p7 = scmp.eq.s32.totalorder %s31_s11, 0  ;;  %p41_p8 = scmp.ne.s32.totalorder %s8386_s29, %s8382_s28 }
  0x26   : > { %p42_p9 = scmp.eq.s32.totalorder %s8390_s30, 0  ;;  %p47_p10 = scmp.ne.s32.totalorder %s8382_s28, %s8378_s27 }
  0x27   : > { %s8538_s22 = scalar_select %p32_p7, %s8386_s29, %s34_s15  }
  0x28   : > { %p8540_p11 = por %p42_p9, %p41_p8  ;;  %p8546_p12 = por %p48_p1, %p47_p10 }
  0x29   : > { %p218_p13 = scmp.eq.s32.totalorder %s8477_s12, 1  ;;  %p224_p0 = scmp.eq.s32.totalorder %s6430_s17, 1 }
  0x2a   : > { %p7819_p2 = scmp.lt.s32.totalorder %s8390_s30, 2  ;;  %s327_s21 = sand.u32 1, %s8386_s29  }
  0x2b   : > { %p8553_p4 = por %p218_p13, %p41_p8  ;;  %p8557_p6 = por %p224_p0, %p47_p10 }
  0x2c   : > { %s6439_s24 = sshll.u32 %s327_s21, 8  ;;  %s7499_s25 = sshll.u32 %s8390_s30, 8 }
  0x2d   : > { %s337_s16 = scalar_lea.hbm %s11261_s0, %s7499_s25  ;;  %s331_s11 = scalar_lea.vmem [#allocation2], %s6439_s24 }
  0x2e   : > { %s340_s15 = sshll.u32 %s331_s11, 4  ;;  %s338_s10 = sshll.u32 %s337_s16, 4  ;;  %s341_s15 = int_to_ptr.vmem [resolvable:$true] %s340_s15  ;;  %s339_s10 = int_to_ptr.hbm [resolvable:$true] %s338_s10 }
  0x2f   : > { %p8567_p7 = pnand %p7819_p2, %p8540_p11  ;;  %s328_s14 = scalar_lea.sflag [#allocation3], %s327_s21 }
  0x30   : > { %s8282_s2 = sshra.s32 %s339_s10, 4  ;;  %s8289_s9 = scalar_lea.hbm %s11261_s0, 512  ;;  %s8283_s2 = int_to_ptr.hbm [resolvable:$true] %s8282_s2 }
  0x31   : > { %s8284_s3 = scalar_lea.hbm %s8283_s2, 256  ;;  %p8286_p9 = pneg %p8567_p7 }
  0x32   : > { %p8285_p8 = scmp.ne.s32.totalorder %s8283_s2, %s8284_s3  ;;  %p8290_p11 = scmp.lt.s32.totalorder %s8283_s2, %s11261_s0 }
  0x33   : > { %p8291_p0 = scmp.lt.s32.totalorder %s8289_s9, %s8284_s3 }
  0x34   : > { %p8287_p10 = pnand %p8286_p9, %p8285_p8 }
  0x35   : > { %p8292_p2 = por %p8291_p0, %p8290_p11 }
  0x36   : > { %p8288_p13 = pneg %p8287_p10 }
  0x38   : > { %p8293_p5 = pnand %p8292_p2, %p8288_p13 }
  0x3a   : > { %8296 = shalt.err (!%p8293_p5)
}
  0x3b   : > { %s11335_s21 = smov 16   ;;  %s11336_s16 = smov 256  }
  0x3c   : > { %7808 = dma.hbm_to_vmem [thread:$0]  (!%p8567_p7), %s339_s10, 4096, %s341_s15, %s328_s14, %s11336_s16, %s11336_s16, %s11335_s21  }
  0x3d   : > { %352 = sbr.rel (%p8482_p3) target bundleno = 2649 (0xa59), region = 52 }
  0x42   : > { %s8587_s11 = sand.u32 1, %s8382_s28  }
  0x43   : > { %s6444_s2 = sshll.u32 %s8587_s11, 8  ;;  %s355_s3 = scalar_lea.sflag [#allocation3], %s8587_s11 }
  0x44   : > { %s8593_s24 = scalar_lea.vmem [#allocation2], %s6444_s2 }
  0x45   : > { %8357 = dma.done.wait (%p8546_p12), %s355_s3, 4096  }
  0x46   : > { %8359 = vsyncadd (%p8546_p12), %s355_s3, 4294963200 }
  0x47   : > { %8361 = dma.done.wait (%p48_p1), [#allocation6], 12384  }
  0x48   : > { %8363 = vsyncadd (%p48_p1), [#allocation6], 4294954912 }
  0x49   : > { %8365 = dma.done.wait (%p48_p1), [#allocation9], 12288  }
  0x4a   : > { %8367 = vsyncadd (%p48_p1), [#allocation9], 4294955008 }
  0x4b   : > { %8369 = dma.done.wait (%p48_p1), [#allocation12], 8448  }
  0x4c   : > { %8371 = vsyncadd (%p48_p1), [#allocation12], 4294958848  ;;  %v6622_v0 = vld [vmem:[#allocation5 + $0x150] sm:$0xf]  ;;  %v7545_v1 = vld [vmem:[#allocation5 + $0x164] sm:$0xf0] }
  0x4d   : > { %v6814_v2 = vld [vmem:[#allocation5 + $0x2d0] sm:$0xf]  ;;  %v6623_v3 = vor.u32 %v7545_v1, %v6622_v0  ;;  %v7593_v4 = vld [vmem:[#allocation5 + $0x2e4] sm:$0xf0]  ;;  %v7542_v5 = vld [vmem:[#allocation5 + $0x154] sm:$0xf] }
  0x4e   : > { %v6624_v6 = vld [vmem:[#allocation5 + $0x168] sm:$0xf0]  ;;  %v6815_v7 = vor.u32 %v7593_v4, %v6814_v2  ;;  %v7590_v9 = vld [vmem:[#allocation5 + $0x2d4] sm:$0xf]  ;;  %v6598_v11 = vld [vmem:[#allocation5 + $0x120] sm:$0xf] }
  0x4f   : > { %v6627_v8 = vor.u32 %v7542_v5, %v6624_v6  ;;  %v6816_v10 = vld [vmem:[#allocation5 + $0x2e8] sm:$0xf0]  ;;  %1063 = vmatpush.bf16.msra.mxu0 %v6623_v3  ;;  %v7539_v13 = vld [vmem:[#allocation5 + $0x134] sm:$0xf0]  ;;  %v6790_v14 = vld [vmem:[#allocation5 + $0x2a0] sm:$0xf] }
  0x50   : > { %v6819_v12 = vor.u32 %v7590_v9, %v6816_v10  ;;  %v7587_v15 = vld [vmem:[#allocation5 + $0x2b4] sm:$0xf0]  ;;  %1112 = vmatpush.bf16.msra.mxu1 %v6815_v7  ;;  %v6599_v16 = vor.u32 %v7539_v13, %v6598_v11  ;;  %v7536_v18 = vld [vmem:[#allocation5 + $0x124] sm:$0xf]  ;;  %v6600_v19 = vld [vmem:[#allocation5 + $0x138] sm:$0xf0] }
  0x51   : > { %1161 = vmatpush.bf16.msra.mxu2 %v6627_v8  ;;  %v6791_v17 = vor.u32 %v7587_v15, %v6790_v14  ;;  %v7584_v20 = vld [vmem:[#allocation5 + $0x2a4] sm:$0xf]  ;;  %v6603_v21 = vor.u32 %v7536_v18, %v6600_v19  ;;  %v6792_v22 = vld [vmem:[#allocation5 + $0x2b8] sm:$0xf0]  ;;  %v6574_v23 = vld [vmem:[#allocation5 + $0xf0] sm:$0xf] }
  0x52   : > { %1210 = vmatpush.bf16.msra.mxu3 %v6819_v12  ;;  %v7533_v24 = vld [vmem:[#allocation5 + $0x104] sm:$0xf0]  ;;  %v6795_v25 = vor.u32 %v7584_v20, %v6792_v22  ;;  %v6766_v26 = vld [vmem:[#allocation5 + $0x270] sm:$0xf]  ;;  %v7530_v28 = vld [vmem:[#allocation5 + $0xf4] sm:$0xf] }
  0x53   : > { %v7581_v27 = vld [vmem:[#allocation5 + $0x284] sm:$0xf0]  ;;  %1064 = vmatpush.bf16.msra.mxu0 %v6599_v16  ;;  %v6575_v29 = vor.u32 %v7533_v24, %v6574_v23  ;;  %v6576_v30 = vld [vmem:[#allocation5 + $0x108] sm:$0xf0]  ;;  %v7578_v31 = vld [vmem:[#allocation5 + $0x274] sm:$0xf] }
  0x54   : > { %v6768_v32 = vld [vmem:[#allocation5 + $0x288] sm:$0xf0]  ;;  %1113 = vmatpush.bf16.msra.mxu1 %v6791_v17  ;;  %v6767_v33 = vor.u32 %v7581_v27, %v6766_v26  ;;  %v6579_v34 = vor.u32 %v7530_v28, %v6576_v30  ;;  %v6550_v35 = vld [vmem:[#allocation5 + $0xc0] sm:$0xf]  ;;  %v7527_v36 = vld [vmem:[#allocation5 + $0xd4] sm:$0xf0] }
  0x55   : > { %1162 = vmatpush.bf16.msra.mxu2 %v6603_v21  ;;  %v6742_v37 = vld [vmem:[#allocation5 + $0x240] sm:$0xf]  ;;  %v6771_v38 = vor.u32 %v7578_v31, %v6768_v32  ;;  %v7575_v39 = vld [vmem:[#allocation5 + $0x254] sm:$0xf0]  ;;  %v7524_v40 = vld [vmem:[#allocation5 + $0xc4] sm:$0xf]  ;;  %v6551_v44 = vor.u32 %v7527_v36, %v6550_v35 }
  0x56   : > { %1211 = vmatpush.bf16.msra.mxu3 %v6795_v25  ;;  %v6552_v41 = vld [vmem:[#allocation5 + $0xd8] sm:$0xf0]  ;;  %v7572_v42 = vld [vmem:[#allocation5 + $0x244] sm:$0xf]  ;;  %v6743_v45 = vor.u32 %v7575_v39, %v6742_v37  ;;  %v6526_v47 = vld [vmem:[#allocation5 + $0x90] sm:$0xf] }
  0x57   : > { %v6744_v43 = vld [vmem:[#allocation5 + $0x258] sm:$0xf0]  ;;  %1065 = vmatpush.bf16.msra.mxu0 %v6575_v29  ;;  %v6555_v46 = vor.u32 %v7524_v40, %v6552_v41  ;;  %v7521_v48 = vld [vmem:[#allocation5 + $0xa4] sm:$0xf0]  ;;  %v6718_v49 = vld [vmem:[#allocation5 + $0x210] sm:$0xf] }
  0x58   : > { %1114 = vmatpush.bf16.msra.mxu1 %v6767_v33  ;;  %v6747_v50 = vor.u32 %v7572_v42, %v6744_v43  ;;  %v7569_v51 = vld [vmem:[#allocation5 + $0x224] sm:$0xf0]  ;;  %v7518_v52 = vld [vmem:[#allocation5 + $0x94] sm:$0xf]  ;;  %v6528_v53 = vld [vmem:[#allocation5 + $0xa8] sm:$0xf0]  ;;  %v6527_v56 = vor.u32 %v7521_v48, %v6526_v47 }
  0x59   : > { %1163 = vmatpush.bf16.msra.mxu2 %v6579_v34  ;;  %v7566_v54 = vld [vmem:[#allocation5 + $0x214] sm:$0xf]  ;;  %v6720_v55 = vld [vmem:[#allocation5 + $0x228] sm:$0xf0]  ;;  %v6719_v57 = vor.u32 %v7569_v51, %v6718_v49  ;;  %v6531_v58 = vor.u32 %v7518_v52, %v6528_v53  ;;  %v6502_v59 = vld [vmem:[#allocation5 + $0x60] sm:$0xf] }
  0x5a   : > { %1212 = vmatpush.bf16.msra.mxu3 %v6771_v38  ;;  %v7515_v60 = vld [vmem:[#allocation5 + $0x74] sm:$0xf0]  ;;  %v6694_v61 = vld [vmem:[#allocation5 + $0x1e0] sm:$0xf]  ;;  %v6723_v62 = vor.u32 %v7566_v54, %v6720_v55  ;;  %v7512_v0 = vld [vmem:[#allocation5 + $0x64] sm:$0xf] }
  0x5b   : > { %1066 = vmatpush.bf16.msra.mxu0 %v6551_v44  ;;  %v7563_v63 = vld [vmem:[#allocation5 + $0x1f4] sm:$0xf0]  ;;  %v6504_v1 = vld [vmem:[#allocation5 + $0x78] sm:$0xf0]  ;;  %v7560_v2 = vld [vmem:[#allocation5 + $0x1e4] sm:$0xf]  ;;  %v6503_v4 = vor.u32 %v7515_v60, %v6502_v59 }
  0x5c   : > { %1115 = vmatpush.bf16.msra.mxu1 %v6743_v45  ;;  %v6696_v3 = vld [vmem:[#allocation5 + $0x1f8] sm:$0xf0]  ;;  %v6695_v5 = vor.u32 %v7563_v63, %v6694_v61  ;;  %v6507_v6 = vor.u32 %v7512_v0, %v6504_v1  ;;  %v6478_v7 = vld [vmem:[#allocation5 + $0x30] sm:$0xf]  ;;  %v7509_v8 = vld [vmem:[#allocation5 + $0x44] sm:$0xf0] }
  0x5d   : > { %1164 = vmatpush.bf16.msra.mxu2 %v6555_v46  ;;  %v6670_v9 = vld [vmem:[#allocation5 + $0x1b0] sm:$0xf]  ;;  %v6699_v10 = vor.u32 %v7560_v2, %v6696_v3  ;;  %v7557_v11 = vld [vmem:[#allocation5 + $0x1c4] sm:$0xf0]  ;;  %v7506_v12 = vld [vmem:[#allocation5 + $0x34] sm:$0xf]  ;;  %v6479_v16 = vor.u32 %v7509_v8, %v6478_v7 }
  0x5e   : > { %1213 = vmatpush.bf16.msra.mxu3 %v6747_v50  ;;  %v6480_v13 = vld [vmem:[#allocation5 + $0x48] sm:$0xf0]  ;;  %v7554_v14 = vld [vmem:[#allocation5 + $0x1b4] sm:$0xf]  ;;  %v6671_v17 = vor.u32 %v7557_v11, %v6670_v9  ;;  %v6454_v19 = vld [vmem:[#allocation5] sm:$0xf] }
  0x5f   : > { %1067 = vmatpush.bf16.msra.mxu0 %v6527_v56  ;;  %v6672_v15 = vld [vmem:[#allocation5 + $0x1c8] sm:$0xf0]  ;;  %v6483_v18 = vor.u32 %v7506_v12, %v6480_v13  ;;  %v7503_v20 = vld [vmem:[#allocation5 + $0x14] sm:$0xf0]  ;;  %v6646_v21 = vld [vmem:[#allocation5 + $0x180] sm:$0xf] }
  0x60   : > { %1116 = vmatpush.bf16.msra.mxu1 %v6719_v57  ;;  %v6675_v22 = vor.u32 %v7554_v14, %v6672_v15  ;;  %v7551_v23 = vld [vmem:[#allocation5 + $0x194] sm:$0xf0]  ;;  %v7500_v24 = vld [vmem:[#allocation5 + $0x4] sm:$0xf]  ;;  %v6456_v25 = vld [vmem:[#allocation5 + $0x18] sm:$0xf0]  ;;  %v6455_v28 = vor.u32 %v7503_v20, %v6454_v19 }
  0x61   : > { %1165 = vmatpush.bf16.msra.mxu2 %v6531_v58  ;;  %v7548_v26 = vld [vmem:[#allocation5 + $0x184] sm:$0xf]  ;;  %v6648_v27 = vld [vmem:[#allocation5 + $0x198] sm:$0xf0]  ;;  %v427_v30 = vld [vmem:[%s8593_s24 + $0x10] sm:$0xff]  ;;  %v6647_v31 = vor.u32 %v7551_v23, %v6646_v21  ;;  %v6459_v32 = vor.u32 %v7500_v24, %v6456_v25  ;;  %vm1948_vm1 = vcmask 130048  }
  0x62   : > { %1214 = vmatpush.bf16.msra.mxu3 %v6723_v62  ;;  %v425_v29 = vld [vmem:[%s8593_s24] sm:$0xff]  ;;  %v426_v33 = vld [vmem:[%s8593_s24 + $0x8] sm:$0xff]  ;;  %v428_v34 = vld [vmem:[%s8593_s24 + $0x18] sm:$0xff]  ;;  %v6651_v35 = vor.u32 %v7548_v26, %v6648_v27  ;;  %s10965_s14 = scalar_lea.vmem [#allocation14], %s6444_s2  ;;  %s7757_s19 = sshll.u32 %s8477_s12, 8 }
  0x63   : > { %1068 = vmatpush.bf16.msra.mxu0 %v6503_v4  ;;  %v8615_v36 = vpack.c.bf16 %v427_v30, %v425_v29  ;;  %v8617_v37 = vpack.c.bf16 %v428_v34, %v426_v33  ;;  %v6630_v38 = vld [vmem:[#allocation5 + $0x158] sm:$0xf]  ;;  %v7546_v39 = vld [vmem:[#allocation5 + $0x16c] sm:$0xf0]  ;;  %v429_v44 = vld [vmem:[%s8593_s24 + $0x20] sm:$0xff]  ;;  %s6296_s17 = scalar_lea.hbm %s11269_s8, %s7757_s19  ;;  %s6297_s25 = sshll.u32 %s10965_s14, 4  ;;  %s6298_s25 = int_to_ptr.vmem [resolvable:$true] %s6297_s25 }
  0x64   : > { %1117 = vmatpush.bf16.msra.mxu1 %v6695_v5  ;;  %v6822_v40 = vld [vmem:[#allocation5 + $0x2d8] sm:$0xf]  ;;  %v6631_v41 = vor.u32 %v7546_v39, %v6630_v38  ;;  %v7594_v42 = vld [vmem:[#allocation5 + $0x2ec] sm:$0xf0]  ;;  %v430_v46 = vld [vmem:[%s8593_s24 + $0x28] sm:$0xff]  ;;  %s6299_s9 = sshll.u32 %s6296_s17, 4  ;;  %s6300_s9 = int_to_ptr.hbm [resolvable:$true] %s6299_s9 }
  0x65   : > { %1166 = vmatpush.bf16.msra.mxu2 %v6507_v6  ;;  %v6823_v43 = vor.u32 %v7594_v42, %v6822_v40  ;;  %v431_v45 = vld [vmem:[%s8593_s24 + $0x30] sm:$0xff]  ;;  %v432_v47 = vld [vmem:[%s8593_s24 + $0x38] sm:$0xff]  ;;  %v6606_v52 = vld [vmem:[#allocation5 + $0x128] sm:$0xf]  ;;  %s6284_s1 = scalar_lea.sflag [#allocation4], %s8587_s11  ;;  %s8326_s18 = sshra.s32 %s6300_s9, 4  ;;  %s8327_s18 = int_to_ptr.hbm [resolvable:$true] %s8326_s18 }
  0x66   : > { %1215 = vmatpush.bf16.msra.mxu3 %v6699_v10  ;;  %v8627_v48 = vpack.c.bf16 %v431_v45, %v429_v44  ;;  %v8629_v49 = vpack.c.bf16 %v432_v47, %v430_v46  ;;  %v7543_v50 = vld [vmem:[#allocation5 + $0x15c] sm:$0xf]  ;;  %v6632_v51 = vld [vmem:[#allocation5 + $0x170] sm:$0xf0]  ;;  %v7540_v54 = vld [vmem:[#allocation5 + $0x13c] sm:$0xf0]  ;;  %p8333_p12 = scmp.lt.s32.totalorder %s8327_s18, %s11269_s8 }
  0x67   : > { %1069 = vmatpush.bf16.msra.mxu0 %v6479_v16  ;;  %v6635_v53 = vor.u32 %v7543_v50, %v6632_v51  ;;  %v6798_v55 = vld [vmem:[#allocation5 + $0x2a8] sm:$0xf]  ;;  %v7588_v56 = vld [vmem:[#allocation5 + $0x2bc] sm:$0xf0]  ;;  %v6607_v57 = vor.u32 %v7540_v54, %v6606_v52  ;;  %v435_v60 = vld [vmem:[%s8593_s24 + $0x50] sm:$0xff]  ;;  %s8328_s21 = scalar_lea.hbm %s8327_s18, 256 }
  0x68   : > { %1118 = vmatpush.bf16.msra.mxu1 %v6671_v17  ;;  %v6799_v58 = vor.u32 %v7588_v56, %v6798_v55  ;;  %v433_v59 = vld [vmem:[%s8593_s24 + $0x40] sm:$0xff]  ;;  %v434_v61 = vld [vmem:[%s8593_s24 + $0x48] sm:$0xff]  ;;  %v436_v62 = vld [vmem:[%s8593_s24 + $0x58] sm:$0xff]  ;;  %p8329_p1 = scmp.ne.s32.totalorder %s8327_s18, %s8328_s21  ;;  %s8332_s3 = scalar_lea.hbm %s11269_s8, 512 }
  0x69   : > { %1167 = vmatpush.bf16.msra.mxu2 %v6483_v18  ;;  %v8639_v63 = vpack.c.bf16 %v435_v60, %v433_v59  ;;  %v8641_v0 = vpack.c.bf16 %v436_v62, %v434_v61  ;;  %v7537_v1 = vld [vmem:[#allocation5 + $0x12c] sm:$0xf]  ;;  %v6608_v2 = vld [vmem:[#allocation5 + $0x140] sm:$0xf0]  ;;  %v7591_v3 = vld [vmem:[#allocation5 + $0x2dc] sm:$0xf]  ;;  %p8334_p7 = scmp.lt.s32.totalorder %s8332_s3, %s8328_s21 }
  0x6a   : > { %1216 = vmatpush.bf16.msra.mxu3 %v6675_v22  ;;  %v6611_v4 = vor.u32 %v7537_v1, %v6608_v2  ;;  %v6824_v5 = vld [vmem:[#allocation5 + $0x2f0] sm:$0xf0]  ;;  %v6582_v6 = vld [vmem:[#allocation5 + $0xf8] sm:$0xf]  ;;  %v7534_v7 = vld [vmem:[#allocation5 + $0x10c] sm:$0xf0]  ;;  %p8330_p3 = pnand %p8329_p1, %p8553_p4 }
  0x6b   : > { %1070 = vmatpush.bf16.msra.mxu0 %v6455_v28  ;;  %v6827_v8 = vor.u32 %v7591_v3, %v6824_v5  ;;  %v6583_v9 = vor.u32 %v7534_v7, %v6582_v6  ;;  %v6774_v10 = vld [vmem:[#allocation5 + $0x278] sm:$0xf]  ;;  %v7582_v11 = vld [vmem:[#allocation5 + $0x28c] sm:$0xf0]  ;;  %v437_v13 = vld [vmem:[%s8593_s24 + $0x60] sm:$0xff]  ;;  %p8335_p8 = por %p8334_p7, %p8333_p12 }
  0x6c   : > { %1119 = vmatpush.bf16.msra.mxu1 %v6647_v31  ;;  %v6775_v12 = vor.u32 %v7582_v11, %v6774_v10  ;;  %v439_v14 = vld [vmem:[%s8593_s24 + $0x70] sm:$0xff]  ;;  %v438_v15 = vld [vmem:[%s8593_s24 + $0x68] sm:$0xff]  ;;  %v440_v16 = vld [vmem:[%s8593_s24 + $0x78] sm:$0xff]  ;;  %p8331_p5 = pneg %p8330_p3 }
  0x6d   : > { %1168 = vmatpush.bf16.msra.mxu2 %v6459_v32  ;;  %v8651_v17 = vpack.c.bf16 %v439_v14, %v437_v13  ;;  %v8653_v18 = vpack.c.bf16 %v440_v16, %v438_v15  ;;  %v7531_v19 = vld [vmem:[#allocation5 + $0xfc] sm:$0xf]  ;;  %v6584_v20 = vld [vmem:[#allocation5 + $0x110] sm:$0xf0]  ;;  %v7585_v21 = vld [vmem:[#allocation5 + $0x2ac] sm:$0xf] }
  0x6e   : > { %1217 = vmatpush.bf16.msra.mxu3 %v6651_v35  ;;  %1071 = vmatmul.bf16.vlgmr.msra.gmra.mxu0 %v8615_v36  ;;  %v6587_v22 = vor.u32 %v7531_v19, %v6584_v20  ;;  %v6800_v23 = vld [vmem:[#allocation5 + $0x2c0] sm:$0xf0]  ;;  %v6558_v24 = vld [vmem:[#allocation5 + $0xc8] sm:$0xf]  ;;  %v7528_v25 = vld [vmem:[#allocation5 + $0xdc] sm:$0xf0]  ;;  %p8336_p9 = pnand %p8335_p8, %p8331_p5 }
  0x6f   : > { %1120 = vmatmul.bf16.vlgmr.msra.gmra.mxu1 %v8617_v37  ;;  %1259 = vmatpush.bf16.msrb.mxu0 %v6631_v41  ;;  %v6803_v26 = vor.u32 %v7585_v21, %v6800_v23  ;;  %v6559_v27 = vor.u32 %v7528_v25, %v6558_v24  ;;  %v6750_v28 = vld [vmem:[#allocation5 + $0x248] sm:$0xf]  ;;  %v7576_v29 = vld [vmem:[#allocation5 + $0x25c] sm:$0xf0]  ;;  %v443_v32 = vld [vmem:[%s8593_s24 + $0x90] sm:$0xff] }
  0x70   : > { %1169 = vmatmul.bf16.vlgmr.msra.gmra.mxu2 %v8615_v36  ;;  %1308 = vmatpush.bf16.msrb.mxu1 %v6823_v43  ;;  %v6751_v30 = vor.u32 %v7576_v29, %v6750_v28  ;;  %v441_v31 = vld [vmem:[%s8593_s24 + $0x80] sm:$0xff]  ;;  %v442_v33 = vld [vmem:[%s8593_s24 + $0x88] sm:$0xff]  ;;  %v444_v34 = vld [vmem:[%s8593_s24 + $0x98] sm:$0xff] }
  0x71   : > { %1218 = vmatmul.bf16.vlgmr.msra.gmra.mxu3 %v8617_v37  ;;  %1357 = vmatpush.bf16.msrb.mxu2 %v6635_v53  ;;  %v8663_v35 = vpack.c.bf16 %v443_v32, %v441_v31  ;;  %v8665_v38 = vpack.c.bf16 %v444_v34, %v442_v33  ;;  %v7525_v39 = vld [vmem:[#allocation5 + $0xcc] sm:$0xf]  ;;  %v6560_v40 = vld [vmem:[#allocation5 + $0xe0] sm:$0xf0]  ;;  %v7579_v41 = vld [vmem:[#allocation5 + $0x27c] sm:$0xf] }
  0x72   : > { %1406 = vmatpush.bf16.msrb.mxu3 %v6827_v8  ;;  %v6563_v42 = vor.u32 %v7525_v39, %v6560_v40  ;;  %v6776_v43 = vld [vmem:[#allocation5 + $0x290] sm:$0xf0]  ;;  %v6534_v44 = vld [vmem:[#allocation5 + $0x98] sm:$0xf]  ;;  %v7522_v45 = vld [vmem:[#allocation5 + $0xac] sm:$0xf0] }
  0x73   : > { %1260 = vmatpush.bf16.msrb.mxu0 %v6607_v57  ;;  %v6779_v46 = vor.u32 %v7579_v41, %v6776_v43  ;;  %v6535_v47 = vor.u32 %v7522_v45, %v6534_v44  ;;  %v7573_v50 = vld [vmem:[#allocation5 + $0x24c] sm:$0xf]  ;;  %v6752_v51 = vld [vmem:[#allocation5 + $0x260] sm:$0xf0]  ;;  %v6726_v52 = vld [vmem:[#allocation5 + $0x218] sm:$0xf] }
  0x74   : > { %1309 = vmatpush.bf16.msrb.mxu1 %v6799_v58  ;;  %v7570_v53 = vld [vmem:[#allocation5 + $0x22c] sm:$0xf0]  ;;  %v6755_v54 = vor.u32 %v7573_v50, %v6752_v51  ;;  %v445_v56 = vld [vmem:[%s8593_s24 + $0xa0] sm:$0xff]  ;;  %v446_v58 = vld [vmem:[%s8593_s24 + $0xa8] sm:$0xff] }
  0x75   : > { %1358 = vmatpush.bf16.msrb.mxu2 %v6611_v4  ;;  %v6727_v55 = vor.u32 %v7570_v53, %v6726_v52  ;;  %v447_v57 = vld [vmem:[%s8593_s24 + $0xb0] sm:$0xff]  ;;  %v448_v59 = vld [vmem:[%s8593_s24 + $0xb8] sm:$0xff]  ;;  %v6510_v6 = vld [vmem:[#allocation5 + $0x68] sm:$0xf] }
  0x76   : > { %1407 = vmatpush.bf16.msrb.mxu3 %v6803_v26  ;;  %v8675_v60 = vpack.c.bf16 %v447_v57, %v445_v56  ;;  %v8677_v61 = vpack.c.bf16 %v448_v59, %v446_v58  ;;  %v7519_v62 = vld [vmem:[#allocation5 + $0x9c] sm:$0xf]  ;;  %v6536_v1 = vld [vmem:[#allocation5 + $0xb0] sm:$0xf0]  ;;  %v7516_v7 = vld [vmem:[#allocation5 + $0x7c] sm:$0xf0] }
  0x77   : > { %1261 = vmatpush.bf16.msrb.mxu0 %v6583_v9  ;;  %v7567_v2 = vld [vmem:[#allocation5 + $0x21c] sm:$0xf]  ;;  %v6539_v3 = vor.u32 %v7519_v62, %v6536_v1  ;;  %v6728_v4 = vld [vmem:[#allocation5 + $0x230] sm:$0xf0]  ;;  %v6702_v8 = vld [vmem:[#allocation5 + $0x1e8] sm:$0xf]  ;;  %v6511_v9 = vor.u32 %v7516_v7, %v6510_v6 }
  0x78   : > { %1310 = vmatpush.bf16.msrb.mxu1 %v6775_v12  ;;  %v6731_v5 = vor.u32 %v7567_v2, %v6728_v4  ;;  %v7564_v10 = vld [vmem:[#allocation5 + $0x1fc] sm:$0xf0]  ;;  %v7513_v11 = vld [vmem:[#allocation5 + $0x6c] sm:$0xf]  ;;  %v6512_v12 = vld [vmem:[#allocation5 + $0x80] sm:$0xf0] }
  0x79   : > { %1359 = vmatpush.bf16.msrb.mxu2 %v6587_v22  ;;  %v6703_v13 = vor.u32 %v7564_v10, %v6702_v8  ;;  %v6515_v14 = vor.u32 %v7513_v11, %v6512_v12  ;;  %v7561_v15 = vld [vmem:[#allocation5 + $0x1ec] sm:$0xf]  ;;  %v6704_v16 = vld [vmem:[#allocation5 + $0x200] sm:$0xf0]  ;;  %v6486_v19 = vld [vmem:[#allocation5 + $0x38] sm:$0xf] }
  0x7a   : > { %1408 = vmatpush.bf16.msrb.mxu3 %v6779_v46  ;;  %v6707_v20 = vor.u32 %v7561_v15, %v6704_v16  ;;  %v7510_v21 = vld [vmem:[#allocation5 + $0x4c] sm:$0xf0]  ;;  %v6678_v22 = vld [vmem:[#allocation5 + $0x1b8] sm:$0xf]  ;;  %v7507_v26 = vld [vmem:[#allocation5 + $0x3c] sm:$0xf] }
  0x7b   : > { %1262 = vmatpush.bf16.msrb.mxu0 %v6559_v27  ;;  %v7558_v23 = vld [vmem:[#allocation5 + $0x1cc] sm:$0xf0]  ;;  %v6487_v24 = vor.u32 %v7510_v21, %v6486_v19  ;;  %v6488_v27 = vld [vmem:[#allocation5 + $0x50] sm:$0xf0]  ;;  %v7555_v28 = vld [vmem:[#allocation5 + $0x1bc] sm:$0xf] }
  0x7c   : > { %1311 = vmatpush.bf16.msrb.mxu1 %v6751_v30  ;;  %v6679_v25 = vor.u32 %v7558_v23, %v6678_v22  ;;  %v6491_v29 = vor.u32 %v7507_v26, %v6488_v27  ;;  %v6680_v30 = vld [vmem:[#allocation5 + $0x1d0] sm:$0xf0]  ;;  %v449_v32 = vld [vmem:[%s8593_s24 + $0xc0] sm:$0xff]  ;;  %v450_v34 = vld [vmem:[%s8593_s24 + $0xc8] sm:$0xff] }
  0x7d   : > { %1360 = vmatpush.bf16.msrb.mxu2 %v6563_v42  ;;  %v6683_v31 = vor.u32 %v7555_v28, %v6680_v30  ;;  %v451_v33 = vld [vmem:[%s8593_s24 + $0xd0] sm:$0xff]  ;;  %v452_v39 = vld [vmem:[%s8593_s24 + $0xd8] sm:$0xff]  ;;  %v6462_v41 = vld [vmem:[#allocation5 + $0x8] sm:$0xf] }
  0x7e   : > { %1076 = vmatmul.bf16.gmra.mxu0 %v8627_v48  ;;  %1409 = vmatpush.bf16.msrb.mxu3 %v6755_v54  ;;  %v8687_v40 = vpack.c.bf16 %v451_v33, %v449_v32  ;;  %v7504_v42 = vld [vmem:[#allocation5 + $0x1c] sm:$0xf0]  ;;  %v6654_v43 = vld [vmem:[#allocation5 + $0x188] sm:$0xf]  ;;  %v8689_v44 = vpack.c.bf16 %v452_v39, %v450_v34  ;;  %v6464_v50 = vld [vmem:[#allocation5 + $0x20] sm:$0xf0] }
  0x7f   : > { %1125 = vmatmul.bf16.gmra.mxu1 %v8629_v49  ;;  %1263 = vmatpush.bf16.msrb.mxu0 %v6535_v47  ;;  %v6463_v45 = vor.u32 %v7504_v42, %v6462_v41  ;;  %v7552_v46 = vld [vmem:[#allocation5 + $0x19c] sm:$0xf0]  ;;  %v7501_v47 = vld [vmem:[#allocation5 + $0xc] sm:$0xf]  ;;  %v6656_v54 = vld [vmem:[#allocation5 + $0x1a0] sm:$0xf0] }
  0x80   : > { %1174 = vmatmul.bf16.gmra.mxu2 %v8627_v48  ;;  %1312 = vmatpush.bf16.msrb.mxu1 %v6727_v55  ;;  %v6655_v51 = vor.u32 %v7552_v46, %v6654_v43  ;;  %v6467_v52 = vor.u32 %v7501_v47, %v6464_v50  ;;  %v7549_v53 = vld [vmem:[#allocation5 + $0x18c] sm:$0xf]  ;;  %v453_v56 = vld [vmem:[%s8593_s24 + $0xe0] sm:$0xff]  ;;  %v455_v57 = vld [vmem:[%s8593_s24 + $0xf0] sm:$0xff] }
  0x81   : > { %1223 = vmatmul.bf16.gmra.mxu3 %v8629_v49  ;;  %1361 = vmatpush.bf16.msrb.mxu2 %v6539_v3  ;;  %v6659_v55 = vor.u32 %v7549_v53, %v6656_v54  ;;  %v454_v58 = vld [vmem:[%s8593_s24 + $0xe8] sm:$0xff]  ;;  %v456_v59 = vld [vmem:[%s8593_s24 + $0xf8] sm:$0xff]  ;;  %v8699_v62 = vpack.c.bf16 %v455_v57, %v453_v56  ;;  %v8707_v2 = vld [vmem:[#allocation7] sm:$0x3f] }
  0x82   : > { %1410 = vmatpush.bf16.msrb.mxu3 %v6731_v5  ;;  %v8701_v1 = vpack.c.bf16 %v456_v59, %v454_v58  ;;  %v8710_v3 = vperm.slane %v8707_v2, 0  ;;  %v8717_v8 = vperm.slane %v8707_v2, 1  ;;  %v7547_v32 = vld [vmem:[#allocation5 + $0x174] sm:$0xf0]  ;;  %v7544_v54 = vld [vmem:[#allocation5 + $0x164] sm:$0xf] }
  0x83   : > { %1264 = vmatpush.bf16.msrb.mxu0 %v6511_v9  ;;  %v7595_v53 = vld [vmem:[#allocation5 + $0x2f4] sm:$0xf0]  ;;  %v6640_v58 = vld [vmem:[#allocation5 + $0x178] sm:$0xf0]  ;;  %v7508_v28 = vld [vmem:[#allocation5 + $0x44] sm:$0xf] }
  0x84   : > { %1313 = vmatpush.bf16.msrb.mxu1 %v6703_v13 }
  0x85   : > { %1362 = vmatpush.bf16.msrb.mxu2 %v6515_v14 }
  0x86   : > { %1411 = vmatpush.bf16.msrb.mxu3 %v6707_v20 }
  0x87   : > { %1265 = vmatpush.bf16.msrb.mxu0 %v6487_v24 }
  0x88   : > { %1314 = vmatpush.bf16.msrb.mxu1 %v6679_v25 }
  0x89   : > { %1363 = vmatpush.bf16.msrb.mxu2 %v6491_v29 }
  0x8a   : > { %1412 = vmatpush.bf16.msrb.mxu3 %v6683_v31  ;;  %v6638_v31 = vld [vmem:[#allocation5 + $0x160] sm:$0xf] }
  0x8b   : > { %1266 = vmatpush.bf16.msrb.mxu0 %v6463_v45  ;;  %v6639_v34 = vor.u32 %v7547_v32, %v6638_v31 }
  0x8c   : > { %1315 = vmatpush.bf16.msrb.mxu1 %v6655_v51 }
  0x8d   : > { %1364 = vmatpush.bf16.msrb.mxu2 %v6467_v52  ;;  %v6830_v52 = vld [vmem:[#allocation5 + $0x2e0] sm:$0xf] }
  0x8e   : > { %1081 = vmatmul.bf16.gmra.mxu0 %v8639_v63  ;;  %1413 = vmatpush.bf16.msrb.mxu3 %v6659_v55  ;;  %v6831_v57 = vor.u32 %v7595_v53, %v6830_v52 }
  0x8f   : > { %1130 = vmatmul.bf16.gmra.mxu1 %v8641_v0  ;;  %1455 = vmatpush.bf16.msra.mxu0 %v6639_v34 }
  0x90   : > { %1179 = vmatmul.bf16.gmra.mxu2 %v8639_v63  ;;  %1504 = vmatpush.bf16.msra.mxu1 %v6831_v57 }
  0x91   : > { %1228 = vmatmul.bf16.gmra.mxu3 %v8641_v0 }
  0x9e   : > { %1086 = vmatmul.bf16.gmra.mxu0 %v8651_v17 }
  0x9f   : > { %1135 = vmatmul.bf16.gmra.mxu1 %v8653_v18 }
  0xa0   : > { %1184 = vmatmul.bf16.gmra.mxu2 %v8651_v17 }
  0xa1   : > { %1233 = vmatmul.bf16.gmra.mxu3 %v8653_v18 }
  0xae   : > { %1091 = vmatmul.bf16.gmra.mxu0 %v8663_v35 }
  0xaf   : > { %1140 = vmatmul.bf16.gmra.mxu1 %v8665_v38 }
  0xb0   : > { %1189 = vmatmul.bf16.gmra.mxu2 %v8663_v35 }
  0xb1   : > { %1238 = vmatmul.bf16.gmra.mxu3 %v8665_v38 }
  0xbe   : > { %1096 = vmatmul.bf16.gmra.mxu0 %v8675_v60 }
  0xbf   : > { %1145 = vmatmul.bf16.gmra.mxu1 %v8677_v61 }
  0xc0   : > { %1194 = vmatmul.bf16.gmra.mxu2 %v8675_v60 }
  0xc1   : > { %1243 = vmatmul.bf16.gmra.mxu3 %v8677_v61 }
  0xce   : > { %1101 = vmatmul.bf16.gmra.mxu0 %v8687_v40 }
  0xcf   : > { %1150 = vmatmul.bf16.gmra.mxu1 %v8689_v44 }
  0xd0   : > { %1199 = vmatmul.bf16.gmra.mxu2 %v8687_v40 }
  0xd1   : > { %1248 = vmatmul.bf16.gmra.mxu3 %v8689_v44 }
  0xde   : > { %1106 = vmatmul.bf16.gmra.mxu0 %v8699_v62 }
  0xdf   : > { %1155 = vmatmul.bf16.gmra.mxu1 %v8701_v1 }
  0xe0   : > { %1204 = vmatmul.bf16.gmra.mxu2 %v8699_v62 }
  0xe1   : > { %1253 = vmatmul.bf16.gmra.mxu3 %v8701_v1 }
  0xeb   : > { %v1072_v4 = vpop.f32.mrf.mxu0 }
  0xec   : > { %v1073_v5 = vadd.f32 %v1072_v4, %v8710_v3  ;;  %v1121_v6 = vpop.f32.mrf.mxu1  ;;  %v6643_v4 = vor.u32 %v7544_v54, %v6640_v58  ;;  %v6616_v54 = vld [vmem:[#allocation5 + $0x148] sm:$0xf0] }
  0xee   : > { %v1122_v7 = vadd.f32 %v1121_v6, %v1073_v5  ;;  %1267 = vmatmul.bf16.vlgmr.msrb.gmra.mxu0 %v8615_v36  ;;  %1553 = vmatpush.bf16.msra.mxu2 %v6643_v4 }
  0xef   : > { %1316 = vmatmul.bf16.vlgmr.msrb.gmra.mxu1 %v8617_v37 }
  0xf0   : > { %1365 = vmatmul.bf16.vlgmr.msrb.gmra.mxu2 %v8615_v36  ;;  %v1660_v16 = vpack.c.bf16 %v1122_v7, %v1122_v7 }
  0xf1   : > { %1414 = vmatmul.bf16.vlgmr.msrb.gmra.mxu3 %v8617_v37 }
  0xf2   : > { %v8722_v21 = vunpack.c.l.b16 %v1660_v16  ;;  %v7559_v16 = vld [vmem:[#allocation5 + $0x1d4] sm:$0xf0] }
  0xf3   : > { %v1170_v9 = vpop.f32.mrf.mxu2  ;;  %v1074_v12 = vpop.f32.mrf.mxu0 }
  0xf4   : > { %v1171_v10 = vadd.f32 %v1170_v9, %v8717_v8  ;;  %v1219_v11 = vpop.f32.mrf.mxu3  ;;  %v1075_v13 = vadd.f32 %v1074_v12, %v8710_v3  ;;  %v1123_v14 = vpop.f32.mrf.mxu1 }
  0xf6   : > { %v1220_v15 = vadd.f32 %v1219_v11, %v1171_v10  ;;  %v1124_v19 = vadd.f32 %v1123_v14, %v1075_v13 }
  0xf8   : > { %v1661_v20 = vpack.c.bf16 %v1124_v19, %v1124_v19  ;;  %v2365_v24 = vpack.c.bf16 %v1220_v15, %v1220_v15 }
  0xfa   : > { %v8724_v22 = vunpack.c.l.b16 %v1661_v20  ;;  %v8731_v41 = vunpack.c.l.b16 %v2365_v24  ;;  %v7541_v24 = vld [vmem:[#allocation5 + $0x144] sm:$0xf0] }
  0xfb   : > { %v1172_v23 = vpop.f32.mrf.mxu2  ;;  %v1077_v27 = vpop.f32.mrf.mxu0 }
  0xfc   : > { %v1173_v25 = vadd.f32 %v1172_v23, %v8717_v8  ;;  %v1221_v26 = vpop.f32.mrf.mxu3  ;;  %v1078_v29 = vadd.f32 %v1077_v27, %v8710_v3  ;;  %v1126_v30 = vpop.f32.mrf.mxu1  ;;  %v6614_v23 = vld [vmem:[#allocation5 + $0x130] sm:$0xf] }
  0xfe   : > { %v1222_v33 = vadd.f32 %v1221_v26, %v1173_v25  ;;  %v1127_v39 = vadd.f32 %v1126_v30, %v1078_v29  ;;  %1272 = vmatmul.bf16.gmra.mxu0 %v8627_v48  ;;  %v6615_v26 = vor.u32 %v7541_v24, %v6614_v23 }
  0xff   : > { %1321 = vmatmul.bf16.gmra.mxu1 %v8629_v49 }
 0x100   : > { %v2366_v42 = vpack.c.bf16 %v1222_v33, %v1222_v33  ;;  %1370 = vmatmul.bf16.gmra.mxu2 %v8627_v48  ;;  %v1662_v5 = vpack.c.bf16 %v1127_v39, %v1127_v39  ;;  %1456 = vmatpush.bf16.msra.mxu0 %v6615_v26  ;;  %v7535_v26 = vld [vmem:[#allocation5 + $0x114] sm:$0xf0] }
 0x101   : > { %1419 = vmatmul.bf16.gmra.mxu3 %v8629_v49 }
 0x102   : > { %v8736_v43 = vunpack.c.l.b16 %v2366_v42  ;;  %v8742_v9 = vunpack.c.l.b16 %v1662_v5 }
 0x103   : > { %v1175_v45 = vpop.f32.mrf.mxu2  ;;  %v1079_v51 = vpop.f32.mrf.mxu0 }
 0x104   : > { %v1176_v47 = vadd.f32 %v1175_v45, %v8717_v8  ;;  %v1224_v50 = vpop.f32.mrf.mxu3  ;;  %v1080_v55 = vadd.f32 %v1079_v51, %v8710_v3  ;;  %v1128_v56 = vpop.f32.mrf.mxu1  ;;  %v6806_v45 = vld [vmem:[#allocation5 + $0x2b0] sm:$0xf] }
 0x106   : > { %v1225_v59 = vadd.f32 %v1224_v50, %v1176_v47  ;;  %v1129_v6 = vadd.f32 %v1128_v56, %v1080_v55  ;;  %v7589_v47 = vld [vmem:[#allocation5 + $0x2c4] sm:$0xf0]  ;;  %v7538_v50 = vld [vmem:[#allocation5 + $0x134] sm:$0xf]  ;;  %v7592_v55 = vld [vmem:[#allocation5 + $0x2e4] sm:$0xf] }
 0x107   : > { %v6807_v53 = vor.u32 %v7589_v47, %v6806_v45  ;;  %v6832_v56 = vld [vmem:[#allocation5 + $0x2f8] sm:$0xf0]  ;;  %v6619_v58 = vor.u32 %v7538_v50, %v6616_v54  ;;  %v7583_v54 = vld [vmem:[#allocation5 + $0x294] sm:$0xf0]  ;;  %v6760_v47 = vld [vmem:[#allocation5 + $0x268] sm:$0xf0] }
 0x108   : > { %v1663_v7 = vpack.c.bf16 %v1129_v6, %v1129_v6  ;;  %v2367_v12 = vpack.c.bf16 %v1225_v59, %v1225_v59  ;;  %v6835_v59 = vor.u32 %v7592_v55, %v6832_v56  ;;  %v7532_v55 = vld [vmem:[#allocation5 + $0x104] sm:$0xf] }
 0x109   : > { %1505 = vmatpush.bf16.msra.mxu1 %v6807_v53  ;;  %1554 = vmatpush.bf16.msra.mxu2 %v6619_v58  ;;  %v6782_v53 = vld [vmem:[#allocation5 + $0x280] sm:$0xf] }
 0x10a   : > { %v8744_v10 = vunpack.c.l.b16 %v1663_v7  ;;  %v8751_v29 = vunpack.c.l.b16 %v2367_v12  ;;  %1602 = vmatpush.bf16.msra.mxu3 %v6835_v59  ;;  %v6783_v58 = vor.u32 %v7583_v54, %v6782_v53  ;;  %v6592_v59 = vld [vmem:[#allocation5 + $0x118] sm:$0xf0] }
 0x10b   : > { %v1177_v11 = vpop.f32.mrf.mxu2  ;;  %v1082_v15 = vpop.f32.mrf.mxu0 }
 0x10c   : > { %v1178_v13 = vadd.f32 %v1177_v11, %v8717_v8  ;;  %v1226_v14 = vpop.f32.mrf.mxu3  ;;  %v1083_v19 = vadd.f32 %v1082_v15, %v8710_v3  ;;  %v1131_v20 = vpop.f32.mrf.mxu1  ;;  %11337 = vst [vmem:[#allocation20_spill] sm:$0xff] %v8751_v29 }
 0x10d   : > { %1506 = vmatpush.bf16.msra.mxu1 %v6783_v58 }
 0x10e   : > { %v1227_v25 = vadd.f32 %v1226_v14, %v1178_v13  ;;  %v1132_v27 = vadd.f32 %v1131_v20, %v1083_v19  ;;  %1277 = vmatmul.bf16.gmra.mxu0 %v8639_v63  ;;  %v7511_v20 = vld [vmem:[#allocation5 + $0x54] sm:$0xf0] }
 0x10f   : > { %1326 = vmatmul.bf16.gmra.mxu1 %v8641_v0 }
 0x110   : > { %v2368_v30 = vpack.c.bf16 %v1227_v25, %v1227_v25  ;;  %1375 = vmatmul.bf16.gmra.mxu2 %v8639_v63  ;;  %v1664_v4 = vpack.c.bf16 %v1132_v27, %v1132_v27  ;;  %v6590_v25 = vld [vmem:[#allocation5 + $0x100] sm:$0xf] }
 0x111   : > { %1424 = vmatmul.bf16.gmra.mxu3 %v8641_v0 }
 0x112   : > { %v8756_v31 = vunpack.c.l.b16 %v2368_v30  ;;  %v8762_v7 = vunpack.c.l.b16 %v1664_v4  ;;  %v6591_v30 = vor.u32 %v7535_v26, %v6590_v25  ;;  %v7586_v4 = vld [vmem:[#allocation5 + $0x2b4] sm:$0xf] }
 0x113   : > { %v1180_v32 = vpop.f32.mrf.mxu2  ;;  %v1084_v42 = vpop.f32.mrf.mxu0 }
 0x114   : > { %11338 = vst [vmem:[#allocation21_spill] sm:$0xff] %v8756_v31  ;;  %v1181_v34 = vadd.f32 %v1180_v32, %v8717_v8  ;;  %v1229_v39 = vpop.f32.mrf.mxu3  ;;  %v1085_v51 = vadd.f32 %v1084_v42, %v8710_v3  ;;  %v1133_v52 = vpop.f32.mrf.mxu1  ;;  %1457 = vmatpush.bf16.msra.mxu0 %v6591_v30 }
 0x116   : > { %v1230_v57 = vadd.f32 %v1229_v39, %v1181_v34  ;;  %v1134_v5 = vadd.f32 %v1133_v52, %v1085_v51 }
 0x118   : > { %v1665_v6 = vpack.c.bf16 %v1134_v5, %v1134_v5  ;;  %v2369_v13 = vpack.c.bf16 %v1230_v57, %v1230_v57  ;;  %v6808_v5 = vld [vmem:[#allocation5 + $0x2c8] sm:$0xf0] }
 0x11a   : > { %v8764_v11 = vunpack.c.l.b16 %v1665_v6  ;;  %v8771_v34 = vunpack.c.l.b16 %v2369_v13  ;;  %v6811_v13 = vor.u32 %v7586_v4, %v6808_v5 }
 0x11b   : > { %v1182_v12 = vpop.f32.mrf.mxu2  ;;  %v1087_v19 = vpop.f32.mrf.mxu0 }
 0x11c   : > { %v1183_v14 = vadd.f32 %v1182_v12, %v8717_v8  ;;  %v1231_v15 = vpop.f32.mrf.mxu3  ;;  %v1088_v23 = vadd.f32 %v1087_v19, %v8710_v3  ;;  %v1136_v24 = vpop.f32.mrf.mxu1  ;;  %11339 = vst [vmem:[#allocation22_spill] sm:$0xff] %v8771_v34  ;;  %v6595_v12 = vor.u32 %v7532_v55, %v6592_v59  ;;  %1603 = vmatpush.bf16.msra.mxu3 %v6811_v13  ;;  %v6758_v13 = vld [vmem:[#allocation5 + $0x250] sm:$0xf]  ;;  %v1651_v34 = vlaneseq }
 0x11e   : > { %v1232_v27 = vadd.f32 %v1231_v15, %v1183_v14  ;;  %v1137_v32 = vadd.f32 %v1136_v24, %v1088_v23  ;;  %1282 = vmatmul.bf16.gmra.mxu0 %v8651_v17  ;;  %1555 = vmatpush.bf16.msra.mxu2 %v6595_v12 }
 0x11f   : > { %1331 = vmatmul.bf16.gmra.mxu1 %v8653_v18 }
 0x120   : > { %v2370_v39 = vpack.c.bf16 %v1232_v27, %v1232_v27  ;;  %1380 = vmatmul.bf16.gmra.mxu2 %v8651_v17  ;;  %v1666_v14 = vpack.c.bf16 %v1137_v32, %v1137_v32 }
 0x121   : > { %1429 = vmatmul.bf16.gmra.mxu3 %v8653_v18 }
 0x122   : > { %v8776_v42 = vunpack.c.l.b16 %v2370_v39  ;;  %v8782_v23 = vunpack.c.l.b16 %v1666_v14  ;;  %v7577_v14 = vld [vmem:[#allocation5 + $0x264] sm:$0xf0] }
 0x123   : > { %v1185_v45 = vpop.f32.mrf.mxu2  ;;  %v1089_v52 = vpop.f32.mrf.mxu0 }
 0x124   : > { %11340 = vst [vmem:[#allocation23_spill] sm:$0xff] %v8776_v42  ;;  %v1186_v50 = vadd.f32 %v1185_v45, %v8717_v8  ;;  %v1234_v51 = vpop.f32.mrf.mxu3  ;;  %v1090_v56 = vadd.f32 %v1089_v52, %v8710_v3  ;;  %v1138_v57 = vpop.f32.mrf.mxu1  ;;  %v7529_v52 = vld [vmem:[#allocation5 + $0xe4] sm:$0xf0] }
 0x126   : > { %v1235_v6 = vadd.f32 %v1234_v51, %v1186_v50  ;;  %v1139_v15 = vadd.f32 %v1138_v57, %v1090_v56  ;;  %v6566_v51 = vld [vmem:[#allocation5 + $0xd0] sm:$0xf] }
 0x127   : > { %v6567_v54 = vor.u32 %v7529_v52, %v6566_v51 }
 0x128   : > { %v1667_v19 = vpack.c.bf16 %v1139_v15, %v1139_v15  ;;  %v2371_v26 = vpack.c.bf16 %v1235_v6, %v1235_v6  ;;  %v7526_v15 = vld [vmem:[#allocation5 + $0xd4] sm:$0xf] }
 0x129   : > { %1458 = vmatpush.bf16.msra.mxu0 %v6567_v54 }
 0x12a   : > { %v8784_v24 = vunpack.c.l.b16 %v1667_v19  ;;  %v8791_v56 = vunpack.c.l.b16 %v2371_v26  ;;  %v6759_v26 = vor.u32 %v7577_v14, %v6758_v13 }
 0x12b   : > { %v1187_v25 = vpop.f32.mrf.mxu2  ;;  %v1092_v39 = vpop.f32.mrf.mxu0 }
 0x12c   : > { %v1188_v27 = vadd.f32 %v1187_v25, %v8717_v8  ;;  %v1236_v30 = vpop.f32.mrf.mxu3  ;;  %v1093_v32 = vadd.f32 %v1092_v39, %v8710_v3  ;;  %v1141_v50 = vpop.f32.mrf.mxu1  ;;  %11341 = vst [vmem:[#allocation24_spill] sm:$0xff] %v8791_v56  ;;  %v6784_v39 = vld [vmem:[#allocation5 + $0x298] sm:$0xf0]  ;;  %1507 = vmatpush.bf16.msra.mxu1 %v6759_v26  ;;  %v7523_v26 = vld [vmem:[#allocation5 + $0xb4] sm:$0xf0] }
 0x12e   : > { %v1237_v53 = vadd.f32 %v1236_v30, %v1188_v27  ;;  %v1142_v55 = vadd.f32 %v1141_v50, %v1093_v32  ;;  %1287 = vmatmul.bf16.gmra.mxu0 %v8663_v35  ;;  %v6568_v27 = vld [vmem:[#allocation5 + $0xe8] sm:$0xf0]  ;;  %v7580_v30 = vld [vmem:[#allocation5 + $0x284] sm:$0xf] }
 0x12f   : > { %1336 = vmatmul.bf16.gmra.mxu1 %v8665_v38  ;;  %v6571_v50 = vor.u32 %v7526_v15, %v6568_v27  ;;  %v6787_v51 = vor.u32 %v7580_v30, %v6784_v39 }
 0x130   : > { %v2372_v57 = vpack.c.bf16 %v1237_v53, %v1237_v53  ;;  %1385 = vmatmul.bf16.gmra.mxu2 %v8663_v35  ;;  %v1668_v52 = vpack.c.bf16 %v1142_v55, %v1142_v55 }
 0x131   : > { %1434 = vmatmul.bf16.gmra.mxu3 %v8665_v38  ;;  %1556 = vmatpush.bf16.msra.mxu2 %v6571_v50  ;;  %v7571_v50 = vld [vmem:[#allocation5 + $0x234] sm:$0xf0] }
 0x132   : > { %v8796_v58 = vunpack.c.l.b16 %v2372_v57  ;;  %1604 = vmatpush.bf16.msra.mxu3 %v6787_v51  ;;  %v8802_v57 = vunpack.c.l.b16 %v1668_v52 }
 0x133   : > { %v1190_v59 = vpop.f32.mrf.mxu2  ;;  %v1094_v12 = vpop.f32.mrf.mxu0 }
 0x134   : > { %11342 = vst [vmem:[#allocation25_spill] sm:$0xff] %v8796_v58  ;;  %v1191_v5 = vadd.f32 %v1190_v59, %v8717_v8  ;;  %v1239_v6 = vpop.f32.mrf.mxu3  ;;  %v1095_v19 = vadd.f32 %v1094_v12, %v8710_v3  ;;  %v1143_v25 = vpop.f32.mrf.mxu1  ;;  %v7574_v12 = vld [vmem:[#allocation5 + $0x254] sm:$0xf] }
 0x136   : > { %v1240_v32 = vadd.f32 %v1239_v6, %v1191_v5  ;;  %v1144_v53 = vadd.f32 %v1143_v25, %v1095_v19  ;;  %v6763_v6 = vor.u32 %v7574_v12, %v6760_v47  ;;  %v6542_v25 = vld [vmem:[#allocation5 + $0xa0] sm:$0xf]  ;;  %v6736_v12 = vld [vmem:[#allocation5 + $0x238] sm:$0xf0] }
 0x137   : > { %v6543_v30 = vor.u32 %v7523_v26, %v6542_v25 }
 0x138   : > { %v1669_v54 = vpack.c.bf16 %v1144_v53, %v1144_v53  ;;  %v2373_v13 = vpack.c.bf16 %v1240_v32, %v1240_v32  ;;  %1605 = vmatpush.bf16.msra.mxu3 %v6763_v6  ;;  %v6734_v32 = vld [vmem:[#allocation5 + $0x220] sm:$0xf]  ;;  %v6544_v53 = vld [vmem:[#allocation5 + $0xb8] sm:$0xf0] }
 0x139   : > { %v6735_v52 = vor.u32 %v7571_v50, %v6734_v32  ;;  %1459 = vmatpush.bf16.msra.mxu0 %v6543_v30  ;;  %v7565_v30 = vld [vmem:[#allocation5 + $0x204] sm:$0xf0] }
 0x13a   : > { %v8804_v59 = vunpack.c.l.b16 %v1669_v54  ;;  %v8811_v51 = vunpack.c.l.b16 %v2373_v13  ;;  %v7568_v54 = vld [vmem:[#allocation5 + $0x224] sm:$0xf]  ;;  %v6518_v13 = vld [vmem:[#allocation5 + $0x70] sm:$0xf] }
 0x13b   : > { %v1192_v4 = vpop.f32.mrf.mxu2  ;;  %v1097_v5 = vpop.f32.mrf.mxu0  ;;  %1508 = vmatpush.bf16.msra.mxu1 %v6735_v52 }
 0x13c   : > { %v1193_v14 = vadd.f32 %v1192_v4, %v8717_v8  ;;  %v1241_v33 = vpop.f32.mrf.mxu3  ;;  %v1098_v15 = vadd.f32 %v1097_v5, %v8710_v3  ;;  %v1146_v19 = vpop.f32.mrf.mxu1  ;;  %v7520_v4 = vld [vmem:[#allocation5 + $0xa4] sm:$0xf]  ;;  %11343 = vst [vmem:[#allocation26_spill] sm:$0xff] %v8811_v51 }
 0x13e   : > { %v1242_v27 = vadd.f32 %v1241_v33, %v1193_v14  ;;  %v1147_v39 = vadd.f32 %v1146_v19, %v1098_v15  ;;  %1292 = vmatmul.bf16.gmra.mxu0 %v8675_v60  ;;  %v6547_v33 = vor.u32 %v7520_v4, %v6544_v53  ;;  %v6739_v14 = vor.u32 %v7568_v54, %v6736_v12  ;;  %v7517_v15 = vld [vmem:[#allocation5 + $0x84] sm:$0xf0]  ;;  %v6710_v19 = vld [vmem:[#allocation5 + $0x1f0] sm:$0xf]  ;;  %v7514_v4 = vld [vmem:[#allocation5 + $0x74] sm:$0xf] }
 0x13f   : > { %1341 = vmatmul.bf16.gmra.mxu1 %v8677_v61  ;;  %v6519_v50 = vor.u32 %v7517_v15, %v6518_v13  ;;  %v6520_v53 = vld [vmem:[#allocation5 + $0x88] sm:$0xf0]  ;;  %v6711_v54 = vor.u32 %v7565_v30, %v6710_v19  ;;  %v6686_v13 = vld [vmem:[#allocation5 + $0x1c0] sm:$0xf] }
 0x140   : > { %v2374_v47 = vpack.c.bf16 %v1242_v27, %v1242_v27  ;;  %1390 = vmatmul.bf16.gmra.mxu2 %v8675_v60  ;;  %1606 = vmatpush.bf16.msra.mxu3 %v6739_v14  ;;  %v6523_v12 = vor.u32 %v7514_v4, %v6520_v53  ;;  %v6712_v14 = vld [vmem:[#allocation5 + $0x208] sm:$0xf0]  ;;  %v1670_v45 = vpack.c.bf16 %v1147_v39, %v1147_v39  ;;  %v7556_v4 = vld [vmem:[#allocation5 + $0x1c4] sm:$0xf]  ;;  %v6688_v53 = vld [vmem:[#allocation5 + $0x1d8] sm:$0xf0] }
 0x141   : > { %1439 = vmatmul.bf16.gmra.mxu3 %v8677_v61  ;;  %1557 = vmatpush.bf16.msra.mxu2 %v6547_v33  ;;  %v7562_v33 = vld [vmem:[#allocation5 + $0x1f4] sm:$0xf]  ;;  %v6687_v19 = vor.u32 %v7559_v16, %v6686_v13 }
 0x142   : > { %v8816_v5 = vunpack.c.l.b16 %v2374_v47  ;;  %1460 = vmatpush.bf16.msra.mxu0 %v6519_v50  ;;  %v6715_v55 = vor.u32 %v7562_v33, %v6712_v14  ;;  %1509 = vmatpush.bf16.msra.mxu1 %v6711_v54  ;;  %v7502_v33 = vld [vmem:[#allocation5 + $0x14] sm:$0xf]  ;;  %v6472_v14 = vld [vmem:[#allocation5 + $0x28] sm:$0xf0] }
 0x143   : > { %v1195_v6 = vpop.f32.mrf.mxu2  ;;  %v1099_v32 = vpop.f32.mrf.mxu0 }
 0x144   : > { %11344 = vst [vmem:[#allocation27_spill] sm:$0xff] %v8816_v5  ;;  %v1196_v26 = vadd.f32 %v1195_v6, %v8717_v8  ;;  %v1244_v27 = vpop.f32.mrf.mxu3  ;;  %v1100_v47 = vadd.f32 %v1099_v32, %v8710_v3  ;;  %v1148_v52 = vpop.f32.mrf.mxu1  ;;  %v6494_v6 = vld [vmem:[#allocation5 + $0x40] sm:$0xf]  ;;  %1607 = vmatpush.bf16.msra.mxu3 %v6715_v55  ;;  %v6496_v32 = vld [vmem:[#allocation5 + $0x58] sm:$0xf0] }
 0x145   : > { %1558 = vmatpush.bf16.msra.mxu2 %v6523_v12  ;;  %v6495_v15 = vor.u32 %v7511_v20, %v6494_v6  ;;  %v6499_v30 = vor.u32 %v7508_v28, %v6496_v32  ;;  %v7505_v55 = vld [vmem:[#allocation5 + $0x24] sm:$0xf0]  ;;  %v6662_v20 = vld [vmem:[#allocation5 + $0x190] sm:$0xf]  ;;  %v6664_v32 = vld [vmem:[#allocation5 + $0x1a8] sm:$0xf0] }
 0x146   : > { %v1245_v46 = vadd.f32 %v1244_v27, %v1196_v26  ;;  %v1149_v25 = vadd.f32 %v1148_v52, %v1100_v47  ;;  %v6691_v26 = vor.u32 %v7556_v4, %v6688_v53  ;;  %v8822_v27 = vunpack.c.l.b16 %v1670_v45  ;;  %1510 = vmatpush.bf16.msra.mxu1 %v6687_v19  ;;  %v6470_v47 = vld [vmem:[#allocation5 + $0x10] sm:$0xf]  ;;  %v7553_v12 = vld [vmem:[#allocation5 + $0x1a4] sm:$0xf0] }
 0x147   : > { %1461 = vmatpush.bf16.msra.mxu0 %v6495_v15  ;;  %v6471_v28 = vor.u32 %v7505_v55, %v6470_v47  ;;  %v6663_v13 = vor.u32 %v7553_v12, %v6662_v20  ;;  %v7550_v15 = vld [vmem:[#allocation5 + $0x194] sm:$0xf]  ;;  %v8867_v55 = vperm.slane %v8707_v2, 2 }
 0x148   : > { %v1671_v56 = vpack.c.bf16 %v1149_v25, %v1149_v25  ;;  %v2375_v52 = vpack.c.bf16 %v1245_v46, %v1245_v46  ;;  %1608 = vmatpush.bf16.msra.mxu3 %v6691_v26  ;;  %v6475_v46 = vor.u32 %v7502_v33, %v6472_v14 }
 0x149   : > { %1559 = vmatpush.bf16.msra.mxu2 %v6499_v30  ;;  %v6667_v30 = vor.u32 %v7550_v15, %v6664_v32 }
 0x14a   : > { %v8824_v39 = vunpack.c.l.b16 %v1671_v56  ;;  %1511 = vmatpush.bf16.msra.mxu1 %v6663_v13  ;;  %v8831_v53 = vunpack.c.l.b16 %v2375_v52 }
 0x14b   : > { %v1197_v50 = vpop.f32.mrf.mxu2  ;;  %v1102_v16 = vpop.f32.mrf.mxu0  ;;  %1462 = vmatpush.bf16.msra.mxu0 %v6471_v28 }
 0x14c   : > { %v1198_v54 = vadd.f32 %v1197_v50, %v8717_v8  ;;  %v1246_v25 = vpop.f32.mrf.mxu3  ;;  %v1103_v56 = vadd.f32 %v1102_v16, %v8710_v3  ;;  %v1151_v6 = vpop.f32.mrf.mxu1  ;;  %11345 = vst [vmem:[#allocation28_spill] sm:$0xff] %v8831_v53  ;;  %1609 = vmatpush.bf16.msra.mxu3 %v6667_v30 }
 0x14d   : > { %1560 = vmatpush.bf16.msra.mxu2 %v6475_v46 }
 0x14e   : > { %v1247_v19 = vadd.f32 %v1246_v25, %v1198_v54  ;;  %v1152_v4 = vadd.f32 %v1151_v6, %v1103_v56  ;;  %1297 = vmatmul.bf16.gmra.mxu0 %v8687_v40 }
 0x14f   : > { %1346 = vmatmul.bf16.gmra.mxu1 %v8689_v44 }
 0x150   : > { %v2376_v26 = vpack.c.bf16 %v1247_v19, %v1247_v19  ;;  %1395 = vmatmul.bf16.gmra.mxu2 %v8687_v40  ;;  %v1672_v12 = vpack.c.bf16 %v1152_v4, %v1152_v4 }
 0x151   : > { %1444 = vmatmul.bf16.gmra.mxu3 %v8689_v44 }
 0x152   : > { %v8836_v50 = vunpack.c.l.b16 %v2376_v26  ;;  %v8842_v56 = vunpack.c.l.b16 %v1672_v12 }
 0x153   : > { %v1200_v47 = vpop.f32.mrf.mxu2  ;;  %v1104_v52 = vpop.f32.mrf.mxu0 }
 0x154   : > { %11346 = vst [vmem:[#allocation29_spill] sm:$0xff] %v8836_v50  ;;  %v1201_v20 = vadd.f32 %v1200_v47, %v8717_v8  ;;  %v1249_v54 = vpop.f32.mrf.mxu3  ;;  %v1105_v25 = vadd.f32 %v1104_v52, %v8710_v3  ;;  %v1153_v16 = vpop.f32.mrf.mxu1 }
 0x156   : > { %v1250_v28 = vadd.f32 %v1249_v54, %v1201_v20  ;;  %v1154_v33 = vadd.f32 %v1153_v16, %v1105_v25 }
 0x158   : > { %v1673_v14 = vpack.c.bf16 %v1154_v33, %v1154_v33  ;;  %v2377_v15 = vpack.c.bf16 %v1250_v28, %v1250_v28 }
 0x15a   : > { %v8844_v6 = vunpack.c.l.b16 %v1673_v14  ;;  %v8851_v54 = vunpack.c.l.b16 %v2377_v15 }
 0x15b   : > { %v1202_v13 = vpop.f32.mrf.mxu2  ;;  %v1107_v46 = vpop.f32.mrf.mxu0 }
 0x15c   : > { %v1203_v32 = vadd.f32 %v1202_v13, %v8717_v8  ;;  %v1251_v19 = vpop.f32.mrf.mxu3  ;;  %v1108_v26 = vadd.f32 %v1107_v46, %v8710_v3  ;;  %v1156_v47 = vpop.f32.mrf.mxu1  ;;  %11347 = vst [vmem:[#allocation30_spill] sm:$0xff] %v8851_v54 }
 0x15e   : > { %v1252_v20 = vadd.f32 %v1251_v19, %v1203_v32  ;;  %v1157_v4 = vadd.f32 %v1156_v47, %v1108_v26  ;;  %1302 = vmatmul.bf16.gmra.mxu0 %v8699_v62 }
 0x15f   : > { %1351 = vmatmul.bf16.gmra.mxu1 %v8701_v1 }
 0x160   : > { %v2378_v52 = vpack.c.bf16 %v1252_v20, %v1252_v20  ;;  %1400 = vmatmul.bf16.gmra.mxu2 %v8699_v62  ;;  %v1674_v19 = vpack.c.bf16 %v1157_v4, %v1157_v4 }
 0x161   : > { %1449 = vmatmul.bf16.gmra.mxu3 %v8701_v1 }
 0x162   : > { %v8856_v25 = vunpack.c.l.b16 %v2378_v52  ;;  %v8862_v47 = vunpack.c.l.b16 %v1674_v19 }
 0x163   : > { %v1205_v16 = vpop.f32.mrf.mxu2  ;;  %v1109_v14 = vpop.f32.mrf.mxu0 }
 0x164   : > { %11348 = vst [vmem:[#allocation31_spill] sm:$0xff] %v8856_v25  ;;  %v1206_v12 = vadd.f32 %v1205_v16, %v8717_v8  ;;  %v1254_v33 = vpop.f32.mrf.mxu3  ;;  %v1110_v13 = vadd.f32 %v1109_v14, %v8710_v3  ;;  %v1158_v15 = vpop.f32.mrf.mxu1 }
 0x166   : > { %v1255_v32 = vadd.f32 %v1254_v33, %v1206_v12  ;;  %v1159_v46 = vadd.f32 %v1158_v15, %v1110_v13 }
 0x168   : > { %v1675_v26 = vpack.c.bf16 %v1159_v46, %v1159_v46  ;;  %v2379_v28 = vpack.c.bf16 %v1255_v32, %v1255_v32 }
 0x16a   : > { %v8864_v20 = vunpack.c.l.b16 %v1675_v26  ;;  %v8874_v14 = vunpack.c.l.b16 %v2379_v28 }
 0x16b   : > { %v1207_v52 = vpop.f32.mrf.mxu2  ;;  %v1268_v45 = vpop.f32.mrf.mxu0 }
 0x16c   : > { %v1208_v16 = vadd.f32 %v1207_v52, %v8717_v8  ;;  %v1256_v30 = vpop.f32.mrf.mxu3  ;;  %v1317_v12 = vpop.f32.mrf.mxu1  ;;  %v1269_v33 = vadd.f32 %v1268_v45, %v8867_v55  ;;  %11349 = vst [vmem:[#allocation32_spill] sm:$0xff] %v8874_v14  ;;  %v8879_v8 = vperm.slane %v8707_v2, 3 }
 0x16e   : > { %v1257_v4 = vadd.f32 %v1256_v30, %v1208_v16  ;;  %1463 = vmatmul.bf16.vlgmr.msra.gmra.mxu0 %v8615_v36  ;;  %v1318_v32 = vadd.f32 %v1317_v12, %v1269_v33 }
 0x16f   : > { %1512 = vmatmul.bf16.vlgmr.msra.gmra.mxu1 %v8617_v37 }
 0x170   : > { %v2380_v13 = vpack.c.bf16 %v1257_v4, %v1257_v4  ;;  %1561 = vmatmul.bf16.vlgmr.msra.gmra.mxu2 %v8615_v36  ;;  %v1676_v16 = vpack.c.bf16 %v1318_v32, %v1318_v32 }
 0x171   : > { %1610 = vmatmul.bf16.vlgmr.msra.gmra.mxu3 %v8617_v37 }
 0x172   : > { %v8882_v15 = vunpack.c.l.b16 %v2380_v13  ;;  %v1716_v3 = vunpack.c.l.b16 %v1676_v16 }
 0x173   : > { %v1366_v30 = vpop.f32.mrf.mxu2  ;;  %v1270_v46 = vpop.f32.mrf.mxu0 }
 0x174   : > { %11350 = vst [vmem:[#allocation33_spill] sm:$0xff] %v8882_v15  ;;  %v1367_v28 = vadd.f32 %v1366_v30, %v8879_v8  ;;  %v1415_v19 = vpop.f32.mrf.mxu3  ;;  %v1271_v26 = vadd.f32 %v1270_v46, %v8867_v55  ;;  %v1319_v52 = vpop.f32.mrf.mxu1 }
 0x176   : > { %v1416_v36 = vadd.f32 %v1415_v19, %v1367_v28  ;;  %v1320_v2 = vadd.f32 %v1319_v52, %v1271_v26 }
 0x178   : > { %v1677_v4 = vpack.c.bf16 %v1320_v2, %v1320_v2  ;;  %v2381_v54 = vpack.c.bf16 %v1416_v36, %v1416_v36 }
 0x17a   : > { %v1717_v37 = vunpack.c.l.b16 %v1677_v4  ;;  %v8891_v46 = vunpack.c.l.b16 %v2381_v54 }
 0x17b   : > { %v1368_v13 = vpop.f32.mrf.mxu2  ;;  %v1273_v25 = vpop.f32.mrf.mxu0 }
 0x17c   : > { %v1369_v12 = vadd.f32 %v1368_v13, %v8879_v8  ;;  %v1417_v33 = vpop.f32.mrf.mxu3  ;;  %v1718_v45 = vpack.c.b16 %v1717_v37, %v1716_v3  ;;  %v1322_v14 = vpop.f32.mrf.mxu1  ;;  %v1274_v15 = vadd.f32 %v1273_v25, %v8867_v55 }
 0x17e   : > { %v1418_v30 = vadd.f32 %v1417_v33, %v1369_v12  ;;  %1468 = vmatmul.bf16.gmra.mxu0 %v8627_v48  ;;  %v1323_v19 = vadd.f32 %v1322_v14, %v1274_v15 }
 0x17f   : > { %1517 = vmatmul.bf16.gmra.mxu1 %v8629_v49  ;;  %1727 = vmatpush.bf16.xpose.msrb.mxu0 %v1718_v45 }
 0x180   : > { %v2382_v32 = vpack.c.bf16 %v1418_v30, %v1418_v30  ;;  %1566 = vmatmul.bf16.gmra.mxu2 %v8627_v48  ;;  %v1678_v4 = vpack.c.bf16 %v1323_v19, %v1323_v19 }
 0x181   : > { %1615 = vmatmul.bf16.gmra.mxu3 %v8629_v49 }
 0x182   : > { %v8896_v28 = vunpack.c.l.b16 %v2382_v32  ;;  %v1742_v49 = vunpack.c.l.b16 %v1678_v4 }
 0x183   : > { %v1371_v3 = vpop.f32.mrf.mxu2  ;;  %v1275_v54 = vpop.f32.mrf.mxu0 }
 0x184   : > { %v1372_v25 = vadd.f32 %v1371_v3, %v8879_v8  ;;  %v1420_v52 = vpop.f32.mrf.mxu3  ;;  %v1276_v36 = vadd.f32 %v1275_v54, %v8867_v55  ;;  %v1324_v16 = vpop.f32.mrf.mxu1 }
 0x186   : > { %v1421_v2 = vadd.f32 %v1420_v52, %v1372_v25  ;;  %v1325_v48 = vadd.f32 %v1324_v16, %v1276_v36 }
 0x188   : > { %v1679_v37 = vpack.c.bf16 %v1325_v48, %v1325_v48  ;;  %v2383_v12 = vpack.c.bf16 %v1421_v2, %v1421_v2 }
 0x18a   : > { %v1743_v45 = vunpack.c.l.b16 %v1679_v37  ;;  %v8905_v25 = vunpack.c.l.b16 %v2383_v12 }
 0x18b   : > { %v1373_v13 = vpop.f32.mrf.mxu2  ;;  %v1278_v33 = vpop.f32.mrf.mxu0 }
 0x18c   : > { %v1374_v14 = vadd.f32 %v1373_v13, %v8879_v8  ;;  %v1422_v15 = vpop.f32.mrf.mxu3  ;;  %v1744_v30 = vpack.c.b16 %v1743_v45, %v1742_v49  ;;  %v1327_v32 = vpop.f32.mrf.mxu1  ;;  %v1279_v26 = vadd.f32 %v1278_v33, %v8867_v55 }
 0x18e   : > { %v1423_v3 = vadd.f32 %v1422_v15, %v1374_v14  ;;  %1473 = vmatmul.bf16.gmra.mxu0 %v8639_v63  ;;  %1753 = vmatpush.bf16.xpose.msrb.mxu1 %v1744_v30  ;;  %v1328_v54 = vadd.f32 %v1327_v32, %v1279_v26 }
 0x18f   : > { %1522 = vmatmul.bf16.gmra.mxu1 %v8641_v0 }
 0x190   : > { %v2384_v19 = vpack.c.bf16 %v1423_v3, %v1423_v3  ;;  %1571 = vmatmul.bf16.gmra.mxu2 %v8639_v63  ;;  %v1680_v13 = vpack.c.bf16 %v1328_v54, %v1328_v54 }
 0x191   : > { %1620 = vmatmul.bf16.gmra.mxu3 %v8641_v0 }
 0x192   : > { %v8910_v52 = vunpack.c.l.b16 %v2384_v19  ;;  %v1768_v14 = vunpack.c.l.b16 %v1680_v13 }
 0x193   : > { %v1376_v36 = vpop.f32.mrf.mxu2  ;;  %v1280_v48 = vpop.f32.mrf.mxu0 }
 0x194   : > { %v1377_v2 = vadd.f32 %v1376_v36, %v8879_v8  ;;  %v1425_v4 = vpop.f32.mrf.mxu3  ;;  %v1281_v37 = vadd.f32 %v1280_v48, %v8867_v55  ;;  %v1329_v49 = vpop.f32.mrf.mxu1 }
 0x196   : > { %v1426_v45 = vadd.f32 %v1425_v4, %v1377_v2  ;;  %v1330_v12 = vadd.f32 %v1329_v49, %v1281_v37 }
 0x198   : > { %v1681_v63 = vpack.c.bf16 %v1330_v12, %v1330_v12  ;;  %v2385_v33 = vpack.c.bf16 %v1426_v45, %v1426_v45 }
 0x19a   : > { %v1769_v0 = vunpack.c.l.b16 %v1681_v63  ;;  %v8919_v2 = vunpack.c.l.b16 %v2385_v33 }
 0x19b   : > { %v1378_v15 = vpop.f32.mrf.mxu2  ;;  %v1283_v32 = vpop.f32.mrf.mxu0 }
 0x19c   : > { %v1379_v26 = vadd.f32 %v1378_v15, %v8879_v8  ;;  %v1427_v30 = vpop.f32.mrf.mxu3  ;;  %v1770_v3 = vpack.c.b16 %v1769_v0, %v1768_v14  ;;  %v1332_v19 = vpop.f32.mrf.mxu1  ;;  %v1284_v16 = vadd.f32 %v1283_v32, %v8867_v55 }
 0x19e   : > { %v1428_v36 = vadd.f32 %v1427_v30, %v1379_v26  ;;  %1478 = vmatmul.bf16.gmra.mxu0 %v8651_v17  ;;  %1779 = vmatpush.bf16.xpose.msrb.mxu2 %v1770_v3  ;;  %v1333_v48 = vadd.f32 %v1332_v19, %v1284_v16 }
 0x19f   : > { %1527 = vmatmul.bf16.gmra.mxu1 %v8653_v18 }
 0x1a0   : > { %v2386_v54 = vpack.c.bf16 %v1428_v36, %v1428_v36  ;;  %1576 = vmatmul.bf16.gmra.mxu2 %v8651_v17  ;;  %v1682_v15 = vpack.c.bf16 %v1333_v48, %v1333_v48 }
 0x1a1   : > { %1625 = vmatmul.bf16.gmra.mxu3 %v8653_v18 }
 0x1a2   : > { %v8924_v4 = vunpack.c.l.b16 %v2386_v54  ;;  %v1794_v26 = vunpack.c.l.b16 %v1682_v15 }
 0x1a3   : > { %v1381_v37 = vpop.f32.mrf.mxu2  ;;  %v1285_v12 = vpop.f32.mrf.mxu0 }
 0x1a4   : > { %v1382_v45 = vadd.f32 %v1381_v37, %v8879_v8  ;;  %v1430_v13 = vpop.f32.mrf.mxu3  ;;  %v1286_v63 = vadd.f32 %v1285_v12, %v8867_v55  ;;  %v1334_v14 = vpop.f32.mrf.mxu1 }
 0x1a6   : > { %v1431_v0 = vadd.f32 %v1430_v13, %v1382_v45  ;;  %v1335_v33 = vadd.f32 %v1334_v14, %v1286_v63 }
 0x1a8   : > { %v1683_v17 = vpack.c.bf16 %v1335_v33, %v1335_v33  ;;  %v2387_v32 = vpack.c.bf16 %v1431_v0, %v1431_v0 }
 0x1aa   : > { %v1795_v18 = vunpack.c.l.b16 %v1683_v17  ;;  %v8933_v45 = vunpack.c.l.b16 %v2387_v32 }
 0x1ab   : > { %v1383_v30 = vpop.f32.mrf.mxu2  ;;  %v1288_v19 = vpop.f32.mrf.mxu0 }
 0x1ac   : > { %v1384_v16 = vadd.f32 %v1383_v30, %v8879_v8  ;;  %v1432_v3 = vpop.f32.mrf.mxu3  ;;  %v1796_v36 = vpack.c.b16 %v1795_v18, %v1794_v26  ;;  %v1337_v54 = vpop.f32.mrf.mxu1  ;;  %v1289_v49 = vadd.f32 %v1288_v19, %v8867_v55 }
 0x1ae   : > { %v1433_v37 = vadd.f32 %v1432_v3, %v1384_v16  ;;  %1483 = vmatmul.bf16.gmra.mxu0 %v8663_v35  ;;  %1805 = vmatpush.bf16.xpose.msrb.mxu3 %v1796_v36  ;;  %v1338_v12 = vadd.f32 %v1337_v54, %v1289_v49 }
 0x1af   : > { %1532 = vmatmul.bf16.gmra.mxu1 %v8665_v38 }
 0x1b0   : > { %v2388_v48 = vpack.c.bf16 %v1433_v37, %v1433_v37  ;;  %1581 = vmatmul.bf16.gmra.mxu2 %v8663_v35  ;;  %v1684_v30 = vpack.c.bf16 %v1338_v12, %v1338_v12 }
 0x1b1   : > { %1630 = vmatmul.bf16.gmra.mxu3 %v8665_v38 }
 0x1b2   : > { %v8938_v13 = vunpack.c.l.b16 %v2388_v48  ;;  %v1820_v16 = vunpack.c.l.b16 %v1684_v30 }
 0x1b3   : > { %v1386_v63 = vpop.f32.mrf.mxu2  ;;  %v1290_v33 = vpop.f32.mrf.mxu0 }
 0x1b4   : > { %v1387_v0 = vadd.f32 %v1386_v63, %v8879_v8  ;;  %v1435_v15 = vpop.f32.mrf.mxu3  ;;  %v1291_v17 = vadd.f32 %v1290_v33, %v8867_v55  ;;  %v1339_v26 = vpop.f32.mrf.mxu1 }
 0x1b6   : > { %v1436_v18 = vadd.f32 %v1435_v15, %v1387_v0  ;;  %v1340_v32 = vadd.f32 %v1339_v26, %v1291_v17 }
 0x1b8   : > { %v1685_v35 = vpack.c.bf16 %v1340_v32, %v1340_v32  ;;  %v2389_v19 = vpack.c.bf16 %v1436_v18, %v1436_v18 }
 0x1ba   : > { %v1821_v38 = vunpack.c.l.b16 %v1685_v35  ;;  %v8947_v33 = vunpack.c.l.b16 %v2389_v19 }
 0x1bb   : > { %v1388_v3 = vpop.f32.mrf.mxu2  ;;  %v1293_v54 = vpop.f32.mrf.mxu0 }
 0x1bc   : > { %v1389_v49 = vadd.f32 %v1388_v3, %v8879_v8  ;;  %v1437_v36 = vpop.f32.mrf.mxu3  ;;  %v1822_v37 = vpack.c.b16 %v1821_v38, %v1820_v16  ;;  %v1342_v48 = vpop.f32.mrf.mxu1  ;;  %v1294_v14 = vadd.f32 %v1293_v54, %v8867_v55 }
 0x1be   : > { %v1438_v63 = vadd.f32 %v1437_v36, %v1389_v49  ;;  %1488 = vmatmul.bf16.gmra.mxu0 %v8675_v60  ;;  %v1343_v15 = vadd.f32 %v1342_v48, %v1294_v14 }
 0x1bf   : > { %1537 = vmatmul.bf16.gmra.mxu1 %v8677_v61  ;;  %1831 = vmatpush.bf16.xpose.msra.mxu0 %v1822_v37 }
 0x1c0   : > { %v2390_v12 = vpack.c.bf16 %v1438_v63, %v1438_v63  ;;  %1586 = vmatmul.bf16.gmra.mxu2 %v8675_v60  ;;  %v1686_v3 = vpack.c.bf16 %v1343_v15, %v1343_v15 }
 0x1c1   : > { %1635 = vmatmul.bf16.gmra.mxu3 %v8677_v61 }
 0x1c2   : > { %v8952_v0 = vunpack.c.l.b16 %v2390_v12  ;;  %v1846_v61 = vunpack.c.l.b16 %v1686_v3 }
 0x1c3   : > { %v1391_v17 = vpop.f32.mrf.mxu2  ;;  %v1295_v32 = vpop.f32.mrf.mxu0 }
 0x1c4   : > { %v1392_v18 = vadd.f32 %v1391_v17, %v8879_v8  ;;  %v1440_v30 = vpop.f32.mrf.mxu3  ;;  %v1296_v35 = vadd.f32 %v1295_v32, %v8867_v55  ;;  %v1344_v16 = vpop.f32.mrf.mxu1 }
 0x1c6   : > { %v1441_v38 = vadd.f32 %v1440_v30, %v1392_v18  ;;  %v1345_v60 = vadd.f32 %v1344_v16, %v1296_v35 }
 0x1c8   : > { %v1687_v19 = vpack.c.bf16 %v1345_v60, %v1345_v60  ;;  %v2391_v54 = vpack.c.bf16 %v1441_v38, %v1441_v38 }
 0x1ca   : > { %v1847_v49 = vunpack.c.l.b16 %v1687_v19  ;;  %v8961_v18 = vunpack.c.l.b16 %v2391_v54 }
 0x1cb   : > { %v1393_v36 = vpop.f32.mrf.mxu2  ;;  %v1298_v48 = vpop.f32.mrf.mxu0 }
 0x1cc   : > { %v1394_v14 = vadd.f32 %v1393_v36, %v8879_v8  ;;  %v1442_v37 = vpop.f32.mrf.mxu3  ;;  %v1848_v63 = vpack.c.b16 %v1847_v49, %v1846_v61  ;;  %v1347_v12 = vpop.f32.mrf.mxu1  ;;  %v1299_v26 = vadd.f32 %v1298_v48, %v8867_v55 }
 0x1ce   : > { %v1443_v17 = vadd.f32 %v1442_v37, %v1394_v14  ;;  %1493 = vmatmul.bf16.gmra.mxu0 %v8687_v40  ;;  %1857 = vmatpush.bf16.xpose.msra.mxu1 %v1848_v63  ;;  %v1348_v32 = vadd.f32 %v1347_v12, %v1299_v26 }
 0x1cf   : > { %1542 = vmatmul.bf16.gmra.mxu1 %v8689_v44 }
 0x1d0   : > { %v2392_v15 = vpack.c.bf16 %v1443_v17, %v1443_v17  ;;  %1591 = vmatmul.bf16.gmra.mxu2 %v8687_v40  ;;  %v1688_v36 = vpack.c.bf16 %v1348_v32, %v1348_v32 }
 0x1d1   : > { %1640 = vmatmul.bf16.gmra.mxu3 %v8689_v44 }
 0x1d2   : > { %v8966_v30 = vunpack.c.l.b16 %v2392_v15  ;;  %v1872_v44 = vunpack.c.l.b16 %v1688_v36 }
 0x1d3   : > { %v1396_v35 = vpop.f32.mrf.mxu2  ;;  %v1300_v60 = vpop.f32.mrf.mxu0 }
 0x1d4   : > { %v1397_v38 = vadd.f32 %v1396_v35, %v8879_v8  ;;  %v1445_v3 = vpop.f32.mrf.mxu3  ;;  %v1301_v19 = vadd.f32 %v1300_v60, %v8867_v55  ;;  %v1349_v61 = vpop.f32.mrf.mxu1 }
 0x1d6   : > { %v8972_v49 = vadd.f32 %v1445_v3, %v1397_v38  ;;  %v1350_v40 = vadd.f32 %v1349_v61, %v1301_v19 }
 0x1d8   : > { %v1689_v54 = vpack.c.bf16 %v1350_v40, %v1350_v40 }
 0x1da   : > { %v1873_v14 = vunpack.c.l.b16 %v1689_v54 }
 0x1db   : > { %v8974_v37 = vpop.f32.mrf.mxu2  ;;  %v1303_v48 = vpop.f32.mrf.mxu0 }
 0x1dc   : > { %v8976_v26 = vpop.f32.mrf.mxu3  ;;  %v1874_v63 = vpack.c.b16 %v1873_v14, %v1872_v44  ;;  %v1352_v12 = vpop.f32.mrf.mxu1  ;;  %v1304_v17 = vadd.f32 %v1303_v48, %v8867_v55 }
 0x1de   : > { %1498 = vmatmul.bf16.gmra.mxu0 %v8699_v62  ;;  %1883 = vmatpush.bf16.xpose.msra.mxu2 %v1874_v63  ;;  %v1353_v15 = vadd.f32 %v1352_v12, %v1304_v17 }
 0x1df   : > { %1547 = vmatmul.bf16.gmra.mxu1 %v8701_v1 }
 0x1e0   : > { %1596 = vmatmul.bf16.gmra.mxu2 %v8699_v62  ;;  %v1690_v36 = vpack.c.bf16 %v1353_v15, %v1353_v15  ;;  %v8069_v62 = vld [vmem:[#allocation7] sm:$0x3f]  ;;  %v11353_v15 = vpack.c.b16 %v8744_v10, %v8742_v9 }
 0x1e1   : > { %1645 = vmatmul.bf16.gmra.mxu3 %v8701_v1  ;;  %v8989_v1 = vperm.slane %v8069_v62, 4 }
 0x1e2   : > { %v1898_v44 = vunpack.c.l.b16 %v1690_v36 }
 0x1e3   : > { %v1401_v32 = vpop.f32.mrf.mxu2  ;;  %v1305_v3 = vpop.f32.mrf.mxu0 }
 0x1e4   : > { %v1402_v35 = vadd.f32 %v1401_v32, %v8879_v8  ;;  %v1450_v38 = vpop.f32.mrf.mxu3  ;;  %v1306_v60 = vadd.f32 %v1305_v3, %v8867_v55  ;;  %v1354_v19 = vpop.f32.mrf.mxu1  ;;  %v9003_v3 = vperm.slane %v8069_v62, 5 }
 0x1e6   : > { %v8985_v61 = vadd.f32 %v1450_v38, %v1402_v35  ;;  %v1355_v40 = vadd.f32 %v1354_v19, %v1306_v60  ;;  %v11352_v35 = vpack.c.b16 %v8724_v22, %v8722_v21  ;;  %v11354_v38 = vpack.c.b16 %v8764_v11, %v8762_v7 }
 0x1e7   : > { %v11355_v60 = vpack.c.b16 %v8784_v24, %v8782_v23 }
 0x1e8   : > { %11351 = vst [vmem:[#allocation34_spill] sm:$0xff] %v8985_v61  ;;  %v1691_v54 = vpack.c.bf16 %v1355_v40, %v1355_v40 }
 0x1ea   : > { %v1899_v14 = vunpack.c.l.b16 %v1691_v54 }
 0x1eb   : > { %v8987_v48 = vpop.f32.mrf.mxu2  ;;  %v1464_v12 = vpop.f32.mrf.mxu0 }
 0x1ec   : > { %v8991_v63 = vpop.f32.mrf.mxu3  ;;  %v1900_v17 = vpack.c.b16 %v1899_v14, %v1898_v44  ;;  %v1513_v32 = vpop.f32.mrf.mxu1  ;;  %v1465_v55 = vadd.f32 %v1464_v12, %v8989_v1 }
 0x1ee   : > { %1728 = vmatmul.bf16.vlgmr.msrb.gmra.mxu0 %v11352_v35  ;;  %1909 = vmatpush.bf16.xpose.msra.mxu3 %v1900_v17  ;;  %v1514_v19 = vadd.f32 %v1513_v32, %v1465_v55  ;;  %v11356_v35 = vpack.c.b16 %v8804_v59, %v8802_v57 }
 0x1ef   : > { %1754 = vmatmul.bf16.vlgmr.msrb.gmra.mxu1 %v11353_v15  ;;  %v11357_v15 = vpack.c.b16 %v8824_v39, %v8822_v27 }
 0x1f0   : > { %1780 = vmatmul.bf16.vlgmr.msrb.gmra.mxu2 %v11354_v38  ;;  %v1692_v44 = vpack.c.bf16 %v1514_v19, %v1514_v19  ;;  %v11358_v38 = vpack.c.b16 %v8844_v6, %v8842_v56 }
 0x1f1   : > { %1806 = vmatmul.bf16.vlgmr.msrb.gmra.mxu3 %v11355_v60  ;;  %v11359_v60 = vpack.c.b16 %v8864_v20, %v8862_v47 }
 0x1f2   : > { %v2148_v14 = vunpack.c.l.b16 %v1692_v44 }
 0x1f3   : > { %v1562_v36 = vpop.f32.mrf.mxu2  ;;  %v1466_v40 = vpop.f32.mrf.mxu0 }
 0x1f4   : > { %v1563_v21 = vadd.f32 %v1562_v36, %v9003_v3  ;;  %v1611_v22 = vpop.f32.mrf.mxu3  ;;  %v1467_v54 = vadd.f32 %v1466_v40, %v8989_v1  ;;  %v1515_v9 = vpop.f32.mrf.mxu1 }
 0x1f6   : > { %v9010_v10 = vadd.f32 %v1611_v22, %v1563_v21  ;;  %v1516_v7 = vadd.f32 %v1515_v9, %v1467_v54 }
 0x1f8   : > { %v1693_v11 = vpack.c.bf16 %v1516_v7, %v1516_v7 }
 0x1fa   : > { %v2149_v62 = vunpack.c.l.b16 %v1693_v11 }
 0x1fb   : > { %v9012_v12 = vpop.f32.mrf.mxu2  ;;  %v1469_v24 = vpop.f32.mrf.mxu0 }
 0x1fc   : > { %v9014_v23 = vpop.f32.mrf.mxu3  ;;  %v2150_v17 = vpack.c.b16 %v2149_v62, %v2148_v14  ;;  %v1518_v32 = vpop.f32.mrf.mxu1  ;;  %v1470_v55 = vadd.f32 %v1469_v24, %v8989_v1 }
 0x1fe   : > { %1832 = vmatmul.bf16.vlgmr.msra.gmra.mxu0 %v11356_v35  ;;  %v1519_v19 = vadd.f32 %v1518_v32, %v1470_v55 }
 0x1ff   : > { %1858 = vmatmul.bf16.vlgmr.msra.gmra.mxu1 %v11357_v15  ;;  %2162 = vmatpush.bf16.msrb.mxu0 %v2150_v17 }
 0x200   : > { %1884 = vmatmul.bf16.vlgmr.msra.gmra.mxu2 %v11358_v38  ;;  %v1694_v39 = vpack.c.bf16 %v1519_v19, %v1519_v19 }
 0x201   : > { %1910 = vmatmul.bf16.vlgmr.msra.gmra.mxu3 %v11359_v60 }
 0x202   : > { %v2176_v6 = vunpack.c.l.b16 %v1694_v39 }
 0x203   : > { %v1567_v36 = vpop.f32.mrf.mxu2  ;;  %v1471_v57 = vpop.f32.mrf.mxu0 }
 0x204   : > { %v1568_v21 = vadd.f32 %v1567_v36, %v9003_v3  ;;  %v1616_v22 = vpop.f32.mrf.mxu3  ;;  %v1472_v59 = vadd.f32 %v1471_v57, %v8989_v1  ;;  %v1520_v40 = vpop.f32.mrf.mxu1 }
 0x206   : > { %v9031_v27 = vadd.f32 %v1616_v22, %v1568_v21  ;;  %v1521_v54 = vadd.f32 %v1520_v40, %v1472_v59 }
 0x208   : > { %v1695_v56 = vpack.c.bf16 %v1521_v54, %v1521_v54 }
 0x20a   : > { %v2177_v9 = vunpack.c.l.b16 %v1695_v56 }
 0x20b   : > { %v9033_v44 = vpop.f32.mrf.mxu2  ;;  %v1474_v20 = vpop.f32.mrf.mxu0 }
 0x20c   : > { %v9035_v47 = vpop.f32.mrf.mxu3  ;;  %v2178_v7 = vpack.c.b16 %v2177_v9, %v2176_v6  ;;  %v1523_v11 = vpop.f32.mrf.mxu1  ;;  %v1475_v14 = vadd.f32 %v1474_v20, %v8989_v1 }
 0x20e   : > { %2190 = vmatpush.bf16.msrb.mxu1 %v2178_v7  ;;  %v1524_v62 = vadd.f32 %v1523_v11, %v1475_v14 }
 0x210   : > { %v1696_v60 = vpack.c.bf16 %v1524_v62, %v1524_v62 }
 0x212   : > { %v2204_v21 = vunpack.c.l.b16 %v1696_v60 }
 0x213   : > { %v1572_v24 = vpop.f32.mrf.mxu2  ;;  %v1476_v55 = vpop.f32.mrf.mxu0 }
 0x214   : > { %v1573_v17 = vadd.f32 %v1572_v24, %v9003_v3  ;;  %v1621_v32 = vpop.f32.mrf.mxu3  ;;  %v1477_v35 = vadd.f32 %v1476_v55, %v8989_v1  ;;  %v1525_v15 = vpop.f32.mrf.mxu1 }
 0x216   : > { %v9040_v38 = vadd.f32 %v1621_v32, %v1573_v17  ;;  %v1526_v19 = vadd.f32 %v1525_v15, %v1477_v35 }
 0x218   : > { %11360 = vst [vmem:[#allocation35_spill] sm:$0xff] %v9040_v38  ;;  %v1697_v36 = vpack.c.bf16 %v1526_v19, %v1526_v19 }
 0x21a   : > { %v2205_v22 = vunpack.c.l.b16 %v1697_v36 }
 0x21b   : > { %v9042_v57 = vpop.f32.mrf.mxu2  ;;  %v1479_v40 = vpop.f32.mrf.mxu0 }
 0x21c   : > { %v9044_v59 = vpop.f32.mrf.mxu3  ;;  %v2206_v39 = vpack.c.b16 %v2205_v22, %v2204_v21  ;;  %v1528_v54 = vpop.f32.mrf.mxu1  ;;  %v1480_v56 = vadd.f32 %v1479_v40, %v8989_v1 }
 0x21d   : > { %11361 = vst [vmem:[#allocation36_spill] sm:$0xff] %v9044_v59 }
 0x21e   : > { %2218 = vmatpush.bf16.msrb.mxu2 %v2206_v39  ;;  %v1529_v6 = vadd.f32 %v1528_v54, %v1480_v56 }
 0x220   : > { %v1698_v17 = vpack.c.bf16 %v1529_v6, %v1529_v6 }
 0x222   : > { %v2232_v35 = vunpack.c.l.b16 %v1698_v17 }
 0x223   : > { %v1577_v9 = vpop.f32.mrf.mxu2  ;;  %v1481_v11 = vpop.f32.mrf.mxu0 }
 0x224   : > { %v1578_v20 = vadd.f32 %v1577_v9, %v9003_v3  ;;  %v1626_v7 = vpop.f32.mrf.mxu3  ;;  %v1482_v14 = vadd.f32 %v1481_v11, %v8989_v1  ;;  %v1530_v62 = vpop.f32.mrf.mxu1 }
 0x226   : > { %v9049_v24 = vadd.f32 %v1626_v7, %v1578_v20  ;;  %v1531_v32 = vadd.f32 %v1530_v62, %v1482_v14 }
 0x228   : > { %11362 = vst [vmem:[#allocation37_spill] sm:$0xff] %v9049_v24  ;;  %v1699_v55 = vpack.c.bf16 %v1531_v32, %v1531_v32 }
 0x22a   : > { %v2233_v15 = vunpack.c.l.b16 %v1699_v55 }
 0x22b   : > { %v9051_v60 = vpop.f32.mrf.mxu2  ;;  %v1484_v36 = vpop.f32.mrf.mxu0 }
 0x22c   : > { %11363 = vst [vmem:[#allocation38_spill] sm:$0xff] %v9051_v60  ;;  %v9053_v19 = vpop.f32.mrf.mxu3  ;;  %v2234_v21 = vpack.c.b16 %v2233_v15, %v2232_v35  ;;  %v1533_v22 = vpop.f32.mrf.mxu1  ;;  %v1485_v40 = vadd.f32 %v1484_v36, %v8989_v1 }
 0x22d   : > { %11364 = vst [vmem:[#allocation39_spill] sm:$0xff] %v9053_v19 }
 0x22e   : > { %2246 = vmatpush.bf16.msrb.mxu3 %v2234_v21  ;;  %v1534_v39 = vadd.f32 %v1533_v22, %v1485_v40 }
 0x230   : > { %v1700_v14 = vpack.c.bf16 %v1534_v39, %v1534_v39 }
 0x232   : > { %v2260_v32 = vunpack.c.l.b16 %v1700_v14 }
 0x233   : > { %v1582_v54 = vpop.f32.mrf.mxu2  ;;  %v1486_v6 = vpop.f32.mrf.mxu0 }
 0x234   : > { %v1583_v56 = vadd.f32 %v1582_v54, %v9003_v3  ;;  %v1631_v9 = vpop.f32.mrf.mxu3  ;;  %v1487_v20 = vadd.f32 %v1486_v6, %v8989_v1  ;;  %v1535_v7 = vpop.f32.mrf.mxu1 }
 0x236   : > { %v9058_v11 = vadd.f32 %v1631_v9, %v1583_v56  ;;  %v1536_v62 = vadd.f32 %v1535_v7, %v1487_v20 }
 0x238   : > { %11365 = vst [vmem:[#allocation40_spill] sm:$0xff] %v9058_v11  ;;  %v1701_v17 = vpack.c.bf16 %v1536_v62, %v1536_v62 }
 0x23a   : > { %v2261_v55 = vunpack.c.l.b16 %v1701_v17 }
 0x23b   : > { %v9060_v35 = vpop.f32.mrf.mxu2  ;;  %v1489_v36 = vpop.f32.mrf.mxu0 }
 0x23c   : > { %v9062_v15 = vpop.f32.mrf.mxu3  ;;  %v2262_v21 = vpack.c.b16 %v2261_v55, %v2260_v32  ;;  %v1538_v22 = vpop.f32.mrf.mxu1  ;;  %v1490_v40 = vadd.f32 %v1489_v36, %v8989_v1 }
 0x23e   : > { %2274 = vmatpush.bf16.msra.mxu0 %v2262_v21  ;;  %v1539_v54 = vadd.f32 %v1538_v22, %v1490_v40 }
 0x240   : > { %v1702_v62 = vpack.c.bf16 %v1539_v54, %v1539_v54 }
 0x242   : > { %v2288_v58 = vunpack.c.l.b16 %v1702_v62 }
 0x243   : > { %v1587_v6 = vpop.f32.mrf.mxu2  ;;  %v1491_v39 = vpop.f32.mrf.mxu0 }
 0x244   : > { %v1588_v56 = vadd.f32 %v1587_v6, %v9003_v3  ;;  %v1636_v9 = vpop.f32.mrf.mxu3  ;;  %v1492_v20 = vadd.f32 %v1491_v39, %v8989_v1  ;;  %v1540_v7 = vpop.f32.mrf.mxu1 }
 0x246   : > { %v9067_v14 = vadd.f32 %v1636_v9, %v1588_v56  ;;  %v1541_v17 = vadd.f32 %v1540_v7, %v1492_v20 }
 0x248   : > { %11366 = vst [vmem:[#allocation41_spill] sm:$0xff] %v9067_v14  ;;  %v1703_v16 = vpack.c.bf16 %v1541_v17, %v1541_v17 }
 0x24a   : > { %v2289_v32 = vunpack.c.l.b16 %v1703_v16 }
 0x24b   : > { %v9069_v55 = vpop.f32.mrf.mxu2  ;;  %v1494_v21 = vpop.f32.mrf.mxu0 }
 0x24c   : > { %11367 = vst [vmem:[#allocation42_spill] sm:$0xff] %v9069_v55  ;;  %v9071_v36 = vpop.f32.mrf.mxu3  ;;  %v2290_v22 = vpack.c.b16 %v2289_v32, %v2288_v58  ;;  %v1543_v40 = vpop.f32.mrf.mxu1  ;;  %v1495_v6 = vadd.f32 %v1494_v21, %v8989_v1 }
 0x24d   : > { %11368 = vst [vmem:[#allocation43_spill] sm:$0xff] %v9071_v36 }
 0x24e   : > { %2302 = vmatpush.bf16.msra.mxu1 %v2290_v22  ;;  %v1544_v53 = vadd.f32 %v1543_v40, %v1495_v6 }
 0x250   : > { %v1704_v62 = vpack.c.bf16 %v1544_v53, %v1544_v53 }
 0x252   : > { %v2316_v24 = vunpack.c.l.b16 %v1704_v62  ;;  %v1655_v62 = vand.u32 127, %v1651_v34 }
 0x253   : > { %v1592_v39 = vpop.f32.mrf.mxu2  ;;  %v1496_v54 = vpop.f32.mrf.mxu0 }
 0x254   : > { %v1593_v56 = vadd.f32 %v1592_v39, %v9003_v3  ;;  %v1641_v9 = vpop.f32.mrf.mxu3  ;;  %v1497_v20 = vadd.f32 %v1496_v54, %v8989_v1  ;;  %v1545_v7 = vpop.f32.mrf.mxu1 }
 0x256   : > { %v9076_v16 = vadd.f32 %v1641_v9, %v1593_v56  ;;  %v1546_v17 = vadd.f32 %v1545_v7, %v1497_v20  ;;  %v1652_v7 = vshrl.u32 %v1651_v34, 7 }
 0x258   : > { %11369 = vst [vmem:[#allocation44_spill] sm:$0xff] %v9076_v16  ;;  %v1705_v50 = vpack.c.bf16 %v1546_v17, %v1546_v17  ;;  %vm1656_vm0 = vcmp.gt.s32.totalorder %v1655_v62, %v1652_v7  ;;  %v1653_v34 = vadd.s32 8, %v1652_v7 }
 0x25a   : > { %v2317_v58 = vunpack.c.l.b16 %v1705_v50  ;;  %vm1657_vm2 = vcmp.gt.s32.totalorder %v1655_v62, %v1653_v34 }
 0x25b   : > { %v9078_v32 = vpop.f32.mrf.mxu2  ;;  %v1499_v22 = vpop.f32.mrf.mxu0 }
 0x25c   : > { %11370 = vst [vmem:[#allocation45_spill] sm:$0xff] %v9078_v32  ;;  %v9080_v21 = vpop.f32.mrf.mxu3  ;;  %v2318_v40 = vpack.c.b16 %v2317_v58, %v2316_v24  ;;  %v1548_v6 = vpop.f32.mrf.mxu1  ;;  %v1500_v39 = vadd.f32 %v1499_v22, %v8989_v1 }
 0x25d   : > { %11371 = vst [vmem:[#allocation46_spill] sm:$0xff] %v9080_v21 }
 0x25e   : > { %2330 = vmatpush.bf16.msra.mxu2 %v2318_v40  ;;  %v1549_v54 = vadd.f32 %v1548_v6, %v1500_v39  ;;  %v8404_v39 = vmov 0.0  }
 0x25f   : > { %v9091_v19 = vsel %vm1656_vm0, -1e+30, %v8404_v39 }
 0x260   : > { %v1706_v16 = vpack.c.bf16 %v1549_v54, %v1549_v54  ;;  %11375 = vst [vmem:[#allocation50_spill] sm:$0xff] %v9091_v19 }
 0x262   : > { %v2344_v22 = vunpack.c.l.b16 %v1706_v16 }
 0x263   : > { %v1597_v42 = vpop.f32.mrf.mxu2  ;;  %v1501_v9 = vpop.f32.mrf.mxu0 }
 0x264   : > { %v1598_v56 = vadd.f32 %v1597_v42, %v9003_v3  ;;  %v1646_v53 = vpop.f32.mrf.mxu3  ;;  %v1502_v20 = vadd.f32 %v1501_v9, %v8989_v1  ;;  %v1550_v50 = vpop.f32.mrf.mxu1 }
 0x266   : > { %v9085_v17 = vadd.f32 %v1646_v53, %v1598_v56  ;;  %v1551_v24 = vadd.f32 %v1550_v50, %v1502_v20 }
 0x268   : > { %11372 = vst [vmem:[#allocation47_spill] sm:$0xff] %v9085_v17  ;;  %v1707_v58 = vpack.c.bf16 %v1551_v24, %v1551_v24  ;;  %v9103_v24 = vsel %vm1657_vm2, -1e+30, %v8404_v39 }
 0x269   : > { %11376 = vst [vmem:[#allocation51_spill] sm:$0xff] %v9103_v24 }
 0x26a   : > { %v2345_v40 = vunpack.c.l.b16 %v1707_v58 }
 0x26b   : > { %v9087_v21 = vpop.f32.mrf.mxu2  ;;  %v1729_v42 = vpop.f32.mrf.mxu0 }
 0x26c   : > { %11373 = vst [vmem:[#allocation48_spill] sm:$0xff] %v9087_v21  ;;  %v9089_v6 = vpop.f32.mrf.mxu3  ;;  %v2346_v1 = vpack.c.b16 %v2345_v40, %v2344_v22  ;;  %v1916_v9 = vmul.f32 0.088388346, %v1729_v42  ;;  %v1755_v32 = vpop.f32.mrf.mxu1 }
 0x26d   : > { %11374 = vst [vmem:[#allocation49_spill] sm:$0xff] %v9089_v6  ;;  %v1918_v56 = vmul.f32 0.088388346, %v1755_v32 }
 0x26e   : > { %v9094_v54 = vadd.f32 %v1916_v9, %v9091_v19  ;;  %2358 = vmatpush.bf16.msra.mxu3 %v2346_v1 }
 0x26f   : > { %v9097_v16 = vadd.f32 %v1918_v56, %v9091_v19 }
 0x270   : > { %v1949_v53 = vsel %vm1948_vm1, %v9094_v54, -inf }
 0x271   : > { %v1955_v20 = vsel %vm1948_vm1, %v9097_v16, -inf  ;;  %1950 = vmax.xlane.f32.xlu0 %v1949_v53 }
 0x272   : > { %1956 = vmax.xlane.f32.xlu1 %v1955_v20 }
 0x273   : > { %v1781_v50 = vpop.f32.mrf.mxu2  ;;  %v1731_v32 = vpop.f32.mrf.mxu0 }
 0x274   : > { %v1807_v7 = vpop.f32.mrf.mxu3  ;;  %v1917_v58 = vmul.f32 0.088388346, %v1731_v32  ;;  %v1757_v22 = vpop.f32.mrf.mxu1  ;;  %v1920_v62 = vmul.f32 0.088388346, %v1781_v50 }
 0x275   : > { %v1919_v40 = vmul.f32 0.088388346, %v1757_v22 }
 0x276   : > { %v9106_v42 = vadd.f32 %v1917_v58, %v9103_v24  ;;  %v9116_v58 = vadd.f32 %v1920_v62, %v9091_v19 }
 0x277   : > { %v9109_v1 = vadd.f32 %v1919_v40, %v9103_v24 }
 0x278   : > { %v1952_v9 = vsel %vm1948_vm1, %v9106_v42, -inf  ;;  %v1961_v17 = vsel %vm1948_vm1, %v9116_v58, -inf }
 0x279   : > { %v1958_v34 = vsel %vm1948_vm1, %v9109_v1, -inf  ;;  %1953 = vmax.xlane.f32.xlu0 %v1952_v9 }
 0x27a   : > { %1959 = vmax.xlane.f32.xlu1 %v1958_v34  ;;  %v1922_v34 = vmul.f32 0.088388346, %v1807_v7 }
 0x27b   : > { %v1783_v56 = vpop.f32.mrf.mxu2  ;;  %v1833_v20 = vpop.f32.mrf.mxu0 }
 0x27c   : > { %v1921_v39 = vmul.f32 0.088388346, %v1783_v56  ;;  %v1809_v53 = vpop.f32.mrf.mxu3  ;;  %v1924_v32 = vmul.f32 0.088388346, %v1833_v20  ;;  %v1859_v22 = vpop.f32.mrf.mxu1  ;;  %v9131_v51 = vadd.f32 %v1922_v34, %v9091_v19 }
 0x27d   : > { %v1926_v14 = vmul.f32 0.088388346, %v1859_v22  ;;  %v1923_v60 = vmul.f32 0.088388346, %v1809_v53 }
 0x27e   : > { %v9119_v40 = vadd.f32 %v1921_v39, %v9103_v24  ;;  %v9122_v50 = vadd.f32 %v1924_v32, %v9091_v19 }
 0x280   : > { %v1973_v9 = vsel %vm1948_vm1, %v9122_v50, -inf  ;;  %v1964_v56 = vsel %vm1948_vm1, %v9119_v40, -inf }
 0x281   : > { %1962 = vmax.xlane.f32.xlu0 %v1961_v17  ;;  %1974 = vmax.xlane.f32.xlu2 %v1973_v9 }
 0x282   : > { %1965 = vmax.xlane.f32.xlu1 %v1964_v56  ;;  %v1967_v56 = vsel %vm1948_vm1, %v9131_v51, -inf }
 0x283   : > { %v1885_v62 = vpop.f32.mrf.mxu2  ;;  %v1835_v20 = vpop.f32.mrf.mxu0 }
 0x284   : > { %v1911_v39 = vpop.f32.mrf.mxu3  ;;  %v1925_v6 = vmul.f32 0.088388346, %v1835_v20  ;;  %v1861_v21 = vpop.f32.mrf.mxu1  ;;  %v1928_v9 = vmul.f32 0.088388346, %v1885_v62  ;;  %v9146_v20 = vadd.f32 %v1926_v14, %v9091_v19  ;;  %v9161_v14 = vadd.f32 %v1923_v60, %v9103_v24 }
 0x285   : > { %v1927_v32 = vmul.f32 0.088388346, %v1861_v21  ;;  %v1930_v53 = vmul.f32 0.088388346, %v1911_v39 }
 0x286   : > { %v9134_v5 = vadd.f32 %v1925_v6, %v9103_v24  ;;  %v1979_v36 = vsel %vm1948_vm1, %v9146_v20, -inf }
 0x287   : > { %v9137_v7 = vadd.f32 %v1927_v32, %v9103_v24  ;;  %v9152_v32 = vadd.f32 %v1928_v9, %v9091_v19 }
 0x288   : > { %v1976_v17 = vsel %vm1948_vm1, %v9134_v5, -inf }
 0x289   : > { %v1982_v21 = vsel %vm1948_vm1, %v9137_v7, -inf  ;;  %1977 = vmax.xlane.f32.xlu2 %v1976_v17 }
 0x28a   : > { %1968 = vmax.xlane.f32.xlu1 %v1967_v56  ;;  %1983 = vmax.xlane.f32.xlu0 %v1982_v21  ;;  %v1985_v56 = vsel %vm1948_vm1, %v9152_v32, -inf  ;;  %v1970_v21 = vsel %vm1948_vm1, %v9161_v14, -inf }
 0x28b   : > { %v1887_v34 = vpop.f32.mrf.mxu2 }
 0x28c   : > { %v1929_v6 = vmul.f32 0.088388346, %v1887_v34  ;;  %v1913_v62 = vpop.f32.mrf.mxu3 }
 0x28d   : > { %v1931_v38 = vmul.f32 0.088388346, %v1913_v62 }
 0x28e   : > { %v9149_v22 = vadd.f32 %v1929_v6, %v9103_v24  ;;  %v9171_v6 = vadd.f32 %v1930_v53, %v9091_v19 }
 0x28f   : > { %v9164_v9 = vadd.f32 %v1931_v38, %v9103_v24 }
 0x290   : > { %v1988_v17 = vsel %vm1948_vm1, %v9149_v22, -inf }
 0x291   : > { %1980 = vmax.xlane.f32.xlu2 %v1979_v36  ;;  %v1994_v34 = vsel %vm1948_vm1, %v9164_v9, -inf  ;;  %v1991_v36 = vsel %vm1948_vm1, %v9171_v6, -inf }
 0x292   : > { %1989 = vmax.xlane.f32.xlu1 %v1988_v17  ;;  %1986 = vmax.xlane.f32.xlu0 %v1985_v56 }
 0x299   : > { %1971 = vmax.xlane.f32.xlu2 %v1970_v21 }
 0x29a   : > { %1995 = vmax.xlane.f32.xlu0 %v1994_v34 }
 0x2a1   : > { %1992 = vmax.xlane.f32.xlu2 %v1991_v36 }
 0x2e4   : > { %v1951_v60 = vpop.xlane.xlu0 %1950 }
 0x2e5   : > { %v1957_v62 = vpop.xlane.xlu1 %1956  ;;  %v1997_v38 = vsub.f32 %v9094_v54, %v1951_v60 }
 0x2e6   : > { %v1999_v39 = vsub.f32 %v9097_v16, %v1957_v62 }
 0x2e7   : > { %v2013_v17 = vmul.f32 1.442695, %v1997_v38 }
 0x2e8   : > { %v2017_v56 = vmul.f32 1.442695, %v1999_v39 }
 0x2e9   : > { %7875 = vpow2.f32 %v2013_v17 }
 0x2ea   : > { %7877 = vpow2.f32 %v2017_v56 }
 0x2ec   : > { %v1954_v24 = vpop.xlane.xlu0 %1953 }
 0x2ed   : > { %v1960_v21 = vpop.xlane.xlu1 %1959  ;;  %v1998_v34 = vsub.f32 %v9106_v42, %v1954_v24 }
 0x2ee   : > { %v2000_v53 = vsub.f32 %v9109_v1, %v1960_v21 }
 0x2ef   : > { %v9179_v19 = vpop.eup %7875  ;;  %v2015_v29 = vmul.f32 1.442695, %v1998_v34 }
 0x2f0   : > { %v9181_v36 = vpop.eup %7877  ;;  %v2019_v31 = vmul.f32 1.442695, %v2000_v53  ;;  %v2045_v54 = vsel %vm1948_vm1, %v9179_v19, 0.0 }
 0x2f1   : > { %7879 = vpow2.f32 %v2015_v29  ;;  %2046 = vadd.xlane.f32.xlu1 %v2045_v54  ;;  %v2051_v16 = vsel %vm1948_vm1, %v9181_v36, 0.0 }
 0x2f2   : > { %7881 = vpow2.f32 %v2019_v31  ;;  %2052 = vadd.xlane.f32.xlu0 %v2051_v16 }
 0x2f4   : > { %v1963_v60 = vpop.xlane.xlu0 %1962  ;;  %v1975_v24 = vpop.xlane.xlu2 %1974 }
 0x2f5   : > { %v1966_v42 = vpop.xlane.xlu1 %1965  ;;  %v2001_v1 = vsub.f32 %v9116_v58, %v1963_v60  ;;  %v2005_v62 = vsub.f32 %v9122_v50, %v1975_v24 }
 0x2f6   : > { %v2002_v29 = vsub.f32 %v9119_v40, %v1966_v42 }
 0x2f7   : > { %v9189_v38 = vpop.eup %7879  ;;  %v2021_v39 = vmul.f32 1.442695, %v2001_v1  ;;  %v2029_v17 = vmul.f32 1.442695, %v2005_v62 }
 0x2f8   : > { %v9191_v56 = vpop.eup %7881  ;;  %v2048_v21 = vsel %vm1948_vm1, %v9189_v38, 0.0  ;;  %v2023_v58 = vmul.f32 1.442695, %v2002_v29 }
 0x2f9   : > { %7883 = vpow2.f32 %v2021_v39  ;;  %v2054_v31 = vsel %vm1948_vm1, %v9191_v56, 0.0  ;;  %2049 = vadd.xlane.f32.xlu2 %v2048_v21 }
 0x2fa   : > { %2055 = vadd.xlane.f32.xlu1 %v2054_v31  ;;  %7885 = vpow2.f32 %v2029_v17 }
 0x2fb   : > { %7887 = vpow2.f32 %v2023_v58 }
 0x2fc   : > { %v1978_v50 = vpop.xlane.xlu2 %1977 }
 0x2fd   : > { %v1969_v34 = vpop.xlane.xlu1 %1968  ;;  %v1984_v53 = vpop.xlane.xlu0 %1983  ;;  %v2006_v54 = vsub.f32 %v9134_v5, %v1978_v50 }
 0x2fe   : > { %v2008_v16 = vsub.f32 %v9137_v7, %v1984_v53  ;;  %v2003_v24 = vsub.f32 %v9131_v51, %v1969_v34 }
 0x2ff   : > { %v9200_v60 = vpop.eup %7883  ;;  %v2031_v40 = vmul.f32 1.442695, %v2006_v54 }
 0x300   : > { %v2035_v42 = vmul.f32 1.442695, %v2008_v16  ;;  %v2057_v1 = vsel %vm1948_vm1, %v9200_v60, 0.0  ;;  %v9205_v62 = vpop.eup %7885  ;;  %v2025_v5 = vmul.f32 1.442695, %v2003_v24 }
 0x301   : > { %7889 = vpow2.f32 %v2031_v40  ;;  %v2069_v39 = vsel %vm1948_vm1, %v9205_v62, 0.0  ;;  %v9210_v51 = vpop.eup %7887 }
 0x302   : > { %2058 = vadd.xlane.f32.xlu1 %v2057_v1  ;;  %7891 = vpow2.f32 %v2035_v42  ;;  %2070 = vadd.xlane.f32.xlu2 %v2069_v39 }
 0x303   : > { %7893 = vpow2.f32 %v2025_v5 }
 0x304   : > { %v1981_v7 = vpop.xlane.xlu2 %1980 }
 0x305   : > { %v1990_v17 = vpop.xlane.xlu1 %1989  ;;  %v1987_v29 = vpop.xlane.xlu0 %1986  ;;  %v2007_v21 = vsub.f32 %v9146_v20, %v1981_v7 }
 0x306   : > { %v2009_v31 = vsub.f32 %v9152_v32, %v1987_v29  ;;  %v2010_v34 = vsub.f32 %v9149_v22, %v1990_v17  ;;  %v2060_v32 = vsel %vm1948_vm1, %v9210_v51, 0.0 }
 0x307   : > { %v9213_v58 = vpop.eup %7889  ;;  %v2033_v50 = vmul.f32 1.442695, %v2007_v21 }
 0x308   : > { %v2037_v53 = vmul.f32 1.442695, %v2009_v31  ;;  %v2072_v54 = vsel %vm1948_vm1, %v9213_v58, 0.0  ;;  %v9218_v16 = vpop.eup %7891  ;;  %v2039_v40 = vmul.f32 1.442695, %v2010_v34 }
 0x309   : > { %7895 = vpow2.f32 %v2033_v50  ;;  %2073 = vadd.xlane.f32.xlu0 %v2072_v54  ;;  %v2078_v20 = vsel %vm1948_vm1, %v9218_v16, 0.0  ;;  %v9225_v1 = vpop.eup %7893 }
 0x30a   : > { %7897 = vpow2.f32 %v2037_v53  ;;  %2079 = vadd.xlane.f32.xlu1 %v2078_v20  ;;  %2061 = vadd.xlane.f32.xlu2 %v2060_v32  ;;  %v2063_v31 = vsel %vm1948_vm1, %v9225_v1, 0.0 }
 0x30b   : > { %7899 = vpow2.f32 %v2039_v40 }
 0x30c   : > { %v1972_v24 = vpop.xlane.xlu2 %1971 }
 0x30d   : > { %v1996_v22 = vpop.xlane.xlu0 %1995  ;;  %v2004_v42 = vsub.f32 %v9161_v14, %v1972_v24 }
 0x30e   : > { %v2012_v39 = vsub.f32 %v9164_v9, %v1996_v22 }
 0x30f   : > { %v9228_v5 = vpop.eup %7895  ;;  %v2027_v7 = vmul.f32 1.442695, %v2004_v42 }
 0x310   : > { %v2043_v17 = vmul.f32 1.442695, %v2012_v39  ;;  %v2075_v29 = vsel %vm1948_vm1, %v9228_v5, 0.0  ;;  %v9232_v21 = vpop.eup %7897 }
 0x311   : > { %7901 = vpow2.f32 %v2027_v7  ;;  %2076 = vadd.xlane.f32.xlu0 %v2075_v29  ;;  %v2081_v14 = vsel %vm1948_vm1, %v9232_v21, 0.0  ;;  %v9239_v34 = vpop.eup %7899 }
 0x312   : > { %7903 = vpow2.f32 %v2043_v17  ;;  %2082 = vadd.xlane.f32.xlu1 %v2081_v14  ;;  %2064 = vadd.xlane.f32.xlu2 %v2063_v31  ;;  %v2084_v24 = vsel %vm1948_vm1, %v9239_v34, 0.0 }
 0x314   : > { %v1993_v9 = vpop.xlane.xlu2 %1992 }
 0x315   : > { %v2011_v50 = vsub.f32 %v9171_v6, %v1993_v9 }
 0x317   : > { %v9241_v53 = vpop.eup %7901  ;;  %v2041_v54 = vmul.f32 1.442695, %v2011_v50 }
 0x318   : > { %v9243_v20 = vpop.eup %7903  ;;  %v2066_v32 = vsel %vm1948_vm1, %v9241_v53, 0.0 }
 0x319   : > { %7905 = vpow2.f32 %v2041_v54  ;;  %v2090_v40 = vsel %vm1948_vm1, %v9243_v20, 0.0  ;;  %2067 = vadd.xlane.f32.xlu0 %v2066_v32 }
 0x31a   : > { %2091 = vadd.xlane.f32.xlu1 %v2090_v40  ;;  %2085 = vadd.xlane.f32.xlu2 %v2084_v24 }
 0x31f   : > { %v9251_v6 = vpop.eup %7905 }
 0x320   : > { %v2087_v22 = vsel %vm1948_vm1, %v9251_v6, 0.0 }
 0x321   : > { %2088 = vadd.xlane.f32.xlu0 %v2087_v22 }
 0x364   : > { %v2047_v42 = vpop.xlane.xlu1 %2046 }
 0x365   : > { %v2053_v39 = vpop.xlane.xlu0 %2052  ;;  %7907 = vrcp.f32 %v2047_v42 }
 0x366   : > { %7909 = vrcp.f32 %v2053_v39 }
 0x36b   : > { %v7908_v17 = vpop.eup %7907 }
 0x36c   : > { %v2050_v7 = vpop.xlane.xlu2 %2049  ;;  %v7910_v14 = vpop.eup %7909  ;;  %v2109_v31 = vmul.f32 %v7908_v17, %v9179_v19 }
 0x36d   : > { %v2056_v29 = vpop.xlane.xlu1 %2055  ;;  %7911 = vrcp.f32 %v2050_v7  ;;  %v2111_v9 = vmul.f32 %v7910_v14, %v9181_v36 }
 0x36e   : > { %7913 = vrcp.f32 %v2056_v29  ;;  %v2125_v32 = vpack.c.bf16 %v2109_v31, %v2109_v31 }
 0x36f   : > { %v2127_v24 = vpack.c.bf16 %v2111_v9, %v2111_v9 }
 0x370   : > { %v2143_v7 = vunpack.c.l.b16 %v2125_v32 }
 0x371   : > { %v2171_v29 = vunpack.c.l.b16 %v2127_v24 }
 0x373   : > { %v7912_v50 = vpop.eup %7911 }
 0x374   : > { %v7914_v54 = vpop.eup %7913  ;;  %v2110_v40 = vmul.f32 %v7912_v50, %v9189_v38  ;;  %v11377_v38 = vpack.c.b16 %v8896_v28, %v8891_v46 }
 0x375   : > { %v2112_v22 = vmul.f32 %v7914_v54, %v9191_v56  ;;  %v2059_v42 = vpop.xlane.xlu1 %2058  ;;  %v2071_v55 = vpop.xlane.xlu2 %2070 }
 0x376   : > { %v2126_v39 = vpack.c.bf16 %v2110_v40, %v2110_v40  ;;  %7915 = vrcp.f32 %v2071_v55  ;;  %v11378_v55 = vpack.c.b16 %v8910_v52, %v8905_v25 }
 0x377   : > { %v2128_v11 = vpack.c.bf16 %v2112_v22, %v2112_v22  ;;  %7917 = vrcp.f32 %v2059_v42 }
 0x378   : > { %v2144_v59 = vunpack.c.l.b16 %v2126_v39 }
 0x379   : > { %v2172_v61 = vunpack.c.l.b16 %v2128_v11 }
 0x37a   : > { %v2145_v19 = vpack.c.b16 %v2144_v59, %v2143_v7 }
 0x37b   : > { %v2173_v36 = vpack.c.b16 %v2172_v61, %v2171_v29 }
 0x37c   : > { %v2074_v17 = vpop.xlane.xlu0 %2073  ;;  %6836 = vmatmul.msk.bf16.vlgmr.msrb.gmra.mxu0 %vm1948_vm1, %v2145_v19  ;;  %v7916_v14 = vpop.eup %7915 }
 0x37d   : > { %6837 = vmatmul.msk.bf16.vlgmr.msrb.gmra.mxu1 %vm1948_vm1, %v2173_v36  ;;  %7919 = vrcp.f32 %v2074_v17  ;;  %2432 = vmatpush.bf16.xpose.msrb.mxu0 %v11377_v38  ;;  %v2080_v56 = vpop.xlane.xlu1 %2079  ;;  %v2062_v11 = vpop.xlane.xlu2 %2061  ;;  %v2117_v61 = vmul.f32 %v7916_v14, %v9205_v62 }
 0x37e   : > { %2458 = vmatpush.bf16.xpose.msrb.mxu1 %v11378_v55  ;;  %7921 = vrcp.f32 %v2080_v56  ;;  %v7918_v59 = vpop.eup %7917  ;;  %v11379_v56 = vpack.c.b16 %v8952_v0, %v8947_v33  ;;  %v2397_v0 = vpack.c.bf16 %v9010_v10, %v9010_v10  ;;  %v11381_v10 = vpack.c.b16 %v8966_v30, %v8961_v18 }
 0x37f   : > { %7923 = vrcp.f32 %v2062_v11  ;;  %v2113_v9 = vmul.f32 %v7918_v59, %v9200_v60  ;;  %v2133_v50 = vpack.c.bf16 %v2117_v61, %v2117_v61  ;;  %v1565_v60 = vadd.f32 %v9012_v12, %v9003_v3 }
 0x380   : > { %v1404_v18 = vadd.f32 %v8987_v48, %v8879_v8  ;;  %v11383_v48 = vpack.c.b16 %v8938_v13, %v8933_v45  ;;  %v11384_v45 = vld [vmem:[#allocation34_spill] sm:$0xff] }
 0x381   : > { %v2129_v25 = vpack.c.bf16 %v2113_v9, %v2113_v9  ;;  %v2255_v42 = vunpack.c.l.b16 %v2133_v50  ;;  %v1614_v55 = vadd.f32 %v9014_v23, %v1565_v60  ;;  %v2399_v60 = vpack.c.bf16 %v9031_v27, %v9031_v27 }
 0x382   : > { %v2395_v13 = vpack.c.bf16 %v11384_v45, %v11384_v45 }
 0x383   : > { %v7920_v31 = vpop.eup %7919  ;;  %v2199_v19 = vunpack.c.l.b16 %v2129_v25  ;;  %v2398_v23 = vpack.c.bf16 %v1614_v55, %v1614_v55  ;;  %v11385_v55 = vld [vmem:[#allocation36_spill] sm:$0xff] }
 0x384   : > { %v2118_v54 = vmul.f32 %v7920_v31, %v9213_v58  ;;  %v2077_v32 = vpop.xlane.xlu0 %2076  ;;  %v7922_v46 = vpop.eup %7921 }
 0x385   : > { %7925 = vrcp.f32 %v2077_v32  ;;  %v7924_v28 = vpop.eup %7923  ;;  %v2065_v24 = vpop.xlane.xlu2 %2064  ;;  %v2120_v62 = vmul.f32 %v7922_v46, %v9218_v16  ;;  %v1570_v32 = vadd.f32 %v9033_v44, %v9003_v3  ;;  %v2852_v44 = vunpack.c.l.b16 %v2397_v0 }
 0x386   : > { %v2134_v40 = vpack.c.bf16 %v2118_v54, %v2118_v54  ;;  %v2114_v52 = vmul.f32 %v7924_v28, %v9210_v51  ;;  %v2083_v22 = vpop.xlane.xlu1 %2082  ;;  %7927 = vrcp.f32 %v2065_v24  ;;  %v1399_v51 = vadd.f32 %v8974_v37, %v8879_v8 }
 0x387   : > { %7929 = vrcp.f32 %v2083_v22  ;;  %v2136_v17 = vpack.c.bf16 %v2120_v62, %v2120_v62  ;;  %v11380_v37 = vpack.c.b16 %v8924_v4, %v8919_v2  ;;  %v2393_v4 = vpack.c.bf16 %v8972_v49, %v8972_v49 }
 0x388   : > { %v2256_v39 = vunpack.c.l.b16 %v2134_v40  ;;  %v2130_v7 = vpack.c.bf16 %v2114_v52, %v2114_v52  ;;  %v1448_v33 = vadd.f32 %v8976_v26, %v1399_v51  ;;  %v2853_v25 = vunpack.c.l.b16 %v2398_v23  ;;  %v11391_v23 = vld [vmem:[#allocation35_spill] sm:$0xff] }
 0x389   : > { %v2284_v61 = vunpack.c.l.b16 %v2136_v17  ;;  %v1619_v52 = vadd.f32 %v9035_v47, %v1570_v32  ;;  %v1585_v47 = vadd.f32 %v9060_v35, %v9003_v3  ;;  %v11382_v17 = vpack.c.b16 %v8736_v43, %v8731_v41 }
 0x38a   : > { %v2257_v58 = vpack.c.b16 %v2256_v39, %v2255_v42  ;;  %v2200_v36 = vunpack.c.l.b16 %v2130_v7  ;;  %v2394_v26 = vpack.c.bf16 %v1448_v33, %v1448_v33  ;;  %v2577_v39 = vunpack.c.l.b16 %v2393_v4 }
 0x38b   : > { %v7926_v29 = vpop.eup %7925  ;;  %v2854_v30 = vpack.c.b16 %v2853_v25, %v2852_v44  ;;  %v1575_v35 = vadd.f32 %v9042_v57, %v9003_v3  ;;  %v1634_v41 = vadd.f32 %v9062_v15, %v1585_v47  ;;  %v11386_v57 = vld [vmem:[#allocation40_spill] sm:$0xff]  ;;  %v2603_v33 = vunpack.c.l.b16 %v2395_v13  ;;  %v11393_v44 = vld [vmem:[#allocation38_spill] sm:$0xff] }
 0x38c   : > { %v2119_v14 = vmul.f32 %v7926_v29, %v9228_v5  ;;  %v2068_v38 = vpop.xlane.xlu0 %2067  ;;  %6840 = vmatmul.msk.bf16.vlgmr.msra.gmra.mxu0 %vm1948_vm1, %v2257_v58  ;;  %v2201_v16 = vpack.c.b16 %v2200_v36, %v2199_v19  ;;  %v7928_v12 = vpop.eup %7927  ;;  %v2578_v49 = vunpack.c.l.b16 %v2394_v26  ;;  %v2400_v19 = vpack.c.bf16 %v1619_v52, %v1619_v52  ;;  %v11394_v52 = vld [vmem:[#allocation41_spill] sm:$0xff]  ;;  %v11401_v47 = vld [vmem:[#allocation22_spill] sm:$0xff] }
 0x38d   : > { %7931 = vrcp.f32 %v2068_v38  ;;  %2536 = vmatpush.bf16.xpose.msra.mxu0 %v11379_v56  ;;  %v2086_v59 = vpop.xlane.xlu2 %2085  ;;  %v7930_v5 = vpop.eup %7929  ;;  %v2115_v9 = vmul.f32 %v7928_v12, %v9225_v1  ;;  %v1453_v38 = vadd.f32 %v8991_v63, %v1404_v18  ;;  %v1624_v63 = vadd.f32 %v11385_v55, %v1575_v35  ;;  %v11406_v35 = vld [vmem:[#allocation28_spill] sm:$0xff] }
 0x38e   : > { %v2135_v11 = vpack.c.bf16 %v2119_v14, %v2119_v14  ;;  %6838 = vmatmul.msk.bf16.vlgmr.msrb.gmra.mxu2 %vm1948_vm1, %v2201_v16  ;;  %7933 = vrcp.f32 %v2086_v59  ;;  %v2121_v46 = vmul.f32 %v7930_v5, %v9232_v21  ;;  %v2092_v1 = vpop.xlane.xlu1 %2091  ;;  %v2579_v27 = vpack.c.b16 %v2578_v49, %v2577_v39 }
 0x38f   : > { %2484 = vmatpush.bf16.xpose.msrb.mxu2 %v11380_v37  ;;  %v2131_v28 = vpack.c.bf16 %v2115_v9, %v2115_v9  ;;  %v2880_v16 = vunpack.c.l.b16 %v2399_v60  ;;  %v2881_v56 = vunpack.c.l.b16 %v2400_v19  ;;  %v2396_v12 = vpack.c.bf16 %v1453_v38, %v1453_v38  ;;  %v11388_v9 = vld [vmem:[#allocation21_spill] sm:$0xff]  ;;  %v11389_v37 = vld [vmem:[#allocation20_spill] sm:$0xff]  ;;  %v11400_v19 = vld [vmem:[#allocation23_spill] sm:$0xff] }
 0x390   : > { %v2283_v31 = vunpack.c.l.b16 %v2135_v11  ;;  %v2137_v22 = vpack.c.bf16 %v2121_v46, %v2121_v46  ;;  %v2406_v5 = vpack.c.bf16 %v1634_v41, %v1634_v41  ;;  %v1580_v25 = vadd.f32 %v11393_v44, %v9003_v3  ;;  %v11405_v38 = vld [vmem:[#allocation29_spill] sm:$0xff] }
 0x391   : > { %v2227_v42 = vunpack.c.l.b16 %v2131_v28  ;;  %v2882_v59 = vpack.c.b16 %v2881_v56, %v2880_v16  ;;  %v2604_v0 = vunpack.c.l.b16 %v2396_v12  ;;  %v11408_v16 = vld [vmem:[#allocation44_spill] sm:$0xff] }
 0x392   : > { %v2285_v50 = vpack.c.b16 %v2284_v61, %v2283_v31  ;;  %v2311_v36 = vunpack.c.l.b16 %v2137_v22  ;;  %v11387_v61 = vld [vmem:[#allocation42_spill] sm:$0xff]  ;;  %v2965_v28 = vunpack.c.l.b16 %v2406_v5  ;;  %v2407_v22 = vpack.c.bf16 %v11394_v52, %v11394_v52 }
 0x393   : > { %v7932_v54 = vpop.eup %7931  ;;  %v1590_v15 = vadd.f32 %v11387_v61, %v9003_v3  ;;  %v2605_v4 = vpack.c.b16 %v2604_v0, %v2603_v33  ;;  %v2409_v56 = vpack.c.bf16 %v11408_v16, %v11408_v16  ;;  %v11413_v61 = vld [vmem:[#allocation49_spill] sm:$0xff] }
 0x394   : > { %v2116_v40 = vmul.f32 %v7932_v54, %v9241_v53  ;;  %6841 = vmatmul.msk.bf16.vlgmr.msra.gmra.mxu1 %vm1948_vm1, %v2285_v50  ;;  %v2089_v2 = vpop.xlane.xlu0 %2088  ;;  %v7934_v24 = vpop.eup %7933  ;;  %v2401_v50 = vpack.c.bf16 %v11391_v23, %v11391_v23  ;;  %v2402_v54 = vpack.c.bf16 %v1624_v63, %v1624_v63  ;;  %v11409_v63 = vld [vmem:[#allocation48_spill] sm:$0xff] }
 0x395   : > { %2562 = vmatpush.bf16.xpose.msra.mxu1 %v11381_v10  ;;  %7935 = vrcp.f32 %v2089_v2  ;;  %v2122_v53 = vmul.f32 %v7934_v24, %v9239_v34  ;;  %v3020_v13 = vunpack.c.l.b16 %v2409_v56 }
 0x396   : > { %v2132_v21 = vpack.c.bf16 %v2116_v40, %v2116_v40  ;;  %7937 = vrcp.f32 %v2092_v1  ;;  %v11392_v1 = vld [vmem:[#allocation43_spill] sm:$0xff]  ;;  %v2908_v26 = vunpack.c.l.b16 %v2401_v50  ;;  %v2909_v10 = vunpack.c.l.b16 %v2402_v54  ;;  %v11418_v54 = vld [vmem:[#allocation33_spill] sm:$0xff] }
 0x397   : > { %v2138_v7 = vpack.c.bf16 %v2122_v53, %v2122_v53  ;;  %v1639_v40 = vadd.f32 %v11392_v1, %v1590_v15 }
 0x398   : > { %v2228_v62 = vunpack.c.l.b16 %v2132_v21  ;;  %v2910_v49 = vpack.c.b16 %v2909_v10, %v2908_v26 }
 0x399   : > { %v2312_v34 = vunpack.c.l.b16 %v2138_v7  ;;  %v2408_v53 = vpack.c.bf16 %v1639_v40, %v1639_v40  ;;  %v11398_v7 = vld [vmem:[#allocation45_spill] sm:$0xff] }
 0x39a   : > { %v2229_v58 = vpack.c.b16 %v2228_v62, %v2227_v42  ;;  %v11395_v42 = vld [vmem:[#allocation27_spill] sm:$0xff]  ;;  %v11396_v62 = vld [vmem:[#allocation26_spill] sm:$0xff]  ;;  %v1595_v18 = vadd.f32 %v11398_v7, %v9003_v3 }
 0x39b   : > { %v7936_v29 = vpop.eup %7935  ;;  %v2313_v8 = vpack.c.b16 %v2312_v34, %v2311_v36  ;;  %v11397_v39 = vpack.c.b16 %v11395_v42, %v11396_v62  ;;  %v11402_v36 = vpack.c.b16 %v11400_v19, %v11401_v47  ;;  %v11403_v34 = vld [vmem:[#allocation46_spill] sm:$0xff] }
 0x39c   : > { %6839 = vmatmul.msk.bf16.vlgmr.msrb.gmra.mxu3 %vm1948_vm1, %v2229_v58  ;;  %2433 = vmatmul.bf16.vlgmr.msrb.gmra.mxu0 %v11382_v17  ;;  %v7938_v14 = vpop.eup %7937  ;;  %v2123_v51 = vmul.f32 %v7936_v29, %v9251_v6  ;;  %v2405_v6 = vpack.c.bf16 %v11386_v57, %v11386_v57  ;;  %v2992_v58 = vunpack.c.l.b16 %v2407_v22  ;;  %v2993_v29 = vunpack.c.l.b16 %v2408_v53  ;;  %v11411_v57 = vld [vmem:[#allocation24_spill] sm:$0xff]  ;;  %v11421_v22 = vld [vmem:[#allocation50_spill] sm:$0xff] }
 0x39d   : > { %2510 = vmatpush.bf16.xpose.msrb.mxu3 %v11383_v48  ;;  %2866 = vmatpush.bf16.msrb.mxu0 %v2854_v30  ;;  %v2124_v43 = vmul.f32 %v7938_v14, %v9243_v20  ;;  %v11390_v20 = vpack.c.b16 %v11388_v9, %v11389_v37  ;;  %v11399_v30 = vld [vmem:[#allocation39_spill] sm:$0xff]  ;;  %v1644_v17 = vadd.f32 %v11403_v34, %v1595_v18  ;;  %v11404_v14 = vld [vmem:[#allocation37_spill] sm:$0xff]  ;;  %v11415_v9 = vld [vmem:[#allocation30_spill] sm:$0xff] }
 0x39e   : > { %6842 = vmatmul.msk.bf16.vlgmr.msra.gmra.mxu2 %vm1948_vm1, %v2313_v8  ;;  %v2139_v11 = vpack.c.bf16 %v2123_v51, %v2123_v51  ;;  %v2964_v46 = vunpack.c.l.b16 %v2405_v6  ;;  %v1629_v60 = vadd.f32 %v11399_v30, %v1580_v25  ;;  %v2403_v8 = vpack.c.bf16 %v11404_v14, %v11404_v14 }
 0x39f   : > { %2588 = vmatpush.bf16.xpose.msra.mxu2 %v2579_v27  ;;  %v2140_v31 = vpack.c.bf16 %v2124_v43, %v2124_v43  ;;  %v2994_v27 = vpack.c.b16 %v2993_v29, %v2992_v58  ;;  %v11407_v51 = vpack.c.b16 %v11405_v38, %v11406_v35  ;;  %v2410_v41 = vpack.c.bf16 %v1644_v17, %v1644_v17  ;;  %v11422_v58 = vld [vmem:[#allocation51_spill] sm:$0xff] }
 0x3a0   : > { %v2339_v32 = vunpack.c.l.b16 %v2139_v11  ;;  %v2966_v21 = vpack.c.b16 %v2965_v28, %v2964_v46  ;;  %v2404_v48 = vpack.c.bf16 %v1629_v60, %v1629_v60  ;;  %v2936_v43 = vunpack.c.l.b16 %v2403_v8 }
 0x3a1   : > { %v2340_v2 = vunpack.c.l.b16 %v2140_v31  ;;  %v3021_v12 = vunpack.c.l.b16 %v2410_v41  ;;  %v1600_v11 = vadd.f32 %v11409_v63, %v9003_v3  ;;  %v11414_v31 = vld [vmem:[#allocation31_spill] sm:$0xff] }
 0x3a2   : > { %v2937_v45 = vunpack.c.l.b16 %v2404_v48  ;;  %v11416_v37 = vpack.c.b16 %v11414_v31, %v11415_v9 }
 0x3a3   : > { %v2341_v24 = vpack.c.b16 %v2340_v2, %v2339_v32  ;;  %v3022_v5 = vpack.c.b16 %v3021_v12, %v3020_v13  ;;  %v1649_v15 = vadd.f32 %v11413_v61, %v1600_v11  ;;  %v11419_v32 = vld [vmem:[#allocation32_spill] sm:$0xff] }
 0x3a4   : > { %2459 = vmatmul.bf16.vlgmr.msrb.gmra.mxu1 %v11390_v20  ;;  %v2938_v55 = vpack.c.b16 %v2937_v45, %v2936_v43  ;;  %v11417_v20 = vld [vmem:[#allocation47_spill] sm:$0xff]  ;;  %v11420_v46 = vpack.c.b16 %v11418_v54, %v11419_v32 }
 0x3a5   : > { %2894 = vmatpush.bf16.msrb.mxu1 %v2882_v59  ;;  %v11410_v59 = vld [vmem:[#allocation25_spill] sm:$0xff]  ;;  %v2411_v33 = vpack.c.bf16 %v11417_v20, %v11417_v20  ;;  %v2412_v0 = vpack.c.bf16 %v1649_v15, %v1649_v15 }
 0x3a6   : > { %v11412_v6 = vpack.c.b16 %v11410_v59, %v11411_v57 }
 0x3a7   : > { %v3048_v23 = vunpack.c.l.b16 %v2411_v33  ;;  %v3049_v50 = vunpack.c.l.b16 %v2412_v0 }
 0x3a9   : > { %v3050_v3 = vpack.c.b16 %v3049_v50, %v3048_v23 }
 0x3ac   : > { %6843 = vmatmul.msk.bf16.vlgmr.msra.gmra.mxu3 %vm1948_vm1, %v2341_v24  ;;  %2537 = vmatmul.bf16.vlgmr.msra.gmra.mxu0 %v11397_v39 }
 0x3ad   : > { %2614 = vmatpush.bf16.xpose.msra.mxu3 %v2605_v4  ;;  %2978 = vmatpush.bf16.msra.mxu0 %v2966_v21 }
 0x3ae   : > { %2485 = vmatmul.bf16.vlgmr.msrb.gmra.mxu2 %v11402_v36 }
 0x3af   : > { %2922 = vmatpush.bf16.msrb.mxu2 %v2910_v49 }
 0x3b4   : > { %2563 = vmatmul.bf16.vlgmr.msra.gmra.mxu1 %v11407_v51 }
 0x3b5   : > { %3006 = vmatpush.bf16.msra.mxu1 %v2994_v27 }
 0x3bc   : > { %2511 = vmatmul.bf16.vlgmr.msrb.gmra.mxu3 %v11412_v6 }
 0x3bd   : > { %2950 = vmatpush.bf16.msrb.mxu3 %v2938_v55 }
 0x3be   : > { %2589 = vmatmul.bf16.vlgmr.msra.gmra.mxu2 %v11416_v37 }
 0x3bf   : > { %3034 = vmatpush.bf16.msra.mxu2 %v3022_v5 }
 0x3cc   : > { %2615 = vmatmul.bf16.vlgmr.msra.gmra.mxu3 %v11420_v46 }
 0x3cd   : > { %3062 = vmatpush.bf16.msra.mxu3 %v3050_v3 }
 0x3f9   : > { %v9371_v28 = vpop.f32.mrf.mxu0 }
 0x3fa   : > { %v9373_v1 = vpop.f32.mrf.mxu1 }
 0x401   : > { %v9375_v40 = vpop.f32.mrf.mxu0 }
 0x402   : > { %v9377_v2 = vpop.f32.mrf.mxu1 }
 0x409   : > { %v9379_v4 = vpop.f32.mrf.mxu0 }
 0x411   : > { %v9381_v26 = vpop.f32.mrf.mxu0  ;;  %v9383_v10 = vpop.f32.mrf.mxu1 }
 0x412   : > { %v9385_v24 = vpop.f32.mrf.mxu2 }
 0x419   : > { %v9387_v44 = vpop.f32.mrf.mxu1  ;;  %v2434_v25 = vpop.f32.mrf.mxu0 }
 0x41a   : > { %v9389_v21 = vpop.f32.mrf.mxu2  ;;  %v2621_v52 = vmul.f32 0.088388346, %v2434_v25 }
 0x41c   : > { %v2637_v53 = vadd.f32 %v2621_v52, %v11421_v22 }
 0x41e   : > { %v2653_v42 = vsel %vm1948_vm1, %v2637_v53, -inf }
 0x41f   : > { %2654 = vmax.xlane.f32.xlu2 %v2653_v42  ;;  %v9393_v62 = vpop.f32.mrf.mxu3 }
 0x421   : > { %v2436_v39 = vpop.f32.mrf.mxu0  ;;  %v2460_v49 = vpop.f32.mrf.mxu1 }
 0x422   : > { %v9395_v7 = vpop.f32.mrf.mxu2  ;;  %v2622_v18 = vmul.f32 0.088388346, %v2436_v39  ;;  %v2623_v30 = vmul.f32 0.088388346, %v2460_v49 }
 0x424   : > { %v2639_v60 = vadd.f32 %v2623_v30, %v11421_v22  ;;  %v2638_v29 = vadd.f32 %v2622_v18, %v11422_v58 }
 0x426   : > { %v2659_v19 = vsel %vm1948_vm1, %v2639_v60, -inf  ;;  %v2656_v47 = vsel %vm1948_vm1, %v2638_v29, -inf }
 0x427   : > { %2660 = vmax.xlane.f32.xlu1 %v2659_v19  ;;  %2657 = vmax.xlane.f32.xlu0 %v2656_v47  ;;  %v9401_v36 = vpop.f32.mrf.mxu3 }
 0x429   : > { %v2462_v34 = vpop.f32.mrf.mxu1  ;;  %v2538_v6 = vpop.f32.mrf.mxu0 }
 0x42a   : > { %v9403_v17 = vpop.f32.mrf.mxu2  ;;  %v2624_v14 = vmul.f32 0.088388346, %v2462_v34  ;;  %v2629_v61 = vmul.f32 0.088388346, %v2538_v6 }
 0x42c   : > { %v2640_v8 = vadd.f32 %v2624_v14, %v11422_v58  ;;  %v9429_v31 = vadd.f32 %v2629_v61, %v11421_v22 }
 0x42e   : > { %v2662_v48 = vsel %vm1948_vm1, %v2640_v8, -inf  ;;  %v2677_v9 = vsel %vm1948_vm1, %v9429_v31, -inf }
 0x42f   : > { %2663 = vmax.xlane.f32.xlu2 %v2662_v48  ;;  %v9407_v27 = vpop.f32.mrf.mxu3 }
 0x431   : > { %v2540_v23 = vpop.f32.mrf.mxu0  ;;  %v2564_v47 = vpop.f32.mrf.mxu1 }
 0x432   : > { %v2486_v38 = vpop.f32.mrf.mxu2  ;;  %v2630_v46 = vmul.f32 0.088388346, %v2540_v23 }
 0x433   : > { %v2625_v35 = vmul.f32 0.088388346, %v2486_v38  ;;  %v2631_v38 = vmul.f32 0.088388346, %v2564_v47 }
 0x435   : > { %v2641_v51 = vadd.f32 %v2625_v35, %v11421_v22 }
 0x437   : > { %v2665_v16 = vsel %vm1948_vm1, %v2641_v51, -inf  ;;  %v9411_v56 = vpop.f32.mrf.mxu3 }
 0x438   : > { %2666 = vmax.xlane.f32.xlu0 %v2665_v16 }
 0x43a   : > { %v2488_v41 = vpop.f32.mrf.mxu2 }
 0x43b   : > { %v2626_v43 = vmul.f32 0.088388346, %v2488_v41 }
 0x43d   : > { %v9414_v45 = vadd.f32 %v2626_v43, %v11422_v58  ;;  %v9455_v43 = vadd.f32 %v2631_v38, %v11421_v22 }
 0x43f   : > { %v2668_v13 = vsel %vm1948_vm1, %v9414_v45, -inf  ;;  %v2512_v12 = vpop.f32.mrf.mxu3  ;;  %v2683_v6 = vsel %vm1948_vm1, %v9455_v43, -inf }
 0x440   : > { %2669 = vmax.xlane.f32.xlu1 %v2668_v13  ;;  %v2627_v55 = vmul.f32 0.088388346, %v2512_v12 }
 0x442   : > { %v9419_v63 = vadd.f32 %v2627_v55, %v11421_v22  ;;  %v2590_v19 = vpop.f32.mrf.mxu2  ;;  %v2566_v55 = vpop.f32.mrf.mxu1 }
 0x443   : > { %v2632_v61 = vmul.f32 0.088388346, %v2566_v55 }
 0x444   : > { %v2671_v11 = vsel %vm1948_vm1, %v9419_v63, -inf }
 0x445   : > { %2672 = vmax.xlane.f32.xlu2 %v2671_v11 }
 0x447   : > { %v2514_v59 = vpop.f32.mrf.mxu3 }
 0x448   : > { %v2628_v57 = vmul.f32 0.088388346, %v2514_v59 }
 0x44a   : > { %v9424_v5 = vadd.f32 %v2628_v57, %v11422_v58  ;;  %v2592_v13 = vpop.f32.mrf.mxu2 }
 0x44b   : > { %v2634_v59 = vmul.f32 0.088388346, %v2592_v13 }
 0x44c   : > { %v2674_v15 = vsel %vm1948_vm1, %v9424_v5, -inf }
 0x44d   : > { %2675 = vmax.xlane.f32.xlu0 %v2674_v15 }
 0x455   : > { %2678 = vmax.xlane.f32.xlu0 %v2677_v9 }
 0x492   : > { %v2655_v37 = vpop.xlane.xlu2 %2654 }
 0x493   : > { %v2701_v20 = vsub.f32 %v2637_v53, %v2655_v37  ;;  %v9438_v53 = vadd.f32 %v2630_v46, %v11422_v58 }
 0x495   : > { %v2717_v33 = vmul.f32 1.442695, %v2701_v20  ;;  %v2616_v20 = vpop.f32.mrf.mxu3 }
 0x497   : > { %7939 = vpow2.f32 %v2717_v33 }
 0x49a   : > { %v2658_v0 = vpop.xlane.xlu0 %2657  ;;  %v2661_v50 = vpop.xlane.xlu1 %2660 }
 0x49b   : > { %v2702_v3 = vsub.f32 %v2638_v29, %v2658_v0  ;;  %v2703_v25 = vsub.f32 %v2639_v60, %v2661_v50  ;;  %v2680_v29 = vsel %vm1948_vm1, %v9438_v53, -inf  ;;  %v9469_v0 = vadd.f32 %v2632_v61, %v11422_v58 }
 0x49c   : > { %v2635_v50 = vmul.f32 0.088388346, %v2616_v20 }
 0x49d   : > { %v9433_v54 = vpop.eup %7939  ;;  %v2719_v32 = vmul.f32 1.442695, %v2702_v3  ;;  %v2721_v42 = vmul.f32 1.442695, %v2703_v25 }
 0x49e   : > { %v2749_v52 = vsel %vm1948_vm1, %v9433_v54, 0.0 }
 0x49f   : > { %2750 = vadd.xlane.f32.xlu1 %v2749_v52  ;;  %7941 = vpow2.f32 %v2719_v32  ;;  %v2633_v32 = vmul.f32 0.088388346, %v2590_v19 }
 0x4a0   : > { %7943 = vpow2.f32 %v2721_v42  ;;  %v9481_v42 = vadd.f32 %v2635_v50, %v11421_v22 }
 0x4a2   : > { %v2664_v39 = vpop.xlane.xlu2 %2663  ;;  %v2695_v19 = vsel %vm1948_vm1, %v9481_v42, -inf }
 0x4a3   : > { %v2704_v49 = vsub.f32 %v2640_v8, %v2664_v39 }
 0x4a5   : > { %v2723_v18 = vmul.f32 1.442695, %v2704_v49  ;;  %v9440_v30 = vpop.eup %7941 }
 0x4a6   : > { %v2752_v60 = vsel %vm1948_vm1, %v9440_v30, 0.0  ;;  %v9446_v14 = vpop.eup %7943 }
 0x4a7   : > { %7945 = vpow2.f32 %v2723_v18  ;;  %2681 = vmax.xlane.f32.xlu1 %v2680_v29  ;;  %2753 = vadd.xlane.f32.xlu2 %v2752_v60  ;;  %v2755_v41 = vsel %vm1948_vm1, %v9446_v14, 0.0  ;;  %v9486_v18 = vadd.f32 %v2633_v32, %v11421_v22  ;;  %v2618_v29 = vpop.f32.mrf.mxu3 }
 0x4a8   : > { %v2636_v47 = vmul.f32 0.088388346, %v2618_v29 }
 0x4ab   : > { %v2667_v34 = vpop.xlane.xlu0 %2666 }
 0x4ac   : > { %v2705_v48 = vsub.f32 %v2641_v51, %v2667_v34 }
 0x4ad   : > { %v9448_v8 = vpop.eup %7945 }
 0x4ae   : > { %v2725_v35 = vmul.f32 1.442695, %v2705_v48  ;;  %v2758_v16 = vsel %vm1948_vm1, %v9448_v8, 0.0 }
 0x4af   : > { %2759 = vadd.xlane.f32.xlu0 %v2758_v16  ;;  %2756 = vadd.xlane.f32.xlu2 %v2755_v41 }
 0x4b0   : > { %7947 = vpow2.f32 %v2725_v35  ;;  %v9498_v35 = vadd.f32 %v2636_v47, %v11422_v58 }
 0x4b2   : > { %v2698_v41 = vsel %vm1948_vm1, %v9498_v35, -inf }
 0x4b3   : > { %v2670_v12 = vpop.xlane.xlu1 %2669 }
 0x4b4   : > { %v2706_v51 = vsub.f32 %v9414_v45, %v2670_v12  ;;  %v9466_v45 = vadd.f32 %v2634_v59, %v11422_v58 }
 0x4b6   : > { %v9458_v11 = vpop.eup %7947  ;;  %v2727_v57 = vmul.f32 1.442695, %v2706_v51  ;;  %v2692_v3 = vsel %vm1948_vm1, %v9466_v45, -inf }
 0x4b7   : > { %v2761_v15 = vsel %vm1948_vm1, %v9458_v11, 0.0  ;;  %2684 = vmax.xlane.f32.xlu0 %v2683_v6 }
 0x4b8   : > { %7949 = vpow2.f32 %v2727_v57  ;;  %2762 = vadd.xlane.f32.xlu1 %v2761_v15  ;;  %v2673_v9 = vpop.xlane.xlu2 %2672 }
 0x4b9   : > { %v2707_v37 = vsub.f32 %v9419_v63, %v2673_v9  ;;  %v2686_v63 = vsel %vm1948_vm1, %v9469_v0, -inf }
 0x4bb   : > { %v2729_v33 = vmul.f32 1.442695, %v2707_v37 }
 0x4bd   : > { %7951 = vpow2.f32 %v2729_v33 }
 0x4be   : > { %v9471_v23 = vpop.eup %7949 }
 0x4bf   : > { %v2764_v46 = vsel %vm1948_vm1, %v9471_v23, 0.0  ;;  %2693 = vmax.xlane.f32.xlu0 %v2692_v3 }
 0x4c0   : > { %2765 = vadd.xlane.f32.xlu2 %v2764_v46  ;;  %2687 = vmax.xlane.f32.xlu1 %v2686_v63  ;;  %v2676_v25 = vpop.xlane.xlu0 %2675 }
 0x4c1   : > { %v2708_v52 = vsub.f32 %v9424_v5, %v2676_v25  ;;  %v2689_v5 = vsel %vm1948_vm1, %v9486_v18, -inf }
 0x4c3   : > { %v9483_v39 = vpop.eup %7951  ;;  %v2731_v49 = vmul.f32 1.442695, %v2708_v52 }
 0x4c4   : > { %v2767_v60 = vsel %vm1948_vm1, %v9483_v39, 0.0 }
 0x4c5   : > { %7953 = vpow2.f32 %v2731_v49 }
 0x4c7   : > { %2696 = vmax.xlane.f32.xlu0 %v2695_v19 }
 0x4c8   : > { %2690 = vmax.xlane.f32.xlu2 %v2689_v5  ;;  %2768 = vadd.xlane.f32.xlu1 %v2767_v60  ;;  %v2679_v34 = vpop.xlane.xlu0 %2678 }
 0x4c9   : > { %v2709_v48 = vsub.f32 %v9429_v31, %v2679_v34 }
 0x4cb   : > { %v9495_v22 = vpop.eup %7953  ;;  %v2733_v38 = vmul.f32 1.442695, %v2709_v48 }
 0x4cc   : > { %v2770_v16 = vsel %vm1948_vm1, %v9495_v22, 0.0 }
 0x4cd   : > { %7955 = vpow2.f32 %v2733_v38 }
 0x4d0   : > { %2771 = vadd.xlane.f32.xlu2 %v2770_v16  ;;  %2699 = vmax.xlane.f32.xlu1 %v2698_v41 }
 0x4d3   : > { %v9504_v13 = vpop.eup %7955 }
 0x4d4   : > { %v2773_v31 = vsel %vm1948_vm1, %v9504_v13, 0.0 }
 0x4d8   : > { %2774 = vadd.xlane.f32.xlu2 %v2773_v31 }
 0x512   : > { %v2751_v12 = vpop.xlane.xlu1 %2750 }
 0x513   : > { %7957 = vrcp.f32 %v2751_v12 }
 0x519   : > { %v7958_v59 = vpop.eup %7957 }
 0x51a   : > { %v2682_v55 = vpop.xlane.xlu1 %2681  ;;  %v2754_v51 = vpop.xlane.xlu2 %2753  ;;  %v2813_v6 = vmul.f32 %v7958_v59, %v9433_v54 }
 0x51b   : > { %v2710_v58 = vsub.f32 %v9438_v53, %v2682_v55  ;;  %7959 = vrcp.f32 %v2754_v51 }
 0x51c   : > { %v2829_v9 = vpack.c.bf16 %v2813_v6, %v2813_v6 }
 0x51d   : > { %v2735_v57 = vmul.f32 1.442695, %v2710_v58 }
 0x51e   : > { %v2847_v3 = vunpack.c.l.b16 %v2829_v9 }
 0x51f   : > { %7961 = vpow2.f32 %v2735_v57 }
 0x521   : > { %v7960_v61 = vpop.eup %7959 }
 0x522   : > { %v2760_v15 = vpop.xlane.xlu0 %2759  ;;  %v2814_v37 = vmul.f32 %v7960_v61, %v9440_v30  ;;  %v2757_v20 = vpop.xlane.xlu2 %2756 }
 0x523   : > { %7963 = vrcp.f32 %v2760_v15 }
 0x524   : > { %7965 = vrcp.f32 %v2757_v20  ;;  %v2830_v50 = vpack.c.bf16 %v2814_v37, %v2814_v37 }
 0x525   : > { %v9511_v33 = vpop.eup %7961 }
 0x526   : > { %v2776_v53 = vsel %vm1948_vm1, %v9511_v33, 0.0  ;;  %v2848_v32 = vunpack.c.l.b16 %v2830_v50 }
 0x527   : > { %2777 = vadd.xlane.f32.xlu0 %v2776_v53 }
 0x528   : > { %v2849_v54 = vpack.c.b16 %v2848_v32, %v2847_v3 }
 0x529   : > { %v7964_v46 = vpop.eup %7963 }
 0x52a   : > { %v7966_v63 = vpop.eup %7965  ;;  %v2816_v25 = vmul.f32 %v7964_v46, %v9448_v8  ;;  %v2685_v52 = vpop.xlane.xlu0 %2684  ;;  %6844 = vmatmul.msk.bf16.vlgmr.msrb.gmra.mxu0 %vm1948_vm1, %v2849_v54 }
 0x52b   : > { %v2815_v30 = vmul.f32 %v7966_v63, %v9446_v14  ;;  %v2763_v49 = vpop.xlane.xlu1 %2762  ;;  %v2711_v29 = vsub.f32 %v9455_v43, %v2685_v52 }
 0x52c   : > { %v2832_v60 = vpack.c.bf16 %v2816_v25, %v2816_v25  ;;  %7967 = vrcp.f32 %v2763_v49 }
 0x52d   : > { %v2831_v19 = vpack.c.bf16 %v2815_v30, %v2815_v30  ;;  %v2737_v47 = vmul.f32 1.442695, %v2711_v29 }
 0x52e   : > { %v2876_v5 = vunpack.c.l.b16 %v2832_v60 }
 0x52f   : > { %v2875_v34 = vunpack.c.l.b16 %v2831_v19  ;;  %7969 = vpow2.f32 %v2737_v47 }
 0x531   : > { %v2877_v48 = vpack.c.b16 %v2876_v5, %v2875_v34 }
 0x532   : > { %v2694_v38 = vpop.xlane.xlu0 %2693  ;;  %v7968_v14 = vpop.eup %7967 }
 0x533   : > { %v2688_v16 = vpop.xlane.xlu1 %2687  ;;  %v2766_v41 = vpop.xlane.xlu2 %2765  ;;  %v2714_v8 = vsub.f32 %v9466_v45, %v2694_v38  ;;  %6845 = vmatmul.msk.bf16.vlgmr.msrb.gmra.mxu1 %vm1948_vm1, %v2877_v48  ;;  %v2817_v51 = vmul.f32 %v7968_v14, %v9458_v11  ;;  %v7611_v14 = vld [vmem:[#allocation8 + $0x74] sm:$0xf0] }
 0x534   : > { %v2712_v43 = vsub.f32 %v9469_v0, %v2688_v16  ;;  %7971 = vrcp.f32 %v2766_v41 }
 0x535   : > { %v9522_v31 = vpop.eup %7969  ;;  %v2743_v12 = vmul.f32 1.442695, %v2714_v8  ;;  %v2833_v57 = vpack.c.bf16 %v2817_v51, %v2817_v51  ;;  %v6910_v8 = vld [vmem:[#allocation8 + $0x70] sm:$0xf]  ;;  %v7607_v51 = vld [vmem:[#allocation8 + $0x54] sm:$0xf0] }
 0x536   : > { %v2739_v55 = vmul.f32 1.442695, %v2712_v43  ;;  %v2779_v58 = vsel %vm1948_vm1, %v9522_v31, 0.0  ;;  %v6911_v43 = vor.u32 %v7611_v14, %v6910_v8  ;;  %v6950_v8 = vld [vmem:[#allocation8 + $0xc0] sm:$0xf] }
 0x537   : > { %7973 = vpow2.f32 %v2743_v12  ;;  %2780 = vadd.xlane.f32.xlu1 %v2779_v58  ;;  %v2903_v32 = vunpack.c.l.b16 %v2833_v57  ;;  %v6902_v12 = vld [vmem:[#allocation8 + $0x60] sm:$0xf]  ;;  %v7605_v57 = vld [vmem:[#allocation8 + $0x44] sm:$0xf0] }
 0x538   : > { %7975 = vpow2.f32 %v2739_v55  ;;  %3283 = vmatpush.bf16.msrb.mxu0 %v6911_v43  ;;  %v7609_v55 = vld [vmem:[#allocation8 + $0x64] sm:$0xf0]  ;;  %v7608_v43 = vld [vmem:[#allocation8 + $0x64] sm:$0xf] }
 0x539   : > { %v6903_v58 = vor.u32 %v7609_v55, %v6902_v12  ;;  %v7621_v14 = vld [vmem:[#allocation8 + $0xc4] sm:$0xf0]  ;;  %v6904_v55 = vld [vmem:[#allocation8 + $0x68] sm:$0xf0] }
 0x53a   : > { %v7972_v59 = vpop.eup %7971  ;;  %v2697_v45 = vpop.xlane.xlu0 %2696  ;;  %v6951_v12 = vor.u32 %v7621_v14, %v6950_v8  ;;  %v7613_v8 = vld [vmem:[#allocation8 + $0x84] sm:$0xf0]  ;;  %v7600_v14 = vld [vmem:[#allocation8 + $0x24] sm:$0xf] }
 0x53b   : > { %v2818_v6 = vmul.f32 %v7972_v59, %v9471_v23  ;;  %v2769_v61 = vpop.xlane.xlu1 %2768  ;;  %v2691_v0 = vpop.xlane.xlu2 %2690  ;;  %v2715_v15 = vsub.f32 %v9481_v42, %v2697_v45  ;;  %v6886_v45 = vld [vmem:[#allocation8 + $0x40] sm:$0xf] }
 0x53c   : > { %v2713_v9 = vsub.f32 %v9486_v18, %v2691_v0  ;;  %7977 = vrcp.f32 %v2769_v61  ;;  %3284 = vmatpush.bf16.msrb.mxu0 %v6903_v58  ;;  %v6878_v61 = vld [vmem:[#allocation8 + $0x30] sm:$0xf]  ;;  %v7603_v0 = vld [vmem:[#allocation8 + $0x34] sm:$0xf0]  ;;  %v6907_v58 = vor.u32 %v7608_v43, %v6904_v55  ;;  %v7620_v55 = vld [vmem:[#allocation8 + $0xc4] sm:$0xf] }
 0x53d   : > { %v9530_v37 = vpop.eup %7973  ;;  %v2834_v20 = vpack.c.bf16 %v2818_v6, %v2818_v6  ;;  %v2745_v50 = vmul.f32 1.442695, %v2715_v15  ;;  %v6887_v6 = vor.u32 %v7605_v57, %v6886_v45  ;;  %v6879_v15 = vor.u32 %v7603_v0, %v6878_v61  ;;  %v6942_v45 = vld [vmem:[#allocation8 + $0xb0] sm:$0xf]  ;;  %v7619_v57 = vld [vmem:[#allocation8 + $0xb4] sm:$0xf0] }
 0x53e   : > { %v9532_v53 = vpop.eup %7975  ;;  %v2741_v11 = vmul.f32 1.442695, %v2713_v9  ;;  %v2788_v3 = vsel %vm1948_vm1, %v9530_v37, 0.0  ;;  %v6870_v9 = vld [vmem:[#allocation8 + $0x20] sm:$0xf]  ;;  %v6943_v61 = vor.u32 %v7619_v57, %v6942_v45 }
 0x53f   : > { %v2904_v46 = vunpack.c.l.b16 %v2834_v20  ;;  %7979 = vpow2.f32 %v2745_v50  ;;  %v2782_v23 = vsel %vm1948_vm1, %v9532_v53, 0.0  ;;  %2789 = vadd.xlane.f32.xlu1 %v2788_v3  ;;  %v7601_v20 = vld [vmem:[#allocation8 + $0x24] sm:$0xf0]  ;;  %v6974_v3 = vld [vmem:[#allocation8 + $0xf0] sm:$0xf] }
 0x540   : > { %7981 = vpow2.f32 %v2741_v11  ;;  %2783 = vadd.xlane.f32.xlu2 %v2782_v23  ;;  %v6871_v50 = vor.u32 %v7601_v20, %v6870_v9  ;;  %v6862_v23 = vld [vmem:[#allocation8 + $0x10] sm:$0xf]  ;;  %v6896_v0 = vld [vmem:[#allocation8 + $0x58] sm:$0xf0]  ;;  %v7618_v57 = vld [vmem:[#allocation8 + $0xb4] sm:$0xf] }
 0x541   : > { %v2905_v42 = vpack.c.b16 %v2904_v46, %v2903_v32  ;;  %v7627_v32 = vld [vmem:[#allocation8 + $0xf4] sm:$0xf0]  ;;  %v6864_v45 = vld [vmem:[#allocation8 + $0x18] sm:$0xf0] }
 0x542   : > { %v7978_v63 = vpop.eup %7977  ;;  %v6975_v46 = vor.u32 %v7627_v32, %v6974_v3  ;;  %v6934_v32 = vld [vmem:[#allocation8 + $0xa0] sm:$0xf] }
 0x543   : > { %v2700_v18 = vpop.xlane.xlu1 %2699  ;;  %6846 = vmatmul.msk.bf16.vlgmr.msrb.gmra.mxu2 %vm1948_vm1, %v2905_v42  ;;  %v2772_v54 = vpop.xlane.xlu2 %2771  ;;  %v2819_v60 = vmul.f32 %v7978_v63, %v9483_v39  ;;  %v7599_v42 = vld [vmem:[#allocation8 + $0x14] sm:$0xf0]  ;;  %v7625_v63 = vld [vmem:[#allocation8 + $0xe4] sm:$0xf0] }
 0x544   : > { %v2716_v25 = vsub.f32 %v9498_v35, %v2700_v18  ;;  %7983 = vrcp.f32 %v2772_v54  ;;  %3332 = vmatpush.bf16.msrb.mxu1 %v6975_v46  ;;  %v6863_v18 = vor.u32 %v7599_v42, %v6862_v23  ;;  %v6966_v54 = vld [vmem:[#allocation8 + $0xe0] sm:$0xf]  ;;  %v7617_v46 = vld [vmem:[#allocation8 + $0xa4] sm:$0xf0]  ;;  %v7604_v23 = vld [vmem:[#allocation8 + $0x44] sm:$0xf] }
 0x545   : > { %v9540_v52 = vpop.eup %7979  ;;  %v2835_v5 = vpack.c.bf16 %v2819_v60, %v2819_v60  ;;  %v6888_v42 = vld [vmem:[#allocation8 + $0x48] sm:$0xf0] }
 0x546   : > { %v9542_v30 = vpop.eup %7981  ;;  %v2747_v49 = vmul.f32 1.442695, %v2716_v25  ;;  %v2791_v29 = vsel %vm1948_vm1, %v9540_v52, 0.0  ;;  %v6967_v25 = vor.u32 %v7625_v63, %v6966_v54  ;;  %v6968_v54 = vld [vmem:[#allocation8 + $0xe8] sm:$0xf0] }
 0x547   : > { %v2785_v19 = vsel %vm1948_vm1, %v9542_v30, 0.0  ;;  %v2931_v38 = vunpack.c.l.b16 %v2835_v5  ;;  %v7623_v5 = vld [vmem:[#allocation8 + $0xd4] sm:$0xf0] }
 0x548   : > { %7985 = vpow2.f32 %v2747_v49  ;;  %2786 = vadd.xlane.f32.xlu0 %v2785_v19  ;;  %2792 = vadd.xlane.f32.xlu2 %v2791_v29  ;;  %v6854_v49 = vld [vmem:[#allocation8] sm:$0xf]  ;;  %v7597_v29 = vld [vmem:[#allocation8 + $0x4] sm:$0xf0] }
 0x549   : > { %3333 = vmatpush.bf16.msrb.mxu1 %v6967_v25  ;;  %v6855_v60 = vor.u32 %v7597_v29, %v6854_v49  ;;  %v6891_v25 = vor.u32 %v7604_v23, %v6888_v42  ;;  %v3069_v23 = vpack.c.bf16 %v9375_v40, %v9371_v28 }
 0x54a   : > { %v7984_v47 = vpop.eup %7983 }
 0x54b   : > { %v2820_v35 = vmul.f32 %v7984_v47, %v9495_v22  ;;  %v6894_v22 = vld [vmem:[#allocation8 + $0x50] sm:$0xf]  ;;  %v2775_v11 = vpop.xlane.xlu2 %2774 }
 0x54c   : > { %v6895_v59 = vor.u32 %v7607_v51, %v6894_v22  ;;  %7987 = vrcp.f32 %v2775_v11  ;;  %v6958_v47 = vld [vmem:[#allocation8 + $0xd0] sm:$0xf] }
 0x54d   : > { %v2836_v34 = vpack.c.bf16 %v2820_v35, %v2820_v35  ;;  %v7610_v35 = vld [vmem:[#allocation8 + $0x74] sm:$0xf] }
 0x54e   : > { %v9550_v48 = vpop.eup %7985  ;;  %3285 = vmatpush.bf16.msrb.mxu0 %v6895_v59 }
 0x54f   : > { %v2932_v16 = vunpack.c.l.b16 %v2836_v34  ;;  %v2794_v41 = vsel %vm1948_vm1, %v9550_v48, 0.0 }
 0x550   : > { %2795 = vadd.xlane.f32.xlu0 %v2794_v41 }
 0x551   : > { %v2933_v39 = vpack.c.b16 %v2932_v16, %v2931_v38  ;;  %v6959_v38 = vor.u32 %v7623_v5, %v6958_v47  ;;  %v6912_v16 = vld [vmem:[#allocation8 + $0x78] sm:$0xf0]  ;;  %v7602_v47 = vld [vmem:[#allocation8 + $0x34] sm:$0xf] }
 0x552   : > { %3286 = vmatpush.bf16.msrb.mxu0 %v6887_v6  ;;  %v7988_v34 = vpop.eup %7987  ;;  %v6915_v41 = vor.u32 %v7610_v35, %v6912_v16  ;;  %v7606_v6 = vld [vmem:[#allocation8 + $0x54] sm:$0xf]  ;;  %v6880_v35 = vld [vmem:[#allocation8 + $0x38] sm:$0xf0] }
 0x553   : > { %6847 = vmatmul.msk.bf16.vlgmr.msrb.gmra.mxu3 %vm1948_vm1, %v2933_v39  ;;  %3334 = vmatpush.bf16.msrb.mxu1 %v6959_v38  ;;  %v2821_v39 = vmul.f32 %v7988_v34, %v9504_v13  ;;  %v6976_v13 = vld [vmem:[#allocation8 + $0xf8] sm:$0xf0]  ;;  %v6899_v20 = vor.u32 %v7606_v6, %v6896_v0  ;;  %v7622_v34 = vld [vmem:[#allocation8 + $0xd4] sm:$0xf]  ;;  %v6883_v16 = vor.u32 %v7602_v47, %v6880_v35  ;;  %v7612_v47 = vld [vmem:[#allocation8 + $0x84] sm:$0xf] }
 0x554   : > { %3381 = vmatpush.bf16.msrb.mxu2 %v6915_v41  ;;  %v6960_v38 = vld [vmem:[#allocation8 + $0xd8] sm:$0xf0] }
 0x555   : > { %v2837_v51 = vpack.c.bf16 %v2821_v39, %v2821_v39  ;;  %v6963_v41 = vor.u32 %v7622_v34, %v6960_v38  ;;  %v6918_v39 = vld [vmem:[#allocation8 + $0x80] sm:$0xf] }
 0x556   : > { %3287 = vmatpush.bf16.msrb.mxu0 %v6879_v15  ;;  %v7626_v15 = vld [vmem:[#allocation8 + $0xf4] sm:$0xf]  ;;  %v6919_v43 = vor.u32 %v7613_v8, %v6918_v39 }
 0x557   : > { %3335 = vmatpush.bf16.msrb.mxu1 %v6951_v12  ;;  %v2959_v11 = vunpack.c.l.b16 %v2837_v51  ;;  %v6872_v12 = vld [vmem:[#allocation8 + $0x28] sm:$0xf0] }
 0x558   : > { %3382 = vmatpush.bf16.msrb.mxu2 %v6907_v58  ;;  %v6952_v58 = vld [vmem:[#allocation8 + $0xc8] sm:$0xf0] }
 0x559   : > { %v6955_v51 = vor.u32 %v7620_v55, %v6952_v58 }
 0x55a   : > { %3288 = vmatpush.bf16.msrb.mxu0 %v6871_v50  ;;  %v6979_v50 = vor.u32 %v7626_v15, %v6976_v13  ;;  %v6944_v15 = vld [vmem:[#allocation8 + $0xb8] sm:$0xf0] }
 0x55b   : > { %3336 = vmatpush.bf16.msrb.mxu1 %v6943_v61 }
 0x55c   : > { %3383 = vmatpush.bf16.msrb.mxu2 %v6899_v20  ;;  %3430 = vmatpush.bf16.msrb.mxu3 %v6979_v50  ;;  %v7596_v20 = vld [vmem:[#allocation8 + $0x4] sm:$0xf]  ;;  %v6856_v50 = vld [vmem:[#allocation8 + $0x8] sm:$0xf0] }
 0x55e   : > { %3289 = vmatpush.bf16.msrb.mxu0 %v6863_v18  ;;  %v7624_v18 = vld [vmem:[#allocation8 + $0xe4] sm:$0xf] }
 0x55f   : > { %v6971_v49 = vor.u32 %v7624_v18, %v6968_v54  ;;  %v7614_v18 = vld [vmem:[#allocation8 + $0x94] sm:$0xf]  ;;  %v6928_v54 = vld [vmem:[#allocation8 + $0x98] sm:$0xf0] }
 0x560   : > { %3384 = vmatpush.bf16.msrb.mxu2 %v6891_v25 }
 0x561   : > { %3431 = vmatpush.bf16.msrb.mxu3 %v6971_v49 }
 0x562   : > { %3290 = vmatpush.bf16.msrb.mxu0 %v6855_v60  ;;  %v6926_v60 = vld [vmem:[#allocation8 + $0x90] sm:$0xf] }
 0x564   : > { %3385 = vmatpush.bf16.msrb.mxu2 %v6883_v16 }
 0x565   : > { %3432 = vmatpush.bf16.msrb.mxu3 %v6963_v41 }
 0x569   : > { %3433 = vmatpush.bf16.msrb.mxu3 %v6955_v51 }
 0x59a   : > { %v2778_v19 = vpop.xlane.xlu0 %2777 }
 0x59b   : > { %7989 = vrcp.f32 %v2778_v19  ;;  %v7615_v19 = vld [vmem:[#allocation8 + $0x94] sm:$0xf0] }
 0x59c   : > { %v6927_v5 = vor.u32 %v7615_v19, %v6926_v60  ;;  %v6931_v60 = vor.u32 %v7614_v18, %v6928_v54 }
 0x5a1   : > { %v7990_v22 = vpop.eup %7989 }
 0x5a2   : > { %v2822_v59 = vmul.f32 %v7990_v22, %v9511_v33  ;;  %v6935_v33 = vor.u32 %v7617_v46, %v6934_v32  ;;  %v6875_v22 = vor.u32 %v7600_v14, %v6872_v12  ;;  %v6859_v32 = vor.u32 %v7596_v20, %v6856_v50  ;;  %v6936_v46 = vld [vmem:[#allocation8 + $0xa8] sm:$0xf0] }
 0x5a4   : > { %v2838_v9 = vpack.c.bf16 %v2822_v59, %v2822_v59  ;;  %3337 = vmatpush.bf16.msrb.mxu1 %v6935_v33  ;;  %3386 = vmatpush.bf16.msrb.mxu2 %v6875_v22  ;;  %v7598_v59 = vld [vmem:[#allocation8 + $0x14] sm:$0xf] }
 0x5a5   : > { %v6867_v0 = vor.u32 %v7598_v59, %v6864_v45 }
 0x5a6   : > { %v2960_v3 = vunpack.c.l.b16 %v2838_v9  ;;  %v6947_v9 = vor.u32 %v7618_v57, %v6944_v15 }
 0x5a7   : > { %v2868_v14 = vpop.f32.mrf.mxu0 }
 0x5a8   : > { %v2961_v63 = vpack.c.b16 %v2960_v3, %v2959_v11  ;;  %3338 = vmatpush.bf16.msrb.mxu1 %v6927_v5  ;;  %3387 = vmatpush.bf16.msrb.mxu2 %v6867_v0  ;;  %v7616_v11 = vld [vmem:[#allocation8 + $0xa4] sm:$0xf]  ;;  %v6920_v5 = vld [vmem:[#allocation8 + $0x88] sm:$0xf0] }
 0x5a9   : > { %3434 = vmatpush.bf16.msrb.mxu3 %v6947_v9  ;;  %v6939_v33 = vor.u32 %v7616_v11, %v6936_v46  ;;  %v6923_v34 = vor.u32 %v7612_v47, %v6920_v5  ;;  %v3075_v9 = vpack.c.bf16 %v9401_v36, %v9393_v62  ;;  %v3081_v62 = vpack.c.bf16 %v9403_v17, %v9395_v7 }
 0x5aa   : > { %v2781_v29 = vpop.xlane.xlu1 %2780  ;;  %6848 = vmatmul.msk.bf16.vlgmr.msra.gmra.mxu0 %vm1948_vm1, %v2961_v63 }
 0x5ab   : > { %7991 = vrcp.f32 %v2781_v29 }
 0x5ac   : > { %3339 = vmatpush.bf16.msrb.mxu1 %v6919_v43  ;;  %3388 = vmatpush.bf16.msrb.mxu2 %v6859_v32  ;;  %v3079_v32 = vpack.c.bf16 %v9387_v44, %v9383_v10 }
 0x5ad   : > { %3435 = vmatpush.bf16.msrb.mxu3 %v6939_v33 }
 0x5af   : > { %v2870_v57 = vpop.f32.mrf.mxu0 }
 0x5b0   : > { %v3070_v0 = vpack.c.bf16 %v2870_v57, %v2868_v14 }
 0x5b1   : > { %v7992_v13 = vpop.eup %7991  ;;  %3436 = vmatpush.bf16.msrb.mxu3 %v6931_v60 }
 0x5b2   : > { %v2790_v61 = vpop.xlane.xlu1 %2789  ;;  %v2823_v3 = vmul.f32 %v7992_v13, %v9522_v31 }
 0x5b3   : > { %v2784_v6 = vpop.xlane.xlu2 %2783 }
 0x5b4   : > { %7993 = vrcp.f32 %v2784_v6  ;;  %v2839_v63 = vpack.c.bf16 %v2823_v3, %v2823_v3 }
 0x5b5   : > { %7995 = vrcp.f32 %v2790_v61  ;;  %3437 = vmatpush.bf16.msrb.mxu3 %v6923_v34  ;;  %v8070_v34 = vld [vmem:[%s8593_s24] sm:$0xff] }
 0x5b6   : > { %v2987_v28 = vunpack.c.l.b16 %v2839_v63 }
 0x5ba   : > { %v7994_v42 = vpop.eup %7993  ;;  %3291 = vmatmul.bf16.vlgmr.msrb.gmra.mxu0 %v3069_v23 }
 0x5bb   : > { %v2824_v25 = vmul.f32 %v7994_v42, %v9532_v53  ;;  %v2787_v49 = vpop.xlane.xlu0 %2786  ;;  %v2793_v29 = vpop.xlane.xlu2 %2792 }
 0x5bc   : > { %v7996_v31 = vpop.eup %7995  ;;  %7997 = vrcp.f32 %v2787_v49 }
 0x5bd   : > { %v2840_v19 = vpack.c.bf16 %v2824_v25, %v2824_v25  ;;  %7999 = vrcp.f32 %v2793_v29  ;;  %v2826_v35 = vmul.f32 %v7996_v31, %v9530_v37  ;;  %v3071_v37 = vpack.c.bf16 %v9377_v2, %v9373_v1 }
 0x5be   : > { %v3073_v1 = vpack.c.bf16 %v9389_v21, %v9385_v24  ;;  %v3077_v24 = vpack.c.bf16 %v9381_v26, %v9379_v4  ;;  %v3083_v4 = vpack.c.bf16 %v9411_v56, %v9407_v27  ;;  %v3117_v56 = vld [vmem:[#allocation13] ss:$8 sm:$0x3] }
 0x5bf   : > { %v2988_v40 = vunpack.c.l.b16 %v2840_v19  ;;  %v2842_v41 = vpack.c.bf16 %v2826_v35, %v2826_v35  ;;  %v9583_v25 = vperm.slane %v3117_v56, 0  ;;  %v9586_v31 = vperm.slane %v3117_v56, 1  ;;  %v8077_v56 = vld [vmem:[%s8593_s24 + $0x38] sm:$0xff] }
 0x5c1   : > { %v2989_v38 = vpack.c.b16 %v2988_v40, %v2987_v28  ;;  %v3016_v12 = vunpack.c.l.b16 %v2842_v41 }
 0x5c2   : > { %v7998_v16 = vpop.eup %7997 }
 0x5c3   : > { %v2825_v53 = vmul.f32 %v7998_v16, %v9542_v30  ;;  %v2796_v39 = vpop.xlane.xlu0 %2795  ;;  %6849 = vmatmul.msk.bf16.vlgmr.msra.gmra.mxu1 %vm1948_vm1, %v2989_v38  ;;  %v8000_v8 = vpop.eup %7999 }
 0x5c4   : > { %8001 = vrcp.f32 %v2796_v39  ;;  %v2827_v58 = vmul.f32 %v8000_v8, %v9540_v52  ;;  %v2896_v52 = vpop.f32.mrf.mxu1  ;;  %v8071_v39 = vld [vmem:[%s8593_s24 + $0x8] sm:$0xff] }
 0x5c5   : > { %v2841_v43 = vpack.c.bf16 %v2825_v53, %v2825_v53 }
 0x5c6   : > { %v2843_v59 = vpack.c.bf16 %v2827_v58, %v2827_v58 }
 0x5c7   : > { %v3015_v55 = vunpack.c.l.b16 %v2841_v43 }
 0x5c8   : > { %v3043_v6 = vunpack.c.l.b16 %v2843_v59 }
 0x5c9   : > { %v3017_v22 = vpack.c.b16 %v3016_v12, %v3015_v55 }
 0x5ca   : > { %v8002_v51 = vpop.eup %8001  ;;  %3296 = vmatmul.bf16.gmra.mxu0 %v3071_v37 }
 0x5cb   : > { %v2828_v30 = vmul.f32 %v8002_v51, %v9550_v48  ;;  %6850 = vmatmul.msk.bf16.vlgmr.msra.gmra.mxu2 %vm1948_vm1, %v3017_v22  ;;  %v2924_v48 = vpop.f32.mrf.mxu2 }
 0x5cc   : > { %v2898_v2 = vpop.f32.mrf.mxu1 }
 0x5cd   : > { %v2844_v45 = vpack.c.bf16 %v2828_v30, %v2828_v30  ;;  %v3072_v13 = vpack.c.bf16 %v2898_v2, %v2896_v52  ;;  %v8072_v30 = vld [vmem:[%s8593_s24 + $0x10] sm:$0xff] }
 0x5cf   : > { %v3044_v61 = vunpack.c.l.b16 %v2844_v45 }
 0x5d1   : > { %v3045_v15 = vpack.c.b16 %v3044_v61, %v3043_v6 }
 0x5d3   : > { %6851 = vmatmul.msk.bf16.vlgmr.msra.gmra.mxu3 %vm1948_vm1, %v3045_v15  ;;  %3340 = vmatmul.bf16.vlgmr.msrb.gmra.mxu1 %v3070_v0  ;;  %v2926_v20 = vpop.f32.mrf.mxu2 }
 0x5d4   : > { %v3074_v50 = vpack.c.bf16 %v2926_v20, %v2924_v48 }
 0x5d6   : > { %v2952_v11 = vpop.f32.mrf.mxu3 }
 0x5da   : > { %3301 = vmatmul.bf16.gmra.mxu0 %v3073_v1 }
 0x5db   : > { %3389 = vmatmul.bf16.vlgmr.msrb.gmra.mxu2 %v3069_v23 }
 0x5de   : > { %v2954_v21 = vpop.f32.mrf.mxu3 }
 0x5df   : > { %v3076_v3 = vpack.c.bf16 %v2954_v21, %v2952_v11  ;;  %v8074_v11 = vld [vmem:[%s8593_s24 + $0x20] sm:$0xff] }
 0x5e3   : > { %3345 = vmatmul.bf16.gmra.mxu1 %v3072_v13  ;;  %3438 = vmatmul.bf16.vlgmr.msrb.gmra.mxu3 %v3070_v0  ;;  %v8073_v0 = vld [vmem:[%s8593_s24 + $0x18] sm:$0xff] }
 0x5ea   : > { %3306 = vmatmul.bf16.gmra.mxu0 %v3075_v9 }
 0x5eb   : > { %3394 = vmatmul.bf16.gmra.mxu2 %v3071_v37 }
 0x5f3   : > { %3350 = vmatmul.bf16.gmra.mxu1 %v3074_v50  ;;  %3443 = vmatmul.bf16.gmra.mxu3 %v3072_v13 }
 0x5fa   : > { %3311 = vmatmul.bf16.gmra.mxu0 %v3077_v24 }
 0x5fb   : > { %3399 = vmatmul.bf16.gmra.mxu2 %v3073_v1 }
 0x603   : > { %3355 = vmatmul.bf16.gmra.mxu1 %v3076_v3  ;;  %3448 = vmatmul.bf16.gmra.mxu3 %v3074_v50 }
 0x60a   : > { %3316 = vmatmul.bf16.gmra.mxu0 %v3079_v32 }
 0x60b   : > { %3404 = vmatmul.bf16.gmra.mxu2 %v3075_v9 }
 0x613   : > { %3453 = vmatmul.bf16.gmra.mxu3 %v3076_v3 }
 0x61a   : > { %3321 = vmatmul.bf16.gmra.mxu0 %v3081_v62 }
 0x61b   : > { %3409 = vmatmul.bf16.gmra.mxu2 %v3077_v24 }
 0x627   : > { %v2980_v36 = vpop.f32.mrf.mxu0 }
 0x62a   : > { %3326 = vmatmul.bf16.gmra.mxu0 %v3083_v4 }
 0x62b   : > { %3414 = vmatmul.bf16.gmra.mxu2 %v3079_v32 }
 0x62f   : > { %v2982_v26 = vpop.f32.mrf.mxu0 }
 0x630   : > { %v3078_v46 = vpack.c.bf16 %v2982_v26, %v2980_v36 }
 0x632   : > { %3360 = vmatmul.bf16.gmra.mxu1 %v3078_v46  ;;  %3458 = vmatmul.bf16.gmra.mxu3 %v3078_v46 }
 0x637   : > { %v3292_v17 = vpop.f32.mrf.mxu0 }
 0x638   : > { %v3293_v60 = vadd.f32 %v3292_v17, %v9583_v25 }
 0x63b   : > { %3419 = vmatmul.bf16.gmra.mxu2 %v3081_v62  ;;  %v8075_v62 = vld [vmem:[%s8593_s24 + $0x28] sm:$0xff] }
 0x63f   : > { %v3294_v54 = vpop.f32.mrf.mxu0 }
 0x640   : > { %v3008_v10 = vpop.f32.mrf.mxu1  ;;  %v3295_v41 = vadd.f32 %v3294_v54, %v9583_v25 }
 0x647   : > { %v3297_v19 = vpop.f32.mrf.mxu0 }
 0x648   : > { %v3010_v44 = vpop.f32.mrf.mxu1  ;;  %v3298_v61 = vadd.f32 %v3297_v19, %v9583_v25 }
 0x649   : > { %v3080_v23 = vpack.c.bf16 %v3010_v44, %v3008_v10 }
 0x64b   : > { %3365 = vmatmul.bf16.gmra.mxu1 %v3080_v23  ;;  %3424 = vmatmul.bf16.gmra.mxu2 %v3083_v4 }
 0x64c   : > { %3463 = vmatmul.bf16.gmra.mxu3 %v3080_v23 }
 0x64e   : > { %v3036_v7 = vpop.f32.mrf.mxu2 }
 0x64f   : > { %v3299_v58 = vpop.f32.mrf.mxu0 }
 0x650   : > { %v3341_v33 = vpop.f32.mrf.mxu1  ;;  %v3300_v32 = vadd.f32 %v3299_v58, %v9583_v25 }
 0x651   : > { %v3342_v47 = vadd.f32 %v3341_v33, %v3293_v60 }
 0x653   : > { %v9590_v38 = vadd.f32 %v8070_v34, %v3342_v47 }
 0x655   : > { %v3582_v12 = vmul.f32 %v9590_v38, %v9590_v38 }
 0x656   : > { %v3038_v42 = vpop.f32.mrf.mxu2  ;;  %v3064_v18 = vpop.f32.mrf.mxu3 }
 0x657   : > { %v3082_v27 = vpack.c.bf16 %v3038_v42, %v3036_v7  ;;  %v3302_v3 = vpop.f32.mrf.mxu0  ;;  %v8076_v42 = vld [vmem:[%s8593_s24 + $0x30] sm:$0xff] }
 0x658   : > { %v3343_v63 = vpop.f32.mrf.mxu1 }
 0x659   : > { %v3344_v14 = vadd.f32 %v3343_v63, %v3295_v41 }
 0x65b   : > { %3370 = vmatmul.bf16.gmra.mxu1 %v3082_v27  ;;  %v9604_v45 = vadd.f32 %v8072_v30, %v3344_v14  ;;  %v8079_v14 = vld [vmem:[%s8593_s24 + $0x48] sm:$0xff] }
 0x65c   : > { %3468 = vmatmul.bf16.gmra.mxu3 %v3082_v27  ;;  %v3303_v27 = vadd.f32 %v3302_v3, %v9583_v25 }
 0x65d   : > { %v3584_v2 = vmul.f32 %v9604_v45, %v9604_v45 }
 0x65e   : > { %v3066_v49 = vpop.f32.mrf.mxu3  ;;  %v3390_v29 = vpop.f32.mrf.mxu2 }
 0x65f   : > { %v3391_v5 = vadd.f32 %v3390_v29, %v9586_v31  ;;  %v3084_v53 = vpack.c.bf16 %v3066_v49, %v3064_v18  ;;  %v3304_v49 = vpop.f32.mrf.mxu0 }
 0x660   : > { %v3346_v28 = vpop.f32.mrf.mxu1 }
 0x661   : > { %v3347_v52 = vadd.f32 %v3346_v28, %v3298_v61 }
 0x663   : > { %v9618_v24 = vadd.f32 %v8074_v11, %v3347_v52 }
 0x665   : > { %v3586_v10 = vmul.f32 %v9618_v24, %v9618_v24 }
 0x666   : > { %v3392_v40 = vpop.f32.mrf.mxu2  ;;  %v3439_v35 = vpop.f32.mrf.mxu3 }
 0x667   : > { %v3440_v16 = vadd.f32 %v3439_v35, %v3391_v5  ;;  %v3393_v37 = vadd.f32 %v3392_v40, %v9586_v31 }
 0x668   : > { %v3348_v6 = vpop.f32.mrf.mxu1 }
 0x669   : > { %v9594_v8 = vadd.f32 %v8071_v39, %v3440_v16  ;;  %v3349_v26 = vadd.f32 %v3348_v6, %v3300_v32  ;;  %v8078_v16 = vld [vmem:[%s8593_s24 + $0x40] sm:$0xff]  ;;  %v3305_v39 = vadd.f32 %v3304_v49, %v9583_v25  ;;  %v8080_v6 = vld [vmem:[%s8593_s24 + $0x50] sm:$0xff] }
 0x66b   : > { %3375 = vmatmul.bf16.gmra.mxu1 %v3084_v53  ;;  %v3511_v43 = vadd.f32 %v9594_v8, %v9590_v38  ;;  %v3583_v55 = vmul.f32 %v9594_v8, %v9594_v8  ;;  %v9632_v18 = vadd.f32 %v8076_v42, %v3349_v26 }
 0x66c   : > { %3473 = vmatmul.bf16.gmra.mxu3 %v3084_v53 }
 0x66d   : > { %3512 = vadd.xlane.f32.xlu1 %v3511_v43  ;;  %v3614_v22 = vadd.f32 %v3583_v55, %v3582_v12  ;;  %v3588_v19 = vmul.f32 %v9632_v18, %v9632_v18 }
 0x66e   : > { %v3395_v51 = vpop.f32.mrf.mxu2  ;;  %v3441_v59 = vpop.f32.mrf.mxu3 }
 0x66f   : > { %v3442_v57 = vadd.f32 %v3441_v59, %v3393_v37  ;;  %3615 = vadd.xlane.f32.xlu0 %v3614_v22  ;;  %v3396_v48 = vadd.f32 %v3395_v51, %v9586_v31  ;;  %v3307_v22 = vpop.f32.mrf.mxu0 }
 0x670   : > { %v3351_v4 = vpop.f32.mrf.mxu1 }
 0x671   : > { %v9608_v15 = vadd.f32 %v8073_v0, %v3442_v57  ;;  %v3352_v29 = vadd.f32 %v3351_v4, %v3303_v27 }
 0x673   : > { %v3514_v1 = vadd.f32 %v9608_v15, %v9604_v45  ;;  %v3585_v13 = vmul.f32 %v9608_v15, %v9608_v15  ;;  %v9646_v41 = vadd.f32 %v8078_v16, %v3352_v29  ;;  %v8084_v29 = vld [vmem:[%s8593_s24 + $0x70] sm:$0xff] }
 0x675   : > { %3515 = vadd.xlane.f32.xlu2 %v3514_v1  ;;  %v3617_v9 = vadd.f32 %v3585_v13, %v3584_v2  ;;  %v3590_v58 = vmul.f32 %v9646_v41, %v9646_v41  ;;  %v3308_v1 = vadd.f32 %v3307_v22, %v9583_v25  ;;  %v8081_v2 = vld [vmem:[%s8593_s24 + $0x58] sm:$0xff] }
 0x676   : > { %v3397_v20 = vpop.f32.mrf.mxu2  ;;  %v3444_v50 = vpop.f32.mrf.mxu3 }
 0x677   : > { %v3445_v21 = vadd.f32 %v3444_v50, %v3396_v48  ;;  %3618 = vadd.xlane.f32.xlu1 %v3617_v9  ;;  %v3398_v23 = vadd.f32 %v3397_v20, %v9586_v31  ;;  %v3309_v3 = vpop.f32.mrf.mxu0 }
 0x678   : > { %v3353_v5 = vpop.f32.mrf.mxu1 }
 0x679   : > { %v9622_v36 = vadd.f32 %v8075_v62, %v3445_v21  ;;  %v3354_v12 = vadd.f32 %v3353_v5, %v3305_v39  ;;  %v8082_v62 = vld [vmem:[%s8593_s24 + $0x60] sm:$0xff]  ;;  %v7096_v39 = vld [vmem:[#allocation10 + $0xf0] sm:$0xf0] }
 0x67b   : > { %v3517_v46 = vadd.f32 %v9622_v36, %v9618_v24  ;;  %v3587_v44 = vmul.f32 %v9622_v36, %v9622_v36  ;;  %v9660_v61 = vadd.f32 %v8080_v6, %v3354_v12 }
 0x67d   : > { %3518 = vadd.xlane.f32.xlu2 %v3517_v46  ;;  %v3620_v7 = vadd.f32 %v3587_v44, %v3586_v10  ;;  %v3592_v20 = vmul.f32 %v9660_v61, %v9660_v61  ;;  %v3310_v10 = vadd.f32 %v3309_v3, %v9583_v25  ;;  %v8083_v44 = vld [vmem:[%s8593_s24 + $0x68] sm:$0xff] }
 0x67e   : > { %v3400_v17 = vpop.f32.mrf.mxu2  ;;  %v3446_v33 = vpop.f32.mrf.mxu3 }
 0x67f   : > { %v3447_v54 = vadd.f32 %v3446_v33, %v3398_v23  ;;  %3621 = vadd.xlane.f32.xlu1 %v3620_v7  ;;  %v3401_v28 = vadd.f32 %v3400_v17, %v9586_v31  ;;  %v3312_v16 = vpop.f32.mrf.mxu0 }
 0x680   : > { %v3356_v30 = vpop.f32.mrf.mxu1 }
 0x681   : > { %v9636_v63 = vadd.f32 %v8077_v56, %v3447_v54  ;;  %v3357_v48 = vadd.f32 %v3356_v30, %v3308_v1 }
 0x683   : > { %v3520_v60 = vadd.f32 %v9636_v63, %v9632_v18  ;;  %v3589_v47 = vmul.f32 %v9636_v63, %v9636_v63  ;;  %v9674_v4 = vadd.f32 %v8082_v62, %v3357_v48  ;;  %v8087_v62 = vld [vmem:[%s8593_s24 + $0x88] sm:$0xff] }
 0x685   : > { %3521 = vadd.xlane.f32.xlu0 %v3520_v60  ;;  %v3623_v40 = vadd.f32 %v3589_v47, %v3588_v19  ;;  %v3594_v42 = vmul.f32 %v9674_v4, %v9674_v4  ;;  %v8085_v47 = vld [vmem:[%s8593_s24 + $0x78] sm:$0xff] }
 0x686   : > { %v3402_v35 = vpop.f32.mrf.mxu2  ;;  %v3449_v34 = vpop.f32.mrf.mxu3 }
 0x687   : > { %v3450_v53 = vadd.f32 %v3449_v34, %v3401_v28  ;;  %3624 = vadd.xlane.f32.xlu2 %v3623_v40  ;;  %v3403_v51 = vadd.f32 %v3402_v35, %v9586_v31 }
 0x688   : > { %v3358_v46 = vpop.f32.mrf.mxu1 }
 0x689   : > { %v9650_v43 = vadd.f32 %v8079_v14, %v3450_v53  ;;  %v3359_v17 = vadd.f32 %v3358_v46, %v3310_v10  ;;  %v7656_v53 = vld [vmem:[#allocation10 + $0xe4] sm:$0xf] }
 0x68a   : > { %v7688_v14 = vld [vmem:[#allocation10 + $0x1e4] sm:$0xf]  ;;  %v7099_v12 = vor.u32 %v7656_v53, %v7096_v39  ;;  %v8089_v39 = vld [vmem:[%s8593_s24 + $0x98] sm:$0xff] }
 0x68b   : > { %v3523_v55 = vadd.f32 %v9650_v43, %v9646_v41  ;;  %v3591_v37 = vmul.f32 %v9650_v43, %v9650_v43  ;;  %v9688_v60 = vadd.f32 %v8084_v29, %v3359_v17  ;;  %v7652_v17 = vld [vmem:[#allocation10 + $0xc4] sm:$0xf]  ;;  %v7078_v29 = vld [vmem:[#allocation10 + $0xc0] sm:$0xf] }
 0x68c   : > { %4536 = vmatpush.bf16.msra.mxu2 %v7099_v12 }
 0x68d   : > { %3524 = vadd.xlane.f32.xlu0 %v3523_v55  ;;  %v3626_v59 = vadd.f32 %v3591_v37, %v3590_v58  ;;  %v3596_v40 = vmul.f32 %v9688_v60, %v9688_v60  ;;  %v7224_v55 = vld [vmem:[#allocation10 + $0x1f0] sm:$0xf0]  ;;  %v7094_v58 = vld [vmem:[#allocation10 + $0xe0] sm:$0xf]  ;;  %v7658_v37 = vld [vmem:[#allocation10 + $0xec] sm:$0xf0] }
 0x68e   : > { %v3451_v57 = vpop.f32.mrf.mxu3  ;;  %v3405_v52 = vpop.f32.mrf.mxu2 }
 0x68f   : > { %v3452_v0 = vadd.f32 %v3451_v57, %v3403_v51  ;;  %3627 = vadd.xlane.f32.xlu2 %v3626_v59  ;;  %v3406_v11 = vadd.f32 %v3405_v52, %v9586_v31  ;;  %v7227_v51 = vor.u32 %v7688_v14, %v7224_v55  ;;  %v7095_v59 = vor.u32 %v7658_v37, %v7094_v58  ;;  %v7690_v52 = vld [vmem:[#allocation10 + $0x1ec] sm:$0xf0] }
 0x690   : > { %v3313_v57 = vadd.f32 %v3312_v16, %v9583_v25 }
 0x691   : > { %v9664_v13 = vadd.f32 %v8081_v2, %v3452_v0  ;;  %4585 = vmatpush.bf16.msra.mxu3 %v7227_v51  ;;  %4438 = vmatpush.bf16.msra.mxu0 %v7095_v59  ;;  %v7222_v0 = vld [vmem:[#allocation10 + $0x1e0] sm:$0xf]  ;;  %v3314_v2 = vpop.f32.mrf.mxu0  ;;  %v7686_v51 = vld [vmem:[#allocation10 + $0x1cc] sm:$0xf0] }
 0x692   : > { %v7223_v1 = vor.u32 %v7690_v52, %v7222_v0 }
 0x693   : > { %v3526_v9 = vadd.f32 %v9664_v13, %v9660_v61  ;;  %v3593_v50 = vmul.f32 %v9664_v13, %v9664_v13 }
 0x694   : > { %4487 = vmatpush.bf16.msra.mxu1 %v7223_v1 }
 0x695   : > { %3527 = vadd.xlane.f32.xlu1 %v3526_v9  ;;  %v3629_v21 = vadd.f32 %v3593_v50, %v3592_v20  ;;  %v8086_v20 = vld [vmem:[%s8593_s24 + $0x80] sm:$0xff] }
 0x696   : > { %v3454_v32 = vpop.f32.mrf.mxu3  ;;  %v3407_v7 = vpop.f32.mrf.mxu2 }
 0x697   : > { %v3455_v26 = vadd.f32 %v3454_v32, %v3406_v11  ;;  %3630 = vadd.xlane.f32.xlu0 %v3629_v21  ;;  %v3408_v27 = vadd.f32 %v3407_v7, %v9586_v31  ;;  %v3315_v32 = vadd.f32 %v3314_v2, %v9583_v25 }
 0x699   : > { %v9678_v23 = vadd.f32 %v8083_v44, %v3455_v26 }
 0x69b   : > { %v3529_v33 = vadd.f32 %v9678_v23, %v9674_v4  ;;  %v3595_v54 = vmul.f32 %v9678_v23, %v9678_v23 }
 0x69d   : > { %3530 = vadd.xlane.f32.xlu1 %v3529_v33  ;;  %v3632_v56 = vadd.f32 %v3595_v54, %v3594_v42  ;;  %v7080_v33 = vld [vmem:[#allocation10 + $0xd0] sm:$0xf0]  ;;  %v7684_v42 = vld [vmem:[#allocation10 + $0x1c4] sm:$0xf] }
 0x69e   : > { %v3456_v49 = vpop.f32.mrf.mxu3  ;;  %v3410_v22 = vpop.f32.mrf.mxu2 }
 0x69f   : > { %v3457_v19 = vadd.f32 %v3456_v49, %v3408_v27  ;;  %3633 = vadd.xlane.f32.xlu0 %v3632_v56  ;;  %v3411_v48 = vadd.f32 %v3410_v22, %v9586_v31  ;;  %v7083_v56 = vor.u32 %v7652_v17, %v7080_v33  ;;  %v7208_v49 = vld [vmem:[#allocation10 + $0x1d0] sm:$0xf0]  ;;  %v7206_v22 = vld [vmem:[#allocation10 + $0x1c0] sm:$0xf]  ;;  %v7648_v33 = vld [vmem:[#allocation10 + $0xa4] sm:$0xf] }
 0x6a0   : > { %v7207_v59 = vor.u32 %v7686_v51, %v7206_v22  ;;  %v7046_v51 = vld [vmem:[#allocation10 + $0x80] sm:$0xf] }
 0x6a1   : > { %v9691_v5 = vadd.f32 %v8085_v47, %v3457_v19  ;;  %v7654_v19 = vld [vmem:[#allocation10 + $0xcc] sm:$0xf0]  ;;  %4537 = vmatpush.bf16.msra.mxu2 %v7083_v56 }
 0x6a2   : > { %4488 = vmatpush.bf16.msra.mxu1 %v7207_v59  ;;  %v7646_v59 = vld [vmem:[#allocation10 + $0x8c] sm:$0xf0] }
 0x6a3   : > { %v3532_v28 = vadd.f32 %v9691_v5, %v9688_v60  ;;  %v3597_v35 = vmul.f32 %v9691_v5, %v9691_v5 }
 0x6a5   : > { %3533 = vadd.xlane.f32.xlu2 %v3532_v28  ;;  %v3635_v34 = vadd.f32 %v3597_v35, %v3596_v40  ;;  %v7211_v28 = vor.u32 %v7684_v42, %v7208_v49  ;;  %v7079_v40 = vor.u32 %v7654_v19, %v7078_v29  ;;  %v3317_v35 = vpop.f32.mrf.mxu0  ;;  %v7064_v42 = vld [vmem:[#allocation10 + $0xb0] sm:$0xf0]  ;;  %v7062_v19 = vld [vmem:[#allocation10 + $0xa0] sm:$0xf] }
 0x6a6   : > { %v3412_v21 = vpop.f32.mrf.mxu2  ;;  %v3318_v52 = vadd.f32 %v3317_v35, %v9583_v25  ;;  %v7067_v49 = vor.u32 %v7648_v33, %v7064_v42  ;;  %v7192_v29 = vld [vmem:[#allocation10 + $0x1b0] sm:$0xf0] }
 0x6a7   : > { %3636 = vadd.xlane.f32.xlu1 %v3635_v34  ;;  %v3413_v54 = vadd.f32 %v3412_v21, %v9586_v31  ;;  %v8088_v34 = vld [vmem:[%s8593_s24 + $0x90] sm:$0xff]  ;;  %4586 = vmatpush.bf16.msra.mxu3 %v7211_v28  ;;  %v8093_v33 = vld [vmem:[%s8593_s24 + $0xb8] sm:$0xff] }
 0x6a8   : > { %4439 = vmatpush.bf16.msra.mxu0 %v7079_v40  ;;  %4538 = vmatpush.bf16.msra.mxu2 %v7067_v49  ;;  %v7158_v49 = vld [vmem:[#allocation10 + $0x160] sm:$0xf] }
 0x6ae   : > { %v3415_v12 = vpop.f32.mrf.mxu2 }
 0x6af   : > { %v3361_v30 = vpop.f32.mrf.mxu1 }
 0x6b0   : > { %v3362_v6 = vadd.f32 %v3361_v30, %v3313_v57  ;;  %v8405_v57 = vmov 256.0  }
 0x6b1   : > { %8003 = vrcp.f32 %v8405_v57  ;;  %v8092_v57 = vld [vmem:[%s8593_s24 + $0xb0] sm:$0xff] }
 0x6b2   : > { %v9702_v50 = vadd.f32 %v8086_v20, %v3362_v6  ;;  %v3319_v6 = vpop.f32.mrf.mxu0  ;;  %v3416_v20 = vadd.f32 %v3415_v12, %v9586_v31 }
 0x6b4   : > { %v3598_v44 = vmul.f32 %v9702_v50, %v9702_v50 }
 0x6b5   : > { %v3459_v9 = vpop.f32.mrf.mxu3 }
 0x6b6   : > { %v3460_v11 = vadd.f32 %v3459_v9, %v3411_v48  ;;  %v3417_v2 = vpop.f32.mrf.mxu2 }
 0x6b7   : > { %v3363_v3 = vpop.f32.mrf.mxu1  ;;  %v9728_v1 = vpop.eup %8003 }
 0x6b8   : > { %v9706_v26 = vadd.f32 %v8087_v62, %v3460_v11  ;;  %v3364_v46 = vadd.f32 %v3363_v3, %v3315_v32  ;;  %v3560_v9 = vmul.f32 256.0, %v9728_v1  ;;  %v8090_v11 = vld [vmem:[%s8593_s24 + $0xa0] sm:$0xff]  ;;  %vm3564_vm3 = vweird.f32 %v9728_v1 }
 0x6ba   : > { %v3535_v10 = vadd.f32 %v9706_v26, %v9702_v50  ;;  %v3599_v7 = vmul.f32 %v9706_v26, %v9706_v26  ;;  %v9716_v16 = vadd.f32 %v8088_v34, %v3364_v46  ;;  %v3320_v46 = vadd.f32 %v3319_v6, %v9583_v25 }
 0x6bc   : > { %3536 = vadd.xlane.f32.xlu2 %v3535_v10  ;;  %v3638_v27 = vadd.f32 %v3599_v7, %v3598_v44  ;;  %v3600_v58 = vmul.f32 %v9716_v16, %v9716_v16  ;;  %v3561_v10 = vsub.f32 1.0, %v3560_v9  ;;  %v3322_v44 = vpop.f32.mrf.mxu0  ;;  %v8091_v7 = vld [vmem:[%s8593_s24 + $0xa8] sm:$0xff] }
 0x6bd   : > { %v3461_v47 = vpop.f32.mrf.mxu3  ;;  %v7644_v9 = vld [vmem:[#allocation10 + $0x84] sm:$0xf] }
 0x6be   : > { %v3462_v53 = vadd.f32 %v3461_v47, %v3413_v54  ;;  %3639 = vadd.xlane.f32.xlu1 %v3638_v27  ;;  %v7680_v54 = vld [vmem:[#allocation10 + $0x1a4] sm:$0xf]  ;;  %v7650_v47 = vld [vmem:[#allocation10 + $0xac] sm:$0xf0]  ;;  %v3420_v12 = vpop.f32.mrf.mxu2  ;;  %v3562_v22 = vmul.f32 %v9728_v1, %v3561_v10  ;;  %v3323_v10 = vadd.f32 %v3322_v44, %v9583_v25 }
 0x6bf   : > { %v7195_v35 = vor.u32 %v7680_v54, %v7192_v29  ;;  %v7063_v34 = vor.u32 %v7650_v47, %v7062_v19  ;;  %v7674_v44 = vld [vmem:[#allocation10 + $0x16c] sm:$0xf0] }
 0x6c0   : > { %v9719_v14 = vadd.f32 %v8089_v39, %v3462_v53  ;;  %v7190_v53 = vld [vmem:[#allocation10 + $0x1a0] sm:$0xf]  ;;  %v7682_v39 = vld [vmem:[#allocation10 + $0x1ac] sm:$0xf0]  ;;  %v3563_v54 = vadd.f32 %v9728_v1, %v3562_v22 }
 0x6c1   : > { %4587 = vmatpush.bf16.msra.mxu3 %v7195_v35  ;;  %4440 = vmatpush.bf16.msra.mxu0 %v7063_v34 }
 0x6c2   : > { %v3538_v55 = vadd.f32 %v9719_v14, %v9716_v16  ;;  %v3601_v37 = vmul.f32 %v9719_v14, %v9719_v14 }
 0x6c4   : > { %3539 = vadd.xlane.f32.xlu0 %v3538_v55  ;;  %v3641_v30 = vadd.f32 %v3601_v37, %v3600_v58  ;;  %v7191_v55 = vor.u32 %v7682_v39, %v7190_v53  ;;  %v3418_v58 = vadd.f32 %v3417_v2, %v9586_v31  ;;  %v3324_v35 = vpop.f32.mrf.mxu0  ;;  %v7159_v39 = vor.u32 %v7674_v44, %v7158_v49  ;;  %v8095_v49 = vld [vmem:[%s8593_s24 + $0xc8] sm:$0xff] }
 0x6c6   : > { %3642 = vadd.xlane.f32.xlu2 %v3641_v30  ;;  %v7174_v30 = vld [vmem:[#allocation10 + $0x180] sm:$0xf]  ;;  %4489 = vmatpush.bf16.msra.mxu1 %v7191_v55 }
 0x6c8   : > { %v3366_v0 = vpop.f32.mrf.mxu1 }
 0x6c9   : > { %v3367_v48 = vadd.f32 %v3366_v0, %v3318_v52  ;;  %v7047_v52 = vor.u32 %v7646_v59, %v7046_v51  ;;  %v3421_v51 = vadd.f32 %v3420_v12, %v9586_v31 }
 0x6cb   : > { %v9733_v21 = vadd.f32 %v8090_v11, %v3367_v48  ;;  %v7678_v48 = vld [vmem:[#allocation10 + $0x18c] sm:$0xf0]  ;;  %4441 = vmatpush.bf16.msra.mxu0 %v7047_v52 }
 0x6cd   : > { %v3602_v56 = vmul.f32 %v9733_v21, %v9733_v21 }
 0x6cf   : > { %v3464_v3 = vpop.f32.mrf.mxu3 }
 0x6d0   : > { %v3465_v32 = vadd.f32 %v3464_v3, %v3416_v20  ;;  %v3368_v62 = vpop.f32.mrf.mxu1  ;;  %v7048_v20 = vld [vmem:[#allocation10 + $0x90] sm:$0xf0]  ;;  %v7175_v3 = vor.u32 %v7678_v48, %v7174_v30  ;;  %v9766_v30 = vsel %vm3564_vm3, %v9728_v1, %v3563_v54  ;;  %v7670_v1 = vld [vmem:[#allocation10 + $0x14c] sm:$0xf0] }
 0x6d1   : > { %v3369_v27 = vadd.f32 %v3368_v62, %v3320_v46  ;;  %v7676_v62 = vld [vmem:[#allocation10 + $0x184] sm:$0xf]  ;;  %v7176_v46 = vld [vmem:[#allocation10 + $0x190] sm:$0xf0]  ;;  %11423 = vst [vmem:[#allocation34_spill] sm:$0xff] %v9766_v30 }
 0x6d2   : > { %v9737_v17 = vadd.f32 %v8091_v7, %v3465_v32  ;;  %v7051_v32 = vor.u32 %v7644_v9, %v7048_v20  ;;  %v7179_v7 = vor.u32 %v7676_v62, %v7176_v46  ;;  %4490 = vmatpush.bf16.msra.mxu1 %v7175_v3  ;;  %v7014_v9 = vld [vmem:[#allocation10 + $0x40] sm:$0xf]  ;;  %v7638_v20 = vld [vmem:[#allocation10 + $0x4c] sm:$0xf0]  ;;  %v7636_v62 = vld [vmem:[#allocation10 + $0x44] sm:$0xf] }
 0x6d3   : > { %v9748_v6 = vadd.f32 %v8092_v57, %v3369_v27  ;;  %v7030_v27 = vld [vmem:[#allocation10 + $0x60] sm:$0xf]  ;;  %v3422_v57 = vpop.f32.mrf.mxu2  ;;  %v7016_v46 = vld [vmem:[#allocation10 + $0x50] sm:$0xf0] }
 0x6d4   : > { %v3541_v28 = vadd.f32 %v9737_v17, %v9733_v21  ;;  %v3603_v40 = vmul.f32 %v9737_v17, %v9737_v17  ;;  %4539 = vmatpush.bf16.msra.mxu2 %v7051_v32  ;;  %4588 = vmatpush.bf16.msra.mxu3 %v7179_v7  ;;  %v7015_v32 = vor.u32 %v7638_v20, %v7014_v9  ;;  %v7664_v9 = vld [vmem:[#allocation10 + $0x124] sm:$0xf]  ;;  %v7128_v20 = vld [vmem:[#allocation10 + $0x130] sm:$0xf0] }
 0x6d5   : > { %v3604_v19 = vmul.f32 %v9748_v6, %v9748_v6  ;;  %v7019_v54 = vor.u32 %v7636_v62, %v7016_v46 }
 0x6d6   : > { %3542 = vadd.xlane.f32.xlu0 %v3541_v28  ;;  %v3644_v37 = vadd.f32 %v3603_v40, %v3602_v56  ;;  %v7642_v56 = vld [vmem:[#allocation10 + $0x6c] sm:$0xf0]  ;;  %v7640_v28 = vld [vmem:[#allocation10 + $0x64] sm:$0xf]  ;;  %v7032_v40 = vld [vmem:[#allocation10 + $0x70] sm:$0xf0]  ;;  %4491 = vmatpush.bf16.msra.mxu1 %v7159_v39 }
 0x6d7   : > { %v3466_v0 = vpop.f32.mrf.mxu3  ;;  %v7031_v47 = vor.u32 %v7642_v56, %v7030_v27  ;;  %v7035_v55 = vor.u32 %v7640_v28, %v7032_v40  ;;  %v7668_v27 = vld [vmem:[#allocation10 + $0x144] sm:$0xf]  ;;  %v7144_v56 = vld [vmem:[#allocation10 + $0x150] sm:$0xf0] }
 0x6d8   : > { %v3467_v2 = vadd.f32 %v3466_v0, %v3418_v58  ;;  %3645 = vadd.xlane.f32.xlu2 %v3644_v37  ;;  %v3371_v11 = vpop.f32.mrf.mxu1  ;;  %v7672_v58 = vld [vmem:[#allocation10 + $0x164] sm:$0xf]  ;;  %v7160_v37 = vld [vmem:[#allocation10 + $0x170] sm:$0xf0]  ;;  %v8094_v0 = vld [vmem:[%s8593_s24 + $0xc0] sm:$0xff] }
 0x6d9   : > { %v3372_v29 = vadd.f32 %v3371_v11, %v3323_v10  ;;  %v7163_v22 = vor.u32 %v7672_v58, %v7160_v37  ;;  %4540 = vmatpush.bf16.msra.mxu2 %v7035_v55  ;;  %4442 = vmatpush.bf16.msra.mxu0 %v7031_v47  ;;  %v3325_v10 = vadd.f32 %v3324_v35, %v9583_v25  ;;  %v6998_v35 = vld [vmem:[#allocation10 + $0x20] sm:$0xf]  ;;  %v7666_v37 = vld [vmem:[#allocation10 + $0x12c] sm:$0xf0] }
 0x6da   : > { %v9752_v42 = vadd.f32 %v8093_v33, %v3467_v2  ;;  %v7142_v2 = vld [vmem:[#allocation10 + $0x140] sm:$0xf]  ;;  %v7147_v47 = vor.u32 %v7668_v27, %v7144_v56 }
 0x6db   : > { %v9769_v52 = vadd.f32 %v8094_v0, %v3372_v29  ;;  %4589 = vmatpush.bf16.msra.mxu3 %v7163_v22  ;;  %v7143_v33 = vor.u32 %v7670_v1, %v7142_v2  ;;  %v7632_v22 = vld [vmem:[#allocation10 + $0x24] sm:$0xf]  ;;  %v3327_v2 = vpop.f32.mrf.mxu0  ;;  %v8096_v1 = vld [vmem:[%s8593_s24 + $0xd0] sm:$0xff] }
 0x6dc   : > { %v3544_v34 = vadd.f32 %v9752_v42, %v9748_v6  ;;  %v3605_v53 = vmul.f32 %v9752_v42, %v9752_v42 }
 0x6dd   : > { %v3606_v40 = vmul.f32 %v9769_v52, %v9769_v52  ;;  %4443 = vmatpush.bf16.msra.mxu0 %v7015_v32  ;;  %4492 = vmatpush.bf16.msra.mxu1 %v7143_v33  ;;  %v7131_v32 = vor.u32 %v7664_v9, %v7128_v20  ;;  %v7630_v33 = vld [vmem:[#allocation10 + $0xc] sm:$0xf0] }
 0x6de   : > { %3545 = vadd.xlane.f32.xlu1 %v3544_v34  ;;  %v3647_v59 = vadd.f32 %v3605_v53, %v3604_v19  ;;  %v7634_v34 = vld [vmem:[#allocation10 + $0x2c] sm:$0xf0]  ;;  %v7126_v53 = vld [vmem:[#allocation10 + $0x120] sm:$0xf]  ;;  %4541 = vmatpush.bf16.msra.mxu2 %v7019_v54 }
 0x6df   : > { %v3469_v48 = vpop.f32.mrf.mxu3  ;;  %4590 = vmatpush.bf16.msra.mxu3 %v7147_v47  ;;  %v7127_v0 = vor.u32 %v7666_v37, %v7126_v53  ;;  %v7110_v54 = vld [vmem:[#allocation10 + $0x100] sm:$0xf]  ;;  %v7662_v47 = vld [vmem:[#allocation10 + $0x10c] sm:$0xf0]  ;;  %v6984_v53 = vld [vmem:[#allocation10 + $0x10] sm:$0xf0] }
 0x6e0   : > { %v3470_v12 = vadd.f32 %v3469_v48, %v3421_v51  ;;  %3648 = vadd.xlane.f32.xlu0 %v3647_v59  ;;  %v3373_v11 = vpop.f32.mrf.mxu1  ;;  %v3513_v3 = vpop.xlane.xlu1 %3512  ;;  %v7000_v51 = vld [vmem:[#allocation10 + $0x30] sm:$0xf0]  ;;  %v6999_v59 = vor.u32 %v7634_v34, %v6998_v35  ;;  %v7111_v34 = vor.u32 %v7662_v47, %v7110_v54 }
 0x6e1   : > { %v9773_v7 = vmul.f32 %v9766_v30, %v3513_v3  ;;  %v3374_v44 = vadd.f32 %v3373_v11, %v3325_v10  ;;  %v7003_v48 = vor.u32 %v7632_v22, %v7000_v51  ;;  %v6982_v10 = vld [vmem:[#allocation10] sm:$0xf]  ;;  %4493 = vmatpush.bf16.msra.mxu1 %v7127_v0 }
 0x6e2   : > { %v9776_v29 = vadd.f32 %v8095_v49, %v3470_v12  ;;  %v3616_v19 = vpop.xlane.xlu0 %3615  ;;  %v3423_v12 = vadd.f32 %v3422_v57, %v9586_v31  ;;  %4444 = vmatpush.bf16.msra.mxu0 %v6999_v59  ;;  %v6983_v57 = vor.u32 %v7630_v33, %v6982_v10 }
 0x6e3   : > { %v3662_v28 = vmul.f32 %v3616_v19, %v9766_v30  ;;  %v3678_v39 = vmul.f32 %v9773_v7, %v9773_v7  ;;  %v9789_v62 = vadd.f32 %v8096_v1, %v3374_v44  ;;  %v3425_v44 = vpop.f32.mrf.mxu2  ;;  %4542 = vmatpush.bf16.msra.mxu2 %v7003_v48  ;;  %4591 = vmatpush.bf16.msra.mxu3 %v7131_v32  ;;  %v8098_v1 = vld [vmem:[%s8593_s24 + $0xe0] sm:$0xff]  ;;  %v3329_v54 = vpop.f32.mrf.mxu0 }
 0x6e4   : > { %v3547_v55 = vadd.f32 %v9776_v29, %v9769_v52  ;;  %v3607_v58 = vmul.f32 %v9776_v29, %v9776_v29 }
 0x6e5   : > { %v3694_v11 = vsub.f32 %v3662_v28, %v3678_v39  ;;  %v7628_v28 = vld [vmem:[#allocation10 + $0x4] sm:$0xf]  ;;  %v3608_v48 = vmul.f32 %v9789_v62, %v9789_v62  ;;  %4494 = vmatpush.bf16.msra.mxu1 %v7111_v34 }
 0x6e6   : > { %3548 = vadd.xlane.f32.xlu1 %v3547_v55  ;;  %v3650_v3 = vadd.f32 %v3607_v58, %v3606_v40  ;;  %v3328_v40 = vadd.f32 %v3327_v2, %v9583_v25  ;;  %v7660_v39 = vld [vmem:[#allocation10 + $0x104] sm:$0xf]  ;;  %v7112_v55 = vld [vmem:[#allocation10 + $0x110] sm:$0xf0]  ;;  %v6987_v51 = vor.u32 %v7628_v28, %v6984_v53  ;;  %4445 = vmatpush.bf16.msra.mxu0 %v6983_v57 }
 0x6e7   : > { %v3471_v46 = vpop.f32.mrf.mxu3  ;;  %v9791_v27 = vadd.f32 1e-05, %v3694_v11  ;;  %v8097_v58 = vld [vmem:[%s8593_s24 + $0xd8] sm:$0xff]  ;;  %v3426_v11 = vadd.f32 %v3425_v44, %v9586_v31  ;;  %v8099_v28 = vld [vmem:[%s8593_s24 + $0xe8] sm:$0xff]  ;;  %v3330_v53 = vadd.f32 %v3329_v54, %v9583_v25 }
 0x6e8   : > { %v3472_v56 = vadd.f32 %v3471_v46, %v3423_v12  ;;  %3651 = vadd.xlane.f32.xlu0 %v3650_v3  ;;  %v3516_v49 = vpop.xlane.xlu2 %3515  ;;  %v3376_v19 = vpop.f32.mrf.mxu1  ;;  %v7115_v12 = vor.u32 %v7660_v39, %v7112_v55  ;;  %4543 = vmatpush.bf16.msra.mxu2 %v6987_v51 }
 0x6e9   : > { %v9795_v35 = vmul.f32 %v9766_v30, %v3516_v49  ;;  %8005 = vrsqrt.f32 %v9791_v27  ;;  %v3377_v59 = vadd.f32 %v3376_v19, %v3328_v40  ;;  %vm3764_vm5 = vweird.f32 %v9791_v27 }
 0x6ea   : > { %v9799_v37 = vadd.f32 %v8097_v58, %v3472_v56  ;;  %v3619_v22 = vpop.xlane.xlu1 %3618  ;;  %4592 = vmatpush.bf16.msra.mxu3 %v7115_v12 }
 0x6eb   : > { %v3679_v0 = vmul.f32 %v9795_v35, %v9795_v35  ;;  %v3663_v9 = vmul.f32 %v3619_v22, %v9766_v30  ;;  %v9812_v46 = vadd.f32 %v8098_v1, %v3377_v59  ;;  %v3427_v39 = vpop.f32.mrf.mxu2 }
 0x6ec   : > { %v3550_v20 = vadd.f32 %v9799_v37, %v9789_v62  ;;  %v3609_v2 = vmul.f32 %v9799_v37, %v9799_v37  ;;  %v3428_v25 = vadd.f32 %v3427_v39, %v9586_v31  ;;  %v3951_v39 = vld [vmem:[#allocation13 + $0x1] ss:$8 sm:$0x3] }
 0x6ed   : > { %v3695_v3 = vsub.f32 %v3663_v9, %v3679_v0  ;;  %v3610_v58 = vmul.f32 %v9812_v46, %v9812_v46 }
 0x6ee   : > { %3551 = vadd.xlane.f32.xlu2 %v3550_v20  ;;  %v3653_v32 = vadd.f32 %v3609_v2, %v3608_v48 }
 0x6ef   : > { %v3474_v10 = vpop.f32.mrf.mxu3  ;;  %v8006_v33 = vpop.eup %8005  ;;  %v9814_v56 = vadd.f32 1e-05, %v3695_v3 }
 0x6f0   : > { %v3475_v49 = vadd.f32 %v3474_v10, %v3426_v11  ;;  %3654 = vadd.xlane.f32.xlu1 %v3653_v32  ;;  %v3519_v19 = vpop.xlane.xlu2 %3518  ;;  %v3759_v57 = vmul.f32 %v8006_v33, %v9791_v27  ;;  %v3378_v44 = vpop.f32.mrf.mxu1  ;;  %vm3765_vm4 = vweird.f32 %v8006_v33 }
 0x6f1   : > { %v9818_v47 = vmul.f32 %v9766_v30, %v3519_v19  ;;  %8007 = vrsqrt.f32 %v9814_v56  ;;  %v3379_v9 = vadd.f32 %v3378_v44, %v3330_v53  ;;  %v8100_v19 = vld [vmem:[%s8593_s24 + $0xf0] sm:$0xff]  ;;  %v3710_v53 = vsub.f32 %v9590_v38, %v9773_v7  ;;  %vm3766_vm6 = vmor %vm3764_vm5, %vm3765_vm4 }
 0x6f2   : > { %v9822_v40 = vadd.f32 %v8099_v28, %v3475_v49  ;;  %v3622_v34 = vpop.xlane.xlu1 %3621  ;;  %v3760_v55 = vmul.f32 %v8006_v33, %v3759_v57  ;;  %v8101_v28 = vld [vmem:[%s8593_s24 + $0xf8] sm:$0xff]  ;;  %vm3774_vm8 = vweird.f32 %v9814_v56 }
 0x6f3   : > { %v3680_v22 = vmul.f32 %v9818_v47, %v9818_v47  ;;  %v3664_v51 = vmul.f32 %v3622_v34, %v9766_v30  ;;  %v9839_v57 = vadd.f32 %v8100_v19, %v3379_v9  ;;  %v3990_v9 = vld [vmem:[#allocation13 + $0x2] ss:$8 sm:$0x3] }
 0x6f4   : > { %v3553_v59 = vadd.f32 %v9822_v40, %v9812_v46  ;;  %v3611_v0 = vmul.f32 %v9822_v40, %v9822_v40  ;;  %v3761_v48 = vmul.f32 0.5, %v3760_v55 }
 0x6f5   : > { %v3696_v20 = vsub.f32 %v3664_v51, %v3680_v22  ;;  %v3612_v38 = vmul.f32 %v9839_v57, %v9839_v57 }
 0x6f6   : > { %3554 = vadd.xlane.f32.xlu2 %v3553_v59  ;;  %v3656_v2 = vadd.f32 %v3611_v0, %v3610_v58  ;;  %v3762_v12 = vsub.f32 1.5, %v3761_v48  ;;  %v3711_v58 = vsub.f32 %v9594_v8, %v9773_v7  ;;  %v9865_v8 = vperm.slane %v3951_v39, 1 }
 0x6f7   : > { %v3476_v11 = vpop.f32.mrf.mxu3  ;;  %v8008_v3 = vpop.eup %8007  ;;  %v9835_v32 = vadd.f32 1e-05, %v3696_v20 }
 0x6f8   : > { %v3477_v1 = vadd.f32 %v3476_v11, %v3428_v25  ;;  %3657 = vadd.xlane.f32.xlu1 %v3656_v2  ;;  %v3522_v10 = vpop.xlane.xlu0 %3521  ;;  %v3763_v54 = vmul.f32 %v8006_v33, %v3762_v12  ;;  %v3769_v49 = vmul.f32 %v8008_v3, %v9814_v56  ;;  %v9863_v25 = vperm.slane %v3951_v39, 0 }
 0x6f9   : > { %v9842_v31 = vmul.f32 %v9766_v30, %v3522_v10  ;;  %8009 = vrsqrt.f32 %v9835_v32  ;;  %vm3775_vm7 = vweird.f32 %v8008_v3  ;;  %vm3784_vm11 = vweird.f32 %v9835_v32 }
 0x6fa   : > { %v9847_v44 = vadd.f32 %v8101_v28, %v3477_v1  ;;  %v3625_v34 = vpop.xlane.xlu2 %3624  ;;  %v3770_v55 = vmul.f32 %v8008_v3, %v3769_v49  ;;  %v3767_v22 = vsel %vm3766_vm6, %v8006_v33, %v3763_v54  ;;  %v9869_v54 = vperm.slane %v3990_v9, 0  ;;  %vm3776_vm9 = vmor %vm3774_vm8, %vm3775_vm7 }
 0x6fb   : > { %v3665_v51 = vmul.f32 %v3625_v34, %v9766_v30  ;;  %v3681_v27 = vmul.f32 %v9842_v31, %v9842_v31  ;;  %v3918_v33 = vmul.f32 %v3767_v22, %v3710_v53  ;;  %v3919_v20 = vmul.f32 %v3767_v22, %v3711_v58 }
 0x6fc   : > { %v3771_v59 = vmul.f32 0.5, %v3770_v55  ;;  %v3556_v0 = vadd.f32 %v9847_v44, %v9839_v57  ;;  %v3613_v48 = vmul.f32 %v9847_v44, %v9847_v44  ;;  %v3712_v34 = vsub.f32 %v9604_v45, %v9795_v35 }
 0x6fd   : > { %v3697_v7 = vsub.f32 %v3665_v51, %v3681_v27  ;;  %v3713_v53 = vsub.f32 %v9608_v15, %v9795_v35  ;;  %v9882_v55 = vperm.slane %v3990_v9, 1  ;;  %v3957_v56 = vmul.f32 %v9863_v25, %v3918_v33 }
 0x6fe   : > { %v3772_v2 = vsub.f32 1.5, %v3771_v59  ;;  %3557 = vadd.xlane.f32.xlu0 %v3556_v0  ;;  %v3659_v12 = vadd.f32 %v3613_v48, %v3612_v38  ;;  %v3958_v58 = vmul.f32 %v9865_v8, %v3919_v20 }
 0x6ff   : > { %v8010_v11 = vpop.eup %8009  ;;  %v9867_v1 = vadd.f32 1e-05, %v3697_v7  ;;  %v9892_v7 = vadd.f32 %v9869_v54, %v3957_v56 }
 0x700   : > { %v3525_v10 = vpop.xlane.xlu0 %3524  ;;  %v3773_v49 = vmul.f32 %v8008_v3, %v3772_v2  ;;  %v3779_v19 = vmul.f32 %v8010_v11, %v9835_v32  ;;  %3660 = vadd.xlane.f32.xlu2 %v3659_v12  ;;  %vm3785_vm10 = vweird.f32 %v8010_v11  ;;  %v3714_v32 = vsub.f32 %v9618_v24, %v9818_v47 }
 0x701   : > { %v9874_v28 = vmul.f32 %v9766_v30, %v3525_v10  ;;  %8011 = vrsqrt.f32 %v9867_v1  ;;  %vm3786_vm12 = vmor %vm3784_vm11, %vm3785_vm10  ;;  %vm3794_vm14 = vweird.f32 %v9867_v1 }
 0x702   : > { %v3628_v39 = vpop.xlane.xlu2 %3627  ;;  %v3777_v22 = vsel %vm3776_vm9, %v8008_v3, %v3773_v49  ;;  %v3780_v51 = vmul.f32 %v8010_v11, %v3779_v19  ;;  %v9895_v3 = vadd.f32 %v9882_v55, %v3958_v58 }
 0x703   : > { %v3920_v27 = vmul.f32 %v3777_v22, %v3712_v34  ;;  %v3921_v59 = vmul.f32 %v3777_v22, %v3713_v53  ;;  %v3666_v45 = vmul.f32 %v3628_v39, %v9766_v30  ;;  %v3682_v15 = vmul.f32 %v9874_v28, %v9874_v28 }
 0x704   : > { %v3781_v35 = vmul.f32 0.5, %v3780_v51 }
 0x705   : > { %v3959_v0 = vmul.f32 %v9863_v25, %v3920_v27  ;;  %v3960_v38 = vmul.f32 %v9865_v8, %v3921_v59  ;;  %v3698_v48 = vsub.f32 %v3666_v45, %v3682_v15  ;;  %v3715_v59 = vsub.f32 %v9622_v36, %v9818_v47 }
 0x706   : > { %v3782_v9 = vsub.f32 1.5, %v3781_v35 }
 0x707   : > { %v8012_v33 = vpop.eup %8011  ;;  %v9897_v20 = vadd.f32 1e-05, %v3698_v48  ;;  %v9900_v12 = vadd.f32 %v9869_v54, %v3959_v0  ;;  %v9903_v10 = vadd.f32 %v9882_v55, %v3960_v38 }
 0x708   : > { %v3528_v2 = vpop.xlane.xlu1 %3527  ;;  %v3783_v49 = vmul.f32 %v8010_v11, %v3782_v9  ;;  %v3789_v19 = vmul.f32 %v8012_v33, %v9867_v1  ;;  %vm3795_vm13 = vweird.f32 %v8012_v33 }
 0x709   : > { %11424 = vst [vmem:[#allocation36_spill] sm:$0xff] %v9900_v12  ;;  %v9907_v34 = vmul.f32 %v9766_v30, %v3528_v2  ;;  %8013 = vrsqrt.f32 %v9897_v20  ;;  %v9913_v39 = vpack.c.bf16 %v9900_v12, %v9892_v7  ;;  %v9917_v56 = vpack.c.bf16 %v9903_v10, %v9895_v3  ;;  %vm3796_vm15 = vmor %vm3794_vm14, %vm3795_vm13 }
 0x70a   : > { %11425 = vst [vmem:[#allocation40_spill] sm:$0xff] %v9903_v10  ;;  %v3631_v53 = vpop.xlane.xlu0 %3630  ;;  %v3790_v58 = vmul.f32 %v8012_v33, %v3789_v19  ;;  %v3787_v22 = vsel %vm3786_vm12, %v8010_v11, %v3783_v49  ;;  %v3716_v2 = vsub.f32 %v9632_v18, %v9842_v31  ;;  %v3717_v49 = vsub.f32 %v9636_v63, %v9842_v31  ;;  %v7743_v10 = vld [vmem:[#allocation11 + $0x194] sm:$0xf0] }
 0x70b   : > { %v3667_v51 = vmul.f32 %v3631_v53, %v9766_v30  ;;  %v3683_v27 = vmul.f32 %v9907_v34, %v9907_v34  ;;  %4446 = vmatmul.bf16.vlgmr.msra.gmra.mxu0 %v9913_v39  ;;  %4495 = vmatmul.bf16.vlgmr.msra.gmra.mxu1 %v9917_v56  ;;  %v3922_v11 = vmul.f32 %v3787_v22, %v3714_v32  ;;  %vm3804_vm1 = vweird.f32 %v9897_v20 }
 0x70c   : > { %v3791_v45 = vmul.f32 0.5, %v3790_v58  ;;  %4544 = vmatmul.bf16.vlgmr.msra.gmra.mxu2 %v9913_v39  ;;  %4593 = vmatmul.bf16.vlgmr.msra.gmra.mxu3 %v9917_v56  ;;  %v3923_v35 = vmul.f32 %v3787_v22, %v3715_v59 }
 0x70d   : > { %v3699_v15 = vsub.f32 %v3667_v51, %v3683_v27  ;;  %v3961_v22 = vmul.f32 %v9863_v25, %v3922_v11 }
 0x70e   : > { %v3792_v0 = vsub.f32 1.5, %v3791_v45  ;;  %v3962_v1 = vmul.f32 %v9865_v8, %v3923_v35 }
 0x70f   : > { %v8014_v38 = vpop.eup %8013  ;;  %v9930_v48 = vadd.f32 1e-05, %v3699_v15 }
 0x710   : > { %v3531_v9 = vpop.xlane.xlu1 %3530  ;;  %v3793_v24 = vmul.f32 %v8012_v33, %v3792_v0  ;;  %v3799_v36 = vmul.f32 %v8014_v38, %v9897_v20  ;;  %v9953_v11 = vadd.f32 %v9882_v55, %v3962_v1  ;;  %vm3805_vm0 = vweird.f32 %v8014_v38 }
 0x711   : > { %v9935_v47 = vmul.f32 %v9766_v30, %v3531_v9  ;;  %8015 = vrsqrt.f32 %v9930_v48  ;;  %vm3806_vm2 = vmor %vm3804_vm1, %vm3805_vm0  ;;  %v3718_v20 = vsub.f32 %v9646_v41, %v9874_v28  ;;  %vm3814_vm4 = vweird.f32 %v9930_v48 }
 0x712   : > { %v3634_v19 = vpop.xlane.xlu0 %3633  ;;  %v3797_v53 = vsel %vm3796_vm15, %v8012_v33, %v3793_v24  ;;  %v3800_v58 = vmul.f32 %v8014_v38, %v3799_v36  ;;  %v9950_v33 = vadd.f32 %v9869_v54, %v3961_v22  ;;  %11427 = vst [vmem:[#allocation21_spill] sm:$0xff] %v9953_v11 }
 0x713   : > { %v3924_v51 = vmul.f32 %v3797_v53, %v3716_v2  ;;  %v3925_v27 = vmul.f32 %v3797_v53, %v3717_v49  ;;  %v3668_v32 = vmul.f32 %v3634_v19, %v9766_v30  ;;  %v3684_v18 = vmul.f32 %v9935_v47, %v9935_v47 }
 0x714   : > { %v3801_v59 = vmul.f32 0.5, %v3800_v58  ;;  %11426 = vst [vmem:[#allocation42_spill] sm:$0xff] %v9950_v33 }
 0x715   : > { %v3700_v45 = vsub.f32 %v3668_v32, %v3684_v18  ;;  %v3963_v63 = vmul.f32 %v9863_v25, %v3924_v51  ;;  %v3964_v31 = vmul.f32 %v9865_v8, %v3925_v27 }
 0x716   : > { %v3802_v15 = vsub.f32 1.5, %v3801_v59  ;;  %v3719_v59 = vsub.f32 %v9650_v43, %v9874_v28 }
 0x717   : > { %v8016_v35 = vpop.eup %8015  ;;  %v3748_v0 = vadd.f32 1e-05, %v3700_v45  ;;  %v9956_v24 = vadd.f32 %v9869_v54, %v3963_v63  ;;  %v9959_v36 = vadd.f32 %v9882_v55, %v3964_v31 }
 0x718   : > { %v3534_v9 = vpop.xlane.xlu2 %3533  ;;  %v3803_v2 = vmul.f32 %v8014_v38, %v3802_v15  ;;  %v3809_v49 = vmul.f32 %v8016_v35, %v9930_v48  ;;  %vm3815_vm3 = vweird.f32 %v8016_v35 }
 0x719   : > { %11428 = vst [vmem:[#allocation20_spill] sm:$0xff] %v9956_v24  ;;  %v9963_v19 = vmul.f32 %v9766_v30, %v3534_v9  ;;  %8017 = vrsqrt.f32 %v3748_v0  ;;  %v9968_v58 = vpack.c.bf16 %v9956_v24, %v9950_v33  ;;  %v9972_v22 = vpack.c.bf16 %v9959_v36, %v9953_v11  ;;  %vm3816_vm5 = vmor %vm3814_vm4, %vm3815_vm3  ;;  %v7711_v24 = vld [vmem:[#allocation11 + $0x94] sm:$0xf0] }
 0x71a   : > { %11429 = vst [vmem:[#allocation35_spill] sm:$0xff] %v9959_v36  ;;  %v3637_v53 = vpop.xlane.xlu1 %3636  ;;  %v3810_v1 = vmul.f32 %v8016_v35, %v3809_v49  ;;  %v3807_v51 = vsel %vm3806_vm2, %v8014_v38, %v3803_v2  ;;  %v3720_v49 = vsub.f32 %v9660_v61, %v9907_v34  ;;  %vm3824_vm7 = vweird.f32 %v3748_v0  ;;  %v7731_v33 = vld [vmem:[#allocation11 + $0x134] sm:$0xf0] }
 0x71b   : > { %v3685_v27 = vmul.f32 %v9963_v19, %v9963_v19  ;;  %v3669_v32 = vmul.f32 %v3637_v53, %v9766_v30  ;;  %4451 = vmatmul.bf16.gmra.mxu0 %v9968_v58  ;;  %4500 = vmatmul.bf16.gmra.mxu1 %v9972_v22  ;;  %v3926_v38 = vmul.f32 %v3807_v51, %v3718_v20 }
 0x71c   : > { %v3811_v18 = vmul.f32 0.5, %v3810_v1  ;;  %4549 = vmatmul.bf16.gmra.mxu2 %v9968_v58  ;;  %4598 = vmatmul.bf16.gmra.mxu3 %v9972_v22  ;;  %v3927_v15 = vmul.f32 %v3807_v51, %v3719_v59  ;;  %v3721_v53 = vsub.f32 %v9664_v13, %v9907_v34 }
 0x71d   : > { %v3701_v45 = vsub.f32 %v3669_v32, %v3685_v27  ;;  %v3965_v1 = vmul.f32 %v9863_v25, %v3926_v38 }
 0x71e   : > { %v3812_v63 = vsub.f32 1.5, %v3811_v18  ;;  %v3966_v51 = vmul.f32 %v9865_v8, %v3927_v15 }
 0x71f   : > { %v8018_v31 = vpop.eup %8017  ;;  %v3749_v9 = vadd.f32 1e-05, %v3701_v45  ;;  %v9995_v61 = vadd.f32 %v9869_v54, %v3965_v1 }
 0x720   : > { %v3813_v2 = vmul.f32 %v8016_v35, %v3812_v63  ;;  %v3819_v41 = vmul.f32 %v8018_v31, %v3748_v0  ;;  %vm3825_vm6 = vweird.f32 %v8018_v31  ;;  %v3723_v0 = vsub.f32 %v9678_v23, %v9935_v47 }
 0x721   : > { %8019 = vrsqrt.f32 %v3749_v9  ;;  %11430 = vst [vmem:[#allocation43_spill] sm:$0xff] %v9995_v61  ;;  %vm3826_vm8 = vmor %vm3824_vm7, %vm3825_vm6  ;;  %vm3834_vm10 = vweird.f32 %v3749_v9 }
 0x722   : > { %v3817_v43 = vsel %vm3816_vm5, %v8016_v35, %v3813_v2  ;;  %v3820_v28 = vmul.f32 %v8018_v31, %v3819_v41  ;;  %v10001_v35 = vadd.f32 %v9882_v55, %v3966_v51 }
 0x723   : > { %v3928_v27 = vmul.f32 %v3817_v43, %v3720_v49  ;;  %v3929_v32 = vmul.f32 %v3817_v43, %v3721_v53  ;;  %v3722_v53 = vsub.f32 %v9674_v4, %v9935_v47 }
 0x724   : > { %v3821_v20 = vmul.f32 0.5, %v3820_v28  ;;  %11432 = vst [vmem:[#allocation41_spill] sm:$0xff] %v10001_v35 }
 0x725   : > { %v3967_v48 = vmul.f32 %v9863_v25, %v3928_v27  ;;  %v3968_v18 = vmul.f32 %v9865_v8, %v3929_v32 }
 0x726   : > { %v3822_v59 = vsub.f32 1.5, %v3821_v20  ;;  %v3724_v20 = vsub.f32 %v9688_v60, %v9963_v19 }
 0x727   : > { %v8020_v13 = vpop.eup %8019  ;;  %v9998_v34 = vadd.f32 %v9869_v54, %v3967_v48  ;;  %v10004_v45 = vadd.f32 %v9882_v55, %v3968_v18  ;;  %v3725_v48 = vsub.f32 %v9691_v5, %v9963_v19 }
 0x728   : > { %v3823_v38 = vmul.f32 %v8018_v31, %v3822_v59  ;;  %v3829_v63 = vmul.f32 %v8020_v13, %v3749_v9  ;;  %vm3835_vm9 = vweird.f32 %v8020_v13 }
 0x729   : > { %11431 = vst [vmem:[#allocation38_spill] sm:$0xff] %v9998_v34  ;;  %v10008_v15 = vpack.c.bf16 %v9998_v34, %v9995_v61  ;;  %v10012_v2 = vpack.c.bf16 %v10004_v45, %v10001_v35  ;;  %vm3836_vm11 = vmor %vm3834_vm10, %vm3835_vm9  ;;  %v7326_v61 = vld [vmem:[#allocation11 + $0xb0] sm:$0xf] }
 0x72a   : > { %11433 = vst [vmem:[#allocation27_spill] sm:$0xff] %v10004_v45  ;;  %v3830_v41 = vmul.f32 %v8020_v13, %v3829_v63  ;;  %v3827_v49 = vsel %vm3826_vm8, %v8018_v31, %v3823_v38  ;;  %v7657_v38 = vld [vmem:[#allocation10 + $0xec] sm:$0xf]  ;;  %v7104_v63 = vld [vmem:[#allocation10 + $0xf8] sm:$0xf0] }
 0x72b   : > { %4456 = vmatmul.bf16.gmra.mxu0 %v10008_v15  ;;  %4505 = vmatmul.bf16.gmra.mxu1 %v10012_v2  ;;  %v3930_v28 = vmul.f32 %v3827_v49, %v3722_v53  ;;  %v3931_v32 = vmul.f32 %v3827_v49, %v3723_v0  ;;  %v7107_v53 = vor.u32 %v7657_v38, %v7104_v63  ;;  %v7683_v45 = vld [vmem:[#allocation10 + $0x1b4] sm:$0xf0] }
 0x72c   : > { %v3831_v43 = vmul.f32 0.5, %v3830_v41  ;;  %4554 = vmatmul.bf16.gmra.mxu2 %v10008_v15  ;;  %4603 = vmatmul.bf16.gmra.mxu3 %v10012_v2 }
 0x72d   : > { %v3969_v59 = vmul.f32 %v9863_v25, %v3930_v28  ;;  %v3970_v60 = vmul.f32 %v9865_v8, %v3931_v32  ;;  %4732 = vmatpush.bf16.msrb.mxu2 %v7107_v53  ;;  %v7232_v53 = vld [vmem:[#allocation10 + $0x1f8] sm:$0xf0] }
 0x72e   : > { %v3832_v1 = vsub.f32 1.5, %v3831_v43 }
 0x72f   : > { %v3537_v27 = vpop.xlane.xlu2 %3536  ;;  %v10040_v28 = vadd.f32 %v9869_v54, %v3969_v59 }
 0x730   : > { %v10023_v31 = vmul.f32 %v9766_v30, %v3537_v27  ;;  %v3833_v51 = vmul.f32 %v8020_v13, %v3832_v1  ;;  %v10046_v27 = vadd.f32 %v9882_v55, %v3970_v60 }
 0x731   : > { %v3640_v4 = vpop.xlane.xlu1 %3639  ;;  %11434 = vst [vmem:[#allocation26_spill] sm:$0xff] %v10040_v28 }
 0x732   : > { %v3686_v23 = vmul.f32 %v10023_v31, %v10023_v31  ;;  %v3670_v47 = vmul.f32 %v3640_v4, %v9766_v30  ;;  %v3837_v18 = vsel %vm3836_vm11, %v8020_v13, %v3833_v51  ;;  %11436 = vst [vmem:[#allocation39_spill] sm:$0xff] %v10046_v27 }
 0x733   : > { %v3932_v41 = vmul.f32 %v3837_v18, %v3724_v20  ;;  %v3933_v9 = vmul.f32 %v3837_v18, %v3725_v48 }
 0x734   : > { %v3702_v49 = vsub.f32 %v3670_v47, %v3686_v23 }
 0x735   : > { %v3971_v5 = vmul.f32 %v9863_v25, %v3932_v41  ;;  %v3972_v19 = vmul.f32 %v9865_v8, %v3933_v9 }
 0x736   : > { %v3750_v43 = vadd.f32 1e-05, %v3702_v49  ;;  %v7689_v49 = vld [vmem:[#allocation10 + $0x1ec] sm:$0xf] }
 0x737   : > { %v3540_v0 = vpop.xlane.xlu0 %3539  ;;  %v10043_v1 = vadd.f32 %v9869_v54, %v3971_v5  ;;  %v10049_v32 = vadd.f32 %v9882_v55, %v3972_v19  ;;  %v7235_v60 = vor.u32 %v7689_v49, %v7232_v53  ;;  %v7102_v5 = vld [vmem:[#allocation10 + $0xe8] sm:$0xf]  ;;  %v7659_v19 = vld [vmem:[#allocation10 + $0xf4] sm:$0xf0]  ;;  %v3727_v53 = vsub.f32 %v9706_v26, %v10023_v31 }
 0x738   : > { %8021 = vrsqrt.f32 %v3750_v43  ;;  %v10037_v13 = vmul.f32 %v9766_v30, %v3540_v0  ;;  %v7230_v0 = vld [vmem:[#allocation10 + $0x1e8] sm:$0xf]  ;;  %vm3844_vm13 = vweird.f32 %v3750_v43 }
 0x739   : > { %11435 = vst [vmem:[#allocation45_spill] sm:$0xff] %v10043_v1  ;;  %v3643_v51 = vpop.xlane.xlu2 %3642  ;;  %v10053_v4 = vpack.c.bf16 %v10043_v1, %v10040_v28  ;;  %v10058_v48 = vpack.c.bf16 %v10049_v32, %v10046_v27  ;;  %v7103_v1 = vor.u32 %v7659_v19, %v7102_v5  ;;  %4781 = vmatpush.bf16.msrb.mxu3 %v7235_v60  ;;  %v7088_v19 = vld [vmem:[#allocation10 + $0xd8] sm:$0xf0] }
 0x73a   : > { %11437 = vst [vmem:[#allocation23_spill] sm:$0xff] %v10049_v32  ;;  %v3671_v20 = vmul.f32 %v3643_v51, %v9766_v30  ;;  %v3687_v23 = vmul.f32 %v10037_v13, %v10037_v13  ;;  %v3729_v26 = vsub.f32 %v9719_v14, %v10037_v13 }
 0x73b   : > { %4461 = vmatmul.bf16.gmra.mxu0 %v10053_v4  ;;  %4510 = vmatmul.bf16.gmra.mxu1 %v10058_v48 }
 0x73c   : > { %4559 = vmatmul.bf16.gmra.mxu2 %v10053_v4  ;;  %v3703_v47 = vsub.f32 %v3671_v20, %v3687_v23  ;;  %4608 = vmatmul.bf16.gmra.mxu3 %v10058_v48  ;;  %v7691_v20 = vld [vmem:[#allocation10 + $0x1f4] sm:$0xf0] }
 0x73d   : > { %v7231_v27 = vor.u32 %v7691_v20, %v7230_v0  ;;  %4634 = vmatpush.bf16.msrb.mxu0 %v7103_v1 }
 0x73e   : > { %v8022_v18 = vpop.eup %8021  ;;  %v3751_v38 = vadd.f32 1e-05, %v3703_v47 }
 0x73f   : > { %v3839_v59 = vmul.f32 %v8022_v18, %v3750_v43  ;;  %vm3845_vm12 = vweird.f32 %v8022_v18  ;;  %4683 = vmatpush.bf16.msrb.mxu1 %v7231_v27  ;;  %v7653_v43 = vld [vmem:[#allocation10 + $0xcc] sm:$0xf] }
 0x740   : > { %8023 = vrsqrt.f32 %v3751_v38  ;;  %vm3846_vm14 = vmor %vm3844_vm13, %vm3845_vm12  ;;  %v7091_v0 = vor.u32 %v7653_v43, %v7088_v19  ;;  %vm3854_vm0 = vweird.f32 %v3751_v38  ;;  %v7086_v19 = vld [vmem:[#allocation10 + $0xc8] sm:$0xf] }
 0x741   : > { %v3840_v63 = vmul.f32 %v8022_v18, %v3839_v59 }
 0x742   : > { %4733 = vmatpush.bf16.msrb.mxu2 %v7091_v0 }
 0x743   : > { %v3841_v41 = vmul.f32 0.5, %v3840_v63 }
 0x745   : > { %v3842_v9 = vsub.f32 1.5, %v3841_v41 }
 0x746   : > { %v8024_v51 = vpop.eup %8023 }
 0x747   : > { %v3843_v32 = vmul.f32 %v8022_v18, %v3842_v9  ;;  %v3849_v23 = vmul.f32 %v8024_v51, %v3751_v38  ;;  %v3726_v9 = vsub.f32 %v9702_v50, %v10023_v31  ;;  %vm3855_vm15 = vweird.f32 %v8024_v51 }
 0x748   : > { %v3728_v50 = vsub.f32 %v9716_v16, %v10037_v13  ;;  %vm3856_vm1 = vmor %vm3854_vm0, %vm3855_vm15  ;;  %v7685_v13 = vld [vmem:[#allocation10 + $0x1cc] sm:$0xf] }
 0x749   : > { %v3543_v47 = vpop.xlane.xlu0 %3542  ;;  %v3850_v59 = vmul.f32 %v8024_v51, %v3849_v23  ;;  %v3847_v41 = vsel %vm3846_vm14, %v8022_v18, %v3843_v32 }
 0x74a   : > { %v10067_v63 = vmul.f32 %v9766_v30, %v3543_v47  ;;  %v3934_v20 = vmul.f32 %v3847_v41, %v3726_v9  ;;  %v3935_v23 = vmul.f32 %v3847_v41, %v3727_v53 }
 0x74b   : > { %v3646_v49 = vpop.xlane.xlu2 %3645  ;;  %v3851_v5 = vmul.f32 0.5, %v3850_v59 }
 0x74c   : > { %v3672_v60 = vmul.f32 %v3646_v49, %v9766_v30  ;;  %v3688_v1 = vmul.f32 %v10067_v63, %v10067_v63  ;;  %v3973_v41 = vmul.f32 %v9863_v25, %v3934_v20  ;;  %v3974_v9 = vmul.f32 %v9865_v8, %v3935_v23 }
 0x74d   : > { %v3852_v27 = vsub.f32 1.5, %v3851_v5 }
 0x74e   : > { %v3704_v32 = vsub.f32 %v3672_v60, %v3688_v1  ;;  %v7216_v60 = vld [vmem:[#allocation10 + $0x1d8] sm:$0xf0]  ;;  %v10091_v20 = vadd.f32 %v9869_v54, %v3973_v41  ;;  %v10094_v23 = vadd.f32 %v9882_v55, %v3974_v9 }
 0x74f   : > { %v3853_v18 = vmul.f32 %v8024_v51, %v3852_v27  ;;  %v7219_v0 = vor.u32 %v7685_v13, %v7216_v60  ;;  %v7655_v27 = vld [vmem:[#allocation10 + $0xd4] sm:$0xf0] }
 0x750   : > { %v3752_v31 = vadd.f32 1e-05, %v3704_v32  ;;  %11438 = vst [vmem:[#allocation22_spill] sm:$0xff] %v10091_v20  ;;  %v7214_v32 = vld [vmem:[#allocation10 + $0x1c8] sm:$0xf] }
 0x751   : > { %v3546_v47 = vpop.xlane.xlu1 %3545  ;;  %v3857_v59 = vsel %vm3856_vm1, %v8024_v51, %v3853_v18  ;;  %11439 = vst [vmem:[#allocation46_spill] sm:$0xff] %v10094_v23  ;;  %v7687_v18 = vld [vmem:[#allocation10 + $0x1d4] sm:$0xf0]  ;;  %4782 = vmatpush.bf16.msrb.mxu3 %v7219_v0 }
 0x752   : > { %v10081_v49 = vmul.f32 %v9766_v30, %v3546_v47  ;;  %v3936_v53 = vmul.f32 %v3857_v59, %v3728_v50  ;;  %v3937_v5 = vmul.f32 %v3857_v59, %v3729_v26  ;;  %8025 = vrsqrt.f32 %v3752_v31 }
 0x753   : > { %v3649_v38 = vpop.xlane.xlu0 %3648  ;;  %v7087_v47 = vor.u32 %v7655_v27, %v7086_v19  ;;  %v7215_v59 = vor.u32 %v7687_v18, %v7214_v32  ;;  %v7649_v19 = vld [vmem:[#allocation10 + $0xac] sm:$0xf]  ;;  %vm3864_vm3 = vweird.f32 %v3752_v31 }
 0x754   : > { %v3673_v16 = vmul.f32 %v3649_v38, %v9766_v30  ;;  %v3689_v14 = vmul.f32 %v10081_v49, %v10081_v49  ;;  %v3975_v51 = vmul.f32 %v9863_v25, %v3936_v53  ;;  %v3976_v43 = vmul.f32 %v9865_v8, %v3937_v5 }
 0x755   : > { %4635 = vmatpush.bf16.msrb.mxu0 %v7087_v47  ;;  %4684 = vmatpush.bf16.msrb.mxu1 %v7215_v59 }
 0x756   : > { %v3705_v1 = vsub.f32 %v3673_v16, %v3689_v14  ;;  %v10097_v50 = vadd.f32 %v9869_v54, %v3975_v51  ;;  %v10100_v26 = vadd.f32 %v9882_v55, %v3976_v43 }
 0x758   : > { %11440 = vst [vmem:[#allocation37_spill] sm:$0xff] %v10097_v50  ;;  %v10102_v53 = vadd.f32 1e-05, %v3705_v1  ;;  %v8026_v5 = vpop.eup %8025  ;;  %v10106_v9 = vpack.c.bf16 %v10097_v50, %v10091_v20  ;;  %v10110_v38 = vpack.c.bf16 %v10100_v26, %v10094_v23  ;;  %v7072_v1 = vld [vmem:[#allocation10 + $0xb8] sm:$0xf0] }
 0x759   : > { %11441 = vst [vmem:[#allocation29_spill] sm:$0xff] %v10100_v26  ;;  %v3549_v41 = vpop.xlane.xlu1 %3548  ;;  %v3859_v16 = vmul.f32 %v8026_v5, %v3752_v31  ;;  %v7075_v27 = vor.u32 %v7649_v19, %v7072_v1  ;;  %vm3865_vm2 = vweird.f32 %v8026_v5  ;;  %v3730_v19 = vsub.f32 %v9733_v21, %v10067_v63  ;;  %v7200_v31 = vld [vmem:[#allocation10 + $0x1b8] sm:$0xf0]  ;;  %v7198_v23 = vld [vmem:[#allocation10 + $0x1a8] sm:$0xf] }
 0x75a   : > { %8027 = vrsqrt.f32 %v10102_v53  ;;  %v10114_v14 = vmul.f32 %v9766_v30, %v3549_v41  ;;  %4466 = vmatmul.bf16.gmra.mxu0 %v10106_v9  ;;  %4515 = vmatmul.bf16.gmra.mxu1 %v10110_v38  ;;  %vm3866_vm4 = vmor %vm3864_vm3, %vm3865_vm2  ;;  %v7199_v21 = vor.u32 %v7683_v45, %v7198_v23  ;;  %vm3874_vm6 = vweird.f32 %v10102_v53 }
 0x75b   : > { %v3652_v13 = vpop.xlane.xlu0 %3651  ;;  %v3860_v60 = vmul.f32 %v8026_v5, %v3859_v16  ;;  %4564 = vmatmul.bf16.gmra.mxu2 %v10106_v9  ;;  %4613 = vmatmul.bf16.gmra.mxu3 %v10110_v38 }
 0x75c   : > { %v3674_v51 = vmul.f32 %v3652_v13, %v9766_v30  ;;  %v3690_v43 = vmul.f32 %v10114_v14, %v10114_v14  ;;  %4734 = vmatpush.bf16.msrb.mxu2 %v7075_v27  ;;  %v7681_v27 = vld [vmem:[#allocation10 + $0x1ac] sm:$0xf]  ;;  %4685 = vmatpush.bf16.msrb.mxu1 %v7199_v21  ;;  %v7054_v21 = vld [vmem:[#allocation10 + $0x88] sm:$0xf] }
 0x75d   : > { %v3861_v0 = vmul.f32 0.5, %v3860_v60 }
 0x75e   : > { %v3706_v32 = vsub.f32 %v3674_v51, %v3690_v43 }
 0x75f   : > { %v3862_v47 = vsub.f32 1.5, %v3861_v0 }
 0x760   : > { %v8028_v18 = vpop.eup %8027  ;;  %v10124_v41 = vadd.f32 1e-05, %v3706_v32  ;;  %v3731_v32 = vsub.f32 %v9737_v17, %v10067_v63  ;;  %v3732_v63 = vsub.f32 %v9748_v6, %v10081_v49 }
 0x761   : > { %v3869_v59 = vmul.f32 %v8028_v18, %v10102_v53  ;;  %v3552_v16 = vpop.xlane.xlu2 %3551  ;;  %v3863_v13 = vmul.f32 %v8026_v5, %v3862_v47  ;;  %vm3875_vm5 = vweird.f32 %v8028_v18  ;;  %v7203_v47 = vor.u32 %v7681_v27, %v7200_v31  ;;  %v7645_v31 = vld [vmem:[#allocation10 + $0x8c] sm:$0xf] }
 0x762   : > { %v10127_v26 = vmul.f32 %v9766_v30, %v3552_v16  ;;  %8029 = vrsqrt.f32 %v10124_v41  ;;  %v7651_v16 = vld [vmem:[#allocation10 + $0xb4] sm:$0xf0]  ;;  %vm3876_vm7 = vmor %vm3874_vm6, %vm3875_vm5  ;;  %vm3884_vm9 = vweird.f32 %v10124_v41 }
 0x763   : > { %v3870_v50 = vmul.f32 %v8028_v18, %v3869_v59  ;;  %v3655_v60 = vpop.xlane.xlu1 %3654  ;;  %v3867_v51 = vsel %vm3866_vm4, %v8026_v5, %v3863_v13  ;;  %v7070_v59 = vld [vmem:[#allocation10 + $0xa8] sm:$0xf]  ;;  %4783 = vmatpush.bf16.msrb.mxu3 %v7203_v47 }
 0x764   : > { %v3691_v43 = vmul.f32 %v10127_v26, %v10127_v26  ;;  %v3675_v0 = vmul.f32 %v3655_v60, %v9766_v30  ;;  %v3938_v5 = vmul.f32 %v3867_v51, %v3730_v19  ;;  %v7071_v28 = vor.u32 %v7651_v16, %v7070_v59 }
 0x765   : > { %v3871_v1 = vmul.f32 0.5, %v3870_v50  ;;  %v3939_v34 = vmul.f32 %v3867_v51, %v3731_v32  ;;  %v3733_v19 = vsub.f32 %v9752_v42, %v10081_v49  ;;  %v7056_v32 = vld [vmem:[#allocation10 + $0x98] sm:$0xf0] }
 0x766   : > { %v3707_v20 = vsub.f32 %v3675_v0, %v3691_v43  ;;  %4636 = vmatpush.bf16.msrb.mxu0 %v7071_v28  ;;  %v3977_v28 = vmul.f32 %v9863_v25, %v3938_v5  ;;  %v7059_v16 = vor.u32 %v7645_v31, %v7056_v32  ;;  %v7677_v5 = vld [vmem:[#allocation10 + $0x18c] sm:$0xf] }
 0x767   : > { %v3872_v13 = vsub.f32 1.5, %v3871_v1  ;;  %v3978_v49 = vmul.f32 %v9865_v8, %v3939_v34  ;;  %v7673_v31 = vld [vmem:[#allocation10 + $0x16c] sm:$0xf] }
 0x768   : > { %v8030_v50 = vpop.eup %8029  ;;  %v10138_v35 = vadd.f32 1e-05, %v3707_v20  ;;  %v10158_v59 = vadd.f32 %v9869_v54, %v3977_v28  ;;  %4735 = vmatpush.bf16.msrb.mxu2 %v7059_v16 }
 0x769   : > { %v3873_v60 = vmul.f32 %v8028_v18, %v3872_v13  ;;  %v3555_v17 = vpop.xlane.xlu2 %3554  ;;  %v3879_v43 = vmul.f32 %v8030_v50, %v10124_v41  ;;  %vm3885_vm8 = vweird.f32 %v8030_v50  ;;  %v7184_v13 = vld [vmem:[#allocation10 + $0x198] sm:$0xf0] }
 0x76a   : > { %v10147_v45 = vmul.f32 %v9766_v30, %v3555_v17  ;;  %8031 = vrsqrt.f32 %v10138_v35  ;;  %11442 = vst [vmem:[#allocation28_spill] sm:$0xff] %v10158_v59  ;;  %vm3886_vm10 = vmor %vm3884_vm9, %vm3885_vm8  ;;  %vm3894_vm12 = vweird.f32 %v10138_v35 }
 0x76b   : > { %v3877_v23 = vsel %vm3876_vm7, %v8028_v18, %v3873_v60  ;;  %v3658_v20 = vpop.xlane.xlu1 %3657  ;;  %v3880_v6 = vmul.f32 %v8030_v50, %v3879_v43 }
 0x76c   : > { %v3940_v53 = vmul.f32 %v3877_v23, %v3732_v63  ;;  %v3941_v51 = vmul.f32 %v3877_v23, %v3733_v19  ;;  %v3676_v1 = vmul.f32 %v3658_v20, %v9766_v30  ;;  %v3692_v42 = vmul.f32 %v10147_v45, %v10147_v45  ;;  %v7647_v19 = vld [vmem:[#allocation10 + $0x94] sm:$0xf0] }
 0x76d   : > { %v3881_v0 = vmul.f32 0.5, %v3880_v6  ;;  %v7187_v63 = vor.u32 %v7677_v5, %v7184_v13  ;;  %v10172_v20 = vadd.f32 %v9882_v55, %v3978_v49  ;;  %v7055_v28 = vor.u32 %v7647_v19, %v7054_v21  ;;  %v7168_v13 = vld [vmem:[#allocation10 + $0x178] sm:$0xf0]  ;;  %v7038_v21 = vld [vmem:[#allocation10 + $0x68] sm:$0xf] }
 0x76e   : > { %v3979_v27 = vmul.f32 %v9863_v25, %v3940_v53  ;;  %v3980_v18 = vmul.f32 %v9865_v8, %v3941_v51  ;;  %v3708_v47 = vsub.f32 %v3676_v1, %v3692_v42  ;;  %v7182_v53 = vld [vmem:[#allocation10 + $0x188] sm:$0xf]  ;;  %v7679_v51 = vld [vmem:[#allocation10 + $0x194] sm:$0xf0]  ;;  %v3735_v19 = vsub.f32 %v9776_v29, %v10114_v14 }
 0x76f   : > { %v3882_v60 = vsub.f32 1.5, %v3881_v0  ;;  %11445 = vst [vmem:[#allocation25_spill] sm:$0xff] %v10172_v20  ;;  %4784 = vmatpush.bf16.msrb.mxu3 %v7187_v63  ;;  %4637 = vmatpush.bf16.msrb.mxu0 %v7055_v28  ;;  %v7183_v5 = vor.u32 %v7679_v51, %v7182_v53  ;;  %v3734_v63 = vsub.f32 %v9769_v52, %v10114_v14  ;;  %v7675_v28 = vld [vmem:[#allocation10 + $0x174] sm:$0xf0] }
 0x770   : > { %v10161_v17 = vadd.f32 %v9869_v54, %v3979_v27  ;;  %v10164_v34 = vadd.f32 %v9882_v55, %v3980_v18  ;;  %v10166_v43 = vpop.eup %8031  ;;  %v10169_v23 = vadd.f32 1e-05, %v3708_v47  ;;  %v7641_v27 = vld [vmem:[#allocation10 + $0x6c] sm:$0xf]  ;;  %v7040_v18 = vld [vmem:[#allocation10 + $0x78] sm:$0xf0]  ;;  %v7171_v52 = vor.u32 %v7673_v31, %v7168_v13 }
 0x771   : > { %v3883_v6 = vmul.f32 %v8030_v50, %v3882_v60  ;;  %v3889_v1 = vmul.f32 %v10166_v43, %v10138_v35  ;;  %v3558_v42 = vpop.xlane.xlu0 %3557  ;;  %v7643_v60 = vld [vmem:[#allocation10 + $0x74] sm:$0xf0]  ;;  %4686 = vmatpush.bf16.msrb.mxu1 %v7183_v5  ;;  %v7043_v53 = vor.u32 %v7641_v27, %v7040_v18  ;;  %vm3895_vm11 = vweird.f32 %v10166_v43  ;;  %v7150_v27 = vld [vmem:[#allocation10 + $0x148] sm:$0xf]  ;;  %v7669_v35 = vld [vmem:[#allocation10 + $0x14c] sm:$0xf] }
 0x772   : > { %11443 = vst [vmem:[#allocation44_spill] sm:$0xff] %v10161_v17  ;;  %v10179_v0 = vpack.c.bf16 %v10161_v17, %v10158_v59  ;;  %8033 = vrsqrt.f32 %v10169_v23  ;;  %v10183_v41 = vmul.f32 %v9766_v30, %v3558_v42  ;;  %v10187_v49 = vpack.c.bf16 %v10164_v34, %v10172_v20  ;;  %v7639_v5 = vld [vmem:[#allocation10 + $0x54] sm:$0xf0]  ;;  %vm3896_vm13 = vmor %vm3894_vm12, %vm3895_vm11 }
 0x773   : > { %11444 = vst [vmem:[#allocation48_spill] sm:$0xff] %v10164_v34  ;;  %v3887_v32 = vsel %vm3886_vm10, %v8030_v50, %v3883_v6  ;;  %v3890_v47 = vmul.f32 %v10166_v43, %v3889_v1  ;;  %v3661_v16 = vpop.xlane.xlu2 %3660  ;;  %v7166_v50 = vld [vmem:[#allocation10 + $0x168] sm:$0xf]  ;;  %v7039_v34 = vor.u32 %v7643_v60, %v7038_v21  ;;  %4736 = vmatpush.bf16.msrb.mxu2 %v7043_v53  ;;  %v7671_v13 = vld [vmem:[#allocation10 + $0x154] sm:$0xf0]  ;;  %vm3904_vm15 = vweird.f32 %v10169_v23 }
 0x774   : > { %4471 = vmatmul.bf16.gmra.mxu0 %v10179_v0  ;;  %4569 = vmatmul.bf16.gmra.mxu2 %v10179_v0  ;;  %v3693_v1 = vmul.f32 %v10183_v41, %v10183_v41  ;;  %v3677_v42 = vmul.f32 %v3661_v16, %v9766_v30  ;;  %v3942_v51 = vmul.f32 %v3887_v32, %v3734_v63  ;;  %v7022_v16 = vld [vmem:[#allocation10 + $0x48] sm:$0xf]  ;;  %v7637_v21 = vld [vmem:[#allocation10 + $0x4c] sm:$0xf]  ;;  %v7635_v53 = vld [vmem:[#allocation10 + $0x34] sm:$0xf0] }
 0x775   : > { %4520 = vmatmul.bf16.gmra.mxu1 %v10187_v49  ;;  %v3891_v6 = vmul.f32 0.5, %v3890_v47  ;;  %4618 = vmatmul.bf16.gmra.mxu3 %v10187_v49  ;;  %v3943_v29 = vmul.f32 %v3887_v32, %v3735_v19  ;;  %v7167_v20 = vor.u32 %v7675_v28, %v7166_v50  ;;  %v3736_v59 = vsub.f32 %v9789_v62, %v10127_v26  ;;  %v7024_v19 = vld [vmem:[#allocation10 + $0x58] sm:$0xf0]  ;;  %v7358_v30 = vld [vmem:[#allocation11 + $0xf0] sm:$0xf] }
 0x776   : > { %v3709_v17 = vsub.f32 %v3677_v42, %v3693_v1  ;;  %4785 = vmatpush.bf16.msrb.mxu3 %v7171_v52  ;;  %4638 = vmatpush.bf16.msrb.mxu0 %v7039_v34  ;;  %v3737_v62 = vsub.f32 %v9799_v37, %v10127_v26  ;;  %v3981_v34 = vmul.f32 %v9863_v25, %v3942_v51  ;;  %v7152_v28 = vld [vmem:[#allocation10 + $0x158] sm:$0xf0]  ;;  %v7006_v42 = vld [vmem:[#allocation10 + $0x28] sm:$0xf] }
 0x777   : > { %v3892_v14 = vsub.f32 1.5, %v3891_v6  ;;  %4687 = vmatpush.bf16.msrb.mxu1 %v7167_v20  ;;  %v7023_v60 = vor.u32 %v7639_v5, %v7022_v16  ;;  %v7151_v63 = vor.u32 %v7671_v13, %v7150_v27  ;;  %v3982_v20 = vmul.f32 %v9865_v8, %v3943_v29  ;;  %v7134_v51 = vld [vmem:[#allocation10 + $0x128] sm:$0xf]  ;;  %v7667_v16 = vld [vmem:[#allocation10 + $0x134] sm:$0xf0] }
 0x778   : > { %v10202_v47 = vpop.eup %8033  ;;  %v10210_v32 = vadd.f32 1e-05, %v3709_v17  ;;  %v7027_v26 = vor.u32 %v7637_v21, %v7024_v19  ;;  %v7155_v1 = vor.u32 %v7669_v35, %v7152_v28  ;;  %v7135_v29 = vor.u32 %v7667_v16, %v7134_v51  ;;  %v7118_v28 = vld [vmem:[#allocation10 + $0x108] sm:$0xf]  ;;  %v7120_v16 = vld [vmem:[#allocation10 + $0x118] sm:$0xf0] }
 0x779   : > { %v3893_v18 = vmul.f32 %v10166_v43, %v3892_v14  ;;  %v3899_v31 = vmul.f32 %v10202_v47, %v10169_v23  ;;  %v7007_v14 = vor.u32 %v7635_v53, %v7006_v42  ;;  %v10230_v19 = vadd.f32 %v9882_v55, %v3982_v20  ;;  %v6992_v42 = vld [vmem:[#allocation10 + $0x18] sm:$0xf0] }
 0x77a   : > { %8035 = vrsqrt.f32 %v10210_v32  ;;  %4639 = vmatpush.bf16.msrb.mxu0 %v7023_v60  ;;  %4737 = vmatpush.bf16.msrb.mxu2 %v7027_v26  ;;  %v10224_v60 = vadd.f32 %v9869_v54, %v3981_v34  ;;  %v7663_v34 = vld [vmem:[#allocation10 + $0x114] sm:$0xf0]  ;;  %vm3905_vm14 = vweird.f32 %v10202_v47  ;;  %v3738_v23 = vsub.f32 %v9812_v46, %v10147_v45 }
 0x77b   : > { %v3897_v50 = vsel %vm3896_vm13, %v10166_v43, %v3893_v18  ;;  %v3900_v17 = vmul.f32 %v10202_v47, %v3899_v31  ;;  %4688 = vmatpush.bf16.msrb.mxu1 %v7151_v63  ;;  %v7633_v43 = vld [vmem:[#allocation10 + $0x2c] sm:$0xf]  ;;  %4786 = vmatpush.bf16.msrb.mxu3 %v7155_v1  ;;  %v7136_v31 = vld [vmem:[#allocation10 + $0x138] sm:$0xf0]  ;;  %11448 = vst [vmem:[#allocation31_spill] sm:$0xff] %v10230_v19  ;;  %vm3906_vm0 = vmor %vm3904_vm15, %vm3905_vm14  ;;  %vm3914_vm2 = vweird.f32 %v10210_v32 }
 0x77c   : > { %v3944_v6 = vmul.f32 %v3897_v50, %v3736_v59  ;;  %v3945_v37 = vmul.f32 %v3897_v50, %v3737_v62  ;;  %v7008_v59 = vld [vmem:[#allocation10 + $0x38] sm:$0xf0]  ;;  %v7665_v18 = vld [vmem:[#allocation10 + $0x12c] sm:$0xf]  ;;  %11446 = vst [vmem:[#allocation24_spill] sm:$0xff] %v10224_v60  ;;  %v3741_v46 = vsub.f32 %v9847_v44, %v10183_v41 }
 0x77d   : > { %v3901_v52 = vmul.f32 0.5, %v3900_v17  ;;  %v7011_v21 = vor.u32 %v7633_v43, %v7008_v59  ;;  %v7139_v62 = vor.u32 %v7665_v18, %v7136_v31  ;;  %v6990_v50 = vld [vmem:[#allocation10 + $0x8] sm:$0xf]  ;;  %v7631_v17 = vld [vmem:[#allocation10 + $0x14] sm:$0xf0]  ;;  %v7119_v43 = vor.u32 %v7663_v34, %v7118_v28 }
 0x77e   : > { %v3983_v5 = vmul.f32 %v9863_v25, %v3944_v6  ;;  %v3984_v27 = vmul.f32 %v9865_v8, %v3945_v37  ;;  %4640 = vmatpush.bf16.msrb.mxu0 %v7007_v14  ;;  %v6991_v26 = vor.u32 %v7631_v17, %v6990_v50  ;;  %v7629_v1 = vld [vmem:[#allocation10 + $0xc] sm:$0xf] }
 0x77f   : > { %v3902_v13 = vsub.f32 1.5, %v3901_v52  ;;  %4689 = vmatpush.bf16.msrb.mxu1 %v7135_v29  ;;  %v10249_v52 = vld [vmem:[%s11266_s5] sm:$0xf]  ;;  %4738 = vmatpush.bf16.msrb.mxu2 %v7011_v21  ;;  %v7661_v14 = vld [vmem:[#allocation10 + $0x10c] sm:$0xf] }
 0x780   : > { %v10227_v63 = vadd.f32 %v9869_v54, %v3983_v5  ;;  %v10233_v35 = vadd.f32 %v9882_v55, %v3984_v27  ;;  %v8036_v6 = vpop.eup %8035  ;;  %4787 = vmatpush.bf16.msrb.mxu3 %v7139_v62  ;;  %v6995_v5 = vor.u32 %v7629_v1, %v6992_v42  ;;  %v7123_v27 = vor.u32 %v7661_v14, %v7120_v16 }
 0x781   : > { %v3903_v37 = vmul.f32 %v10202_v47, %v3902_v13  ;;  %v3909_v20 = vmul.f32 %v8036_v6, %v10210_v32  ;;  %v10259_v59 = vperm.slane %v10249_v52, 0  ;;  %v3739_v13 = vsub.f32 %v9822_v40, %v10147_v45 }
 0x782   : > { %11447 = vst [vmem:[#allocation49_spill] sm:$0xff] %v10227_v63  ;;  %v10240_v53 = vpack.c.bf16 %v10227_v63, %v10224_v60  ;;  %v10244_v51 = vpack.c.bf16 %v10233_v35, %v10230_v19  ;;  %4641 = vmatpush.bf16.msrb.mxu0 %v6991_v26  ;;  %vm3915_vm1 = vweird.f32 %v8036_v6  ;;  %v10275_v26 = vperm.slane %v10249_v52, 1 }
 0x783   : > { %11449 = vst [vmem:[#allocation30_spill] sm:$0xff] %v10233_v35  ;;  %v3910_v29 = vmul.f32 %v8036_v6, %v3909_v20  ;;  %v3907_v18 = vsel %vm3906_vm0, %v10202_v47, %v3903_v37  ;;  %4690 = vmatpush.bf16.msrb.mxu1 %v7119_v43  ;;  %4739 = vmatpush.bf16.msrb.mxu2 %v6995_v5  ;;  %vm3916_vm3 = vmor %vm3914_vm2, %vm3915_vm1 }
 0x784   : > { %4476 = vmatmul.bf16.gmra.mxu0 %v10240_v53  ;;  %4574 = vmatmul.bf16.gmra.mxu2 %v10240_v53  ;;  %v3946_v50 = vmul.f32 %v3907_v18, %v3738_v23  ;;  %v3947_v17 = vmul.f32 %v3907_v18, %v3739_v13  ;;  %v3740_v37 = vsub.f32 %v9839_v57, %v10183_v41 }
 0x785   : > { %4525 = vmatmul.bf16.gmra.mxu1 %v10244_v51  ;;  %4623 = vmatmul.bf16.gmra.mxu3 %v10244_v51  ;;  %v3911_v31 = vmul.f32 0.5, %v3910_v29 }
 0x786   : > { %4788 = vmatpush.bf16.msrb.mxu3 %v7123_v27  ;;  %v3985_v20 = vmul.f32 %v9863_v25, %v3946_v50  ;;  %v3986_v14 = vmul.f32 %v9865_v8, %v3947_v17 }
 0x787   : > { %v3912_v21 = vsub.f32 1.5, %v3911_v31 }
 0x788   : > { %v4447_v62 = vpop.f32.mrf.mxu0  ;;  %v4496_v34 = vpop.f32.mrf.mxu1  ;;  %v10287_v5 = vadd.f32 %v9869_v54, %v3985_v20  ;;  %v10293_v29 = vadd.f32 %v9882_v55, %v3986_v14 }
 0x789   : > { %v4448_v28 = vadd.f32 %v4447_v62, %v10259_v59  ;;  %v3913_v47 = vmul.f32 %v8036_v6, %v3912_v21 }
 0x78a   : > { %11450 = vst [vmem:[#allocation47_spill] sm:$0xff] %v10287_v5 }
 0x78b   : > { %v10272_v40 = vadd.f32 %v4496_v34, %v4448_v28  ;;  %v3917_v45 = vsel %vm3916_vm3, %v8036_v6, %v3913_v47  ;;  %11452 = vst [vmem:[#allocation32_spill] sm:$0xff] %v10293_v29 }
 0x78c   : > { %v3948_v1 = vmul.f32 %v3917_v45, %v3740_v37  ;;  %v3949_v42 = vmul.f32 %v3917_v45, %v3741_v46 }
 0x78e   : > { %v3987_v16 = vmul.f32 %v9863_v25, %v3948_v1  ;;  %v3988_v57 = vmul.f32 %v9865_v8, %v3949_v42 }
 0x78f   : > { %v4545_v32 = vpop.f32.mrf.mxu2  ;;  %v4594_v41 = vpop.f32.mrf.mxu3 }
 0x790   : > { %v4546_v44 = vadd.f32 %v4545_v32, %v10275_v26  ;;  %v10282_v43 = vpop.f32.mrf.mxu0  ;;  %v10284_v6 = vpop.f32.mrf.mxu1  ;;  %v10290_v27 = vadd.f32 %v9869_v54, %v3987_v16  ;;  %v10296_v25 = vadd.f32 %v9882_v55, %v3988_v57 }
 0x792   : > { %11451 = vst [vmem:[#allocation33_spill] sm:$0xff] %v10290_v27  ;;  %v10298_v8 = vadd.f32 %v4594_v41, %v4546_v44  ;;  %v10302_v18 = vpack.c.bf16 %v10290_v27, %v10287_v5  ;;  %v10306_v31 = vpack.c.bf16 %v10296_v25, %v10293_v29  ;;  %v7723_v27 = vld [vmem:[#allocation11 + $0xf4] sm:$0xf0] }
 0x793   : > { %11453 = vst [vmem:[#allocation50_spill] sm:$0xff] %v10296_v25 }
 0x794   : > { %4481 = vmatmul.bf16.gmra.mxu0 %v10302_v18  ;;  %4579 = vmatmul.bf16.gmra.mxu2 %v10302_v18 }
 0x795   : > { %4530 = vmatmul.bf16.gmra.mxu1 %v10306_v31  ;;  %4628 = vmatmul.bf16.gmra.mxu3 %v10306_v31 }
 0x797   : > { %v10312_v54 = vpop.f32.mrf.mxu2  ;;  %v10314_v55 = vpop.f32.mrf.mxu3 }
 0x798   : > { %v4452_v23 = vpop.f32.mrf.mxu0  ;;  %v4501_v21 = vpop.f32.mrf.mxu1 }
 0x799   : > { %v4453_v13 = vadd.f32 %v4452_v23, %v10259_v59 }
 0x79b   : > { %v10317_v62 = vadd.f32 %v4501_v21, %v4453_v13 }
 0x79f   : > { %v4550_v50 = vpop.f32.mrf.mxu2  ;;  %v4599_v28 = vpop.f32.mrf.mxu3 }
 0x7a0   : > { %v4551_v17 = vadd.f32 %v4550_v50, %v10275_v26  ;;  %v10320_v34 = vpop.f32.mrf.mxu0  ;;  %v10322_v47 = vpop.f32.mrf.mxu1 }
 0x7a2   : > { %v10324_v37 = vadd.f32 %v4599_v28, %v4551_v17  ;;  %v7422_v28 = vld [vmem:[#allocation11 + $0x170] sm:$0xf] }
 0x7a4   : > { %4642 = vmatmul.bf16.vlgmr.msrb.gmra.mxu0 %v9913_v39  ;;  %4740 = vmatmul.bf16.vlgmr.msrb.gmra.mxu2 %v9913_v39 }
 0x7a5   : > { %4691 = vmatmul.bf16.vlgmr.msrb.gmra.mxu1 %v9917_v56  ;;  %4789 = vmatmul.bf16.vlgmr.msrb.gmra.mxu3 %v9917_v56 }
 0x7a7   : > { %v10330_v46 = vpop.f32.mrf.mxu2  ;;  %v10332_v45 = vpop.f32.mrf.mxu3 }
 0x7a8   : > { %v4457_v1 = vpop.f32.mrf.mxu0  ;;  %v4506_v20 = vpop.f32.mrf.mxu1 }
 0x7a9   : > { %v4458_v42 = vadd.f32 %v4457_v1, %v10259_v59  ;;  %v7739_v1 = vld [vmem:[#allocation11 + $0x174] sm:$0xf0] }
 0x7ab   : > { %v10335_v14 = vadd.f32 %v4506_v20, %v4458_v42  ;;  %v7423_v42 = vor.u32 %v7739_v1, %v7422_v28  ;;  %v7294_v20 = vld [vmem:[#allocation11 + $0x70] sm:$0xf]  ;;  %v7737_v28 = vld [vmem:[#allocation11 + $0x164] sm:$0xf0]  ;;  %v7286_v1 = vld [vmem:[#allocation11 + $0x60] sm:$0xf] }
 0x7ad   : > { %5415 = vmatpush.bf16.msra.mxu2 %v7423_v42 }
 0x7af   : > { %v4555_v32 = vpop.f32.mrf.mxu2  ;;  %v4604_v57 = vpop.f32.mrf.mxu3 }
 0x7b0   : > { %v4556_v16 = vadd.f32 %v4555_v32, %v10275_v26  ;;  %v10338_v44 = vpop.f32.mrf.mxu0  ;;  %v10340_v41 = vpop.f32.mrf.mxu1  ;;  %v7707_v32 = vld [vmem:[#allocation11 + $0x74] sm:$0xf0] }
 0x7b2   : > { %v10342_v39 = vadd.f32 %v4604_v57, %v4556_v16  ;;  %v7295_v16 = vor.u32 %v7707_v32, %v7294_v20  ;;  %v7486_v57 = vld [vmem:[#allocation11 + $0x1f0] sm:$0xf]  ;;  %v7705_v20 = vld [vmem:[#allocation11 + $0x64] sm:$0xf0]  ;;  %v7478_v32 = vld [vmem:[#allocation11 + $0x1e0] sm:$0xf] }
 0x7b4   : > { %4647 = vmatmul.bf16.gmra.mxu0 %v9968_v58  ;;  %4745 = vmatmul.bf16.gmra.mxu2 %v9968_v58  ;;  %v7755_v58 = vld [vmem:[#allocation11 + $0x1f4] sm:$0xf0] }
 0x7b5   : > { %4696 = vmatmul.bf16.gmra.mxu1 %v9972_v22  ;;  %4794 = vmatmul.bf16.gmra.mxu3 %v9972_v22  ;;  %v7487_v25 = vor.u32 %v7755_v58, %v7486_v57 }
 0x7b6   : > { %5317 = vmatpush.bf16.msra.mxu0 %v7295_v16 }
 0x7b7   : > { %v10348_v56 = vpop.f32.mrf.mxu2  ;;  %v10350_v23 = vpop.f32.mrf.mxu3  ;;  %5464 = vmatpush.bf16.msra.mxu3 %v7487_v25  ;;  %v7350_v25 = vld [vmem:[#allocation11 + $0xe0] sm:$0xf] }
 0x7b8   : > { %v4462_v13 = vpop.f32.mrf.mxu0  ;;  %v4511_v50 = vpop.f32.mrf.mxu1 }
 0x7b9   : > { %v4463_v21 = vadd.f32 %v4462_v13, %v10259_v59  ;;  %v7359_v13 = vor.u32 %v7723_v27, %v7358_v30  ;;  %v7287_v30 = vor.u32 %v7705_v20, %v7286_v1  ;;  %v7753_v27 = vld [vmem:[#allocation11 + $0x1e4] sm:$0xf0]  ;;  %v7406_v1 = vld [vmem:[#allocation11 + $0x150] sm:$0xf] }
 0x7ba   : > { %v7278_v20 = vld [vmem:[#allocation11 + $0x50] sm:$0xf] }
 0x7bb   : > { %v10353_v17 = vadd.f32 %v4511_v50, %v4463_v21  ;;  %5366 = vmatpush.bf16.msra.mxu1 %v7359_v13  ;;  %v7414_v50 = vld [vmem:[#allocation11 + $0x160] sm:$0xf]  ;;  %5318 = vmatpush.bf16.msra.mxu0 %v7287_v30 }
 0x7bc   : > { %v7415_v42 = vor.u32 %v7737_v28, %v7414_v50 }
 0x7be   : > { %5416 = vmatpush.bf16.msra.mxu2 %v7415_v42  ;;  %v7735_v42 = vld [vmem:[#allocation11 + $0x154] sm:$0xf0] }
 0x7bf   : > { %v4560_v22 = vpop.f32.mrf.mxu2  ;;  %v4609_v5 = vpop.f32.mrf.mxu3  ;;  %v7407_v30 = vor.u32 %v7735_v42, %v7406_v1 }
 0x7c0   : > { %v4561_v29 = vadd.f32 %v4560_v22, %v10275_v26  ;;  %v10362_v57 = vpop.f32.mrf.mxu0 }
 0x7c2   : > { %v10356_v21 = vadd.f32 %v4609_v5, %v4561_v29  ;;  %v7721_v5 = vld [vmem:[#allocation11 + $0xe4] sm:$0xf0]  ;;  %v7479_v29 = vor.u32 %v7753_v27, %v7478_v32  ;;  %v7703_v27 = vld [vmem:[#allocation11 + $0x54] sm:$0xf0]  ;;  %5417 = vmatpush.bf16.msra.mxu2 %v7407_v30 }
 0x7c3   : > { %v7351_v16 = vor.u32 %v7721_v5, %v7350_v25  ;;  %v7470_v25 = vld [vmem:[#allocation11 + $0x1d0] sm:$0xf]  ;;  %v7751_v5 = vld [vmem:[#allocation11 + $0x1d4] sm:$0xf0]  ;;  %v7733_v30 = vld [vmem:[#allocation11 + $0x144] sm:$0xf0] }
 0x7c4   : > { %4652 = vmatmul.bf16.gmra.mxu0 %v10008_v15  ;;  %4750 = vmatmul.bf16.gmra.mxu2 %v10008_v15  ;;  %v10364_v15 = vpop.f32.mrf.mxu1 }
 0x7c5   : > { %4701 = vmatmul.bf16.gmra.mxu1 %v10012_v2  ;;  %4799 = vmatmul.bf16.gmra.mxu3 %v10012_v2 }
 0x7c6   : > { %5465 = vmatpush.bf16.msra.mxu3 %v7479_v29  ;;  %5367 = vmatpush.bf16.msra.mxu1 %v7351_v16  ;;  %v7279_v29 = vor.u32 %v7703_v27, %v7278_v20  ;;  %v7270_v27 = vld [vmem:[#allocation11 + $0x40] sm:$0xf] }
 0x7c7   : > { %v10368_v2 = vpop.f32.mrf.mxu2  ;;  %v10372_v22 = vpop.f32.mrf.mxu3 }
 0x7c8   : > { %5319 = vmatpush.bf16.msra.mxu0 %v7279_v29  ;;  %v7749_v29 = vld [vmem:[#allocation11 + $0x1c4] sm:$0xf0] }
 0x7d4   : > { %4657 = vmatmul.bf16.gmra.mxu0 %v10053_v4  ;;  %4755 = vmatmul.bf16.gmra.mxu2 %v10053_v4 }
 0x7d5   : > { %4706 = vmatmul.bf16.gmra.mxu1 %v10058_v48  ;;  %4804 = vmatmul.bf16.gmra.mxu3 %v10058_v48  ;;  %v7471_v48 = vor.u32 %v7751_v5, %v7470_v25  ;;  %v7701_v5 = vld [vmem:[#allocation11 + $0x44] sm:$0xf0] }
 0x7d7   : > { %v4467_v58 = vpop.f32.mrf.mxu0  ;;  %v4516_v50 = vpop.f32.mrf.mxu1  ;;  %5466 = vmatpush.bf16.msra.mxu3 %v7471_v48 }
 0x7d8   : > { %v4468_v13 = vadd.f32 %v4467_v58, %v10259_v59  ;;  %v7342_v58 = vld [vmem:[#allocation11 + $0xd0] sm:$0xf] }
 0x7da   : > { %v10375_v28 = vadd.f32 %v4516_v50, %v4468_v13  ;;  %v7719_v13 = vld [vmem:[#allocation11 + $0xd4] sm:$0xf0] }
 0x7db   : > { %v7343_v50 = vor.u32 %v7719_v13, %v7342_v58  ;;  %v7717_v13 = vld [vmem:[#allocation11 + $0xc4] sm:$0xf0] }
 0x7dd   : > { %5368 = vmatpush.bf16.msra.mxu1 %v7343_v50 }
 0x7de   : > { %v4565_v32 = vpop.f32.mrf.mxu2  ;;  %v4614_v16 = vpop.f32.mrf.mxu3 }
 0x7df   : > { %v4566_v4 = vadd.f32 %v4565_v32, %v10275_v26  ;;  %v10384_v1 = vpop.f32.mrf.mxu0  ;;  %v10386_v42 = vpop.f32.mrf.mxu1  ;;  %v7398_v32 = vld [vmem:[#allocation11 + $0x140] sm:$0xf] }
 0x7e0   : > { %v7399_v25 = vor.u32 %v7733_v30, %v7398_v32  ;;  %v7262_v32 = vld [vmem:[#allocation11 + $0x30] sm:$0xf]  ;;  %v7699_v30 = vld [vmem:[#allocation11 + $0x34] sm:$0xf0] }
 0x7e1   : > { %v10378_v63 = vadd.f32 %v4614_v16, %v4566_v4  ;;  %v7462_v4 = vld [vmem:[#allocation11 + $0x1c0] sm:$0xf] }
 0x7e2   : > { %v7463_v58 = vor.u32 %v7749_v29, %v7462_v4  ;;  %5418 = vmatpush.bf16.msra.mxu2 %v7399_v25 }
 0x7e4   : > { %4662 = vmatmul.bf16.gmra.mxu0 %v10106_v9  ;;  %4760 = vmatmul.bf16.gmra.mxu2 %v10106_v9  ;;  %v7271_v9 = vor.u32 %v7701_v5, %v7270_v27  ;;  %v7263_v27 = vor.u32 %v7699_v30, %v7262_v32  ;;  %v7715_v5 = vld [vmem:[#allocation11 + $0xb4] sm:$0xf0] }
 0x7e5   : > { %4711 = vmatmul.bf16.gmra.mxu1 %v10110_v38  ;;  %4809 = vmatmul.bf16.gmra.mxu3 %v10110_v38  ;;  %v7334_v38 = vld [vmem:[#allocation11 + $0xc0] sm:$0xf]  ;;  %v7327_v25 = vor.u32 %v7715_v5, %v7326_v61  ;;  %v7246_v61 = vld [vmem:[#allocation11 + $0x10] sm:$0xf]  ;;  %v7695_v5 = vld [vmem:[#allocation11 + $0x14] sm:$0xf0] }
 0x7e6   : > { %v10388_v20 = vpop.f32.mrf.mxu2  ;;  %v10390_v48 = vpop.f32.mrf.mxu3  ;;  %v7335_v19 = vor.u32 %v7717_v13, %v7334_v38  ;;  %5320 = vmatpush.bf16.msra.mxu0 %v7271_v9  ;;  %5467 = vmatpush.bf16.msra.mxu3 %v7463_v58  ;;  %v7697_v9 = vld [vmem:[#allocation11 + $0x24] sm:$0xf0]  ;;  %v7318_v58 = vld [vmem:[#allocation11 + $0xa0] sm:$0xf] }
 0x7e8   : > { %5369 = vmatpush.bf16.msra.mxu1 %v7335_v19 }
 0x7ea   : > { %5321 = vmatpush.bf16.msra.mxu0 %v7263_v27  ;;  %v7310_v27 = vld [vmem:[#allocation11 + $0x90] sm:$0xf] }
 0x7ec   : > { %5370 = vmatpush.bf16.msra.mxu1 %v7327_v25  ;;  %v7247_v25 = vor.u32 %v7695_v5, %v7246_v61  ;;  %v7302_v61 = vld [vmem:[#allocation11 + $0x80] sm:$0xf]  ;;  %v7709_v5 = vld [vmem:[#allocation11 + $0x84] sm:$0xf0] }
 0x7f1   : > { %v4472_v16 = vpop.f32.mrf.mxu0 }
 0x7f2   : > { %v4473_v50 = vadd.f32 %v4472_v16, %v10259_v59  ;;  %v4521_v35 = vpop.f32.mrf.mxu1  ;;  %v7254_v16 = vld [vmem:[#allocation11 + $0x20] sm:$0xf] }
 0x7f3   : > { %v7255_v32 = vor.u32 %v7697_v9, %v7254_v16 }
 0x7f4   : > { %v4522_v60 = vadd.f32 %v4521_v35, %v4473_v50  ;;  %4667 = vmatmul.bf16.gmra.mxu0 %v10179_v0  ;;  %4765 = vmatmul.bf16.gmra.mxu2 %v10179_v0  ;;  %v7713_v0 = vld [vmem:[#allocation11 + $0xa4] sm:$0xf0] }
 0x7f5   : > { %4716 = vmatmul.bf16.gmra.mxu1 %v10187_v49  ;;  %4814 = vmatmul.bf16.gmra.mxu3 %v10187_v49  ;;  %v7319_v30 = vor.u32 %v7713_v0, %v7318_v58 }
 0x7f6   : > { %5322 = vmatpush.bf16.msra.mxu0 %v7255_v32  ;;  %v7693_v32 = vld [vmem:[#allocation11 + $0x4] sm:$0xf0] }
 0x7f7   : > { %v4570_v4 = vpop.f32.mrf.mxu2  ;;  %5371 = vmatpush.bf16.msra.mxu1 %v7319_v30 }
 0x7f8   : > { %v4571_v29 = vadd.f32 %v4570_v4, %v10275_v26  ;;  %v4619_v35 = vpop.f32.mrf.mxu3  ;;  %v4870_v4 = vmax.f32 %v4522_v60, 0.0 }
 0x7f9   : > { %v4474_v19 = vpop.f32.mrf.mxu0 }
 0x7fa   : > { %v10398_v38 = vadd.f32 %v4619_v35, %v4571_v29  ;;  %v4475_v13 = vadd.f32 %v4474_v19, %v10259_v59  ;;  %v4523_v50 = vpop.f32.mrf.mxu1  ;;  %v7311_v29 = vor.u32 %v7711_v24, %v7310_v27  ;;  %v7390_v35 = vld [vmem:[#allocation11 + $0x130] sm:$0xf]  ;;  %5323 = vmatpush.bf16.msra.mxu0 %v7247_v25  ;;  %v7303_v27 = vor.u32 %v7709_v5, %v7302_v61 }
 0x7fb   : > { %v7454_v19 = vld [vmem:[#allocation11 + $0x1b0] sm:$0xf]  ;;  %v7391_v58 = vor.u32 %v7731_v33, %v7390_v35  ;;  %v7382_v33 = vld [vmem:[#allocation11 + $0x120] sm:$0xf] }
 0x7fc   : > { %v4524_v49 = vadd.f32 %v4523_v50, %v4475_v13  ;;  %5372 = vmatpush.bf16.msra.mxu1 %v7311_v29  ;;  %v7747_v13 = vld [vmem:[#allocation11 + $0x1b4] sm:$0xf0]  ;;  %v7238_v50 = vld [vmem:[#allocation11] sm:$0xf] }
 0x7fd   : > { %v7455_v30 = vor.u32 %v7747_v13, %v7454_v19  ;;  %5419 = vmatpush.bf16.msra.mxu2 %v7391_v58 }
 0x7fe   : > { %v4874_v36 = vmax.f32 %v4524_v49, 0.0  ;;  %v7239_v49 = vor.u32 %v7693_v32, %v7238_v50  ;;  %v7374_v32 = vld [vmem:[#allocation11 + $0x110] sm:$0xf] }
 0x7ff   : > { %v10401_v11 = vpop.f32.mrf.mxu2  ;;  %5468 = vmatpush.bf16.msra.mxu3 %v7455_v30 }
 0x800   : > { %v10403_v16 = vpack.c.bf16 %v4874_v36, %v4870_v4  ;;  %v10405_v9 = vpop.f32.mrf.mxu3  ;;  %5324 = vmatpush.bf16.msra.mxu0 %v7239_v49  ;;  %5373 = vmatpush.bf16.msra.mxu1 %v7303_v27  ;;  %v7729_v4 = vld [vmem:[#allocation11 + $0x124] sm:$0xf0]  ;;  %v7446_v49 = vld [vmem:[#allocation11 + $0x1a0] sm:$0xf] }
 0x801   : > { %v4477_v60 = vpop.f32.mrf.mxu0  ;;  %v7383_v25 = vor.u32 %v7729_v4, %v7382_v33  ;;  %v7366_v27 = vld [vmem:[#allocation11 + $0x100] sm:$0xf]  ;;  %v7725_v33 = vld [vmem:[#allocation11 + $0x104] sm:$0xf0] }
 0x802   : > { %v4526_v0 = vpop.f32.mrf.mxu1  ;;  %v4478_v24 = vadd.f32 %v4477_v60, %v10259_v59  ;;  %v7727_v60 = vld [vmem:[#allocation11 + $0x114] sm:$0xf0]  ;;  %v7367_v4 = vor.u32 %v7725_v33, %v7366_v27 }
 0x803   : > { %5420 = vmatpush.bf16.msra.mxu2 %v7383_v25  ;;  %v7375_v30 = vor.u32 %v7727_v60, %v7374_v32  ;;  %v7741_v60 = vld [vmem:[#allocation11 + $0x184] sm:$0xf0] }
 0x804   : > { %v4527_v36 = vadd.f32 %v4526_v0, %v4478_v24  ;;  %4672 = vmatmul.bf16.gmra.mxu0 %v10240_v53  ;;  %4770 = vmatmul.bf16.gmra.mxu2 %v10240_v53 }
 0x805   : > { %4721 = vmatmul.bf16.gmra.mxu1 %v10244_v51  ;;  %4819 = vmatmul.bf16.gmra.mxu3 %v10244_v51  ;;  %v7745_v51 = vld [vmem:[#allocation11 + $0x1a4] sm:$0xf0] }
 0x806   : > { %v7447_v61 = vor.u32 %v7745_v51, %v7446_v49  ;;  %v4878_v5 = vmax.f32 %v4527_v36, 0.0  ;;  %v7430_v36 = vld [vmem:[#allocation11 + $0x180] sm:$0xf]  ;;  %v4548_v49 = vadd.f32 %v10312_v54, %v10275_v26 }
 0x807   : > { %v4575_v29 = vpop.f32.mrf.mxu2  ;;  %5421 = vmatpush.bf16.msra.mxu2 %v7375_v30 }
 0x808   : > { %v4624_v35 = vpop.f32.mrf.mxu3  ;;  %v4576_v19 = vadd.f32 %v4575_v29, %v10275_v26  ;;  %5469 = vmatpush.bf16.msra.mxu3 %v7447_v61 }
 0x809   : > { %v4479_v58 = vpop.f32.mrf.mxu0 }
 0x80a   : > { %v4528_v13 = vpop.f32.mrf.mxu1  ;;  %v4480_v50 = vadd.f32 %v4479_v58, %v10259_v59  ;;  %v10414_v0 = vadd.f32 %v4624_v35, %v4576_v19  ;;  %v7438_v58 = vld [vmem:[#allocation11 + $0x190] sm:$0xf] }
 0x80b   : > { %5422 = vmatpush.bf16.msra.mxu2 %v7367_v4  ;;  %v7439_v19 = vor.u32 %v7743_v10, %v7438_v58  ;;  %v4450_v10 = vadd.f32 %v10282_v43, %v10259_v59  ;;  %v4597_v4 = vadd.f32 %v10314_v55, %v4548_v49 }
 0x80c   : > { %v4529_v53 = vadd.f32 %v4528_v13, %v4480_v50 }
 0x80d   : > { %5470 = vmatpush.bf16.msra.mxu3 %v7439_v19  ;;  %v4499_v33 = vadd.f32 %v10284_v6, %v4450_v10  ;;  %v4835_v19 = vmax.f32 %v4597_v4, 0.0 }
 0x80e   : > { %v4882_v24 = vmax.f32 %v4529_v53, 0.0  ;;  %v7431_v53 = vor.u32 %v7741_v60, %v7430_v36 }
 0x80f   : > { %v10416_v29 = vpop.f32.mrf.mxu2  ;;  %v4834_v43 = vmax.f32 %v4499_v33, 0.0 }
 0x810   : > { %v10418_v25 = vpop.f32.mrf.mxu3  ;;  %v10420_v35 = vpack.c.bf16 %v4882_v24, %v4878_v5 }
 0x811   : > { %v4482_v13 = vpop.f32.mrf.mxu0  ;;  %5471 = vmatpush.bf16.msra.mxu3 %v7431_v53 }
 0x812   : > { %v4531_v50 = vpop.f32.mrf.mxu1  ;;  %v4483_v32 = vadd.f32 %v4482_v13, %v10259_v59 }
 0x814   : > { %v4532_v30 = vadd.f32 %v4531_v50, %v4483_v32  ;;  %4677 = vmatmul.bf16.gmra.mxu0 %v10302_v18  ;;  %4775 = vmatmul.bf16.gmra.mxu2 %v10302_v18  ;;  %v4830_v50 = vmax.f32 %v10272_v40, 0.0  ;;  %v4831_v32 = vmax.f32 %v10298_v8, 0.0  ;;  %v4455_v40 = vadd.f32 %v10320_v34, %v10259_v59 }
 0x815   : > { %4726 = vmatmul.bf16.gmra.mxu1 %v10306_v31  ;;  %4824 = vmatmul.bf16.gmra.mxu3 %v10306_v31  ;;  %v4553_v8 = vadd.f32 %v10330_v46, %v10275_v26 }
 0x816   : > { %v4886_v13 = vmax.f32 %v4532_v30, 0.0  ;;  %v10445_v10 = vpack.c.bf16 %v4834_v43, %v4830_v50  ;;  %v10447_v49 = vpack.c.bf16 %v4835_v19, %v4831_v32  ;;  %v4504_v4 = vadd.f32 %v10322_v47, %v4455_v40 }
 0x817   : > { %v4580_v51 = vpop.f32.mrf.mxu2  ;;  %v4838_v32 = vmax.f32 %v10317_v62, 0.0  ;;  %v4460_v62 = vadd.f32 %v10338_v44, %v10259_v59 }
 0x818   : > { %v4629_v61 = vpop.f32.mrf.mxu3  ;;  %v4581_v5 = vadd.f32 %v4580_v51, %v10275_v26  ;;  %v10450_v51 = vperm.slane %v10249_v52, 2  ;;  %v4842_v46 = vmax.f32 %v4504_v4, 0.0 }
 0x819   : > { %v4484_v24 = vpop.f32.mrf.mxu0 }
 0x81a   : > { %v4533_v27 = vpop.f32.mrf.mxu1  ;;  %v4485_v18 = vadd.f32 %v4484_v24, %v10259_v59  ;;  %v10435_v31 = vadd.f32 %v4629_v61, %v4581_v5  ;;  %v10460_v24 = vperm.slane %v10249_v52, 3  ;;  %v4839_v52 = vmax.f32 %v10324_v37, 0.0 }
 0x81b   : > { %v4558_v37 = vadd.f32 %v10348_v56, %v10275_v26 }
 0x81c   : > { %v4534_v58 = vadd.f32 %v4533_v27, %v4485_v18  ;;  %v4602_v18 = vadd.f32 %v10332_v45, %v4553_v8 }
 0x81e   : > { %v4890_v54 = vmax.f32 %v4534_v58, 0.0 }
 0x81f   : > { %v10439_v36 = vpop.f32.mrf.mxu2 }
 0x820   : > { %v10441_v60 = vpop.f32.mrf.mxu3  ;;  %v10443_v6 = vpack.c.bf16 %v4890_v54, %v4886_v13  ;;  %v4843_v13 = vmax.f32 %v4602_v18, 0.0 }
 0x821   : > { %v4643_v55 = vpop.f32.mrf.mxu0 }
 0x822   : > { %v4692_v53 = vpop.f32.mrf.mxu1  ;;  %v4644_v30 = vadd.f32 %v4643_v55, %v10450_v51 }
 0x824   : > { %5325 = vmatmul.bf16.vlgmr.msra.gmra.mxu0 %v10445_v10  ;;  %v4693_v58 = vadd.f32 %v4692_v53, %v4644_v30  ;;  %v10472_v30 = vpack.c.bf16 %v4842_v46, %v4838_v32 }
 0x825   : > { %5374 = vmatmul.bf16.vlgmr.msra.gmra.mxu1 %v10447_v49 }
 0x826   : > { %v4832_v54 = vmax.f32 %v4693_v58, 0.0 }
 0x827   : > { %v4741_v61 = vpop.f32.mrf.mxu2 }
 0x828   : > { %v4790_v5 = vpop.f32.mrf.mxu3  ;;  %v4742_v19 = vadd.f32 %v4741_v61, %v10460_v24  ;;  %v10474_v61 = vpack.c.bf16 %v4843_v13, %v4839_v52 }
 0x829   : > { %v4645_v27 = vpop.f32.mrf.mxu0 }
 0x82a   : > { %v4694_v33 = vpop.f32.mrf.mxu1  ;;  %v4646_v43 = vadd.f32 %v4645_v27, %v10450_v51  ;;  %v4791_v40 = vadd.f32 %v4790_v5, %v4742_v19 }
 0x82c   : > { %v4695_v34 = vadd.f32 %v4694_v33, %v4646_v43  ;;  %v4509_v43 = vadd.f32 %v10340_v41, %v4460_v62  ;;  %v7706_v41 = vld [vmem:[#allocation11 + $0x74] sm:$0xf]  ;;  %v4846_v62 = vmax.f32 %v10335_v14, 0.0 }
 0x82e   : > { %v4836_v50 = vmax.f32 %v4695_v34, 0.0  ;;  %v4607_v34 = vadd.f32 %v10350_v23, %v4558_v37  ;;  %v7754_v23 = vld [vmem:[#allocation11 + $0x1f4] sm:$0xf]  ;;  %v4847_v37 = vmax.f32 %v10342_v39, 0.0 }
 0x82f   : > { %v4743_v12 = vpop.f32.mrf.mxu2 }
 0x830   : > { %v10468_v55 = vpack.c.bf16 %v4836_v50, %v4832_v54  ;;  %v4792_v47 = vpop.f32.mrf.mxu3  ;;  %v4744_v45 = vadd.f32 %v4743_v12, %v10460_v24  ;;  %v4833_v12 = vmax.f32 %v4791_v40, 0.0  ;;  %v4850_v54 = vmax.f32 %v4509_v43, 0.0  ;;  %v7738_v40 = vld [vmem:[#allocation11 + $0x174] sm:$0xf]  ;;  %v7488_v43 = vld [vmem:[#allocation11 + $0x1f8] sm:$0xf0] }
 0x831   : > { %v4648_v53 = vpop.f32.mrf.mxu0  ;;  %v4851_v50 = vmax.f32 %v4607_v34, 0.0 }
 0x832   : > { %v4697_v8 = vpop.f32.mrf.mxu1  ;;  %5423 = vmatmul.bf16.vlgmr.msra.gmra.mxu2 %v10468_v55  ;;  %v4793_v27 = vadd.f32 %v4792_v47, %v4744_v45  ;;  %v4649_v33 = vadd.f32 %v4648_v53, %v10450_v51  ;;  %v7424_v45 = vld [vmem:[#allocation11 + $0x178] sm:$0xf0] }
 0x833   : > { %v7427_v53 = vor.u32 %v7738_v40, %v7424_v45  ;;  %v10498_v14 = vpack.c.bf16 %v4851_v50, %v4847_v37 }
 0x834   : > { %5330 = vmatmul.bf16.gmra.mxu0 %v10472_v30  ;;  %v4837_v5 = vmax.f32 %v4793_v27, 0.0  ;;  %v4698_v44 = vadd.f32 %v4697_v8, %v4649_v33  ;;  %v7296_v27 = vld [vmem:[#allocation11 + $0x78] sm:$0xf0] }
 0x835   : > { %5379 = vmatmul.bf16.gmra.mxu1 %v10474_v61  ;;  %v7299_v33 = vor.u32 %v7706_v41, %v7296_v27  ;;  %5611 = vmatpush.bf16.msrb.mxu2 %v7427_v53 }
 0x836   : > { %v10483_v4 = vpack.c.bf16 %v4837_v5, %v4833_v12  ;;  %v4840_v52 = vmax.f32 %v4698_v44, 0.0  ;;  %v7491_v44 = vor.u32 %v7754_v23, %v7488_v43 }
 0x837   : > { %v4746_v18 = vpop.f32.mrf.mxu2  ;;  %5513 = vmatpush.bf16.msrb.mxu0 %v7299_v33 }
 0x838   : > { %v4795_v58 = vpop.f32.mrf.mxu3  ;;  %5472 = vmatmul.bf16.vlgmr.msra.gmra.mxu3 %v10483_v4  ;;  %v4747_v32 = vadd.f32 %v4746_v18, %v10460_v24 }
 0x839   : > { %v4650_v19 = vpop.f32.mrf.mxu0  ;;  %5660 = vmatpush.bf16.msrb.mxu3 %v7491_v44  ;;  %v7416_v44 = vld [vmem:[#allocation11 + $0x168] sm:$0xf0] }
 0x83a   : > { %v4699_v46 = vpop.f32.mrf.mxu1  ;;  %v4651_v13 = vadd.f32 %v4650_v19, %v10450_v51  ;;  %v4796_v34 = vadd.f32 %v4795_v58, %v4747_v32  ;;  %v4465_v58 = vadd.f32 %v10362_v57, %v10259_v59 }
 0x83c   : > { %v4700_v56 = vadd.f32 %v4699_v46, %v4651_v13  ;;  %v10496_v13 = vpack.c.bf16 %v4850_v54, %v4846_v62  ;;  %v4841_v32 = vmax.f32 %v4796_v34, 0.0  ;;  %v7360_v54 = vld [vmem:[#allocation11 + $0xf8] sm:$0xf0]  ;;  %v4514_v27 = vadd.f32 %v10364_v15, %v4465_v58  ;;  %v7704_v15 = vld [vmem:[#allocation11 + $0x64] sm:$0xf] }
 0x83d   : > { %v7288_v58 = vld [vmem:[#allocation11 + $0x68] sm:$0xf0] }
 0x83e   : > { %v4844_v47 = vmax.f32 %v4700_v56, 0.0  ;;  %v4563_v56 = vadd.f32 %v10368_v2, %v10275_v26 }
 0x83f   : > { %v4748_v8 = vpop.f32.mrf.mxu2 }
 0x840   : > { %v4797_v12 = vpop.f32.mrf.mxu3  ;;  %v10492_v5 = vpack.c.bf16 %v4844_v47, %v4840_v52  ;;  %v4749_v18 = vadd.f32 %v4748_v8, %v10460_v24  ;;  %v7722_v47 = vld [vmem:[#allocation11 + $0xf4] sm:$0xf]  ;;  %v4612_v23 = vadd.f32 %v10372_v22, %v4563_v56  ;;  %v7752_v22 = vld [vmem:[#allocation11 + $0x1e4] sm:$0xf]  ;;  %v4854_v56 = vmax.f32 %v10353_v17, 0.0 }
 0x841   : > { %v4653_v19 = vpop.f32.mrf.mxu0  ;;  %v7363_v40 = vor.u32 %v7722_v47, %v7360_v54  ;;  %v7291_v54 = vor.u32 %v7704_v15, %v7288_v58 }
 0x842   : > { %v4702_v46 = vpop.f32.mrf.mxu1  ;;  %5428 = vmatmul.bf16.gmra.mxu2 %v10492_v5  ;;  %v4798_v39 = vadd.f32 %v4797_v12, %v4749_v18  ;;  %v4654_v50 = vadd.f32 %v4653_v19, %v10450_v51  ;;  %v4858_v12 = vmax.f32 %v4514_v27, 0.0  ;;  %v4859_v33 = vmax.f32 %v4612_v23, 0.0  ;;  %v7736_v19 = vld [vmem:[#allocation11 + $0x164] sm:$0xf] }
 0x843   : > { %5562 = vmatpush.bf16.msrb.mxu1 %v7363_v40  ;;  %5514 = vmatpush.bf16.msrb.mxu0 %v7291_v54 }
 0x844   : > { %5335 = vmatmul.bf16.gmra.mxu0 %v10496_v13  ;;  %v4845_v52 = vmax.f32 %v4798_v39, 0.0  ;;  %v4703_v62 = vadd.f32 %v4702_v46, %v4654_v50  ;;  %v7419_v39 = vor.u32 %v7736_v19, %v7416_v44  ;;  %v7480_v50 = vld [vmem:[#allocation11 + $0x1e8] sm:$0xf0] }
 0x845   : > { %5384 = vmatmul.bf16.gmra.mxu1 %v10498_v14 }
 0x846   : > { %v10507_v45 = vpack.c.bf16 %v4845_v52, %v4841_v32  ;;  %v4848_v34 = vmax.f32 %v4703_v62, 0.0  ;;  %v4855_v32 = vmax.f32 %v10356_v21, 0.0  ;;  %5612 = vmatpush.bf16.msrb.mxu2 %v7419_v39  ;;  %v4568_v62 = vadd.f32 %v10388_v20, %v10275_v26 }
 0x847   : > { %v4751_v53 = vpop.f32.mrf.mxu2 }
 0x848   : > { %v4800_v41 = vpop.f32.mrf.mxu3  ;;  %5477 = vmatmul.bf16.gmra.mxu3 %v10507_v45  ;;  %v4752_v43 = vadd.f32 %v4751_v53, %v10460_v24  ;;  %v10522_v17 = vpack.c.bf16 %v4859_v33, %v4855_v32  ;;  %v4617_v15 = vadd.f32 %v10390_v48, %v4568_v62  ;;  %v7750_v48 = vld [vmem:[#allocation11 + $0x1d4] sm:$0xf] }
 0x849   : > { %v4655_v57 = vpop.f32.mrf.mxu0 }
 0x84a   : > { %v4704_v2 = vpop.f32.mrf.mxu1  ;;  %v4656_v37 = vadd.f32 %v4655_v57, %v10450_v51  ;;  %v4801_v40 = vadd.f32 %v4800_v41, %v4752_v43  ;;  %v7483_v57 = vor.u32 %v7752_v22, %v7480_v50  ;;  %v4470_v41 = vadd.f32 %v10384_v1, %v10259_v59  ;;  %v7720_v43 = vld [vmem:[#allocation11 + $0xe4] sm:$0xf]  ;;  %v7734_v50 = vld [vmem:[#allocation11 + $0x154] sm:$0xf] }
 0x84b   : > { %v4867_v32 = vmax.f32 %v4617_v15, 0.0 }
 0x84c   : > { %v4705_v8 = vadd.f32 %v4704_v2, %v4656_v37  ;;  %v10520_v2 = vpack.c.bf16 %v4858_v12, %v4854_v56  ;;  %5661 = vmatpush.bf16.msrb.mxu3 %v7483_v57  ;;  %v4849_v37 = vmax.f32 %v4801_v40, 0.0  ;;  %v7352_v12 = vld [vmem:[#allocation11 + $0xe8] sm:$0xf0]  ;;  %v4519_v39 = vadd.f32 %v10386_v42, %v4470_v41  ;;  %v7408_v40 = vld [vmem:[#allocation11 + $0x158] sm:$0xf0] }
 0x84d   : > { %v7702_v42 = vld [vmem:[#allocation11 + $0x54] sm:$0xf]  ;;  %v4862_v57 = vmax.f32 %v10375_v28, 0.0 }
 0x84e   : > { %v4852_v18 = vmax.f32 %v4705_v8, 0.0  ;;  %v4866_v56 = vmax.f32 %v4519_v39, 0.0 }
 0x84f   : > { %v4753_v46 = vpop.f32.mrf.mxu2 }
 0x850   : > { %v4802_v52 = vpop.f32.mrf.mxu3  ;;  %v10516_v47 = vpack.c.bf16 %v4852_v18, %v4848_v34  ;;  %v4754_v53 = vadd.f32 %v4753_v46, %v10460_v24  ;;  %v7355_v34 = vor.u32 %v7720_v43, %v7352_v12  ;;  %v10544_v39 = vpack.c.bf16 %v4866_v56, %v4862_v57 }
 0x851   : > { %v4658_v27 = vpop.f32.mrf.mxu0 }
 0x852   : > { %v4707_v23 = vpop.f32.mrf.mxu1  ;;  %5433 = vmatmul.bf16.gmra.mxu2 %v10516_v47  ;;  %v4803_v21 = vadd.f32 %v4802_v52, %v4754_v53  ;;  %v4659_v33 = vadd.f32 %v4658_v27, %v10450_v51  ;;  %5563 = vmatpush.bf16.msrb.mxu1 %v7355_v34  ;;  %v7411_v53 = vor.u32 %v7734_v50, %v7408_v40  ;;  %v7280_v27 = vld [vmem:[#allocation11 + $0x58] sm:$0xf0] }
 0x854   : > { %5340 = vmatmul.bf16.gmra.mxu0 %v10520_v2  ;;  %v4853_v8 = vmax.f32 %v4803_v21, 0.0  ;;  %v4708_v20 = vadd.f32 %v4707_v23, %v4659_v33  ;;  %v4863_v21 = vmax.f32 %v10378_v63, 0.0  ;;  %5613 = vmatpush.bf16.msrb.mxu2 %v7411_v53 }
 0x855   : > { %5389 = vmatmul.bf16.gmra.mxu1 %v10522_v17 }
 0x856   : > { %v10531_v18 = vpack.c.bf16 %v4853_v8, %v4849_v37  ;;  %v4856_v52 = vmax.f32 %v4708_v20, 0.0  ;;  %v7283_v37 = vor.u32 %v7702_v42, %v7280_v27  ;;  %v7472_v8 = vld [vmem:[#allocation11 + $0x1d8] sm:$0xf0]  ;;  %v10546_v28 = vpack.c.bf16 %v4867_v32, %v4863_v21 }
 0x857   : > { %v4756_v19 = vpop.f32.mrf.mxu2  ;;  %v7344_v20 = vld [vmem:[#allocation11 + $0xd8] sm:$0xf0]  ;;  %v4871_v42 = vmax.f32 %v10398_v38, 0.0 }
 0x858   : > { %v4805_v44 = vpop.f32.mrf.mxu3  ;;  %5482 = vmatmul.bf16.gmra.mxu3 %v10531_v18  ;;  %v4757_v46 = vadd.f32 %v4756_v19, %v10460_v24  ;;  %v7475_v19 = vor.u32 %v7750_v48, %v7472_v8  ;;  %5515 = vmatpush.bf16.msrb.mxu0 %v7283_v37  ;;  %v7700_v8 = vld [vmem:[#allocation11 + $0x44] sm:$0xf] }
 0x859   : > { %v4660_v59 = vpop.f32.mrf.mxu0 }
 0x85a   : > { %v4709_v1 = vpop.f32.mrf.mxu1  ;;  %v4661_v58 = vadd.f32 %v4660_v59, %v10450_v51  ;;  %v4806_v43 = vadd.f32 %v4805_v44, %v4757_v46  ;;  %5662 = vmatpush.bf16.msrb.mxu3 %v7475_v19  ;;  %v4573_v44 = vadd.f32 %v10401_v11, %v10275_v26 }
 0x85c   : > { %v4710_v22 = vadd.f32 %v4709_v1, %v4661_v58  ;;  %v4857_v15 = vmax.f32 %v4806_v43, 0.0  ;;  %v7718_v1 = vld [vmem:[#allocation11 + $0xd4] sm:$0xf]  ;;  %v7748_v43 = vld [vmem:[#allocation11 + $0x1c4] sm:$0xf] }
 0x85e   : > { %v4860_v54 = vmax.f32 %v4710_v22, 0.0  ;;  %v7347_v22 = vor.u32 %v7718_v1, %v7344_v20 }
 0x85f   : > { %v4758_v23 = vpop.f32.mrf.mxu2 }
 0x860   : > { %v4807_v41 = vpop.f32.mrf.mxu3  ;;  %v10540_v62 = vpack.c.bf16 %v4860_v54, %v4856_v52  ;;  %v4759_v12 = vadd.f32 %v4758_v23, %v10460_v24  ;;  %5564 = vmatpush.bf16.msrb.mxu1 %v7347_v22  ;;  %v4622_v52 = vadd.f32 %v10405_v9, %v4573_v44  ;;  %v7732_v23 = vld [vmem:[#allocation11 + $0x144] sm:$0xf]  ;;  %v7272_v9 = vld [vmem:[#allocation11 + $0x48] sm:$0xf0] }
 0x861   : > { %v4663_v33 = vpop.f32.mrf.mxu0  ;;  %v7716_v44 = vld [vmem:[#allocation11 + $0xc4] sm:$0xf] }
 0x862   : > { %v4712_v34 = vpop.f32.mrf.mxu1  ;;  %5438 = vmatmul.bf16.gmra.mxu2 %v10540_v62  ;;  %v4808_v63 = vadd.f32 %v4807_v41, %v4759_v12  ;;  %v4664_v58 = vadd.f32 %v4663_v33, %v10450_v51  ;;  %v4875_v27 = vmax.f32 %v4622_v52, 0.0  ;;  %v7400_v41 = vld [vmem:[#allocation11 + $0x148] sm:$0xf0] }
 0x863   : > { %v7403_v37 = vor.u32 %v7732_v23, %v7400_v41  ;;  %v7696_v23 = vld [vmem:[#allocation11 + $0x24] sm:$0xf]  ;;  %v7256_v41 = vld [vmem:[#allocation11 + $0x28] sm:$0xf0] }
 0x864   : > { %5345 = vmatmul.bf16.gmra.mxu0 %v10544_v39  ;;  %v4861_v59 = vmax.f32 %v4808_v63, 0.0  ;;  %v4713_v40 = vadd.f32 %v4712_v34, %v4664_v58  ;;  %v7275_v34 = vor.u32 %v7700_v8, %v7272_v9  ;;  %v7464_v63 = vld [vmem:[#allocation11 + $0x1c8] sm:$0xf0] }
 0x865   : > { %5394 = vmatmul.bf16.gmra.mxu1 %v10546_v28  ;;  %5614 = vmatpush.bf16.msrb.mxu2 %v7403_v37  ;;  %v7467_v58 = vor.u32 %v7748_v43, %v7464_v63  ;;  %v7712_v37 = vld [vmem:[#allocation11 + $0xa4] sm:$0xf]  ;;  %v7259_v43 = vor.u32 %v7696_v23, %v7256_v41 }
 0x866   : > { %v10553_v56 = vpack.c.bf16 %v4861_v59, %v4857_v15  ;;  %v4864_v57 = vmax.f32 %v4713_v40, 0.0  ;;  %v7336_v15 = vld [vmem:[#allocation11 + $0xc8] sm:$0xf0]  ;;  %5516 = vmatpush.bf16.msrb.mxu0 %v7275_v34  ;;  %v7714_v40 = vld [vmem:[#allocation11 + $0xb4] sm:$0xf] }
 0x867   : > { %v4761_v32 = vpop.f32.mrf.mxu2  ;;  %v7339_v22 = vor.u32 %v7716_v44, %v7336_v15  ;;  %5663 = vmatpush.bf16.msrb.mxu3 %v7467_v58 }
 0x868   : > { %v4810_v46 = vpop.f32.mrf.mxu3  ;;  %5487 = vmatmul.bf16.gmra.mxu3 %v10553_v56  ;;  %v4762_v48 = vadd.f32 %v4761_v32, %v10460_v24  ;;  %v10564_v32 = vpack.c.bf16 %v4875_v27, %v4871_v42 }
 0x869   : > { %v4665_v54 = vpop.f32.mrf.mxu0  ;;  %5565 = vmatpush.bf16.msrb.mxu1 %v7339_v22 }
 0x86a   : > { %v4714_v50 = vpop.f32.mrf.mxu1  ;;  %v4666_v11 = vadd.f32 %v4665_v54, %v10450_v51  ;;  %v4811_v38 = vadd.f32 %v4810_v46, %v4762_v48  ;;  %v7698_v54 = vld [vmem:[#allocation11 + $0x34] sm:$0xf] }
 0x86c   : > { %v4715_v53 = vadd.f32 %v4714_v50, %v4666_v11  ;;  %v7264_v50 = vld [vmem:[#allocation11 + $0x38] sm:$0xf0]  ;;  %v4865_v48 = vmax.f32 %v4811_v38, 0.0  ;;  %v7694_v38 = vld [vmem:[#allocation11 + $0x14] sm:$0xf] }
 0x86d   : > { %v7267_v46 = vor.u32 %v7698_v54, %v7264_v50  ;;  %v7328_v11 = vld [vmem:[#allocation11 + $0xb8] sm:$0xf0] }
 0x86e   : > { %v4868_v21 = vmax.f32 %v4715_v53, 0.0  ;;  %v4578_v53 = vadd.f32 %v10416_v29, %v10275_v26  ;;  %v7331_v42 = vor.u32 %v7714_v40, %v7328_v11  ;;  %v7730_v11 = vld [vmem:[#allocation11 + $0x134] sm:$0xf] }
 0x86f   : > { %v4763_v12 = vpop.f32.mrf.mxu2  ;;  %5517 = vmatpush.bf16.msrb.mxu0 %v7267_v46 }
 0x870   : > { %v4812_v33 = vpop.f32.mrf.mxu3  ;;  %v10560_v19 = vpack.c.bf16 %v4868_v21, %v4864_v57  ;;  %v4764_v59 = vadd.f32 %v4763_v12, %v10460_v24  ;;  %5566 = vmatpush.bf16.msrb.mxu1 %v7331_v42  ;;  %v7320_v12 = vld [vmem:[#allocation11 + $0xa8] sm:$0xf0]  ;;  %v7692_v42 = vld [vmem:[#allocation11 + $0x4] sm:$0xf] }
 0x871   : > { %v4668_v1 = vpop.f32.mrf.mxu0  ;;  %v7323_v63 = vor.u32 %v7712_v37, %v7320_v12  ;;  %v7240_v12 = vld [vmem:[#allocation11 + $0x8] sm:$0xf0] }
 0x872   : > { %v4717_v20 = vpop.f32.mrf.mxu1  ;;  %5443 = vmatmul.bf16.gmra.mxu2 %v10560_v19  ;;  %v4813_v52 = vadd.f32 %v4812_v33, %v4764_v59  ;;  %v4669_v27 = vadd.f32 %v4668_v1, %v10450_v51  ;;  %v4627_v33 = vadd.f32 %v10418_v25, %v4578_v53  ;;  %v7248_v59 = vld [vmem:[#allocation11 + $0x18] sm:$0xf0]  ;;  %v7710_v1 = vld [vmem:[#allocation11 + $0x94] sm:$0xf] }
 0x873   : > { %5518 = vmatpush.bf16.msrb.mxu0 %v7259_v43  ;;  %v7251_v22 = vor.u32 %v7694_v38, %v7248_v59  ;;  %v7392_v53 = vld [vmem:[#allocation11 + $0x138] sm:$0xf0] }
 0x874   : > { %5350 = vmatmul.bf16.gmra.mxu0 %v10403_v16  ;;  %v4869_v57 = vmax.f32 %v4813_v52, 0.0  ;;  %v4718_v44 = vadd.f32 %v4717_v20, %v4669_v27  ;;  %5567 = vmatpush.bf16.msrb.mxu1 %v7323_v63  ;;  %v7312_v52 = vld [vmem:[#allocation11 + $0x98] sm:$0xf0]  ;;  %v4883_v54 = vmax.f32 %v4627_v33, 0.0  ;;  %v7395_v20 = vor.u32 %v7730_v11, %v7392_v53 }
 0x875   : > { %5399 = vmatmul.bf16.gmra.mxu1 %v10564_v32  ;;  %v7315_v25 = vor.u32 %v7710_v1, %v7312_v52  ;;  %v4879_v27 = vmax.f32 %v10414_v0, 0.0  ;;  %v7243_v63 = vor.u32 %v7692_v42, %v7240_v12  ;;  %v4583_v52 = vadd.f32 %v10439_v36, %v10275_v26  ;;  %v7744_v36 = vld [vmem:[#allocation11 + $0x1a4] sm:$0xf] }
 0x876   : > { %v10571_v21 = vpack.c.bf16 %v4869_v57, %v4865_v48  ;;  %v4872_v40 = vmax.f32 %v4718_v44, 0.0  ;;  %v7746_v48 = vld [vmem:[#allocation11 + $0x1b4] sm:$0xf]  ;;  %v7456_v57 = vld [vmem:[#allocation11 + $0x1b8] sm:$0xf0]  ;;  %5615 = vmatpush.bf16.msrb.mxu2 %v7395_v20 }
 0x877   : > { %v4766_v8 = vpop.f32.mrf.mxu2  ;;  %5519 = vmatpush.bf16.msrb.mxu0 %v7251_v22  ;;  %v7459_v43 = vor.u32 %v7746_v48, %v7456_v57  ;;  %v7708_v44 = vld [vmem:[#allocation11 + $0x84] sm:$0xf]  ;;  %v10582_v38 = vpack.c.bf16 %v4883_v54, %v4879_v27  ;;  %v7384_v22 = vld [vmem:[#allocation11 + $0x128] sm:$0xf0]  ;;  %v7726_v20 = vld [vmem:[#allocation11 + $0x114] sm:$0xf]  ;;  %v4632_v57 = vadd.f32 %v10441_v60, %v4583_v52 }
 0x878   : > { %v4815_v9 = vpop.f32.mrf.mxu3  ;;  %5492 = vmatmul.bf16.gmra.mxu3 %v10571_v21  ;;  %v4767_v50 = vadd.f32 %v4766_v8, %v10460_v24  ;;  %5568 = vmatpush.bf16.msrb.mxu1 %v7315_v25  ;;  %v7376_v48 = vld [vmem:[#allocation11 + $0x118] sm:$0xf0]  ;;  %v7724_v12 = vld [vmem:[#allocation11 + $0x104] sm:$0xf] }
 0x879   : > { %v4670_v29 = vpop.f32.mrf.mxu0  ;;  %5664 = vmatpush.bf16.msrb.mxu3 %v7459_v43  ;;  %v7379_v26 = vor.u32 %v7726_v20, %v7376_v48  ;;  %v7440_v60 = vld [vmem:[#allocation11 + $0x198] sm:$0xf0]  ;;  %v7432_v20 = vld [vmem:[#allocation11 + $0x188] sm:$0xf0] }
 0x87a   : > { %v4719_v34 = vpop.f32.mrf.mxu1  ;;  %v4671_v15 = vadd.f32 %v4670_v29, %v10450_v51  ;;  %v4816_v8 = vadd.f32 %v4815_v9, %v4767_v50 }
 0x87b   : > { %5520 = vmatpush.bf16.msrb.mxu0 %v7243_v63  ;;  %v4891_v63 = vmax.f32 %v4632_v57, 0.0 }
 0x87c   : > { %v4720_v58 = vadd.f32 %v4719_v34, %v4671_v15  ;;  %v7304_v15 = vld [vmem:[#allocation11 + $0x88] sm:$0xf0]  ;;  %v4873_v9 = vmax.f32 %v4816_v8, 0.0 }
 0x87d   : > { %v7307_v0 = vor.u32 %v7708_v44, %v7304_v15  ;;  %v7368_v8 = vld [vmem:[#allocation11 + $0x108] sm:$0xf0] }
 0x87e   : > { %v4876_v46 = vmax.f32 %v4720_v58, 0.0  ;;  %v7728_v58 = vld [vmem:[#allocation11 + $0x124] sm:$0xf] }
 0x87f   : > { %v4768_v23 = vpop.f32.mrf.mxu2  ;;  %5569 = vmatpush.bf16.msrb.mxu1 %v7307_v0  ;;  %v7387_v54 = vor.u32 %v7728_v58, %v7384_v22  ;;  %v7742_v0 = vld [vmem:[#allocation11 + $0x194] sm:$0xf] }
 0x880   : > { %v4817_v41 = vpop.f32.mrf.mxu3  ;;  %v10578_v37 = vpack.c.bf16 %v4876_v46, %v4872_v40  ;;  %v4769_v33 = vadd.f32 %v4768_v23, %v10460_v24  ;;  %v7448_v23 = vld [vmem:[#allocation11 + $0x1a8] sm:$0xf0]  ;;  %v7443_v58 = vor.u32 %v7742_v0, %v7440_v60 }
 0x881   : > { %v4673_v29 = vpop.f32.mrf.mxu0  ;;  %5616 = vmatpush.bf16.msrb.mxu2 %v7387_v54  ;;  %v7451_v43 = vor.u32 %v7744_v36, %v7448_v23 }
 0x882   : > { %v4722_v34 = vpop.f32.mrf.mxu1  ;;  %5448 = vmatmul.bf16.gmra.mxu2 %v10578_v37  ;;  %v4818_v59 = vadd.f32 %v4817_v41, %v4769_v33  ;;  %v4674_v50 = vadd.f32 %v4673_v29, %v10450_v51  ;;  %v7371_v29 = vor.u32 %v7724_v12, %v7368_v8  ;;  %v10609_v12 = vld [vmem:[#allocation13 + $0x3] ss:$8 sm:$0x3] }
 0x883   : > { %5665 = vmatpush.bf16.msrb.mxu3 %v7451_v43 }
 0x884   : > { %5355 = vmatmul.bf16.gmra.mxu0 %v10420_v35  ;;  %v4877_v1 = vmax.f32 %v4818_v59, 0.0  ;;  %v4723_v42 = vadd.f32 %v4722_v34, %v4674_v50  ;;  %v4887_v34 = vmax.f32 %v10435_v31, 0.0 }
 0x885   : > { %5404 = vmatmul.bf16.gmra.mxu1 %v10582_v38  ;;  %5617 = vmatpush.bf16.msrb.mxu2 %v7379_v26 }
 0x886   : > { %v10589_v25 = vpack.c.bf16 %v4877_v1, %v4873_v9  ;;  %v4880_v44 = vmax.f32 %v4723_v42, 0.0 }
 0x887   : > { %v4771_v40 = vpop.f32.mrf.mxu2  ;;  %5666 = vmatpush.bf16.msrb.mxu3 %v7443_v58 }
 0x888   : > { %v4820_v46 = vpop.f32.mrf.mxu3  ;;  %5497 = vmatmul.bf16.gmra.mxu3 %v10589_v25  ;;  %v4772_v33 = vadd.f32 %v4771_v40, %v10460_v24  ;;  %v10600_v40 = vpack.c.bf16 %v4891_v63, %v4887_v34 }
 0x889   : > { %v4675_v11 = vpop.f32.mrf.mxu0  ;;  %5618 = vmatpush.bf16.msrb.mxu2 %v7371_v29 }
 0x88a   : > { %v4724_v53 = vpop.f32.mrf.mxu1  ;;  %v4676_v27 = vadd.f32 %v4675_v11, %v10450_v51  ;;  %v4821_v22 = vadd.f32 %v4820_v46, %v4772_v33 }
 0x88c   : > { %v4725_v41 = vadd.f32 %v4724_v53, %v4676_v27  ;;  %v7740_v53 = vld [vmem:[#allocation11 + $0x184] sm:$0xf]  ;;  %v4881_v48 = vmax.f32 %v4821_v22, 0.0 }
 0x88d   : > { %v7435_v31 = vor.u32 %v7740_v53, %v7432_v20 }
 0x88e   : > { %v4884_v15 = vmax.f32 %v4725_v41, 0.0 }
 0x88f   : > { %v4773_v59 = vpop.f32.mrf.mxu2  ;;  %5667 = vmatpush.bf16.msrb.mxu3 %v7435_v31 }
 0x890   : > { %v4822_v9 = vpop.f32.mrf.mxu3  ;;  %v10596_v1 = vpack.c.bf16 %v4884_v15, %v4880_v44  ;;  %v4774_v52 = vadd.f32 %v4773_v59, %v10460_v24  ;;  %v10613_v44 = vperm.slane %v10609_v12, 0 }
 0x891   : > { %v4678_v50 = vpop.f32.mrf.mxu0 }
 0x892   : > { %v4727_v54 = vpop.f32.mrf.mxu1  ;;  %5453 = vmatmul.bf16.gmra.mxu2 %v10596_v1  ;;  %v4823_v11 = vadd.f32 %v4822_v9, %v4774_v52  ;;  %v4679_v46 = vadd.f32 %v4678_v50, %v10450_v51 }
 0x894   : > { %5360 = vmatmul.bf16.gmra.mxu0 %v10443_v6  ;;  %v4885_v57 = vmax.f32 %v4823_v11, 0.0  ;;  %v4728_v41 = vadd.f32 %v4727_v54, %v4679_v46 }
 0x895   : > { %5409 = vmatmul.bf16.gmra.mxu1 %v10600_v40 }
 0x896   : > { %v10605_v42 = vpack.c.bf16 %v4885_v57, %v4881_v48  ;;  %v4888_v29 = vmax.f32 %v4728_v41, 0.0 }
 0x897   : > { %v4776_v27 = vpop.f32.mrf.mxu2 }
 0x898   : > { %v4825_v26 = vpop.f32.mrf.mxu3  ;;  %5502 = vmatmul.bf16.gmra.mxu3 %v10605_v42  ;;  %v4777_v33 = vadd.f32 %v4776_v27, %v10460_v24 }
 0x899   : > { %v4680_v36 = vpop.f32.mrf.mxu0 }
 0x89a   : > { %v4729_v23 = vpop.f32.mrf.mxu1  ;;  %v4681_v43 = vadd.f32 %v4680_v36, %v10450_v51  ;;  %v4826_v60 = vadd.f32 %v4825_v26, %v4777_v33 }
 0x89c   : > { %v4730_v8 = vadd.f32 %v4729_v23, %v4681_v43  ;;  %v4889_v50 = vmax.f32 %v4826_v60, 0.0 }
 0x89e   : > { %v4892_v63 = vmax.f32 %v4730_v8, 0.0 }
 0x89f   : > { %v4778_v15 = vpop.f32.mrf.mxu2 }
 0x8a0   : > { %v10615_v0 = vpack.c.bf16 %v4892_v63, %v4888_v29  ;;  %v4779_v34 = vadd.f32 %v4778_v15, %v10460_v24  ;;  %v4827_v58 = vpop.f32.mrf.mxu3 }
 0x8a1   : > { %v5326_v59 = vpop.f32.mrf.mxu0 }
 0x8a2   : > { %v5375_v9 = vpop.f32.mrf.mxu1  ;;  %v5327_v51 = vadd.f32 %v5326_v59, %v10613_v44  ;;  %5458 = vmatmul.bf16.gmra.mxu2 %v10615_v0  ;;  %v4828_v22 = vadd.f32 %v4827_v58, %v4779_v34 }
 0x8a4   : > { %v5376_v52 = vadd.f32 %v5375_v9, %v5327_v51  ;;  %5521 = vmatmul.bf16.vlgmr.msrb.gmra.mxu0 %v10445_v10  ;;  %v4893_v54 = vmax.f32 %v4828_v22, 0.0 }
 0x8a5   : > { %5570 = vmatmul.bf16.vlgmr.msrb.gmra.mxu1 %v10447_v49 }
 0x8a6   : > { %v10622_v11 = vpack.c.bf16 %v4893_v54, %v4889_v50 }
 0x8a8   : > { %5507 = vmatmul.bf16.gmra.mxu3 %v10622_v11 }
 0x8a9   : > { %v5328_v24 = vpop.f32.mrf.mxu0 }
 0x8aa   : > { %v5377_v53 = vpop.f32.mrf.mxu1  ;;  %v5329_v20 = vadd.f32 %v5328_v24, %v10613_v44 }
 0x8ac   : > { %v5378_v31 = vadd.f32 %v5377_v53, %v5329_v20 }
 0x8b1   : > { %v5331_v48 = vpop.f32.mrf.mxu0 }
 0x8b2   : > { %v5380_v57 = vpop.f32.mrf.mxu1  ;;  %v5332_v46 = vadd.f32 %v5331_v48, %v10613_v44  ;;  %5619 = vmatmul.bf16.vlgmr.msrb.gmra.mxu2 %v10468_v55 }
 0x8b4   : > { %v5381_v10 = vadd.f32 %v5380_v57, %v5332_v46  ;;  %5526 = vmatmul.bf16.gmra.mxu0 %v10472_v30 }
 0x8b5   : > { %5575 = vmatmul.bf16.gmra.mxu1 %v10474_v61  ;;  %v5424_v49 = vpop.f32.mrf.mxu2 }
 0x8b6   : > { %v5425_v27 = vadd.f32 %v5424_v49, %v5376_v52 }
 0x8b8   : > { %5668 = vmatmul.bf16.vlgmr.msrb.gmra.mxu3 %v10483_v4 }
 0x8b9   : > { %v5333_v26 = vpop.f32.mrf.mxu0 }
 0x8ba   : > { %v5382_v36 = vpop.f32.mrf.mxu1  ;;  %v5334_v23 = vadd.f32 %v5333_v26, %v10613_v44 }
 0x8bb   : > { %v5473_v43 = vpop.f32.mrf.mxu3 }
 0x8bc   : > { %v5383_v41 = vadd.f32 %v5382_v36, %v5334_v23  ;;  %v10632_v8 = vadd.f32 %v5473_v43, %v5425_v27 }
 0x8bd   : > { %v5426_v33 = vpop.f32.mrf.mxu2 }
 0x8be   : > { %v5427_v29 = vadd.f32 %v5426_v33, %v5378_v31 }
 0x8c1   : > { %v5336_v55 = vpop.f32.mrf.mxu0 }
 0x8c2   : > { %v5385_v63 = vpop.f32.mrf.mxu1  ;;  %v5337_v30 = vadd.f32 %v5336_v55, %v10613_v44  ;;  %5624 = vmatmul.bf16.gmra.mxu2 %v10492_v5 }
 0x8c3   : > { %v5475_v15 = vpop.f32.mrf.mxu3 }
 0x8c4   : > { %v5386_v61 = vadd.f32 %v5385_v63, %v5337_v30  ;;  %5531 = vmatmul.bf16.gmra.mxu0 %v10496_v13  ;;  %v10638_v4 = vadd.f32 %v5475_v15, %v5427_v29 }
 0x8c5   : > { %5580 = vmatmul.bf16.gmra.mxu1 %v10498_v14  ;;  %v5429_v60 = vpop.f32.mrf.mxu2 }
 0x8c6   : > { %v5430_v34 = vadd.f32 %v5429_v60, %v5381_v10 }
 0x8c8   : > { %5673 = vmatmul.bf16.gmra.mxu3 %v10507_v45 }
 0x8c9   : > { %v5338_v59 = vpop.f32.mrf.mxu0 }
 0x8ca   : > { %v5387_v9 = vpop.f32.mrf.mxu1  ;;  %v5339_v58 = vadd.f32 %v5338_v59, %v10613_v44 }
 0x8cb   : > { %v5478_v22 = vpop.f32.mrf.mxu3 }
 0x8cc   : > { %v5388_v51 = vadd.f32 %v5387_v9, %v5339_v58  ;;  %v10642_v52 = vadd.f32 %v5478_v22, %v5430_v34 }
 0x8cd   : > { %v5431_v5 = vpop.f32.mrf.mxu2 }
 0x8ce   : > { %v5432_v50 = vadd.f32 %v5431_v5, %v5383_v41 }
 0x8d1   : > { %v5341_v54 = vpop.f32.mrf.mxu0 }
 0x8d2   : > { %v5390_v13 = vpop.f32.mrf.mxu1  ;;  %v5342_v14 = vadd.f32 %v5341_v54, %v10613_v44  ;;  %5629 = vmatmul.bf16.gmra.mxu2 %v10516_v47 }
 0x8d3   : > { %v5480_v53 = vpop.f32.mrf.mxu3 }
 0x8d4   : > { %v5391_v24 = vadd.f32 %v5390_v13, %v5342_v14  ;;  %5536 = vmatmul.bf16.gmra.mxu0 %v10520_v2  ;;  %v10648_v45 = vadd.f32 %v5480_v53, %v5432_v50 }
 0x8d5   : > { %5585 = vmatmul.bf16.gmra.mxu1 %v10522_v17  ;;  %v5434_v20 = vpop.f32.mrf.mxu2 }
 0x8d6   : > { %v5435_v31 = vadd.f32 %v5434_v20, %v5386_v61 }
 0x8d8   : > { %5678 = vmatmul.bf16.gmra.mxu3 %v10531_v18 }
 0x8d9   : > { %v5343_v48 = vpop.f32.mrf.mxu0 }
 0x8da   : > { %v5392_v57 = vpop.f32.mrf.mxu1  ;;  %v5344_v46 = vadd.f32 %v5343_v48, %v10613_v44 }
 0x8db   : > { %v5483_v49 = vpop.f32.mrf.mxu3 }
 0x8dc   : > { %v5393_v10 = vadd.f32 %v5392_v57, %v5344_v46  ;;  %v10652_v27 = vadd.f32 %v5483_v49, %v5435_v31 }
 0x8dd   : > { %v5436_v47 = vpop.f32.mrf.mxu2 }
 0x8de   : > { %v5437_v26 = vadd.f32 %v5436_v47, %v5388_v51 }
 0x8e1   : > { %v5346_v36 = vpop.f32.mrf.mxu0 }
 0x8e2   : > { %v5395_v2 = vpop.f32.mrf.mxu1  ;;  %v5347_v17 = vadd.f32 %v5346_v36, %v10613_v44  ;;  %5634 = vmatmul.bf16.gmra.mxu2 %v10540_v62 }
 0x8e3   : > { %v5485_v41 = vpop.f32.mrf.mxu3 }
 0x8e4   : > { %v5396_v23 = vadd.f32 %v5395_v2, %v5347_v17  ;;  %5541 = vmatmul.bf16.gmra.mxu0 %v10544_v39  ;;  %v10658_v18 = vadd.f32 %v5485_v41, %v5437_v26 }
 0x8e5   : > { %5590 = vmatmul.bf16.gmra.mxu1 %v10546_v28  ;;  %v5439_v43 = vpop.f32.mrf.mxu2 }
 0x8e6   : > { %v5440_v33 = vadd.f32 %v5439_v43, %v5391_v24 }
 0x8e8   : > { %5683 = vmatmul.bf16.gmra.mxu3 %v10553_v56 }
 0x8e9   : > { %v5348_v29 = vpop.f32.mrf.mxu0 }
 0x8ea   : > { %v5397_v55 = vpop.f32.mrf.mxu1  ;;  %v5349_v63 = vadd.f32 %v5348_v29, %v10613_v44 }
 0x8eb   : > { %v5488_v61 = vpop.f32.mrf.mxu3 }
 0x8ec   : > { %v5398_v30 = vadd.f32 %v5397_v55, %v5349_v63  ;;  %v10662_v15 = vadd.f32 %v5488_v61, %v5440_v33 }
 0x8ed   : > { %v5441_v62 = vpop.f32.mrf.mxu2 }
 0x8ee   : > { %v5442_v60 = vadd.f32 %v5441_v62, %v5393_v10 }
 0x8f1   : > { %v5351_v34 = vpop.f32.mrf.mxu0 }
 0x8f2   : > { %v5400_v39 = vpop.f32.mrf.mxu1  ;;  %v5352_v28 = vadd.f32 %v5351_v34, %v10613_v44  ;;  %5639 = vmatmul.bf16.gmra.mxu2 %v10560_v19 }
 0x8f3   : > { %v5490_v9 = vpop.f32.mrf.mxu3 }
 0x8f4   : > { %v5401_v59 = vadd.f32 %v5400_v39, %v5352_v28  ;;  %5546 = vmatmul.bf16.gmra.mxu0 %v10403_v16  ;;  %v10668_v56 = vadd.f32 %v5490_v9, %v5442_v60 }
 0x8f5   : > { %5595 = vmatmul.bf16.gmra.mxu1 %v10564_v32  ;;  %v5444_v58 = vpop.f32.mrf.mxu2 }
 0x8f6   : > { %v5445_v51 = vadd.f32 %v5444_v58, %v5396_v23 }
 0x8f8   : > { %5688 = vmatmul.bf16.gmra.mxu3 %v10571_v21 }
 0x8f9   : > { %v5353_v22 = vpop.f32.mrf.mxu0 }
 0x8fa   : > { %v5402_v5 = vpop.f32.mrf.mxu1  ;;  %v5354_v50 = vadd.f32 %v5353_v22, %v10613_v44 }
 0x8fb   : > { %v5493_v13 = vpop.f32.mrf.mxu3 }
 0x8fc   : > { %v5403_v54 = vadd.f32 %v5402_v5, %v5354_v50  ;;  %v10672_v14 = vadd.f32 %v5493_v13, %v5445_v51  ;;  %v10701_v5 = vperm.slane %v10609_v12, 1 }
 0x8fd   : > { %v5446_v19 = vpop.f32.mrf.mxu2 }
 0x8fe   : > { %v5447_v24 = vadd.f32 %v5446_v19, %v5398_v30 }
 0x901   : > { %v5356_v53 = vpop.f32.mrf.mxu0 }
 0x902   : > { %v5405_v16 = vpop.f32.mrf.mxu1  ;;  %v5357_v32 = vadd.f32 %v5356_v53, %v10613_v44  ;;  %5644 = vmatmul.bf16.gmra.mxu2 %v10578_v37 }
 0x903   : > { %v5495_v31 = vpop.f32.mrf.mxu3 }
 0x904   : > { %v5406_v20 = vadd.f32 %v5405_v16, %v5357_v32  ;;  %5551 = vmatmul.bf16.gmra.mxu0 %v10420_v35  ;;  %v10678_v21 = vadd.f32 %v5495_v31, %v5447_v24  ;;  %v10708_v31 = vadd.f32 %v10632_v8, %v9892_v7 }
 0x905   : > { %5600 = vmatmul.bf16.gmra.mxu1 %v10582_v38  ;;  %v5449_v48 = vpop.f32.mrf.mxu2 }
 0x906   : > { %v5450_v57 = vadd.f32 %v5449_v48, %v5401_v59 }
 0x908   : > { %5693 = vmatmul.bf16.gmra.mxu3 %v10589_v25 }
 0x909   : > { %v5358_v46 = vpop.f32.mrf.mxu0 }
 0x90a   : > { %v5407_v10 = vpop.f32.mrf.mxu1  ;;  %v5359_v49 = vadd.f32 %v5358_v46, %v10613_v44 }
 0x90b   : > { %v5498_v26 = vpop.f32.mrf.mxu3 }
 0x90c   : > { %v5408_v47 = vadd.f32 %v5407_v10, %v5359_v49  ;;  %v10682_v36 = vadd.f32 %v5498_v26, %v5450_v57  ;;  %v5805_v26 = vmul.f32 %v10708_v31, %v10708_v31 }
 0x90d   : > { %v5451_v37 = vpop.f32.mrf.mxu2 }
 0x90e   : > { %v5452_v2 = vadd.f32 %v5451_v37, %v5403_v54 }
 0x911   : > { %v5361_v17 = vpop.f32.mrf.mxu0 }
 0x912   : > { %v5410_v35 = vpop.f32.mrf.mxu1  ;;  %v5362_v38 = vadd.f32 %v5361_v17, %v10613_v44  ;;  %5649 = vmatmul.bf16.gmra.mxu2 %v10596_v1 }
 0x913   : > { %v5500_v41 = vpop.f32.mrf.mxu3 }
 0x914   : > { %v5411_v23 = vadd.f32 %v5410_v35, %v5362_v38  ;;  %5556 = vmatmul.bf16.gmra.mxu0 %v10443_v6  ;;  %v10688_v25 = vadd.f32 %v5500_v41, %v5452_v2  ;;  %v11454_v35 = vld [vmem:[#allocation36_spill] sm:$0xff] }
 0x915   : > { %5605 = vmatmul.bf16.gmra.mxu1 %v10600_v40  ;;  %v5454_v43 = vpop.f32.mrf.mxu2 }
 0x916   : > { %v5455_v33 = vadd.f32 %v5454_v43, %v5406_v20  ;;  %v11455_v43 = vld [vmem:[#allocation40_spill] sm:$0xff] }
 0x918   : > { %5698 = vmatmul.bf16.gmra.mxu3 %v10605_v42 }
 0x919   : > { %v5363_v29 = vpop.f32.mrf.mxu0 }
 0x91a   : > { %v5412_v55 = vpop.f32.mrf.mxu1  ;;  %v5364_v63 = vadd.f32 %v5363_v29, %v10613_v44 }
 0x91b   : > { %v5503_v61 = vpop.f32.mrf.mxu3 }
 0x91c   : > { %v5413_v30 = vadd.f32 %v5412_v55, %v5364_v63  ;;  %v10692_v62 = vadd.f32 %v5503_v61, %v5455_v33 }
 0x91d   : > { %v5456_v1 = vpop.f32.mrf.mxu2 }
 0x91e   : > { %v5457_v60 = vadd.f32 %v5456_v1, %v5408_v47 }
 0x921   : > { %v5522_v34 = vpop.f32.mrf.mxu0 }
 0x922   : > { %v5571_v6 = vpop.f32.mrf.mxu1  ;;  %5654 = vmatmul.bf16.gmra.mxu2 %v10615_v0  ;;  %v5523_v13 = vadd.f32 %v5522_v34, %v10701_v5 }
 0x923   : > { %v5505_v40 = vpop.f32.mrf.mxu3 }
 0x924   : > { %v10695_v39 = vadd.f32 %v5505_v40, %v5457_v60  ;;  %v5572_v53 = vadd.f32 %v5571_v6, %v5523_v13  ;;  %v11456_v6 = vld [vmem:[#allocation42_spill] sm:$0xff] }
 0x925   : > { %v5459_v28 = vpop.f32.mrf.mxu2  ;;  %v10736_v40 = vadd.f32 %v10642_v52, %v11456_v6  ;;  %v11462_v6 = vld [vmem:[#allocation38_spill] sm:$0xff] }
 0x926   : > { %v5460_v59 = vadd.f32 %v5459_v28, %v5411_v23 }
 0x928   : > { %5703 = vmatmul.bf16.gmra.mxu3 %v10622_v11 }
 0x929   : > { %v5524_v42 = vpop.f32.mrf.mxu0 }
 0x92a   : > { %v5573_v9 = vpop.f32.mrf.mxu1  ;;  %v5525_v12 = vadd.f32 %v5524_v42, %v10701_v5 }
 0x92b   : > { %v5508_v44 = vpop.f32.mrf.mxu3 }
 0x92c   : > { %v10698_v58 = vadd.f32 %v5508_v44, %v5460_v59  ;;  %v5574_v10 = vadd.f32 %v5573_v9, %v5525_v12  ;;  %v11457_v9 = vld [vmem:[#allocation21_spill] sm:$0xff] }
 0x92d   : > { %v5461_v51 = vpop.f32.mrf.mxu2 }
 0x92e   : > { %v5462_v22 = vadd.f32 %v5461_v51, %v5413_v30 }
 0x931   : > { %v5527_v50 = vpop.f32.mrf.mxu0 }
 0x932   : > { %v5576_v54 = vpop.f32.mrf.mxu1  ;;  %v5528_v38 = vadd.f32 %v5527_v50, %v10701_v5  ;;  %v5809_v50 = vmul.f32 %v10736_v40, %v10736_v40 }
 0x933   : > { %v5510_v0 = vpop.f32.mrf.mxu3 }
 0x934   : > { %v10704_v19 = vadd.f32 %v5510_v0, %v5462_v22  ;;  %v5577_v29 = vadd.f32 %v5576_v54, %v5528_v38 }
 0x935   : > { %v5620_v24 = vpop.f32.mrf.mxu2 }
 0x936   : > { %v5621_v32 = vadd.f32 %v5620_v24, %v5572_v53  ;;  %v11458_v53 = vld [vmem:[#allocation20_spill] sm:$0xff] }
 0x939   : > { %v5529_v11 = vpop.f32.mrf.mxu0 }
 0x93a   : > { %v5578_v16 = vpop.f32.mrf.mxu1  ;;  %v5530_v28 = vadd.f32 %v5529_v11, %v10701_v5  ;;  %v10750_v11 = vadd.f32 %v10648_v45, %v11458_v53  ;;  %v11464_v53 = vld [vmem:[#allocation26_spill] sm:$0xff] }
 0x93b   : > { %v5669_v20 = vpop.f32.mrf.mxu3 }
 0x93c   : > { %v5670_v48 = vadd.f32 %v5669_v20, %v5621_v32  ;;  %v5579_v51 = vadd.f32 %v5578_v16, %v5530_v28  ;;  %v10778_v28 = vadd.f32 %v10658_v18, %v11462_v6 }
 0x93d   : > { %v5622_v57 = vpop.f32.mrf.mxu2 }
 0x93e   : > { %v10712_v46 = vadd.f32 %v5670_v48, %v9895_v3  ;;  %v5623_v8 = vadd.f32 %v5622_v57, %v5574_v10  ;;  %v10722_v3 = vadd.f32 %v10638_v4, %v11454_v35  ;;  %v11459_v48 = vld [vmem:[#allocation35_spill] sm:$0xff] }
 0x940   : > { %v5741_v47 = vadd.f32 %v10712_v46, %v10708_v31  ;;  %v5806_v37 = vmul.f32 %v10712_v46, %v10712_v46  ;;  %v5807_v63 = vmul.f32 %v10722_v3, %v10722_v3 }
 0x941   : > { %v5532_v49 = vpop.f32.mrf.mxu0 }
 0x942   : > { %v5581_v7 = vpop.f32.mrf.mxu1  ;;  %5742 = vadd.xlane.f32.xlu0 %v5741_v47  ;;  %v5837_v2 = vadd.f32 %v5806_v37, %v5805_v26  ;;  %v5533_v32 = vadd.f32 %v5532_v49, %v10701_v5  ;;  %v5811_v47 = vmul.f32 %v10750_v11, %v10750_v11 }
 0x943   : > { %v5671_v17 = vpop.f32.mrf.mxu3 }
 0x944   : > { %v5672_v23 = vadd.f32 %v5671_v17, %v5623_v8  ;;  %5838 = vadd.xlane.f32.xlu1 %v5837_v2  ;;  %v5582_v10 = vadd.f32 %v5581_v7, %v5533_v32  ;;  %v11460_v17 = vld [vmem:[#allocation43_spill] sm:$0xff]  ;;  %v10792_v32 = vadd.f32 %v10662_v15, %v11464_v53 }
 0x945   : > { %v5625_v41 = vpop.f32.mrf.mxu2  ;;  %v10764_v35 = vadd.f32 %v10652_v27, %v11460_v17 }
 0x946   : > { %v10726_v33 = vadd.f32 %v5672_v23, %v11455_v43  ;;  %v5626_v61 = vadd.f32 %v5625_v41, %v5577_v29  ;;  %v11461_v41 = vld [vmem:[#allocation41_spill] sm:$0xff] }
 0x948   : > { %v5808_v30 = vmul.f32 %v10726_v33, %v10726_v33  ;;  %v5744_v4 = vadd.f32 %v10726_v33, %v10722_v3 }
 0x949   : > { %v5534_v55 = vpop.f32.mrf.mxu0 }
 0x94a   : > { %v5840_v1 = vadd.f32 %v5808_v30, %v5807_v63  ;;  %v5583_v60 = vpop.f32.mrf.mxu1  ;;  %v5535_v38 = vadd.f32 %v5534_v55, %v10701_v5  ;;  %v5813_v30 = vmul.f32 %v10764_v35, %v10764_v35 }
 0x94b   : > { %v5674_v34 = vpop.f32.mrf.mxu3 }
 0x94c   : > { %v5675_v59 = vadd.f32 %v5674_v34, %v5626_v61  ;;  %5841 = vadd.xlane.f32.xlu2 %v5840_v1  ;;  %5745 = vadd.xlane.f32.xlu1 %v5744_v4  ;;  %v5584_v63 = vadd.f32 %v5583_v60, %v5535_v38  ;;  %v11466_v38 = vld [vmem:[#allocation45_spill] sm:$0xff] }
 0x94d   : > { %v5627_v42 = vpop.f32.mrf.mxu2 }
 0x94e   : > { %v10740_v44 = vadd.f32 %v5675_v59, %v11457_v9  ;;  %v5628_v0 = vadd.f32 %v5627_v42, %v5579_v51  ;;  %v11463_v9 = vld [vmem:[#allocation27_spill] sm:$0xff] }
 0x950   : > { %v5810_v54 = vmul.f32 %v10740_v44, %v10740_v44  ;;  %v5747_v52 = vadd.f32 %v10740_v44, %v10736_v40 }
 0x951   : > { %v5537_v22 = vpop.f32.mrf.mxu0 }
 0x952   : > { %v5843_v13 = vadd.f32 %v5810_v54, %v5809_v50  ;;  %v5586_v12 = vpop.f32.mrf.mxu1  ;;  %v5538_v59 = vadd.f32 %v5537_v22, %v10701_v5  ;;  %v5815_v54 = vmul.f32 %v10778_v28, %v10778_v28 }
 0x953   : > { %v5676_v24 = vpop.f32.mrf.mxu3 }
 0x954   : > { %v5677_v16 = vadd.f32 %v5676_v24, %v5628_v0  ;;  %5748 = vadd.xlane.f32.xlu2 %v5747_v52  ;;  %5844 = vadd.xlane.f32.xlu0 %v5843_v13  ;;  %v5587_v50 = vadd.f32 %v5586_v12, %v5538_v59  ;;  %v11468_v59 = vld [vmem:[#allocation22_spill] sm:$0xff] }
 0x955   : > { %v5630_v20 = vpop.f32.mrf.mxu2 }
 0x956   : > { %v10754_v57 = vadd.f32 %v5677_v16, %v11459_v48  ;;  %v5631_v45 = vadd.f32 %v5630_v20, %v5582_v10  ;;  %v11465_v10 = vld [vmem:[#allocation39_spill] sm:$0xff] }
 0x958   : > { %v5812_v26 = vmul.f32 %v10754_v57, %v10754_v57  ;;  %v5750_v49 = vadd.f32 %v10754_v57, %v10750_v11 }
 0x959   : > { %v5539_v37 = vpop.f32.mrf.mxu0 }
 0x95a   : > { %v5846_v8 = vadd.f32 %v5812_v26, %v5811_v47  ;;  %v5588_v29 = vpop.f32.mrf.mxu1  ;;  %v5540_v16 = vadd.f32 %v5539_v37, %v10701_v5 }
 0x95b   : > { %v5679_v2 = vpop.f32.mrf.mxu3 }
 0x95c   : > { %v5680_v7 = vadd.f32 %v5679_v2, %v5631_v45  ;;  %5847 = vadd.xlane.f32.xlu1 %v5846_v8  ;;  %5751 = vadd.xlane.f32.xlu0 %v5750_v49  ;;  %v5589_v26 = vadd.f32 %v5588_v29, %v5540_v16  ;;  %v5817_v45 = vmul.f32 %v10792_v32, %v10792_v32 }
 0x95d   : > { %v5632_v23 = vpop.f32.mrf.mxu2 }
 0x95e   : > { %v10768_v43 = vadd.f32 %v5680_v7, %v11461_v41  ;;  %v5633_v1 = vadd.f32 %v5632_v23, %v5584_v63  ;;  %v10806_v7 = vadd.f32 %v10668_v56, %v11466_v38  ;;  %v11467_v63 = vld [vmem:[#allocation23_spill] sm:$0xff] }
 0x960   : > { %v5814_v61 = vmul.f32 %v10768_v43, %v10768_v43  ;;  %v5753_v55 = vadd.f32 %v10768_v43, %v10764_v35 }
 0x961   : > { %v5542_v4 = vpop.f32.mrf.mxu0 }
 0x962   : > { %v5849_v27 = vadd.f32 %v5814_v61, %v5813_v30  ;;  %v5591_v52 = vpop.f32.mrf.mxu1  ;;  %v5543_v23 = vadd.f32 %v5542_v4, %v10701_v5 }
 0x963   : > { %v5681_v34 = vpop.f32.mrf.mxu3 }
 0x964   : > { %v5682_v60 = vadd.f32 %v5681_v34, %v5633_v1  ;;  %5850 = vadd.xlane.f32.xlu2 %v5849_v27  ;;  %5754 = vadd.xlane.f32.xlu1 %v5753_v55  ;;  %v5592_v1 = vadd.f32 %v5591_v52, %v5543_v23  ;;  %v5819_v27 = vmul.f32 %v10806_v7, %v10806_v7 }
 0x965   : > { %v5635_v42 = vpop.f32.mrf.mxu2 }
 0x966   : > { %v10782_v51 = vadd.f32 %v5682_v60, %v11463_v9  ;;  %v5636_v13 = vadd.f32 %v5635_v42, %v5587_v50  ;;  %v10820_v60 = vadd.f32 %v10672_v14, %v11468_v59 }
 0x968   : > { %v5816_v0 = vmul.f32 %v10782_v51, %v10782_v51  ;;  %v5756_v18 = vadd.f32 %v10782_v51, %v10778_v28 }
 0x969   : > { %v5544_v48 = vpop.f32.mrf.mxu0 }
 0x96a   : > { %v5852_v22 = vadd.f32 %v5816_v0, %v5815_v54  ;;  %v5593_v2 = vpop.f32.mrf.mxu1  ;;  %v5545_v42 = vadd.f32 %v5544_v48, %v10701_v5  ;;  %v11469_v0 = vld [vmem:[#allocation46_spill] sm:$0xff] }
 0x96b   : > { %v5684_v24 = vpop.f32.mrf.mxu3 }
 0x96c   : > { %v5685_v20 = vadd.f32 %v5684_v24, %v5636_v13  ;;  %5757 = vadd.xlane.f32.xlu2 %v5756_v18  ;;  %5853 = vadd.xlane.f32.xlu0 %v5852_v22  ;;  %v5594_v13 = vadd.f32 %v5593_v2, %v5545_v42  ;;  %v5821_v18 = vmul.f32 %v10820_v60, %v10820_v60 }
 0x96d   : > { %v5637_v12 = vpop.f32.mrf.mxu2 }
 0x96e   : > { %v10796_v47 = vadd.f32 %v5685_v20, %v11465_v10  ;;  %v5638_v49 = vadd.f32 %v5637_v12, %v5589_v26  ;;  %v11470_v12 = vld [vmem:[#allocation37_spill] sm:$0xff] }
 0x96f   : > { %v10834_v48 = vadd.f32 %v10678_v21, %v11470_v12 }
 0x970   : > { %v5818_v8 = vmul.f32 %v10796_v47, %v10796_v47  ;;  %v5759_v37 = vadd.f32 %v10796_v47, %v10792_v32 }
 0x971   : > { %v5547_v61 = vpop.f32.mrf.mxu0  ;;  %v5823_v2 = vmul.f32 %v10834_v48, %v10834_v48 }
 0x972   : > { %v5855_v15 = vadd.f32 %v5818_v8, %v5817_v45  ;;  %v5596_v54 = vpop.f32.mrf.mxu1  ;;  %v5548_v10 = vadd.f32 %v5547_v61, %v10701_v5  ;;  %v11471_v8 = vld [vmem:[#allocation29_spill] sm:$0xff] }
 0x973   : > { %v5686_v17 = vpop.f32.mrf.mxu3 }
 0x974   : > { %v5687_v41 = vadd.f32 %v5686_v17, %v5638_v49  ;;  %5856 = vadd.xlane.f32.xlu1 %v5855_v15  ;;  %5760 = vadd.xlane.f32.xlu0 %v5759_v37  ;;  %v5597_v37 = vadd.f32 %v5596_v54, %v5548_v10 }
 0x975   : > { %v5640_v29 = vpop.f32.mrf.mxu2 }
 0x976   : > { %v10810_v30 = vadd.f32 %v5687_v41, %v11467_v63  ;;  %v5641_v34 = vadd.f32 %v5640_v29, %v5592_v1  ;;  %v11472_v63 = vld [vmem:[#allocation28_spill] sm:$0xff] }
 0x977   : > { %v10848_v61 = vadd.f32 %v10682_v36, %v11472_v63 }
 0x978   : > { %v5820_v55 = vmul.f32 %v10810_v30, %v10810_v30  ;;  %v5762_v4 = vadd.f32 %v10810_v30, %v10806_v7 }
 0x979   : > { %v5549_v24 = vpop.f32.mrf.mxu0 }
 0x97a   : > { %v5858_v56 = vadd.f32 %v5820_v55, %v5819_v27  ;;  %v5598_v15 = vpop.f32.mrf.mxu1  ;;  %v5550_v1 = vadd.f32 %v5549_v24, %v10701_v5 }
 0x97b   : > { %v5689_v6 = vpop.f32.mrf.mxu3 }
 0x97c   : > { %v5690_v9 = vadd.f32 %v5689_v6, %v5641_v34  ;;  %5859 = vadd.xlane.f32.xlu2 %v5858_v56  ;;  %5763 = vadd.xlane.f32.xlu1 %v5762_v4  ;;  %v11473_v34 = vld [vmem:[#allocation25_spill] sm:$0xff]  ;;  %v5599_v4 = vadd.f32 %v5598_v15, %v5550_v1  ;;  %v5825_v6 = vmul.f32 %v10848_v61, %v10848_v61 }
 0x97d   : > { %v5642_v50 = vpop.f32.mrf.mxu2 }
 0x97e   : > { %v10824_v52 = vadd.f32 %v5690_v9, %v11469_v0  ;;  %v5643_v14 = vadd.f32 %v5642_v50, %v5594_v13  ;;  %v11474_v0 = vld [vmem:[#allocation44_spill] sm:$0xff] }
 0x97f   : > { %v10862_v13 = vadd.f32 %v10688_v25, %v11474_v0 }
 0x980   : > { %v5822_v22 = vmul.f32 %v10824_v52, %v10824_v52  ;;  %v5765_v53 = vadd.f32 %v10824_v52, %v10820_v60 }
 0x981   : > { %v5552_v41 = vpop.f32.mrf.mxu0  ;;  %v5827_v12 = vmul.f32 %v10862_v13, %v10862_v13 }
 0x982   : > { %v5861_v16 = vadd.f32 %v5822_v22, %v5821_v18  ;;  %v5601_v42 = vpop.f32.mrf.mxu1  ;;  %v5553_v18 = vadd.f32 %v5552_v41, %v10701_v5 }
 0x983   : > { %v5691_v20 = vpop.f32.mrf.mxu3 }
 0x984   : > { %v5692_v26 = vadd.f32 %v5691_v20, %v5643_v14  ;;  %5766 = vadd.xlane.f32.xlu2 %v5765_v53  ;;  %5862 = vadd.xlane.f32.xlu0 %v5861_v16  ;;  %v11475_v53 = vld [vmem:[#allocation48_spill] sm:$0xff]  ;;  %v5602_v20 = vadd.f32 %v5601_v42, %v5553_v18 }
 0x985   : > { %v5645_v45 = vpop.f32.mrf.mxu2 }
 0x986   : > { %v10838_v49 = vadd.f32 %v5692_v26, %v11471_v8  ;;  %v5646_v38 = vadd.f32 %v5645_v45, %v5597_v37  ;;  %v11476_v37 = vld [vmem:[#allocation24_spill] sm:$0xff] }
 0x988   : > { %v5824_v17 = vmul.f32 %v10838_v49, %v10838_v49  ;;  %v5768_v23 = vadd.f32 %v10838_v49, %v10834_v48 }
 0x989   : > { %v5554_v14 = vpop.f32.mrf.mxu0 }
 0x98a   : > { %v5864_v21 = vadd.f32 %v5824_v17, %v5823_v2  ;;  %v5603_v8 = vpop.f32.mrf.mxu1  ;;  %v10876_v2 = vadd.f32 %v10692_v62, %v11476_v37  ;;  %v5555_v17 = vadd.f32 %v5554_v14, %v10701_v5 }
 0x98b   : > { %v5694_v29 = vpop.f32.mrf.mxu3 }
 0x98c   : > { %v5695_v27 = vadd.f32 %v5694_v29, %v5646_v38  ;;  %5865 = vadd.xlane.f32.xlu1 %v5864_v21  ;;  %5769 = vadd.xlane.f32.xlu0 %v5768_v23  ;;  %v11477_v23 = vld [vmem:[#allocation31_spill] sm:$0xff]  ;;  %v5604_v63 = vadd.f32 %v5603_v8, %v5555_v17  ;;  %v5829_v1 = vmul.f32 %v10876_v2, %v10876_v2 }
 0x98d   : > { %v5647_v55 = vpop.f32.mrf.mxu2 }
 0x98e   : > { %v10852_v56 = vadd.f32 %v5695_v27, %v11473_v34  ;;  %v5648_v9 = vadd.f32 %v5647_v55, %v5599_v4 }
 0x990   : > { %v5826_v59 = vmul.f32 %v10852_v56, %v10852_v56  ;;  %v5771_v50 = vadd.f32 %v10852_v56, %v10848_v61 }
 0x991   : > { %v5557_v29 = vpop.f32.mrf.mxu0 }
 0x992   : > { %v5867_v36 = vadd.f32 %v5826_v59, %v5825_v6  ;;  %v5558_v6 = vadd.f32 %v5557_v29, %v10701_v5  ;;  %v5606_v42 = vpop.f32.mrf.mxu1 }
 0x993   : > { %v5696_v54 = vpop.f32.mrf.mxu3 }
 0x994   : > { %v5697_v22 = vadd.f32 %v5696_v54, %v5648_v9  ;;  %5868 = vadd.xlane.f32.xlu2 %v5867_v36  ;;  %5772 = vadd.xlane.f32.xlu1 %v5771_v50  ;;  %v11478_v36 = vld [vmem:[#allocation30_spill] sm:$0xff]  ;;  %v11479_v54 = vld [vmem:[#allocation49_spill] sm:$0xff]  ;;  %v5607_v18 = vadd.f32 %v5606_v42, %v5558_v6 }
 0x995   : > { %v5650_v24 = vpop.f32.mrf.mxu2  ;;  %v10894_v0 = vadd.f32 %v10695_v39, %v11479_v54 }
 0x996   : > { %v10866_v16 = vadd.f32 %v5697_v22, %v11475_v53  ;;  %v5651_v26 = vadd.f32 %v5650_v24, %v5602_v20 }
 0x998   : > { %v5828_v10 = vmul.f32 %v10866_v16, %v10866_v16  ;;  %v5774_v25 = vadd.f32 %v10866_v16, %v10862_v13 }
 0x999   : > { %v5559_v22 = vpop.f32.mrf.mxu0 }
 0x99a   : > { %v5870_v45 = vadd.f32 %v5828_v10, %v5827_v12  ;;  %v5560_v20 = vadd.f32 %v5559_v22, %v10701_v5  ;;  %v11480_v10 = vld [vmem:[#allocation47_spill] sm:$0xff]  ;;  %v5608_v39 = vpop.f32.mrf.mxu1 }
 0x99b   : > { %v5699_v15 = vpop.f32.mrf.mxu3 }
 0x99c   : > { %v5700_v38 = vadd.f32 %v5699_v15, %v5651_v26  ;;  %5775 = vadd.xlane.f32.xlu2 %v5774_v25  ;;  %5871 = vadd.xlane.f32.xlu0 %v5870_v45  ;;  %v10901_v26 = vadd.f32 %v10698_v58, %v11480_v10  ;;  %v11481_v25 = vld [vmem:[#allocation32_spill] sm:$0xff]  ;;  %v5609_v15 = vadd.f32 %v5608_v39, %v5560_v20 }
 0x99d   : > { %v5652_v21 = vpop.f32.mrf.mxu2 }
 0x99e   : > { %v10880_v41 = vadd.f32 %v5700_v38, %v11477_v23  ;;  %v5653_v55 = vadd.f32 %v5652_v21, %v5604_v63  ;;  %v11482_v23 = vld [vmem:[#allocation33_spill] sm:$0xff]  ;;  %v11483_v63 = vld [vmem:[#allocation50_spill] sm:$0xff] }
 0x99f   : > { %v10912_v58 = vadd.f32 %v10704_v19, %v11482_v23 }
 0x9a0   : > { %v5830_v27 = vmul.f32 %v10880_v41, %v10880_v41  ;;  %v5777_v34 = vadd.f32 %v10880_v41, %v10876_v2 }
 0x9a1   : > { %v5835_v19 = vmul.f32 %v10912_v58, %v10912_v58 }
 0x9a2   : > { %v5873_v62 = vadd.f32 %v5830_v27, %v5829_v1  ;;  %v11484_v27 = vld [vmem:[#allocation34_spill] sm:$0xff] }
 0x9a3   : > { %v5701_v4 = vpop.f32.mrf.mxu3 }
 0x9a4   : > { %v5702_v59 = vadd.f32 %v5701_v4, %v5653_v55  ;;  %5874 = vadd.xlane.f32.xlu1 %v5873_v62  ;;  %5778 = vadd.xlane.f32.xlu0 %v5777_v34  ;;  %v5831_v62 = vmul.f32 %v10894_v0, %v10894_v0 }
 0x9a5   : > { %v5655_v9 = vpop.f32.mrf.mxu2 }
 0x9a6   : > { %v10890_v50 = vadd.f32 %v5702_v59, %v11478_v36  ;;  %v5656_v24 = vadd.f32 %v5655_v9, %v5607_v18 }
 0x9a8   : > { %v5780_v14 = vadd.f32 %v10890_v50, %v10894_v0  ;;  %v5832_v5 = vmul.f32 %v10890_v50, %v10890_v50 }
 0x9aa   : > { %v5876_v59 = vadd.f32 %v5832_v5, %v5831_v62 }
 0x9ab   : > { %v5704_v53 = vpop.f32.mrf.mxu3 }
 0x9ac   : > { %v5705_v12 = vadd.f32 %v5704_v53, %v5656_v24  ;;  %5781 = vadd.xlane.f32.xlu1 %v5780_v14  ;;  %v5833_v53 = vmul.f32 %v10901_v26, %v10901_v26 }
 0x9ad   : > { %v5657_v8 = vpop.f32.mrf.mxu2 }
 0x9ae   : > { %v10904_v45 = vadd.f32 %v5705_v12, %v11481_v25  ;;  %v5658_v17 = vadd.f32 %v5657_v8, %v5609_v15 }
 0x9b0   : > { %v5783_v37 = vadd.f32 %v10904_v45, %v10901_v26  ;;  %v5834_v22 = vmul.f32 %v10904_v45, %v10904_v45 }
 0x9b2   : > { %5784 = vadd.xlane.f32.xlu2 %v5783_v37  ;;  %v5879_v12 = vadd.f32 %v5834_v22, %v5833_v53 }
 0x9b3   : > { %v5706_v38 = vpop.f32.mrf.mxu3 }
 0x9b4   : > { %v5707_v21 = vadd.f32 %v5706_v38, %v5658_v17 }
 0x9b5   : > { %v5743_v29 = vpop.xlane.xlu0 %5742 }
 0x9b6   : > { %v10915_v1 = vadd.f32 %v5707_v21, %v11483_v63  ;;  %v5789_v55 = vmul.f32 %v5743_v29, %v11484_v27  ;;  %v6174_v29 = vld [vmem:[#allocation13 + $0x4] ss:$8 sm:$0x3] }
 0x9b7   : > { %v5839_v34 = vpop.xlane.xlu1 %5838 }
 0x9b8   : > { %v5885_v4 = vmul.f32 %v5839_v34, %v11484_v27  ;;  %v5901_v6 = vmul.f32 %v5789_v55, %v5789_v55  ;;  %v5786_v42 = vadd.f32 %v10915_v1, %v10912_v58  ;;  %v5836_v9 = vmul.f32 %v10915_v1, %v10915_v1 }
 0x9ba   : > { %v5917_v36 = vsub.f32 %v5885_v4, %v5901_v6  ;;  %5877 = vadd.xlane.f32.xlu2 %v5876_v59  ;;  %5787 = vadd.xlane.f32.xlu0 %v5786_v42  ;;  %v5882_v54 = vadd.f32 %v5836_v9, %v5835_v19  ;;  %v6213_v4 = vld [vmem:[#allocation13 + $0x5] ss:$8 sm:$0x3]  ;;  %v10943_v59 = vperm.slane %v6174_v29, 0  ;;  %v5933_v9 = vsub.f32 %v10708_v31, %v5789_v55 }
 0x9bc   : > { %v5965_v18 = vadd.f32 1e-05, %v5917_v36  ;;  %5883 = vadd.xlane.f32.xlu1 %v5882_v54  ;;  %v5934_v36 = vsub.f32 %v10712_v46, %v5789_v55  ;;  %v10947_v54 = vperm.slane %v6174_v29, 1 }
 0x9be   : > { %8037 = vrsqrt.f32 %v5965_v18  ;;  %vm5987_vm5 = vweird.f32 %v5965_v18 }
 0x9bf   : > { %v5842_v24 = vpop.xlane.xlu2 %5841  ;;  %v5746_v14 = vpop.xlane.xlu1 %5745 }
 0x9c0   : > { %v10932_v20 = vmul.f32 %v5746_v14, %v11484_v27  ;;  %v5886_v10 = vmul.f32 %v5842_v24, %v11484_v27  ;;  %v10949_v24 = vperm.slane %v6213_v4, 0 }
 0x9c2   : > { %v5902_v25 = vmul.f32 %v10932_v20, %v10932_v20  ;;  %5880 = vadd.xlane.f32.xlu0 %v5879_v12 }
 0x9c4   : > { %v8038_v39 = vpop.eup %8037  ;;  %v5918_v8 = vsub.f32 %v5886_v10, %v5902_v25  ;;  %v10951_v25 = vperm.slane %v6213_v4, 1 }
 0x9c5   : > { %v5982_v15 = vmul.f32 %v8038_v39, %v5965_v18  ;;  %vm5988_vm4 = vweird.f32 %v8038_v39 }
 0x9c6   : > { %v5966_v37 = vadd.f32 1e-05, %v5918_v8  ;;  %vm5989_vm6 = vmor %vm5987_vm5, %vm5988_vm4 }
 0x9c7   : > { %v5983_v17 = vmul.f32 %v8038_v39, %v5982_v15  ;;  %v5749_v38 = vpop.xlane.xlu2 %5748  ;;  %v5845_v21 = vpop.xlane.xlu0 %5844 }
 0x9c8   : > { %8039 = vrsqrt.f32 %v5966_v37  ;;  %v10938_v5 = vmul.f32 %v5749_v38, %v11484_v27  ;;  %v5887_v62 = vmul.f32 %v5845_v21, %v11484_v27  ;;  %vm5997_vm8 = vweird.f32 %v5966_v37 }
 0x9c9   : > { %v5984_v23 = vmul.f32 0.5, %v5983_v17 }
 0x9ca   : > { %v5903_v63 = vmul.f32 %v10938_v5, %v10938_v5 }
 0x9cb   : > { %v5985_v34 = vsub.f32 1.5, %v5984_v23 }
 0x9cc   : > { %v5919_v6 = vsub.f32 %v5887_v62, %v5903_v63 }
 0x9cd   : > { %v5986_v42 = vmul.f32 %v8038_v39, %v5985_v34 }
 0x9ce   : > { %v8040_v19 = vpop.eup %8039  ;;  %v5967_v22 = vadd.f32 1e-05, %v5919_v6 }
 0x9cf   : > { %v5990_v14 = vsel %vm5989_vm6, %v8038_v39, %v5986_v42  ;;  %v5992_v53 = vmul.f32 %v8040_v19, %v5966_v37  ;;  %v5848_v12 = vpop.xlane.xlu1 %5847  ;;  %v5752_v10 = vpop.xlane.xlu0 %5751  ;;  %vm5998_vm7 = vweird.f32 %v8040_v19 }
 0x9d0   : > { %v6141_v8 = vmul.f32 %v5990_v14, %v5933_v9  ;;  %v6142_v18 = vmul.f32 %v5990_v14, %v5934_v36  ;;  %8041 = vrsqrt.f32 %v5967_v22  ;;  %v10954_v31 = vmul.f32 %v5752_v10, %v11484_v27  ;;  %vm5999_vm9 = vmor %vm5997_vm8, %vm5998_vm7 }
 0x9d1   : > { %v5993_v15 = vmul.f32 %v8040_v19, %v5992_v53  ;;  %v5888_v39 = vmul.f32 %v5848_v12, %v11484_v27  ;;  %v5935_v36 = vsub.f32 %v10722_v3, %v10932_v20  ;;  %v5936_v14 = vsub.f32 %v10726_v33, %v10932_v20 }
 0x9d2   : > { %v6180_v46 = vmul.f32 %v10943_v59, %v6141_v8  ;;  %v6181_v55 = vmul.f32 %v10947_v54, %v6142_v18  ;;  %v5904_v38 = vmul.f32 %v10954_v31, %v10954_v31  ;;  %vm6007_vm11 = vweird.f32 %v5967_v22 }
 0x9d3   : > { %v5994_v17 = vmul.f32 0.5, %v5993_v15 }
 0x9d4   : > { %v6219_v21 = vadd.f32 %v10949_v24, %v6180_v46  ;;  %v6220_v23 = vadd.f32 %v10951_v25, %v6181_v55  ;;  %v5920_v63 = vsub.f32 %v5888_v39, %v5904_v38 }
 0x9d5   : > { %v5995_v29 = vsub.f32 1.5, %v5994_v17 }
 0x9d6   : > { %v8042_v62 = vpop.eup %8041  ;;  %6251 = vst [vmem:[%s10965_s14] sm:$0xff] %v6219_v21  ;;  %v5968_v6 = vadd.f32 1e-05, %v5920_v63  ;;  %v5937_v63 = vsub.f32 %v10736_v40, %v10938_v5 }
 0x9d7   : > { %6252 = vst [vmem:[%s10965_s14 + $0x8] sm:$0xff] %v6220_v23  ;;  %v5996_v34 = vmul.f32 %v8040_v19, %v5995_v29  ;;  %v6002_v4 = vmul.f32 %v8042_v62, %v5967_v22  ;;  %v5851_v42 = vpop.xlane.xlu2 %5850  ;;  %v5755_v9 = vpop.xlane.xlu1 %5754  ;;  %vm6008_vm10 = vweird.f32 %v8042_v62 }
 0x9d8   : > { %v10974_v53 = vmul.f32 %v5755_v9, %v11484_v27  ;;  %8043 = vrsqrt.f32 %v5968_v6  ;;  %v5889_v37 = vmul.f32 %v5851_v42, %v11484_v27  ;;  %vm6009_vm12 = vmor %vm6007_vm11, %vm6008_vm10  ;;  %vm6017_vm14 = vweird.f32 %v5968_v6 }
 0x9d9   : > { %v6000_v12 = vsel %vm5999_vm9, %v8040_v19, %v5996_v34  ;;  %v6003_v10 = vmul.f32 %v8042_v62, %v6002_v4  ;;  %v5938_v34 = vsub.f32 %v10740_v44, %v10938_v5 }
 0x9da   : > { %v6143_v8 = vmul.f32 %v6000_v12, %v5935_v36  ;;  %v6144_v18 = vmul.f32 %v6000_v12, %v5936_v14  ;;  %v5905_v15 = vmul.f32 %v10974_v53, %v10974_v53 }
 0x9db   : > { %v6004_v46 = vmul.f32 0.5, %v6003_v10 }
 0x9dc   : > { %v6182_v3 = vmul.f32 %v10943_v59, %v6143_v8  ;;  %v6183_v33 = vmul.f32 %v10947_v54, %v6144_v18  ;;  %v5921_v20 = vsub.f32 %v5889_v37, %v5905_v15 }
 0x9dd   : > { %v6005_v55 = vsub.f32 1.5, %v6004_v46 }
 0x9de   : > { %v6221_v19 = vadd.f32 %v10949_v24, %v6182_v3  ;;  %v6222_v17 = vadd.f32 %v10951_v25, %v6183_v33  ;;  %v10983_v39 = vadd.f32 1e-05, %v5921_v20  ;;  %v8044_v38 = vpop.eup %8043 }
 0x9df   : > { %v6006_v21 = vmul.f32 %v8042_v62, %v6005_v55  ;;  %v5758_v23 = vpop.xlane.xlu2 %5757  ;;  %v5854_v29 = vpop.xlane.xlu0 %5853  ;;  %v6012_v4 = vmul.f32 %v8044_v38, %v5968_v6  ;;  %vm6018_vm13 = vweird.f32 %v8044_v38 }
 0x9e0   : > { %6253 = vst [vmem:[%s10965_s14 + $0x10] sm:$0xff] %v6221_v19  ;;  %8045 = vrsqrt.f32 %v10983_v39  ;;  %v10993_v9 = vmul.f32 %v5758_v23, %v11484_v27  ;;  %v5890_v40 = vmul.f32 %v5854_v29, %v11484_v27  ;;  %vm6019_vm15 = vmor %vm6017_vm14, %vm6018_vm13  ;;  %vm6027_vm1 = vweird.f32 %v10983_v39 }
 0x9e1   : > { %6254 = vst [vmem:[%s10965_s14 + $0x18] sm:$0xff] %v6222_v17  ;;  %v6010_v42 = vsel %vm6009_vm12, %v8042_v62, %v6006_v21  ;;  %v6013_v14 = vmul.f32 %v8044_v38, %v6012_v4  ;;  %v5939_v17 = vsub.f32 %v10750_v11, %v10954_v31  ;;  %v5940_v21 = vsub.f32 %v10754_v57, %v10954_v31 }
 0x9e2   : > { %v6145_v36 = vmul.f32 %v6010_v42, %v5937_v63  ;;  %v6146_v22 = vmul.f32 %v6010_v42, %v5938_v34  ;;  %v5906_v12 = vmul.f32 %v10993_v9, %v10993_v9 }
 0x9e3   : > { %v6014_v10 = vmul.f32 0.5, %v6013_v14 }
 0x9e4   : > { %v6184_v44 = vmul.f32 %v10943_v59, %v6145_v36  ;;  %v6185_v5 = vmul.f32 %v10947_v54, %v6146_v22  ;;  %v5922_v8 = vsub.f32 %v5890_v40, %v5906_v12 }
 0x9e5   : > { %v6015_v15 = vsub.f32 1.5, %v6014_v10  ;;  %v5941_v10 = vsub.f32 %v10764_v35, %v10974_v53 }
 0x9e6   : > { %v8046_v62 = vpop.eup %8045  ;;  %v6223_v18 = vadd.f32 %v10949_v24, %v6184_v44  ;;  %v6224_v37 = vadd.f32 %v10951_v25, %v6185_v5  ;;  %v11003_v3 = vadd.f32 1e-05, %v5922_v8  ;;  %v5942_v8 = vsub.f32 %v10768_v43, %v10974_v53 }
 0x9e7   : > { %v6022_v46 = vmul.f32 %v8046_v62, %v10983_v39  ;;  %v5857_v33 = vpop.xlane.xlu1 %5856  ;;  %v5761_v20 = vpop.xlane.xlu0 %5760  ;;  %v6016_v55 = vmul.f32 %v8044_v38, %v6015_v15  ;;  %vm6028_vm0 = vweird.f32 %v8046_v62 }
 0x9e8   : > { %6255 = vst [vmem:[%s10965_s14 + $0x20] sm:$0xff] %v6223_v18  ;;  %v11007_v19 = vmul.f32 %v5761_v20, %v11484_v27  ;;  %8047 = vrsqrt.f32 %v11003_v3  ;;  %v5891_v63 = vmul.f32 %v5857_v33, %v11484_v27  ;;  %vm6029_vm2 = vmor %vm6027_vm1, %vm6028_vm0  ;;  %vm6037_vm4 = vweird.f32 %v11003_v3 }
 0x9e9   : > { %6256 = vst [vmem:[%s10965_s14 + $0x28] sm:$0xff] %v6224_v37  ;;  %v6023_v23 = vmul.f32 %v8046_v62, %v6022_v46  ;;  %v6020_v29 = vsel %vm6019_vm15, %v8044_v38, %v6016_v55 }
 0x9ea   : > { %v5907_v6 = vmul.f32 %v11007_v19, %v11007_v19  ;;  %v6147_v34 = vmul.f32 %v6020_v29, %v5939_v17  ;;  %v6148_v4 = vmul.f32 %v6020_v29, %v5940_v21 }
 0x9eb   : > { %v6024_v42 = vmul.f32 0.5, %v6023_v23 }
 0x9ec   : > { %v5923_v36 = vsub.f32 %v5891_v63, %v5907_v6  ;;  %v6186_v22 = vmul.f32 %v10943_v59, %v6147_v34  ;;  %v6187_v11 = vmul.f32 %v10947_v54, %v6148_v4 }
 0x9ed   : > { %v6025_v57 = vsub.f32 1.5, %v6024_v42 }
 0x9ee   : > { %v11020_v31 = vadd.f32 1e-05, %v5923_v36  ;;  %v8048_v38 = vpop.eup %8047  ;;  %v6225_v14 = vadd.f32 %v10949_v24, %v6186_v22  ;;  %v6226_v12 = vadd.f32 %v10951_v25, %v6187_v11  ;;  %v5943_v22 = vsub.f32 %v10778_v28, %v10993_v9 }
 0x9ef   : > { %v6026_v40 = vmul.f32 %v8046_v62, %v6025_v57  ;;  %v5860_v44 = vpop.xlane.xlu2 %5859  ;;  %v5764_v5 = vpop.xlane.xlu1 %5763  ;;  %v6032_v18 = vmul.f32 %v8048_v38, %v11003_v3  ;;  %vm6038_vm3 = vweird.f32 %v8048_v38  ;;  %v5944_v11 = vsub.f32 %v10782_v51, %v10993_v9 }
 0x9f0   : > { %8049 = vrsqrt.f32 %v11020_v31  ;;  %6257 = vst [vmem:[%s10965_s14 + $0x30] sm:$0xff] %v6225_v14  ;;  %v11033_v15 = vmul.f32 %v5764_v5, %v11484_v27  ;;  %v5892_v35 = vmul.f32 %v5860_v44, %v11484_v27  ;;  %vm6039_vm5 = vmor %vm6037_vm4, %vm6038_vm3  ;;  %vm6047_vm7 = vweird.f32 %v11020_v31 }
 0x9f1   : > { %v6030_v37 = vsel %vm6029_vm2, %v8046_v62, %v6026_v40  ;;  %6258 = vst [vmem:[%s10965_s14 + $0x38] sm:$0xff] %v6226_v12  ;;  %v6033_v33 = vmul.f32 %v8048_v38, %v6032_v18 }
 0x9f2   : > { %v6149_v39 = vmul.f32 %v6030_v37, %v5941_v10  ;;  %v6150_v46 = vmul.f32 %v6030_v37, %v5942_v8  ;;  %v5908_v43 = vmul.f32 %v11033_v15, %v11033_v15 }
 0x9f3   : > { %v6034_v55 = vmul.f32 0.5, %v6033_v33 }
 0x9f4   : > { %v6188_v53 = vmul.f32 %v10943_v59, %v6149_v39  ;;  %v6189_v20 = vmul.f32 %v10947_v54, %v6150_v46  ;;  %v5924_v62 = vsub.f32 %v5892_v35, %v5908_v43  ;;  %v5945_v35 = vsub.f32 %v10792_v32, %v11007_v19 }
 0x9f5   : > { %v6035_v29 = vsub.f32 1.5, %v6034_v55  ;;  %v5946_v43 = vsub.f32 %v10796_v47, %v11007_v19 }
 0x9f6   : > { %v8050_v17 = vpop.eup %8049  ;;  %v6227_v21 = vadd.f32 %v10949_v24, %v6188_v53  ;;  %v6228_v23 = vadd.f32 %v10951_v25, %v6189_v20  ;;  %v11044_v6 = vadd.f32 1e-05, %v5924_v62 }
 0x9f7   : > { %v6042_v63 = vmul.f32 %v8050_v17, %v11020_v31  ;;  %v5767_v34 = vpop.xlane.xlu2 %5766  ;;  %v5863_v4 = vpop.xlane.xlu0 %5862  ;;  %v6036_v42 = vmul.f32 %v8048_v38, %v6035_v29  ;;  %vm6048_vm6 = vweird.f32 %v8050_v17 }
 0x9f8   : > { %6259 = vst [vmem:[%s10965_s14 + $0x40] sm:$0xff] %v6227_v21  ;;  %v11049_v36 = vmul.f32 %v5767_v34, %v11484_v27  ;;  %8051 = vrsqrt.f32 %v11044_v6  ;;  %v5893_v3 = vmul.f32 %v5863_v4, %v11484_v27  ;;  %vm6049_vm8 = vmor %vm6047_vm7, %vm6048_vm6  ;;  %vm6057_vm10 = vweird.f32 %v11044_v6 }
 0x9f9   : > { %6260 = vst [vmem:[%s10965_s14 + $0x48] sm:$0xff] %v6228_v23  ;;  %v6043_v57 = vmul.f32 %v8050_v17, %v6042_v63  ;;  %v6040_v14 = vsel %vm6039_vm5, %v8048_v38, %v6036_v42 }
 0x9fa   : > { %v5909_v12 = vmul.f32 %v11049_v36, %v11049_v36  ;;  %v6151_v40 = vmul.f32 %v6040_v14, %v5943_v22  ;;  %v6152_v44 = vmul.f32 %v6040_v14, %v5944_v11 }
 0x9fb   : > { %v6044_v5 = vmul.f32 0.5, %v6043_v57 }
 0x9fc   : > { %v5925_v10 = vsub.f32 %v5893_v3, %v5909_v12  ;;  %v6190_v8 = vmul.f32 %v10943_v59, %v6151_v40  ;;  %v6191_v28 = vmul.f32 %v10947_v54, %v6152_v44  ;;  %v5947_v40 = vsub.f32 %v10806_v7, %v11033_v15 }
 0x9fd   : > { %v6045_v51 = vsub.f32 1.5, %v6044_v5  ;;  %v5948_v44 = vsub.f32 %v10810_v30, %v11033_v15 }
 0x9fe   : > { %v11062_v9 = vadd.f32 1e-05, %v5925_v10  ;;  %v8052_v38 = vpop.eup %8051  ;;  %v6229_v18 = vadd.f32 %v10949_v24, %v6190_v8  ;;  %v6230_v37 = vadd.f32 %v10951_v25, %v6191_v28 }
 0x9ff   : > { %v6046_v39 = vmul.f32 %v8050_v17, %v6045_v51  ;;  %v5866_v46 = vpop.xlane.xlu1 %5865  ;;  %v5770_v33 = vpop.xlane.xlu0 %5769  ;;  %v6052_v53 = vmul.f32 %v8052_v38, %v11044_v6  ;;  %vm6058_vm9 = vweird.f32 %v8052_v38 }
 0xa00   : > { %8053 = vrsqrt.f32 %v11062_v9  ;;  %6261 = vst [vmem:[%s10965_s14 + $0x50] sm:$0xff] %v6229_v18  ;;  %v11075_v55 = vmul.f32 %v5770_v33, %v11484_v27  ;;  %v5894_v32 = vmul.f32 %v5866_v46, %v11484_v27  ;;  %vm6059_vm11 = vmor %vm6057_vm10, %vm6058_vm9  ;;  %vm6067_vm13 = vweird.f32 %v11062_v9 }
 0xa01   : > { %v6050_v20 = vsel %vm6049_vm8, %v8050_v17, %v6046_v39  ;;  %6262 = vst [vmem:[%s10965_s14 + $0x58] sm:$0xff] %v6230_v37  ;;  %v6053_v21 = vmul.f32 %v8052_v38, %v6052_v53 }
 0xa02   : > { %v6153_v31 = vmul.f32 %v6050_v20, %v5945_v35  ;;  %v6154_v62 = vmul.f32 %v6050_v20, %v5946_v43  ;;  %v5910_v47 = vmul.f32 %v11075_v55, %v11075_v55  ;;  %v5949_v20 = vsub.f32 %v10820_v60, %v11049_v36 }
 0xa03   : > { %v6054_v29 = vmul.f32 0.5, %v6053_v21 }
 0xa04   : > { %v6192_v19 = vmul.f32 %v10943_v59, %v6153_v31  ;;  %v6193_v23 = vmul.f32 %v10947_v54, %v6154_v62  ;;  %v5926_v17 = vsub.f32 %v5894_v32, %v5910_v47  ;;  %v5950_v31 = vsub.f32 %v10824_v52, %v11049_v36 }
 0xa05   : > { %v6055_v42 = vsub.f32 1.5, %v6054_v29 }
 0xa06   : > { %v8054_v63 = vpop.eup %8053  ;;  %v6231_v34 = vadd.f32 %v10949_v24, %v6192_v19  ;;  %v6232_v4 = vadd.f32 %v10951_v25, %v6193_v23  ;;  %v11086_v11 = vadd.f32 1e-05, %v5926_v17 }
 0xa07   : > { %v6062_v22 = vmul.f32 %v8054_v63, %v11062_v9  ;;  %v5869_v57 = vpop.xlane.xlu2 %5868  ;;  %v5773_v14 = vpop.xlane.xlu1 %5772  ;;  %v6056_v12 = vmul.f32 %v8052_v38, %v6055_v42  ;;  %vm6068_vm12 = vweird.f32 %v8054_v63 }
 0xa08   : > { %6263 = vst [vmem:[%s10965_s14 + $0x60] sm:$0xff] %v6231_v34  ;;  %v11091_v3 = vmul.f32 %v5773_v14, %v11484_v27  ;;  %8055 = vrsqrt.f32 %v11086_v11  ;;  %v5895_v8 = vmul.f32 %v5869_v57, %v11484_v27  ;;  %vm6069_vm14 = vmor %vm6067_vm13, %vm6068_vm12  ;;  %vm6077_vm0 = vweird.f32 %v11086_v11 }
 0xa09   : > { %6264 = vst [vmem:[%s10965_s14 + $0x68] sm:$0xff] %v6232_v4  ;;  %v6063_v5 = vmul.f32 %v8054_v63, %v6062_v22  ;;  %v6060_v10 = vsel %vm6059_vm11, %v8052_v38, %v6056_v12 }
 0xa0a   : > { %v5911_v6 = vmul.f32 %v11091_v3, %v11091_v3  ;;  %v6155_v28 = vmul.f32 %v6060_v10, %v5947_v40  ;;  %v6156_v51 = vmul.f32 %v6060_v10, %v5948_v44  ;;  %v5952_v10 = vsub.f32 %v10838_v49, %v11075_v55 }
 0xa0b   : > { %v6064_v18 = vmul.f32 0.5, %v6063_v5  ;;  %v5951_v5 = vsub.f32 %v10834_v48, %v11075_v55 }
 0xa0c   : > { %v5927_v37 = vsub.f32 %v5895_v8, %v5911_v6  ;;  %v6194_v39 = vmul.f32 %v10943_v59, %v6155_v28  ;;  %v6195_v7 = vmul.f32 %v10947_v54, %v6156_v51 }
 0xa0d   : > { %v6065_v30 = vsub.f32 1.5, %v6064_v18 }
 0xa0e   : > { %v11104_v15 = vadd.f32 1e-05, %v5927_v37  ;;  %v8056_v38 = vpop.eup %8055  ;;  %v6233_v46 = vadd.f32 %v10949_v24, %v6194_v39  ;;  %v6234_v33 = vadd.f32 %v10951_v25, %v6195_v7 }
 0xa0f   : > { %v6066_v35 = vmul.f32 %v8054_v63, %v6065_v30  ;;  %v5776_v43 = vpop.xlane.xlu2 %5775  ;;  %v5872_v53 = vpop.xlane.xlu0 %5871  ;;  %v6072_v62 = vmul.f32 %v8056_v38, %v11086_v11  ;;  %vm6078_vm15 = vweird.f32 %v8056_v38 }
 0xa10   : > { %8057 = vrsqrt.f32 %v11104_v15  ;;  %6265 = vst [vmem:[%s10965_s14 + $0x70] sm:$0xff] %v6233_v46  ;;  %v11117_v32 = vmul.f32 %v5776_v43, %v11484_v27  ;;  %v5896_v52 = vmul.f32 %v5872_v53, %v11484_v27  ;;  %vm6079_vm1 = vmor %vm6077_vm0, %vm6078_vm15  ;;  %vm6087_vm3 = vweird.f32 %v11104_v15 }
 0xa11   : > { %v6070_v21 = vsel %vm6069_vm14, %v8054_v63, %v6066_v35  ;;  %6266 = vst [vmem:[%s10965_s14 + $0x78] sm:$0xff] %v6234_v33  ;;  %v6073_v19 = vmul.f32 %v8056_v38, %v6072_v62  ;;  %v5953_v35 = vsub.f32 %v10848_v61, %v11091_v3  ;;  %v5954_v43 = vsub.f32 %v10852_v56, %v11091_v3 }
 0xa12   : > { %v6157_v9 = vmul.f32 %v6070_v21, %v5949_v20  ;;  %v6158_v47 = vmul.f32 %v6070_v21, %v5950_v31  ;;  %v5912_v60 = vmul.f32 %v11117_v32, %v11117_v32 }
 0xa13   : > { %v6074_v29 = vmul.f32 0.5, %v6073_v19 }
 0xa14   : > { %v6196_v36 = vmul.f32 %v10943_v59, %v6157_v9  ;;  %v6197_v23 = vmul.f32 %v10947_v54, %v6158_v47  ;;  %v5928_v17 = vsub.f32 %v5896_v52, %v5912_v60 }
 0xa15   : > { %v6075_v42 = vsub.f32 1.5, %v6074_v29  ;;  %v5955_v29 = vsub.f32 %v10862_v13, %v11117_v32 }
 0xa16   : > { %v8058_v63 = vpop.eup %8057  ;;  %v6235_v34 = vadd.f32 %v10949_v24, %v6196_v36  ;;  %v6236_v4 = vadd.f32 %v10951_v25, %v6197_v23  ;;  %v5976_v57 = vadd.f32 1e-05, %v5928_v17  ;;  %v5956_v17 = vsub.f32 %v10866_v16, %v11117_v32 }
 0xa17   : > { %v6082_v22 = vmul.f32 %v8058_v63, %v11104_v15  ;;  %v5875_v14 = vpop.xlane.xlu1 %5874  ;;  %v5779_v12 = vpop.xlane.xlu0 %5778  ;;  %v6076_v40 = vmul.f32 %v8056_v38, %v6075_v42  ;;  %vm6088_vm2 = vweird.f32 %v8058_v63 }
 0xa18   : > { %6267 = vst [vmem:[%s10965_s14 + $0x80] sm:$0xff] %v6235_v34  ;;  %v11131_v44 = vmul.f32 %v5779_v12, %v11484_v27  ;;  %8059 = vrsqrt.f32 %v5976_v57  ;;  %v5897_v28 = vmul.f32 %v5875_v14, %v11484_v27  ;;  %vm6089_vm4 = vmor %vm6087_vm3, %vm6088_vm2  ;;  %vm6097_vm6 = vweird.f32 %v5976_v57 }
 0xa19   : > { %6268 = vst [vmem:[%s10965_s14 + $0x88] sm:$0xff] %v6236_v4  ;;  %v6083_v8 = vmul.f32 %v8058_v63, %v6082_v22  ;;  %v6080_v6 = vsel %vm6079_vm1, %v8056_v38, %v6076_v40 }
 0xa1a   : > { %v5913_v51 = vmul.f32 %v11131_v44, %v11131_v44  ;;  %v6159_v11 = vmul.f32 %v6080_v6, %v5951_v5  ;;  %v6160_v18 = vmul.f32 %v6080_v6, %v5952_v10 }
 0xa1b   : > { %v6084_v37 = vmul.f32 0.5, %v6083_v8 }
 0xa1c   : > { %v5929_v39 = vsub.f32 %v5897_v28, %v5913_v51  ;;  %v6198_v7 = vmul.f32 %v10943_v59, %v6159_v11  ;;  %v6199_v48 = vmul.f32 %v10947_v54, %v6160_v18  ;;  %v5957_v51 = vsub.f32 %v10876_v2, %v11131_v44 }
 0xa1d   : > { %v6085_v49 = vsub.f32 1.5, %v6084_v37  ;;  %v5958_v11 = vsub.f32 %v10880_v41, %v11131_v44 }
 0xa1e   : > { %v5977_v55 = vadd.f32 1e-05, %v5929_v39  ;;  %v8060_v30 = vpop.eup %8059  ;;  %v6237_v38 = vadd.f32 %v10949_v24, %v6198_v7  ;;  %v6238_v46 = vadd.f32 %v10951_v25, %v6199_v48 }
 0xa1f   : > { %v6086_v33 = vmul.f32 %v8058_v63, %v6085_v49  ;;  %v6092_v53 = vmul.f32 %v8060_v30, %v5976_v57  ;;  %vm6098_vm5 = vweird.f32 %v8060_v30  ;;  %v5782_v36 = vpop.xlane.xlu1 %5781 }
 0xa20   : > { %8061 = vrsqrt.f32 %v5977_v55  ;;  %6269 = vst [vmem:[%s10965_s14 + $0x90] sm:$0xff] %v6237_v38  ;;  %vm6099_vm7 = vmor %vm6097_vm6, %vm6098_vm5  ;;  %v11163_v4 = vmul.f32 %v5782_v36, %v11484_v27  ;;  %vm6107_vm9 = vweird.f32 %v5977_v55 }
 0xa21   : > { %v6090_v20 = vsel %vm6089_vm4, %v8058_v63, %v6086_v33  ;;  %6270 = vst [vmem:[%s10965_s14 + $0x98] sm:$0xff] %v6238_v46  ;;  %v6093_v21 = vmul.f32 %v8060_v30, %v6092_v53 }
 0xa22   : > { %v6161_v31 = vmul.f32 %v6090_v20, %v5953_v35  ;;  %v6162_v62 = vmul.f32 %v6090_v20, %v5954_v43  ;;  %v5914_v32 = vmul.f32 %v11163_v4, %v11163_v4  ;;  %v5960_v36 = vsub.f32 %v10890_v50, %v11163_v4 }
 0xa23   : > { %v6094_v47 = vmul.f32 0.5, %v6093_v21 }
 0xa24   : > { %v6200_v9 = vmul.f32 %v10943_v59, %v6161_v31  ;;  %v6201_v15 = vmul.f32 %v10947_v54, %v6162_v62 }
 0xa25   : > { %v5785_v61 = vpop.xlane.xlu2 %5784  ;;  %v6095_v60 = vsub.f32 1.5, %v6094_v47 }
 0xa26   : > { %v8062_v19 = vpop.eup %8061  ;;  %v6239_v56 = vadd.f32 %v10949_v24, %v6200_v9  ;;  %v6240_v3 = vadd.f32 %v10951_v25, %v6201_v15  ;;  %v11185_v2 = vmul.f32 %v5785_v61, %v11484_v27 }
 0xa27   : > { %v6102_v52 = vmul.f32 %v8062_v19, %v5977_v55  ;;  %v6096_v23 = vmul.f32 %v8060_v30, %v6095_v60  ;;  %vm6108_vm8 = vweird.f32 %v8062_v19 }
 0xa28   : > { %6271 = vst [vmem:[%s10965_s14 + $0xa0] sm:$0xff] %v6239_v56  ;;  %vm6109_vm10 = vmor %vm6107_vm9, %vm6108_vm8  ;;  %v5915_v20 = vmul.f32 %v11185_v2, %v11185_v2 }
 0xa29   : > { %6272 = vst [vmem:[%s10965_s14 + $0xa8] sm:$0xff] %v6240_v3  ;;  %v6103_v63 = vmul.f32 %v8062_v19, %v6102_v52  ;;  %v6100_v34 = vsel %vm6099_vm7, %v8060_v30, %v6096_v23  ;;  %v5959_v52 = vsub.f32 %v10894_v0, %v11163_v4 }
 0xa2a   : > { %v6163_v42 = vmul.f32 %v6100_v34, %v5955_v29  ;;  %v6164_v22 = vmul.f32 %v6100_v34, %v5956_v17 }
 0xa2b   : > { %v6104_v14 = vmul.f32 0.5, %v6103_v63 }
 0xa2c   : > { %v6202_v12 = vmul.f32 %v10943_v59, %v6163_v42  ;;  %v6203_v57 = vmul.f32 %v10947_v54, %v6164_v22 }
 0xa2d   : > { %v6105_v40 = vsub.f32 1.5, %v6104_v14  ;;  %v5878_v13 = vpop.xlane.xlu2 %5877  ;;  %v5788_v16 = vpop.xlane.xlu0 %5787 }
 0xa2e   : > { %v5898_v5 = vmul.f32 %v5878_v13, %v11484_v27  ;;  %v6241_v10 = vadd.f32 %v10949_v24, %v6202_v12  ;;  %v6242_v8 = vadd.f32 %v10951_v25, %v6203_v57  ;;  %v11173_v28 = vmul.f32 %v5788_v16, %v11484_v27 }
 0xa2f   : > { %v6106_v6 = vmul.f32 %v8062_v19, %v6105_v40  ;;  %v5884_v37 = vpop.xlane.xlu1 %5883 }
 0xa30   : > { %v5930_v18 = vsub.f32 %v5898_v5, %v5914_v32  ;;  %6273 = vst [vmem:[%s10965_s14 + $0xb0] sm:$0xff] %v6241_v10  ;;  %v5900_v7 = vmul.f32 %v5884_v37, %v11484_v27  ;;  %v5916_v30 = vmul.f32 %v11173_v28, %v11173_v28  ;;  %v5963_v50 = vsub.f32 %v10912_v58, %v11173_v28 }
 0xa31   : > { %v6110_v39 = vsel %vm6109_vm10, %v8062_v19, %v6106_v6  ;;  %6274 = vst [vmem:[%s10965_s14 + $0xb8] sm:$0xff] %v6242_v8  ;;  %v5964_v4 = vsub.f32 %v10915_v1, %v11173_v28  ;;  %v5961_v58 = vsub.f32 %v10901_v26, %v11185_v2  ;;  %v5962_v1 = vsub.f32 %v10904_v45, %v11185_v2 }
 0xa32   : > { %v6165_v48 = vmul.f32 %v6110_v39, %v5957_v51  ;;  %v6166_v49 = vmul.f32 %v6110_v39, %v5958_v11  ;;  %v5978_v55 = vadd.f32 1e-05, %v5930_v18  ;;  %v5932_v38 = vsub.f32 %v5900_v7, %v5916_v30 }
 0xa34   : > { %v6204_v41 = vmul.f32 %v10943_v59, %v6165_v48  ;;  %v6205_v44 = vmul.f32 %v10947_v54, %v6166_v49  ;;  %8063 = vrsqrt.f32 %v5978_v55  ;;  %v5980_v43 = vadd.f32 1e-05, %v5932_v38 }
 0xa35   : > { %v5881_v35 = vpop.xlane.xlu0 %5880  ;;  %vm6117_vm12 = vweird.f32 %v5978_v55 }
 0xa36   : > { %v6243_v46 = vadd.f32 %v10949_v24, %v6204_v41  ;;  %v6244_v33 = vadd.f32 %v10951_v25, %v6205_v44  ;;  %v5899_v53 = vmul.f32 %v5881_v35, %v11484_v27  ;;  %8065 = vrsqrt.f32 %v5980_v43 }
 0xa37   : > { %vm6137_vm15 = vweird.f32 %v5980_v43 }
 0xa38   : > { %6275 = vst [vmem:[%s10965_s14 + $0xc0] sm:$0xff] %v6243_v46  ;;  %v5931_v31 = vsub.f32 %v5899_v53, %v5915_v20 }
 0xa39   : > { %6276 = vst [vmem:[%s10965_s14 + $0xc8] sm:$0xff] %v6244_v33 }
 0xa3a   : > { %v8064_v62 = vpop.eup %8063  ;;  %v5979_v9 = vadd.f32 1e-05, %v5931_v31 }
 0xa3b   : > { %v6112_v21 = vmul.f32 %v8064_v62, %v5978_v55  ;;  %vm6118_vm11 = vweird.f32 %v8064_v62 }
 0xa3c   : > { %8067 = vrsqrt.f32 %v5979_v9  ;;  %v8066_v47 = vpop.eup %8065  ;;  %vm6119_vm13 = vmor %vm6117_vm12, %vm6118_vm11  ;;  %vm6127_vm2 = vweird.f32 %v5979_v9 }
 0xa3d   : > { %v6113_v15 = vmul.f32 %v8064_v62, %v6112_v21  ;;  %v6132_v19 = vmul.f32 %v8066_v47, %v5980_v43  ;;  %vm6138_vm14 = vweird.f32 %v8066_v47 }
 0xa3e   : > { %vm6139_vm0 = vmor %vm6137_vm15, %vm6138_vm14 }
 0xa3f   : > { %v6114_v61 = vmul.f32 0.5, %v6113_v15  ;;  %v6133_v3 = vmul.f32 %v8066_v47, %v6132_v19 }
 0xa41   : > { %v6115_v56 = vsub.f32 1.5, %v6114_v61  ;;  %v6134_v23 = vmul.f32 0.5, %v6133_v3 }
 0xa42   : > { %v8068_v60 = vpop.eup %8067 }
 0xa43   : > { %v6116_v27 = vmul.f32 %v8064_v62, %v6115_v56  ;;  %v6122_v29 = vmul.f32 %v8068_v60, %v5979_v9  ;;  %v6135_v42 = vsub.f32 1.5, %v6134_v23  ;;  %vm6128_vm1 = vweird.f32 %v8068_v60 }
 0xa44   : > { %vm6129_vm3 = vmor %vm6127_vm2, %vm6128_vm1 }
 0xa45   : > { %v6120_v17 = vsel %vm6119_vm13, %v8064_v62, %v6116_v27  ;;  %v6123_v22 = vmul.f32 %v8068_v60, %v6122_v29  ;;  %v6136_v0 = vmul.f32 %v8066_v47, %v6135_v42 }
 0xa46   : > { %v6167_v63 = vmul.f32 %v6120_v17, %v5959_v52  ;;  %v6168_v34 = vmul.f32 %v6120_v17, %v5960_v36 }
 0xa47   : > { %v6124_v57 = vmul.f32 0.5, %v6123_v22  ;;  %v6140_v16 = vsel %vm6139_vm0, %v8066_v47, %v6136_v0 }
 0xa48   : > { %v6206_v14 = vmul.f32 %v10943_v59, %v6167_v63  ;;  %v6207_v12 = vmul.f32 %v10947_v54, %v6168_v34  ;;  %v6171_v5 = vmul.f32 %v6140_v16, %v5963_v50  ;;  %v6172_v10 = vmul.f32 %v6140_v16, %v5964_v4 }
 0xa49   : > { %v6125_v32 = vsub.f32 1.5, %v6124_v57 }
 0xa4a   : > { %v6245_v40 = vadd.f32 %v10949_v24, %v6206_v14  ;;  %v6246_v13 = vadd.f32 %v10951_v25, %v6207_v12  ;;  %v6210_v6 = vmul.f32 %v10943_v59, %v6171_v5  ;;  %v6211_v28 = vmul.f32 %v10947_v54, %v6172_v10 }
 0xa4b   : > { %v6126_v8 = vmul.f32 %v8068_v60, %v6125_v32 }
 0xa4c   : > { %6277 = vst [vmem:[%s10965_s14 + $0xd0] sm:$0xff] %v6245_v40  ;;  %v6249_v26 = vadd.f32 %v10949_v24, %v6210_v6  ;;  %v6250_v45 = vadd.f32 %v10951_v25, %v6211_v28 }
 0xa4d   : > { %6278 = vst [vmem:[%s10965_s14 + $0xd8] sm:$0xff] %v6246_v13  ;;  %v6130_v51 = vsel %vm6129_vm3, %v8068_v60, %v6126_v8 }
 0xa4e   : > { %v6169_v11 = vmul.f32 %v6130_v51, %v5961_v58  ;;  %v6170_v18 = vmul.f32 %v6130_v51, %v5962_v1  ;;  %6281 = vst [vmem:[%s10965_s14 + $0xf0] sm:$0xff] %v6249_v26 }
 0xa4f   : > { %6282 = vst [vmem:[%s10965_s14 + $0xf8] sm:$0xff] %v6250_v45 }
 0xa50   : > { %v6208_v37 = vmul.f32 %v10943_v59, %v6169_v11  ;;  %v6209_v39 = vmul.f32 %v10947_v54, %v6170_v18 }
 0xa52   : > { %v6247_v7 = vadd.f32 %v10949_v24, %v6208_v37  ;;  %v6248_v48 = vadd.f32 %v10951_v25, %v6209_v39 }
 0xa54   : > { %6279 = vst [vmem:[%s10965_s14 + $0xe0] sm:$0xff] %v6247_v7 }
 0xa55   : > { %6280 = vst [vmem:[%s10965_s14 + $0xe8] sm:$0xff] %v6248_v48 }
 0xa56   : > { %8339 = shalt.err (!%p8336_p9)
}
 0xa57   : > { %s8406_s11 = smov 256   ;;  %s8407_s10 = smov 16  }
 0xa58   : > { %7784 = dma.vmem_to_hbm [thread:$0]  (%p8553_p4), %s6298_s25, 4096, %s6300_s9, %s6284_s1, %s8406_s11, %s8406_s11, %s8407_s10  }
 0xa59 PF: > { %s6314_s14 = sand.u32 1, %s8378_s27   ;;  %p11485_p10 = scmp.ge.s32.totalorder %s8390_s30, 2 }
 0xa5a   : > { %s6315_s19 = scalar_lea.sflag [#allocation4], %s6314_s14 }
 0xa5b   : > { %p7810_p13 = pnand %p11485_p10, %p8557_p6 }
 0xa5d   : > { %p7811_p11 = pneg %p7810_p13 }
 0xa5f   : > { %8373 = dma.done.wait (%p7811_p11), %s6315_s19, 4096  }
 0xa60   : > { %8375 = vsyncadd (%p7811_p11), %s6315_s19, 4294963200  ;;  %p24_p0 = scmp.ge.s32.totalorder %s8527_s20, 4   ;;  %s11486_s27 = smov %s8382_s28 }
 0xa61   : > { %s11487_s28 = smov %s8386_s29  ;;  %s11488_s29 = smov %s8538_s22 }
 0xa62   : > { %s11489_s30 = smov %s8527_s20  ;;  %26 = sbr.rel (!%p24_p0) target bundleno = 12 (0xc), region = 126 }
 0xa67   :  { %6321 = vsyncpa [#allocation3], 1 }
 0xa68   :  { %6323 = vsyncpa [#allocation3 + $0x1], 1 }
 0xa69   :  { %6324 = vsyncpa [#allocation6], 1 }
 0xa6a   :  { %6325 = vsyncpa [#allocation9], 1 }
 0xa6b   :  { %6326 = vsyncpa [#allocation12], 1 }
 0xa6c   :  { %6327 = vsyncpa [#allocation4], 1 }
 0xa6d   :  { %6329 = vsyncpa [#allocation4 + $0x1], 1 }

</bundles_post_ra>
